<compile_context>
chip_gen: v5e
topology: v5e:2x2
jax: 0.10.0
libtpu: 0.0.40
codegen_flags: <defaults>
</compile_context>

<pallas_src>
import math
import warnings
from functools import partial

import jax
import jax.numpy as jnp
from jax.experimental import pallas as pl
from jax.experimental.pallas import tpu as pltpu

EPS = 1e-5  # torch.nn.LayerNorm default eps
_INV_SQRT2 = 1.0 / math.sqrt(2.0)


def _layernorm(v, g, b):
    mu = jnp.mean(v, axis=-1, keepdims=True)
    var = jnp.mean((v - mu) ** 2, axis=-1, keepdims=True)
    return (v - mu) * jax.lax.rsqrt(var + EPS) * g + b


def _erf_poly(z):
    """Abramowitz & Stegun 7.1.26 erf approximation, |error| <= 1.5e-7.

    Uses only exp / mul / add / where, all of which lower cleanly in Mosaic
    (the exp rides the EUP slot).  Matches exact erf to well below the bf16
    matmul noise floor, so the kernel tracks the module's erf-GELU exactly.
    """
    a1, a2, a3, a4, a5 = (0.254829592, -0.284496736, 1.421413741,
                          -1.453152027, 1.061405429)
    pc = 0.3275911
    az = jnp.abs(z)
    t = 1.0 / (1.0 + pc * az)
    poly = ((((a5 * t + a4) * t + a3) * t + a2) * t + a1) * t
    y = 1.0 - poly * jnp.exp(-az * az)
    return jnp.where(z < 0.0, -y, y)


def _gelu_erf(h):
    return 0.5 * h * (1.0 + _erf_poly(h * _INV_SQRT2))


def attblock_kernel(x_ref,
                    ln1_g, ln1_b, wqkv, bqkv, wo, bo,
                    ln2_g, ln2_b, ln3_g, ln3_b,
                    w1, b1, ln4_g, ln4_b, w2, b2,
                    o_ref,
                    *, num_heads, head_dim, batch_tile, seq_len):
    f32, bf16 = jnp.float32, jnp.bfloat16
    Bt, S, hd = batch_tile, seq_len, head_dim
    E = x_ref.shape[-1]

    # Flatten the batch tile so every projection is one wide MXU matmul.
    x = x_ref[...].reshape(Bt * S, E).astype(f32)

    # LayerNorm1 (f32)
    xn = _layernorm(x, ln1_g[...], ln1_b[...])

    # ---- Multi-head self-attention -------------------------------------
    # Fused QKV projection: (Bt*S, E) @ (E, 3E), bf16 operands, f32 accumulate.
    # The 1/sqrt(head_dim) query scale is pre-folded into wqkv/bqkv.
    qkv = jnp.dot(xn.astype(bf16), wqkv[...], preferred_element_type=f32) + bqkv[...]
    q = qkv[:, :E]
    k = qkv[:, E:2 * E]
    v = qkv[:, 2 * E:]

    # Per-head attention, batched over the whole batch tile with 3-D einsums
    # (single leading batch dim — the supported batched-matmul form).  Head
    # contexts stay in registers (bf16) and are concatenated lane-wise so the
    # output projection is one fused matmul over the concatenated heads.
    ctx_heads = []
    for h in range(num_heads):
        c0 = h * hd
        qh = q[:, c0:c0 + hd].reshape(Bt, S, hd).astype(bf16)
        kh = k[:, c0:c0 + hd].reshape(Bt, S, hd).astype(bf16)
        vh = v[:, c0:c0 + hd].reshape(Bt, S, hd).astype(bf16)
        logits = jnp.einsum('bqd,bkd->bqk', qh, kh,
                            preferred_element_type=f32)         # (Bt, S, S)
        logits = logits - jnp.max(logits, axis=-1, keepdims=True)
        p = jnp.exp(logits)
        p = p / jnp.sum(p, axis=-1, keepdims=True)               # exact f32 softmax
        ctx_h = jnp.einsum('bqk,bkd->bqd', p.astype(bf16), vh,
                           preferred_element_type=f32)           # (Bt, S, hd)
        ctx_heads.append(ctx_h.astype(bf16))
    ctx = jnp.concatenate(ctx_heads, axis=-1).reshape(Bt * S, E)  # bf16

    # Fused output projection over concatenated heads: (Bt*S, E) @ (E, E).
    att = jnp.dot(ctx, wo[...], preferred_element_type=f32) + bo[...]

    # LayerNorm2, then residual.  NOTE: the PyTorch forward rebinds
    # `x = self.layer_norm1(x)` before `x = x + x_att`, so the residual adds
    # the LayerNorm1 output — replicated here on purpose.
    att = _layernorm(att, ln2_g[...], ln2_b[...])
    xr = _layernorm(xn + att, ln3_g[...], ln3_b[...])            # LayerNorm3

    # ---- MLP ------------------------------------------------------------
    h1 = jnp.dot(xr.astype(bf16), w1[...], preferred_element_type=f32) + b1[...]
    h1 = _gelu_erf(h1)                                           # exact-erf GELU
    h1 = _layernorm(h1, ln4_g[...], ln4_b[...])                  # LayerNorm4
    h2 = jnp.dot(h1.astype(bf16), w2[...], preferred_element_type=f32) + b2[...]

    # Second residual: x (= LayerNorm3 output) + linear2(...)
    o_ref[...] = (xr + h2).reshape(Bt, S, E).astype(o_ref.dtype)


def attblock_forward(x, params, num_heads, *, batch_tile=None,
                     single_buffer_weights=True):
    B, S, E = x.shape
    assert E % num_heads == 0
    head_dim = E // num_heads
    # For best layout: S % 8 == 0 and E % 128 == 0 keep the (Bt,S,E)<->(Bt*S,E)
    # reshapes and the qkv column splits layout-free.  The toy E=32 is sub-lane
    # but still lowers correctly.
    if batch_tile is None:
        # Keep at least 2 grid steps so v7x's two TensorCores both get work;
        # for real workloads pick the largest Bt that fits the per-generation
        # VMEM budget (v5e/v6e: 128 MiB physical; v7x: 64 MiB).
        batch_tile = B // 2 if (B >= 2 and B % 2 == 0) else 1
    assert B % batch_tile == 0

    weight_names = ["ln1_g", "ln1_b", "wqkv", "bqkv", "wo", "bo",
                    "ln2_g", "ln2_b", "ln3_g", "ln3_b",
                    "w1", "b1", "ln4_g", "ln4_b", "w2", "b2"]
    weights = [params[n] for n in weight_names]

    def weight_spec(a):
        nd = a.ndim
        idx = lambda b, _nd=nd: (0,) * _nd
        if single_buffer_weights:
            # Grid-invariant weights: a second pipeline buffer is pure VMEM waste.
            return pl.BlockSpec(a.shape, idx, pipeline_mode=pl.Buffered(1))
        return pl.BlockSpec(a.shape, idx)

    in_specs = [pl.BlockSpec((batch_tile, S, E), lambda b: (b, 0, 0))]
    in_specs += [weight_spec(w) for w in weights]

    kernel = partial(attblock_kernel, num_heads=num_heads, head_dim=head_dim,
                     batch_tile=batch_tile, seq_len=S)

    # Advisory cost estimate for the XLA scheduler around the custom call.
    H = params["w1"].shape[1]
    flops = int(2 * B * S * E * (3 * E + E + 2 * H)
                + 4 * B * num_heads * S * S * head_dim)
    transcendentals = int(B * num_heads * S * S + B * S * H)
    bytes_accessed = int(2 * x.size * x.dtype.itemsize
                         + sum(int(w.size) * w.dtype.itemsize for w in weights))

    return pl.pallas_call(
        kernel,
        out_shape=jax.ShapeDtypeStruct((B, S, E), x.dtype),
        grid_spec=pltpu.PrefetchScalarGridSpec(
            num_scalar_prefetch=0,
            grid=(B // batch_tile,),
            in_specs=in_specs,
            out_specs=pl.BlockSpec((batch_tile, S, E), lambda b: (b, 0, 0)),
        ),
        compiler_params=pltpu.CompilerParams(
            dimension_semantics=("parallel",),
            # Explicit scoped-VMEM limit (safe under v5e/v6e/v7x physical).
            # Size per generation for realistic shapes: ~96-110 MiB on
            # v5e/v6e, <= ~56 MiB on v7x.
            vmem_limit_bytes=48 * 1024 * 1024),
        cost_estimate=pl.CostEstimate(flops=flops,
                                      transcendentals=transcendentals,
                                      bytes_accessed=bytes_accessed),
    )(x, *weights)


def init_params(key, embed_dim, expansion_factor, num_heads):
    """Parameters in torch shapes, converted to the fused/bf16 kernel layout."""
    E = embed_dim
    H = E * expansion_factor
    ks = jax.random.split(key, 16)

    def normal(k, shape, scale=0.05):
        return (scale * jax.random.normal(k, shape)).astype(jnp.float32)

    in_proj_w = normal(ks[0], (3 * E, E))     # nn.MultiheadAttention.in_proj_weight
    in_proj_b = normal(ks[1], (3 * E,))
    out_proj_w = normal(ks[2], (E, E))
    out_proj_b = normal(ks[3], (E,))
    w1 = normal(ks[4], (H, E))                # nn.Linear(E, H).weight
    b1 = normal(ks[5], (H,))
    w2 = normal(ks[6], (E, H))                # nn.Linear(H, E).weight
    b2 = normal(ks[7], (E,))

    def ln_params(kg, kb, n):
        g = (1.0 + 0.1 * jax.random.normal(kg, (1, n))).astype(jnp.float32)
        b = (0.1 * jax.random.normal(kb, (1, n))).astype(jnp.float32)
        return g, b

    ln1_g, ln1_b = ln_params(ks[8], ks[9], E)
    ln2_g, ln2_b = ln_params(ks[10], ks[11], E)
    ln3_g, ln3_b = ln_params(ks[12], ks[13], E)
    ln4_g, ln4_b = ln_params(ks[14], ks[15], H)

    # Fold the 1/sqrt(head_dim) query scale into the Q columns of the fused
    # QKV weight / bias (one-time weight prep; removes a (Bt*S, E) runtime mul).
    scale = 1.0 / math.sqrt(E // num_heads)
    qcol_scale = jnp.concatenate(
        [jnp.full((E,), scale, jnp.float32), jnp.ones((2 * E,), jnp.float32)])

    bf16 = jnp.bfloat16
    wqkv = (in_proj_w.T * qcol_scale[None, :]).astype(bf16)  # columns [q|k|v]
    bqkv = (in_proj_b * qcol_scale).reshape(1, 3 * E)

    return dict(
        ln1_g=ln1_g, ln1_b=ln1_b, ln2_g=ln2_g, ln2_b=ln2_b,
        ln3_g=ln3_g, ln3_b=ln3_b, ln4_g=ln4_g, ln4_b=ln4_b,
        wqkv=wqkv, bqkv=bqkv,
        wo=out_proj_w.T.astype(bf16), bo=out_proj_b.reshape(1, E),
        w1=w1.T.astype(bf16), b1=b1.reshape(1, H),
        w2=w2.T.astype(bf16), b2=b2.reshape(1, E),
    )


def attblock_reference(x, params, num_heads):
    """Pure-JAX mirror of the PyTorch forward (x_cls=None path).

    Mirrors the kernel's MXU numerics (bf16 matmul operands, f32 accumulation,
    f32 LayerNorm) but keeps EXACT softmax division and EXACT erf GELU (as in
    the PyTorch module), so it is a faithful numerical yardstick.
    """
    f32, bf16 = jnp.float32, jnp.bfloat16

    def mm(a, w):
        return jnp.dot(a.astype(bf16), w.astype(bf16), preferred_element_type=f32)

    B, S, E = x.shape
    hd = E // num_heads

    xn = _layernorm(x.astype(f32).reshape(B * S, E), params["ln1_g"], params["ln1_b"])
    qkv = mm(xn, params["wqkv"]) + params["bqkv"]
    q = qkv[:, :E].reshape(B, S, num_heads, hd)        # scale pre-folded in wqkv
    k = qkv[:, E:2 * E].reshape(B, S, num_heads, hd)
    v = qkv[:, 2 * E:].reshape(B, S, num_heads, hd)
    s = jnp.einsum('bqhd,bkhd->bhqk', q.astype(bf16), k.astype(bf16),
                   preferred_element_type=f32)
    p = jax.nn.softmax(s, axis=-1)
    ctx = jnp.einsum('bhqk,bkhd->bqhd', p.astype(bf16), v.astype(bf16),
                     preferred_element_type=f32).reshape(B * S, E)
    att = mm(ctx, params["wo"]) + params["bo"]
    att = _layernorm(att, params["ln2_g"], params["ln2_b"])
    xr = _layernorm(xn + att, params["ln3_g"], params["ln3_b"])
    h1 = mm(xr, params["w1"]) + params["b1"]
    h1 = 0.5 * h1 * (1.0 + jax.lax.erf(h1 / math.sqrt(2.0)))   # exact GELU
    h1 = _layernorm(h1, params["ln4_g"], params["ln4_b"])
    h2 = mm(h1, params["w2"]) + params["b2"]
    return (xr + h2).reshape(B, S, E)


if __name__ == "__main__":
    B, S, E = 4, 16, 32
    num_heads, expansion = 8, 2

    key = jax.random.PRNGKey(0)
    kx, kp = jax.random.split(key)
    x = jax.random.normal(kx, (B, S, E), dtype=jnp.float32)
    params = init_params(kp, E, expansion, num_heads)

    try:
        out = jax.block_until_ready(attblock_forward(x, params, num_heads))
    except Exception:
        # pl.Buffered(1) single-buffering of the grid-invariant weights may not
        # be supported by every jax/Mosaic version.  Fall back LOUDLY: the
        # default double-buffered weights use 2x the resident-weight VMEM,
        # which matters on v7x (re-derive batch_tile there if this fires).
        warnings.warn("single-buffered (pl.Buffered(1)) weight BlockSpecs were "
                      "rejected; falling back to double-buffered weights "
                      "(2x resident-weight VMEM).")
        out = jax.block_until_ready(
            attblock_forward(x, params, num_heads, single_buffer_weights=False))

    ref = attblock_reference(x, params, num_heads)
    max_err = float(jnp.max(jnp.abs(out - ref)))
    assert out.shape == (B, S, E)
    # Kernel uses exact f32 softmax and a <=1.5e-7-error erf GELU; the only
    # residual differences vs the reference are mirrored-bf16 accumulation
    # order effects (observed ~1e-5).
    assert jnp.allclose(out, ref, atol=2e-3, rtol=2e-3), f"max_err={max_err}"

    print("KERNEL_OK")
</pallas_src>

<mosaic_0001>
module attributes {stable_mosaic.version = 11 : i64} {
  func.func @attblock_kernel(%arg0: i32, %arg1: memref<2x16x32xf32, #tpu.memory_space<vmem>>, %arg2: memref<1x32xf32, #tpu.memory_space<vmem>>, %arg3: memref<1x32xf32, #tpu.memory_space<vmem>>, %arg4: memref<32x96xbf16, #tpu.memory_space<vmem>>, %arg5: memref<1x96xf32, #tpu.memory_space<vmem>>, %arg6: memref<32x32xbf16, #tpu.memory_space<vmem>>, %arg7: memref<1x32xf32, #tpu.memory_space<vmem>>, %arg8: memref<1x32xf32, #tpu.memory_space<vmem>>, %arg9: memref<1x32xf32, #tpu.memory_space<vmem>>, %arg10: memref<1x32xf32, #tpu.memory_space<vmem>>, %arg11: memref<1x32xf32, #tpu.memory_space<vmem>>, %arg12: memref<32x64xbf16, #tpu.memory_space<vmem>>, %arg13: memref<1x64xf32, #tpu.memory_space<vmem>>, %arg14: memref<1x64xf32, #tpu.memory_space<vmem>>, %arg15: memref<1x64xf32, #tpu.memory_space<vmem>>, %arg16: memref<64x32xbf16, #tpu.memory_space<vmem>>, %arg17: memref<1x32xf32, #tpu.memory_space<vmem>>, %arg18: memref<2x16x32xf32, #tpu.memory_space<vmem>>) attributes {dimension_semantics = [#tpu.dimension_semantics<parallel>], iteration_bounds = array<i64: 2>, scalar_prefetch = 0 : i64, scratch_operands = 0 : i64, tpu.core_type = #tpu.core_type<tc>, window_params = [{transform_indices = @transform_0, window_bounds = array<i64: 2, 16, 32>}, {pipeline_mode = #tpu.pipeline_mode<synchronous>, transform_indices = @transform_1, window_bounds = array<i64: 1, 32>}, {pipeline_mode = #tpu.pipeline_mode<synchronous>, transform_indices = @transform_2, window_bounds = array<i64: 1, 32>}, {pipeline_mode = #tpu.pipeline_mode<synchronous>, transform_indices = @transform_3, window_bounds = array<i64: 32, 96>}, {pipeline_mode = #tpu.pipeline_mode<synchronous>, transform_indices = @transform_4, window_bounds = array<i64: 1, 96>}, {pipeline_mode = #tpu.pipeline_mode<synchronous>, transform_indices = @transform_5, window_bounds = array<i64: 32, 32>}, {pipeline_mode = #tpu.pipeline_mode<synchronous>, transform_indices = @transform_6, window_bounds = array<i64: 1, 32>}, {pipeline_mode = #tpu.pipeline_mode<synchronous>, transform_indices = @transform_7, window_bounds = array<i64: 1, 32>}, {pipeline_mode = #tpu.pipeline_mode<synchronous>, transform_indices = @transform_8, window_bounds = array<i64: 1, 32>}, {pipeline_mode = #tpu.pipeline_mode<synchronous>, transform_indices = @transform_9, window_bounds = array<i64: 1, 32>}, {pipeline_mode = #tpu.pipeline_mode<synchronous>, transform_indices = @transform_10, window_bounds = array<i64: 1, 32>}, {pipeline_mode = #tpu.pipeline_mode<synchronous>, transform_indices = @transform_11, window_bounds = array<i64: 32, 64>}, {pipeline_mode = #tpu.pipeline_mode<synchronous>, transform_indices = @transform_12, window_bounds = array<i64: 1, 64>}, {pipeline_mode = #tpu.pipeline_mode<synchronous>, transform_indices = @transform_13, window_bounds = array<i64: 1, 64>}, {pipeline_mode = #tpu.pipeline_mode<synchronous>, transform_indices = @transform_14, window_bounds = array<i64: 1, 64>}, {pipeline_mode = #tpu.pipeline_mode<synchronous>, transform_indices = @transform_15, window_bounds = array<i64: 64, 32>}, {pipeline_mode = #tpu.pipeline_mode<synchronous>, transform_indices = @transform_16, window_bounds = array<i64: 1, 32>}, {transform_indices = @transform_17, window_bounds = array<i64: 2, 16, 32>}]} {
    %c0 = arith.constant 0 : index
    %c0_0 = arith.constant 0 : index
    %c0_1 = arith.constant 0 : index
    %0 = vector.load %arg1[%c0, %c0_0, %c0_1] : memref<2x16x32xf32, #tpu.memory_space<vmem>>, vector<2x16x32xf32>
    %1 = vector.shape_cast %0 : vector<2x16x32xf32> to vector<32x32xf32>
    %c0_2 = arith.constant 0 : index
    %c0_3 = arith.constant 0 : index
    %2 = vector.load %arg2[%c0_2, %c0_3] : memref<1x32xf32, #tpu.memory_space<vmem>>, vector<1x32xf32>
    %c0_4 = arith.constant 0 : index
    %c0_5 = arith.constant 0 : index
    %3 = vector.load %arg3[%c0_4, %c0_5] : memref<1x32xf32, #tpu.memory_space<vmem>>, vector<1x32xf32>
    %cst = arith.constant dense<0.000000e+00> : vector<32xf32>
    %4 = vector.multi_reduction <add>, %1, %cst [1] : vector<32x32xf32> to vector<32xf32>
    %5 = vector.shape_cast %4 : vector<32xf32> to vector<32x1xf32>
    %cst_6 = arith.constant 3.200000e+01 : f32
    %6 = vector.broadcast %cst_6 : f32 to vector<32x1xf32>
    %7 = arith.divf %5, %6 : vector<32x1xf32>
    %8 = vector.broadcast %7 : vector<32x1xf32> to vector<32x32xf32>
    %9 = arith.subf %1, %8 : vector<32x32xf32>
    %10 = arith.mulf %9, %9 : vector<32x32xf32>
    %cst_7 = arith.constant dense<0.000000e+00> : vector<32xf32>
    %11 = vector.multi_reduction <add>, %10, %cst_7 [1] : vector<32x32xf32> to vector<32xf32>
    %12 = vector.shape_cast %11 : vector<32xf32> to vector<32x1xf32>
    %cst_8 = arith.constant 3.200000e+01 : f32
    %13 = vector.broadcast %cst_8 : f32 to vector<32x1xf32>
    %14 = arith.divf %12, %13 : vector<32x1xf32>
    %15 = vector.broadcast %7 : vector<32x1xf32> to vector<32x32xf32>
    %16 = arith.subf %1, %15 : vector<32x32xf32>
    %cst_9 = arith.constant 9.99999974E-6 : f32
    %17 = vector.broadcast %cst_9 : f32 to vector<32x1xf32>
    %18 = arith.addf %14, %17 : vector<32x1xf32>
    %19 = math.rsqrt %18 : vector<32x1xf32>
    %20 = vector.broadcast %19 : vector<32x1xf32> to vector<32x32xf32>
    %21 = arith.mulf %16, %20 : vector<32x32xf32>
    %22 = vector.broadcast %2 : vector<1x32xf32> to vector<32x32xf32>
    %23 = arith.mulf %21, %22 : vector<32x32xf32>
    %24 = vector.broadcast %3 : vector<1x32xf32> to vector<32x32xf32>
    %25 = arith.addf %23, %24 : vector<32x32xf32>
    %26 = arith.truncf %25 : vector<32x32xf32> to vector<32x32xbf16>
    %c0_10 = arith.constant 0 : index
    %c0_11 = arith.constant 0 : index
    %27 = vector.load %arg4[%c0_10, %c0_11] : memref<32x96xbf16, #tpu.memory_space<vmem>>, vector<32x96xbf16>
    %cst_12 = arith.constant dense<0.000000e+00> : vector<32x96xf32>
    %28 = tpu.matmul %26, %27, %cst_12 {dimension_numbers = #tpu.dot_dimension_numbers<[1], [0], [0], [1], [0, 0, 1, 1], [], []>} : vector<32x32xbf16>, vector<32x96xbf16>, vector<32x96xf32> -> vector<32x96xf32>
    %c0_13 = arith.constant 0 : index
    %c0_14 = arith.constant 0 : index
    %29 = vector.load %arg5[%c0_13, %c0_14] : memref<1x96xf32, #tpu.memory_space<vmem>>, vector<1x96xf32>
    %30 = vector.broadcast %29 : vector<1x96xf32> to vector<32x96xf32>
    %31 = arith.addf %28, %30 : vector<32x96xf32>
    %32 = vector.extract_strided_slice %31 {offsets = [0, 0], sizes = [32, 32], strides = [1, 1]} : vector<32x96xf32> to vector<32x32xf32>
    %33 = vector.extract_strided_slice %31 {offsets = [0, 32], sizes = [32, 32], strides = [1, 1]} : vector<32x96xf32> to vector<32x32xf32>
    %34 = vector.extract_strided_slice %31 {offsets = [0, 64], sizes = [32, 32], strides = [1, 1]} : vector<32x96xf32> to vector<32x32xf32>
    %35 = vector.extract_strided_slice %32 {offsets = [0, 0], sizes = [32, 4], strides = [1, 1]} : vector<32x32xf32> to vector<32x4xf32>
    %36 = vector.shape_cast %35 : vector<32x4xf32> to vector<2x16x4xf32>
    %37 = arith.truncf %36 : vector<2x16x4xf32> to vector<2x16x4xbf16>
    %38 = vector.extract_strided_slice %33 {offsets = [0, 0], sizes = [32, 4], strides = [1, 1]} : vector<32x32xf32> to vector<32x4xf32>
    %39 = vector.shape_cast %38 : vector<32x4xf32> to vector<2x16x4xf32>
    %40 = arith.truncf %39 : vector<2x16x4xf32> to vector<2x16x4xbf16>
    %41 = vector.extract_strided_slice %34 {offsets = [0, 0], sizes = [32, 4], strides = [1, 1]} : vector<32x32xf32> to vector<32x4xf32>
    %42 = vector.shape_cast %41 : vector<32x4xf32> to vector<2x16x4xf32>
    %43 = arith.truncf %42 : vector<2x16x4xf32> to vector<2x16x4xbf16>
    "tpu.trace_start"() <{level = 10 : i32, message = "bqd,bkd->bqk"}> : () -> ()
    %cst_15 = arith.constant dense<0.000000e+00> : vector<2x16x16xf32>
    %44 = tpu.matmul %37, %40, %cst_15 {dimension_numbers = #tpu.dot_dimension_numbers<[2], [2], [1], [1], [0, 0, 0, 1, 1, 1], [0], [0]>} : vector<2x16x4xbf16>, vector<2x16x4xbf16>, vector<2x16x16xf32> -> vector<2x16x16xf32>
    "tpu.trace_stop"() : () -> ()
    %cst_16 = arith.constant dense<0xFF800000> : vector<2x16xf32>
    %45 = vector.multi_reduction <maximumf>, %44, %cst_16 [2] : vector<2x16x16xf32> to vector<2x16xf32>
    %46 = vector.shape_cast %45 : vector<2x16xf32> to vector<2x16x1xf32>
    %47 = vector.broadcast %46 : vector<2x16x1xf32> to vector<2x16x16xf32>
    %48 = arith.subf %44, %47 : vector<2x16x16xf32>
    %49 = math.exp %48 : vector<2x16x16xf32>
    %cst_17 = arith.constant dense<0.000000e+00> : vector<2x16xf32>
    %50 = vector.multi_reduction <add>, %49, %cst_17 [2] : vector<2x16x16xf32> to vector<2x16xf32>
    %51 = vector.shape_cast %50 : vector<2x16xf32> to vector<2x16x1xf32>
    %52 = vector.broadcast %51 : vector<2x16x1xf32> to vector<2x16x16xf32>
    %53 = arith.divf %49, %52 : vector<2x16x16xf32>
    %54 = arith.truncf %53 : vector<2x16x16xf32> to vector<2x16x16xbf16>
    "tpu.trace_start"() <{level = 10 : i32, message = "bqk,bkd->bqd"}> : () -> ()
    %cst_18 = arith.constant dense<0.000000e+00> : vector<2x16x4xf32>
    %55 = tpu.matmul %54, %43, %cst_18 {dimension_numbers = #tpu.dot_dimension_numbers<[2], [1], [1], [2], [0, 0, 0, 1, 1, 2], [0], [0]>} : vector<2x16x16xbf16>, vector<2x16x4xbf16>, vector<2x16x4xf32> -> vector<2x16x4xf32>
    "tpu.trace_stop"() : () -> ()
    %56 = arith.truncf %55 : vector<2x16x4xf32> to vector<2x16x4xbf16>
    %57 = vector.extract_strided_slice %32 {offsets = [0, 4], sizes = [32, 4], strides = [1, 1]} : vector<32x32xf32> to vector<32x4xf32>
    %58 = vector.shape_cast %57 : vector<32x4xf32> to vector<2x16x4xf32>
    %59 = arith.truncf %58 : vector<2x16x4xf32> to vector<2x16x4xbf16>
    %60 = vector.extract_strided_slice %33 {offsets = [0, 4], sizes = [32, 4], strides = [1, 1]} : vector<32x32xf32> to vector<32x4xf32>
    %61 = vector.shape_cast %60 : vector<32x4xf32> to vector<2x16x4xf32>
    %62 = arith.truncf %61 : vector<2x16x4xf32> to vector<2x16x4xbf16>
    %63 = vector.extract_strided_slice %34 {offsets = [0, 4], sizes = [32, 4], strides = [1, 1]} : vector<32x32xf32> to vector<32x4xf32>
    %64 = vector.shape_cast %63 : vector<32x4xf32> to vector<2x16x4xf32>
    %65 = arith.truncf %64 : vector<2x16x4xf32> to vector<2x16x4xbf16>
    "tpu.trace_start"() <{level = 10 : i32, message = "bqd,bkd->bqk"}> : () -> ()
    %cst_19 = arith.constant dense<0.000000e+00> : vector<2x16x16xf32>
    %66 = tpu.matmul %59, %62, %cst_19 {dimension_numbers = #tpu.dot_dimension_numbers<[2], [2], [1], [1], [0, 0, 0, 1, 1, 1], [0], [0]>} : vector<2x16x4xbf16>, vector<2x16x4xbf16>, vector<2x16x16xf32> -> vector<2x16x16xf32>
    "tpu.trace_stop"() : () -> ()
    %cst_20 = arith.constant dense<0xFF800000> : vector<2x16xf32>
    %67 = vector.multi_reduction <maximumf>, %66, %cst_20 [2] : vector<2x16x16xf32> to vector<2x16xf32>
    %68 = vector.shape_cast %67 : vector<2x16xf32> to vector<2x16x1xf32>
    %69 = vector.broadcast %68 : vector<2x16x1xf32> to vector<2x16x16xf32>
    %70 = arith.subf %66, %69 : vector<2x16x16xf32>
    %71 = math.exp %70 : vector<2x16x16xf32>
    %cst_21 = arith.constant dense<0.000000e+00> : vector<2x16xf32>
    %72 = vector.multi_reduction <add>, %71, %cst_21 [2] : vector<2x16x16xf32> to vector<2x16xf32>
    %73 = vector.shape_cast %72 : vector<2x16xf32> to vector<2x16x1xf32>
    %74 = vector.broadcast %73 : vector<2x16x1xf32> to vector<2x16x16xf32>
    %75 = arith.divf %71, %74 : vector<2x16x16xf32>
    %76 = arith.truncf %75 : vector<2x16x16xf32> to vector<2x16x16xbf16>
    "tpu.trace_start"() <{level = 10 : i32, message = "bqk,bkd->bqd"}> : () -> ()
    %cst_22 = arith.constant dense<0.000000e+00> : vector<2x16x4xf32>
    %77 = tpu.matmul %76, %65, %cst_22 {dimension_numbers = #tpu.dot_dimension_numbers<[2], [1], [1], [2], [0, 0, 0, 1, 1, 2], [0], [0]>} : vector<2x16x16xbf16>, vector<2x16x4xbf16>, vector<2x16x4xf32> -> vector<2x16x4xf32>
    "tpu.trace_stop"() : () -> ()
    %78 = arith.truncf %77 : vector<2x16x4xf32> to vector<2x16x4xbf16>
    %79 = vector.extract_strided_slice %32 {offsets = [0, 8], sizes = [32, 4], strides = [1, 1]} : vector<32x32xf32> to vector<32x4xf32>
    %80 = vector.shape_cast %79 : vector<32x4xf32> to vector<2x16x4xf32>
    %81 = arith.truncf %80 : vector<2x16x4xf32> to vector<2x16x4xbf16>
    %82 = vector.extract_strided_slice %33 {offsets = [0, 8], sizes = [32, 4], strides = [1, 1]} : vector<32x32xf32> to vector<32x4xf32>
    %83 = vector.shape_cast %82 : vector<32x4xf32> to vector<2x16x4xf32>
    %84 = arith.truncf %83 : vector<2x16x4xf32> to vector<2x16x4xbf16>
    %85 = vector.extract_strided_slice %34 {offsets = [0, 8], sizes = [32, 4], strides = [1, 1]} : vector<32x32xf32> to vector<32x4xf32>
    %86 = vector.shape_cast %85 : vector<32x4xf32> to vector<2x16x4xf32>
    %87 = arith.truncf %86 : vector<2x16x4xf32> to vector<2x16x4xbf16>
    "tpu.trace_start"() <{level = 10 : i32, message = "bqd,bkd->bqk"}> : () -> ()
    %cst_23 = arith.constant dense<0.000000e+00> : vector<2x16x16xf32>
    %88 = tpu.matmul %81, %84, %cst_23 {dimension_numbers = #tpu.dot_dimension_numbers<[2], [2], [1], [1], [0, 0, 0, 1, 1, 1], [0], [0]>} : vector<2x16x4xbf16>, vector<2x16x4xbf16>, vector<2x16x16xf32> -> vector<2x16x16xf32>
    "tpu.trace_stop"() : () -> ()
    %cst_24 = arith.constant dense<0xFF800000> : vector<2x16xf32>
    %89 = vector.multi_reduction <maximumf>, %88, %cst_24 [2] : vector<2x16x16xf32> to vector<2x16xf32>
    %90 = vector.shape_cast %89 : vector<2x16xf32> to vector<2x16x1xf32>
    %91 = vector.broadcast %90 : vector<2x16x1xf32> to vector<2x16x16xf32>
    %92 = arith.subf %88, %91 : vector<2x16x16xf32>
    %93 = math.exp %92 : vector<2x16x16xf32>
    %cst_25 = arith.constant dense<0.000000e+00> : vector<2x16xf32>
    %94 = vector.multi_reduction <add>, %93, %cst_25 [2] : vector<2x16x16xf32> to vector<2x16xf32>
    %95 = vector.shape_cast %94 : vector<2x16xf32> to vector<2x16x1xf32>
    %96 = vector.broadcast %95 : vector<2x16x1xf32> to vector<2x16x16xf32>
    %97 = arith.divf %93, %96 : vector<2x16x16xf32>
    %98 = arith.truncf %97 : vector<2x16x16xf32> to vector<2x16x16xbf16>
    "tpu.trace_start"() <{level = 10 : i32, message = "bqk,bkd->bqd"}> : () -> ()
    %cst_26 = arith.constant dense<0.000000e+00> : vector<2x16x4xf32>
    %99 = tpu.matmul %98, %87, %cst_26 {dimension_numbers = #tpu.dot_dimension_numbers<[2], [1], [1], [2], [0, 0, 0, 1, 1, 2], [0], [0]>} : vector<2x16x16xbf16>, vector<2x16x4xbf16>, vector<2x16x4xf32> -> vector<2x16x4xf32>
    "tpu.trace_stop"() : () -> ()
    %100 = arith.truncf %99 : vector<2x16x4xf32> to vector<2x16x4xbf16>
    %101 = vector.extract_strided_slice %32 {offsets = [0, 12], sizes = [32, 4], strides = [1, 1]} : vector<32x32xf32> to vector<32x4xf32>
    %102 = vector.shape_cast %101 : vector<32x4xf32> to vector<2x16x4xf32>
    %103 = arith.truncf %102 : vector<2x16x4xf32> to vector<2x16x4xbf16>
    %104 = vector.extract_strided_slice %33 {offsets = [0, 12], sizes = [32, 4], strides = [1, 1]} : vector<32x32xf32> to vector<32x4xf32>
    %105 = vector.shape_cast %104 : vector<32x4xf32> to vector<2x16x4xf32>
    %106 = arith.truncf %105 : vector<2x16x4xf32> to vector<2x16x4xbf16>
    %107 = vector.extract_strided_slice %34 {offsets = [0, 12], sizes = [32, 4], strides = [1, 1]} : vector<32x32xf32> to vector<32x4xf32>
    %108 = vector.shape_cast %107 : vector<32x4xf32> to vector<2x16x4xf32>
    %109 = arith.truncf %108 : vector<2x16x4xf32> to vector<2x16x4xbf16>
    "tpu.trace_start"() <{level = 10 : i32, message = "bqd,bkd->bqk"}> : () -> ()
    %cst_27 = arith.constant dense<0.000000e+00> : vector<2x16x16xf32>
    %110 = tpu.matmul %103, %106, %cst_27 {dimension_numbers = #tpu.dot_dimension_numbers<[2], [2], [1], [1], [0, 0, 0, 1, 1, 1], [0], [0]>} : vector<2x16x4xbf16>, vector<2x16x4xbf16>, vector<2x16x16xf32> -> vector<2x16x16xf32>
    "tpu.trace_stop"() : () -> ()
    %cst_28 = arith.constant dense<0xFF800000> : vector<2x16xf32>
    %111 = vector.multi_reduction <maximumf>, %110, %cst_28 [2] : vector<2x16x16xf32> to vector<2x16xf32>
    %112 = vector.shape_cast %111 : vector<2x16xf32> to vector<2x16x1xf32>
    %113 = vector.broadcast %112 : vector<2x16x1xf32> to vector<2x16x16xf32>
    %114 = arith.subf %110, %113 : vector<2x16x16xf32>
    %115 = math.exp %114 : vector<2x16x16xf32>
    %cst_29 = arith.constant dense<0.000000e+00> : vector<2x16xf32>
    %116 = vector.multi_reduction <add>, %115, %cst_29 [2] : vector<2x16x16xf32> to vector<2x16xf32>
    %117 = vector.shape_cast %116 : vector<2x16xf32> to vector<2x16x1xf32>
    %118 = vector.broadcast %117 : vector<2x16x1xf32> to vector<2x16x16xf32>
    %119 = arith.divf %115, %118 : vector<2x16x16xf32>
    %120 = arith.truncf %119 : vector<2x16x16xf32> to vector<2x16x16xbf16>
    "tpu.trace_start"() <{level = 10 : i32, message = "bqk,bkd->bqd"}> : () -> ()
    %cst_30 = arith.constant dense<0.000000e+00> : vector<2x16x4xf32>
    %121 = tpu.matmul %120, %109, %cst_30 {dimension_numbers = #tpu.dot_dimension_numbers<[2], [1], [1], [2], [0, 0, 0, 1, 1, 2], [0], [0]>} : vector<2x16x16xbf16>, vector<2x16x4xbf16>, vector<2x16x4xf32> -> vector<2x16x4xf32>
    "tpu.trace_stop"() : () -> ()
    %122 = arith.truncf %121 : vector<2x16x4xf32> to vector<2x16x4xbf16>
    %123 = vector.extract_strided_slice %32 {offsets = [0, 16], sizes = [32, 4], strides = [1, 1]} : vector<32x32xf32> to vector<32x4xf32>
    %124 = vector.shape_cast %123 : vector<32x4xf32> to vector<2x16x4xf32>
    %125 = arith.truncf %124 : vector<2x16x4xf32> to vector<2x16x4xbf16>
    %126 = vector.extract_strided_slice %33 {offsets = [0, 16], sizes = [32, 4], strides = [1, 1]} : vector<32x32xf32> to vector<32x4xf32>
    %127 = vector.shape_cast %126 : vector<32x4xf32> to vector<2x16x4xf32>
    %128 = arith.truncf %127 : vector<2x16x4xf32> to vector<2x16x4xbf16>
    %129 = vector.extract_strided_slice %34 {offsets = [0, 16], sizes = [32, 4], strides = [1, 1]} : vector<32x32xf32> to vector<32x4xf32>
    %130 = vector.shape_cast %129 : vector<32x4xf32> to vector<2x16x4xf32>
    %131 = arith.truncf %130 : vector<2x16x4xf32> to vector<2x16x4xbf16>
    "tpu.trace_start"() <{level = 10 : i32, message = "bqd,bkd->bqk"}> : () -> ()
    %cst_31 = arith.constant dense<0.000000e+00> : vector<2x16x16xf32>
    %132 = tpu.matmul %125, %128, %cst_31 {dimension_numbers = #tpu.dot_dimension_numbers<[2], [2], [1], [1], [0, 0, 0, 1, 1, 1], [0], [0]>} : vector<2x16x4xbf16>, vector<2x16x4xbf16>, vector<2x16x16xf32> -> vector<2x16x16xf32>
    "tpu.trace_stop"() : () -> ()
    %cst_32 = arith.constant dense<0xFF800000> : vector<2x16xf32>
    %133 = vector.multi_reduction <maximumf>, %132, %cst_32 [2] : vector<2x16x16xf32> to vector<2x16xf32>
    %134 = vector.shape_cast %133 : vector<2x16xf32> to vector<2x16x1xf32>
    %135 = vector.broadcast %134 : vector<2x16x1xf32> to vector<2x16x16xf32>
    %136 = arith.subf %132, %135 : vector<2x16x16xf32>
    %137 = math.exp %136 : vector<2x16x16xf32>
    %cst_33 = arith.constant dense<0.000000e+00> : vector<2x16xf32>
    %138 = vector.multi_reduction <add>, %137, %cst_33 [2] : vector<2x16x16xf32> to vector<2x16xf32>
    %139 = vector.shape_cast %138 : vector<2x16xf32> to vector<2x16x1xf32>
    %140 = vector.broadcast %139 : vector<2x16x1xf32> to vector<2x16x16xf32>
    %141 = arith.divf %137, %140 : vector<2x16x16xf32>
    %142 = arith.truncf %141 : vector<2x16x16xf32> to vector<2x16x16xbf16>
    "tpu.trace_start"() <{level = 10 : i32, message = "bqk,bkd->bqd"}> : () -> ()
    %cst_34 = arith.constant dense<0.000000e+00> : vector<2x16x4xf32>
    %143 = tpu.matmul %142, %131, %cst_34 {dimension_numbers = #tpu.dot_dimension_numbers<[2], [1], [1], [2], [0, 0, 0, 1, 1, 2], [0], [0]>} : vector<2x16x16xbf16>, vector<2x16x4xbf16>, vector<2x16x4xf32> -> vector<2x16x4xf32>
    "tpu.trace_stop"() : () -> ()
    %144 = arith.truncf %143 : vector<2x16x4xf32> to vector<2x16x4xbf16>
    %145 = vector.extract_strided_slice %32 {offsets = [0, 20], sizes = [32, 4], strides = [1, 1]} : vector<32x32xf32> to vector<32x4xf32>
    %146 = vector.shape_cast %145 : vector<32x4xf32> to vector<2x16x4xf32>
    %147 = arith.truncf %146 : vector<2x16x4xf32> to vector<2x16x4xbf16>
    %148 = vector.extract_strided_slice %33 {offsets = [0, 20], sizes = [32, 4], strides = [1, 1]} : vector<32x32xf32> to vector<32x4xf32>
    %149 = vector.shape_cast %148 : vector<32x4xf32> to vector<2x16x4xf32>
    %150 = arith.truncf %149 : vector<2x16x4xf32> to vector<2x16x4xbf16>
    %151 = vector.extract_strided_slice %34 {offsets = [0, 20], sizes = [32, 4], strides = [1, 1]} : vector<32x32xf32> to vector<32x4xf32>
    %152 = vector.shape_cast %151 : vector<32x4xf32> to vector<2x16x4xf32>
    %153 = arith.truncf %152 : vector<2x16x4xf32> to vector<2x16x4xbf16>
    "tpu.trace_start"() <{level = 10 : i32, message = "bqd,bkd->bqk"}> : () -> ()
    %cst_35 = arith.constant dense<0.000000e+00> : vector<2x16x16xf32>
    %154 = tpu.matmul %147, %150, %cst_35 {dimension_numbers = #tpu.dot_dimension_numbers<[2], [2], [1], [1], [0, 0, 0, 1, 1, 1], [0], [0]>} : vector<2x16x4xbf16>, vector<2x16x4xbf16>, vector<2x16x16xf32> -> vector<2x16x16xf32>
    "tpu.trace_stop"() : () -> ()
    %cst_36 = arith.constant dense<0xFF800000> : vector<2x16xf32>
    %155 = vector.multi_reduction <maximumf>, %154, %cst_36 [2] : vector<2x16x16xf32> to vector<2x16xf32>
    %156 = vector.shape_cast %155 : vector<2x16xf32> to vector<2x16x1xf32>
    %157 = vector.broadcast %156 : vector<2x16x1xf32> to vector<2x16x16xf32>
    %158 = arith.subf %154, %157 : vector<2x16x16xf32>
    %159 = math.exp %158 : vector<2x16x16xf32>
    %cst_37 = arith.constant dense<0.000000e+00> : vector<2x16xf32>
    %160 = vector.multi_reduction <add>, %159, %cst_37 [2] : vector<2x16x16xf32> to vector<2x16xf32>
    %161 = vector.shape_cast %160 : vector<2x16xf32> to vector<2x16x1xf32>
    %162 = vector.broadcast %161 : vector<2x16x1xf32> to vector<2x16x16xf32>
    %163 = arith.divf %159, %162 : vector<2x16x16xf32>
    %164 = arith.truncf %163 : vector<2x16x16xf32> to vector<2x16x16xbf16>
    "tpu.trace_start"() <{level = 10 : i32, message = "bqk,bkd->bqd"}> : () -> ()
    %cst_38 = arith.constant dense<0.000000e+00> : vector<2x16x4xf32>
    %165 = tpu.matmul %164, %153, %cst_38 {dimension_numbers = #tpu.dot_dimension_numbers<[2], [1], [1], [2], [0, 0, 0, 1, 1, 2], [0], [0]>} : vector<2x16x16xbf16>, vector<2x16x4xbf16>, vector<2x16x4xf32> -> vector<2x16x4xf32>
    "tpu.trace_stop"() : () -> ()
    %166 = arith.truncf %165 : vector<2x16x4xf32> to vector<2x16x4xbf16>
    %167 = vector.extract_strided_slice %32 {offsets = [0, 24], sizes = [32, 4], strides = [1, 1]} : vector<32x32xf32> to vector<32x4xf32>
    %168 = vector.shape_cast %167 : vector<32x4xf32> to vector<2x16x4xf32>
    %169 = arith.truncf %168 : vector<2x16x4xf32> to vector<2x16x4xbf16>
    %170 = vector.extract_strided_slice %33 {offsets = [0, 24], sizes = [32, 4], strides = [1, 1]} : vector<32x32xf32> to vector<32x4xf32>
    %171 = vector.shape_cast %170 : vector<32x4xf32> to vector<2x16x4xf32>
    %172 = arith.truncf %171 : vector<2x16x4xf32> to vector<2x16x4xbf16>
    %173 = vector.extract_strided_slice %34 {offsets = [0, 24], sizes = [32, 4], strides = [1, 1]} : vector<32x32xf32> to vector<32x4xf32>
    %174 = vector.shape_cast %173 : vector<32x4xf32> to vector<2x16x4xf32>
    %175 = arith.truncf %174 : vector<2x16x4xf32> to vector<2x16x4xbf16>
    "tpu.trace_start"() <{level = 10 : i32, message = "bqd,bkd->bqk"}> : () -> ()
    %cst_39 = arith.constant dense<0.000000e+00> : vector<2x16x16xf32>
    %176 = tpu.matmul %169, %172, %cst_39 {dimension_numbers = #tpu.dot_dimension_numbers<[2], [2], [1], [1], [0, 0, 0, 1, 1, 1], [0], [0]>} : vector<2x16x4xbf16>, vector<2x16x4xbf16>, vector<2x16x16xf32> -> vector<2x16x16xf32>
    "tpu.trace_stop"() : () -> ()
    %cst_40 = arith.constant dense<0xFF800000> : vector<2x16xf32>
    %177 = vector.multi_reduction <maximumf>, %176, %cst_40 [2] : vector<2x16x16xf32> to vector<2x16xf32>
    %178 = vector.shape_cast %177 : vector<2x16xf32> to vector<2x16x1xf32>
    %179 = vector.broadcast %178 : vector<2x16x1xf32> to vector<2x16x16xf32>
    %180 = arith.subf %176, %179 : vector<2x16x16xf32>
    %181 = math.exp %180 : vector<2x16x16xf32>
    %cst_41 = arith.constant dense<0.000000e+00> : vector<2x16xf32>
    %182 = vector.multi_reduction <add>, %181, %cst_41 [2] : vector<2x16x16xf32> to vector<2x16xf32>
    %183 = vector.shape_cast %182 : vector<2x16xf32> to vector<2x16x1xf32>
    %184 = vector.broadcast %183 : vector<2x16x1xf32> to vector<2x16x16xf32>
    %185 = arith.divf %181, %184 : vector<2x16x16xf32>
    %186 = arith.truncf %185 : vector<2x16x16xf32> to vector<2x16x16xbf16>
    "tpu.trace_start"() <{level = 10 : i32, message = "bqk,bkd->bqd"}> : () -> ()
    %cst_42 = arith.constant dense<0.000000e+00> : vector<2x16x4xf32>
    %187 = tpu.matmul %186, %175, %cst_42 {dimension_numbers = #tpu.dot_dimension_numbers<[2], [1], [1], [2], [0, 0, 0, 1, 1, 2], [0], [0]>} : vector<2x16x16xbf16>, vector<2x16x4xbf16>, vector<2x16x4xf32> -> vector<2x16x4xf32>
    "tpu.trace_stop"() : () -> ()
    %188 = arith.truncf %187 : vector<2x16x4xf32> to vector<2x16x4xbf16>
    %189 = vector.extract_strided_slice %32 {offsets = [0, 28], sizes = [32, 4], strides = [1, 1]} : vector<32x32xf32> to vector<32x4xf32>
    %190 = vector.shape_cast %189 : vector<32x4xf32> to vector<2x16x4xf32>
    %191 = arith.truncf %190 : vector<2x16x4xf32> to vector<2x16x4xbf16>
    %192 = vector.extract_strided_slice %33 {offsets = [0, 28], sizes = [32, 4], strides = [1, 1]} : vector<32x32xf32> to vector<32x4xf32>
    %193 = vector.shape_cast %192 : vector<32x4xf32> to vector<2x16x4xf32>
    %194 = arith.truncf %193 : vector<2x16x4xf32> to vector<2x16x4xbf16>
    %195 = vector.extract_strided_slice %34 {offsets = [0, 28], sizes = [32, 4], strides = [1, 1]} : vector<32x32xf32> to vector<32x4xf32>
    %196 = vector.shape_cast %195 : vector<32x4xf32> to vector<2x16x4xf32>
    %197 = arith.truncf %196 : vector<2x16x4xf32> to vector<2x16x4xbf16>
    "tpu.trace_start"() <{level = 10 : i32, message = "bqd,bkd->bqk"}> : () -> ()
    %cst_43 = arith.constant dense<0.000000e+00> : vector<2x16x16xf32>
    %198 = tpu.matmul %191, %194, %cst_43 {dimension_numbers = #tpu.dot_dimension_numbers<[2], [2], [1], [1], [0, 0, 0, 1, 1, 1], [0], [0]>} : vector<2x16x4xbf16>, vector<2x16x4xbf16>, vector<2x16x16xf32> -> vector<2x16x16xf32>
    "tpu.trace_stop"() : () -> ()
    %cst_44 = arith.constant dense<0xFF800000> : vector<2x16xf32>
    %199 = vector.multi_reduction <maximumf>, %198, %cst_44 [2] : vector<2x16x16xf32> to vector<2x16xf32>
    %200 = vector.shape_cast %199 : vector<2x16xf32> to vector<2x16x1xf32>
    %201 = vector.broadcast %200 : vector<2x16x1xf32> to vector<2x16x16xf32>
    %202 = arith.subf %198, %201 : vector<2x16x16xf32>
    %203 = math.exp %202 : vector<2x16x16xf32>
    %cst_45 = arith.constant dense<0.000000e+00> : vector<2x16xf32>
    %204 = vector.multi_reduction <add>, %203, %cst_45 [2] : vector<2x16x16xf32> to vector<2x16xf32>
    %205 = vector.shape_cast %204 : vector<2x16xf32> to vector<2x16x1xf32>
    %206 = vector.broadcast %205 : vector<2x16x1xf32> to vector<2x16x16xf32>
    %207 = arith.divf %203, %206 : vector<2x16x16xf32>
    %208 = arith.truncf %207 : vector<2x16x16xf32> to vector<2x16x16xbf16>
    "tpu.trace_start"() <{level = 10 : i32, message = "bqk,bkd->bqd"}> : () -> ()
    %cst_46 = arith.constant dense<0.000000e+00> : vector<2x16x4xf32>
    %209 = tpu.matmul %208, %197, %cst_46 {dimension_numbers = #tpu.dot_dimension_numbers<[2], [1], [1], [2], [0, 0, 0, 1, 1, 2], [0], [0]>} : vector<2x16x16xbf16>, vector<2x16x4xbf16>, vector<2x16x4xf32> -> vector<2x16x4xf32>
    "tpu.trace_stop"() : () -> ()
    %210 = arith.truncf %209 : vector<2x16x4xf32> to vector<2x16x4xbf16>
    %211 = tpu.concatenate %56, %78, %100, %122, %144, %166, %188, %210 in 2 : vector<2x16x4xbf16>, vector<2x16x4xbf16>, vector<2x16x4xbf16>, vector<2x16x4xbf16>, vector<2x16x4xbf16>, vector<2x16x4xbf16>, vector<2x16x4xbf16>, vector<2x16x4xbf16> -> vector<2x16x32xbf16>
    %212 = vector.shape_cast %211 : vector<2x16x32xbf16> to vector<32x32xbf16>
    %c0_47 = arith.constant 0 : index
    %c0_48 = arith.constant 0 : index
    %213 = vector.load %arg6[%c0_47, %c0_48] : memref<32x32xbf16, #tpu.memory_space<vmem>>, vector<32x32xbf16>
    %cst_49 = arith.constant dense<0.000000e+00> : vector<32x32xf32>
    %214 = tpu.matmul %212, %213, %cst_49 {dimension_numbers = #tpu.dot_dimension_numbers<[1], [0], [0], [1], [0, 0, 1, 1], [], []>} : vector<32x32xbf16>, vector<32x32xbf16>, vector<32x32xf32> -> vector<32x32xf32>
    %c0_50 = arith.constant 0 : index
    %c0_51 = arith.constant 0 : index
    %215 = vector.load %arg7[%c0_50, %c0_51] : memref<1x32xf32, #tpu.memory_space<vmem>>, vector<1x32xf32>
    %216 = vector.broadcast %215 : vector<1x32xf32> to vector<32x32xf32>
    %217 = arith.addf %214, %216 : vector<32x32xf32>
    %c0_52 = arith.constant 0 : index
    %c0_53 = arith.constant 0 : index
    %218 = vector.load %arg8[%c0_52, %c0_53] : memref<1x32xf32, #tpu.memory_space<vmem>>, vector<1x32xf32>
    %c0_54 = arith.constant 0 : index
    %c0_55 = arith.constant 0 : index
    %219 = vector.load %arg9[%c0_54, %c0_55] : memref<1x32xf32, #tpu.memory_space<vmem>>, vector<1x32xf32>
    %cst_56 = arith.constant dense<0.000000e+00> : vector<32xf32>
    %220 = vector.multi_reduction <add>, %217, %cst_56 [1] : vector<32x32xf32> to vector<32xf32>
    %221 = vector.shape_cast %220 : vector<32xf32> to vector<32x1xf32>
    %cst_57 = arith.constant 3.200000e+01 : f32
    %222 = vector.broadcast %cst_57 : f32 to vector<32x1xf32>
    %223 = arith.divf %221, %222 : vector<32x1xf32>
    %224 = vector.broadcast %223 : vector<32x1xf32> to vector<32x32xf32>
    %225 = arith.subf %217, %224 : vector<32x32xf32>
    %226 = arith.mulf %225, %225 : vector<32x32xf32>
    %cst_58 = arith.constant dense<0.000000e+00> : vector<32xf32>
    %227 = vector.multi_reduction <add>, %226, %cst_58 [1] : vector<32x32xf32> to vector<32xf32>
    %228 = vector.shape_cast %227 : vector<32xf32> to vector<32x1xf32>
    %cst_59 = arith.constant 3.200000e+01 : f32
    %229 = vector.broadcast %cst_59 : f32 to vector<32x1xf32>
    %230 = arith.divf %228, %229 : vector<32x1xf32>
    %231 = vector.broadcast %223 : vector<32x1xf32> to vector<32x32xf32>
    %232 = arith.subf %217, %231 : vector<32x32xf32>
    %cst_60 = arith.constant 9.99999974E-6 : f32
    %233 = vector.broadcast %cst_60 : f32 to vector<32x1xf32>
    %234 = arith.addf %230, %233 : vector<32x1xf32>
    %235 = math.rsqrt %234 : vector<32x1xf32>
    %236 = vector.broadcast %235 : vector<32x1xf32> to vector<32x32xf32>
    %237 = arith.mulf %232, %236 : vector<32x32xf32>
    %238 = vector.broadcast %218 : vector<1x32xf32> to vector<32x32xf32>
    %239 = arith.mulf %237, %238 : vector<32x32xf32>
    %240 = vector.broadcast %219 : vector<1x32xf32> to vector<32x32xf32>
    %241 = arith.addf %239, %240 : vector<32x32xf32>
    %242 = arith.addf %25, %241 : vector<32x32xf32>
    %c0_61 = arith.constant 0 : index
    %c0_62 = arith.constant 0 : index
    %243 = vector.load %arg10[%c0_61, %c0_62] : memref<1x32xf32, #tpu.memory_space<vmem>>, vector<1x32xf32>
    %c0_63 = arith.constant 0 : index
    %c0_64 = arith.constant 0 : index
    %244 = vector.load %arg11[%c0_63, %c0_64] : memref<1x32xf32, #tpu.memory_space<vmem>>, vector<1x32xf32>
    %cst_65 = arith.constant dense<0.000000e+00> : vector<32xf32>
    %245 = vector.multi_reduction <add>, %242, %cst_65 [1] : vector<32x32xf32> to vector<32xf32>
    %246 = vector.shape_cast %245 : vector<32xf32> to vector<32x1xf32>
    %cst_66 = arith.constant 3.200000e+01 : f32
    %247 = vector.broadcast %cst_66 : f32 to vector<32x1xf32>
    %248 = arith.divf %246, %247 : vector<32x1xf32>
    %249 = vector.broadcast %248 : vector<32x1xf32> to vector<32x32xf32>
    %250 = arith.subf %242, %249 : vector<32x32xf32>
    %251 = arith.mulf %250, %250 : vector<32x32xf32>
    %cst_67 = arith.constant dense<0.000000e+00> : vector<32xf32>
    %252 = vector.multi_reduction <add>, %251, %cst_67 [1] : vector<32x32xf32> to vector<32xf32>
    %253 = vector.shape_cast %252 : vector<32xf32> to vector<32x1xf32>
    %cst_68 = arith.constant 3.200000e+01 : f32
    %254 = vector.broadcast %cst_68 : f32 to vector<32x1xf32>
    %255 = arith.divf %253, %254 : vector<32x1xf32>
    %256 = vector.broadcast %248 : vector<32x1xf32> to vector<32x32xf32>
    %257 = arith.subf %242, %256 : vector<32x32xf32>
    %cst_69 = arith.constant 9.99999974E-6 : f32
    %258 = vector.broadcast %cst_69 : f32 to vector<32x1xf32>
    %259 = arith.addf %255, %258 : vector<32x1xf32>
    %260 = math.rsqrt %259 : vector<32x1xf32>
    %261 = vector.broadcast %260 : vector<32x1xf32> to vector<32x32xf32>
    %262 = arith.mulf %257, %261 : vector<32x32xf32>
    %263 = vector.broadcast %243 : vector<1x32xf32> to vector<32x32xf32>
    %264 = arith.mulf %262, %263 : vector<32x32xf32>
    %265 = vector.broadcast %244 : vector<1x32xf32> to vector<32x32xf32>
    %266 = arith.addf %264, %265 : vector<32x32xf32>
    %267 = arith.truncf %266 : vector<32x32xf32> to vector<32x32xbf16>
    %c0_70 = arith.constant 0 : index
    %c0_71 = arith.constant 0 : index
    %268 = vector.load %arg12[%c0_70, %c0_71] : memref<32x64xbf16, #tpu.memory_space<vmem>>, vector<32x64xbf16>
    %cst_72 = arith.constant dense<0.000000e+00> : vector<32x64xf32>
    %269 = tpu.matmul %267, %268, %cst_72 {dimension_numbers = #tpu.dot_dimension_numbers<[1], [0], [0], [1], [0, 0, 1, 1], [], []>} : vector<32x32xbf16>, vector<32x64xbf16>, vector<32x64xf32> -> vector<32x64xf32>
    %c0_73 = arith.constant 0 : index
    %c0_74 = arith.constant 0 : index
    %270 = vector.load %arg13[%c0_73, %c0_74] : memref<1x64xf32, #tpu.memory_space<vmem>>, vector<1x64xf32>
    %271 = vector.broadcast %270 : vector<1x64xf32> to vector<32x64xf32>
    %272 = arith.addf %269, %271 : vector<32x64xf32>
    %cst_75 = arith.constant 5.000000e-01 : f32
    %273 = vector.broadcast %cst_75 : f32 to vector<32x64xf32>
    %274 = arith.mulf %273, %272 : vector<32x64xf32>
    %cst_76 = arith.constant 0.707106769 : f32
    %275 = vector.broadcast %cst_76 : f32 to vector<32x64xf32>
    %276 = arith.mulf %272, %275 : vector<32x64xf32>
    %277 = math.absf %276 : vector<32x64xf32>
    %cst_77 = arith.constant 0.327591091 : f32
    %278 = vector.broadcast %cst_77 : f32 to vector<32x64xf32>
    %279 = arith.mulf %278, %277 : vector<32x64xf32>
    %cst_78 = arith.constant 1.000000e+00 : f32
    %280 = vector.broadcast %cst_78 : f32 to vector<32x64xf32>
    %281 = arith.addf %280, %279 : vector<32x64xf32>
    %cst_79 = arith.constant 1.000000e+00 : f32
    %282 = vector.broadcast %cst_79 : f32 to vector<32x64xf32>
    %283 = arith.divf %282, %281 : vector<32x64xf32>
    %cst_80 = arith.constant 1.06140542 : f32
    %284 = vector.broadcast %cst_80 : f32 to vector<32x64xf32>
    %285 = arith.mulf %284, %283 : vector<32x64xf32>
    %cst_81 = arith.constant -1.45315206 : f32
    %286 = vector.broadcast %cst_81 : f32 to vector<32x64xf32>
    %287 = arith.addf %285, %286 : vector<32x64xf32>
    %288 = arith.mulf %287, %283 : vector<32x64xf32>
    %cst_82 = arith.constant 1.42141378 : f32
    %289 = vector.broadcast %cst_82 : f32 to vector<32x64xf32>
    %290 = arith.addf %288, %289 : vector<32x64xf32>
    %291 = arith.mulf %290, %283 : vector<32x64xf32>
    %cst_83 = arith.constant -0.284496725 : f32
    %292 = vector.broadcast %cst_83 : f32 to vector<32x64xf32>
    %293 = arith.addf %291, %292 : vector<32x64xf32>
    %294 = arith.mulf %293, %283 : vector<32x64xf32>
    %cst_84 = arith.constant 0.254829586 : f32
    %295 = vector.broadcast %cst_84 : f32 to vector<32x64xf32>
    %296 = arith.addf %294, %295 : vector<32x64xf32>
    %297 = arith.mulf %296, %283 : vector<32x64xf32>
    %cst_85 = arith.constant 0.000000e+00 : f32
    %298 = vector.broadcast %cst_85 : f32 to vector<32x64xf32>
    %299 = arith.subf %298, %277 : vector<32x64xf32>
    %300 = arith.mulf %299, %277 : vector<32x64xf32>
    %301 = math.exp %300 : vector<32x64xf32>
    %302 = arith.mulf %297, %301 : vector<32x64xf32>
    %cst_86 = arith.constant 1.000000e+00 : f32
    %303 = vector.broadcast %cst_86 : f32 to vector<32x64xf32>
    %304 = arith.subf %303, %302 : vector<32x64xf32>
    %cst_87 = arith.constant 0.000000e+00 : f32
    %305 = vector.broadcast %cst_87 : f32 to vector<32x64xf32>
    %306 = arith.cmpf olt, %276, %305 : vector<32x64xf32>
    %cst_88 = arith.constant 0.000000e+00 : f32
    %307 = vector.broadcast %cst_88 : f32 to vector<32x64xf32>
    %308 = arith.subf %307, %304 : vector<32x64xf32>
    %309 = arith.select %306, %308, %304 : vector<32x64xi1>, vector<32x64xf32>
    %cst_89 = arith.constant 1.000000e+00 : f32
    %310 = vector.broadcast %cst_89 : f32 to vector<32x64xf32>
    %311 = arith.addf %310, %309 : vector<32x64xf32>
    %312 = arith.mulf %274, %311 : vector<32x64xf32>
    %c0_90 = arith.constant 0 : index
    %c0_91 = arith.constant 0 : index
    %313 = vector.load %arg14[%c0_90, %c0_91] : memref<1x64xf32, #tpu.memory_space<vmem>>, vector<1x64xf32>
    %c0_92 = arith.constant 0 : index
    %c0_93 = arith.constant 0 : index
    %314 = vector.load %arg15[%c0_92, %c0_93] : memref<1x64xf32, #tpu.memory_space<vmem>>, vector<1x64xf32>
    %cst_94 = arith.constant dense<0.000000e+00> : vector<32xf32>
    %315 = vector.multi_reduction <add>, %312, %cst_94 [1] : vector<32x64xf32> to vector<32xf32>
    %316 = vector.shape_cast %315 : vector<32xf32> to vector<32x1xf32>
    %cst_95 = arith.constant 6.400000e+01 : f32
    %317 = vector.broadcast %cst_95 : f32 to vector<32x1xf32>
    %318 = arith.divf %316, %317 : vector<32x1xf32>
    %319 = vector.broadcast %318 : vector<32x1xf32> to vector<32x64xf32>
    %320 = arith.subf %312, %319 : vector<32x64xf32>
    %321 = arith.mulf %320, %320 : vector<32x64xf32>
    %cst_96 = arith.constant dense<0.000000e+00> : vector<32xf32>
    %322 = vector.multi_reduction <add>, %321, %cst_96 [1] : vector<32x64xf32> to vector<32xf32>
    %323 = vector.shape_cast %322 : vector<32xf32> to vector<32x1xf32>
    %cst_97 = arith.constant 6.400000e+01 : f32
    %324 = vector.broadcast %cst_97 : f32 to vector<32x1xf32>
    %325 = arith.divf %323, %324 : vector<32x1xf32>
    %326 = vector.broadcast %318 : vector<32x1xf32> to vector<32x64xf32>
    %327 = arith.subf %312, %326 : vector<32x64xf32>
    %cst_98 = arith.constant 9.99999974E-6 : f32
    %328 = vector.broadcast %cst_98 : f32 to vector<32x1xf32>
    %329 = arith.addf %325, %328 : vector<32x1xf32>
    %330 = math.rsqrt %329 : vector<32x1xf32>
    %331 = vector.broadcast %330 : vector<32x1xf32> to vector<32x64xf32>
    %332 = arith.mulf %327, %331 : vector<32x64xf32>
    %333 = vector.broadcast %313 : vector<1x64xf32> to vector<32x64xf32>
    %334 = arith.mulf %332, %333 : vector<32x64xf32>
    %335 = vector.broadcast %314 : vector<1x64xf32> to vector<32x64xf32>
    %336 = arith.addf %334, %335 : vector<32x64xf32>
    %337 = arith.truncf %336 : vector<32x64xf32> to vector<32x64xbf16>
    %c0_99 = arith.constant 0 : index
    %c0_100 = arith.constant 0 : index
    %338 = vector.load %arg16[%c0_99, %c0_100] : memref<64x32xbf16, #tpu.memory_space<vmem>>, vector<64x32xbf16>
    %cst_101 = arith.constant dense<0.000000e+00> : vector<32x32xf32>
    %339 = tpu.matmul %337, %338, %cst_101 {dimension_numbers = #tpu.dot_dimension_numbers<[1], [0], [0], [1], [0, 0, 1, 1], [], []>} : vector<32x64xbf16>, vector<64x32xbf16>, vector<32x32xf32> -> vector<32x32xf32>
    %c0_102 = arith.constant 0 : index
    %c0_103 = arith.constant 0 : index
    %340 = vector.load %arg17[%c0_102, %c0_103] : memref<1x32xf32, #tpu.memory_space<vmem>>, vector<1x32xf32>
    %341 = vector.broadcast %340 : vector<1x32xf32> to vector<32x32xf32>
    %342 = arith.addf %339, %341 : vector<32x32xf32>
    %343 = arith.addf %266, %342 : vector<32x32xf32>
    %344 = vector.shape_cast %343 : vector<32x32xf32> to vector<2x16x32xf32>
    %c0_104 = arith.constant 0 : index
    %c0_105 = arith.constant 0 : index
    %c0_106 = arith.constant 0 : index
    %345 = vector.load %arg18[%c0_104, %c0_105, %c0_106] : memref<2x16x32xf32, #tpu.memory_space<vmem>>, vector<2x16x32xf32>
    tpu.vector_store %arg18[%c0_104, %c0_105, %c0_106], %344 {strides = array<i32>} : memref<2x16x32xf32, #tpu.memory_space<vmem>>, vector<2x16x32xf32>,
    return
  }
  func.func @transform_0(%arg0: i32) -> (i32, i32, i32) {
    %c0_i32 = arith.constant 0 : i32
    %c0_i32_0 = arith.constant 0 : i32
    %c0_i32_1 = arith.constant 0 : i32
    return %arg0, %c0_i32, %c0_i32_0 : i32, i32, i32
  }
  func.func @transform_1(%arg0: i32) -> (i32, i32) {
    %c0_i32 = arith.constant 0 : i32
    %c0_i32_0 = arith.constant 0 : i32
    %c0_i32_1 = arith.constant 0 : i32
    return %c0_i32, %c0_i32_0 : i32, i32
  }
  func.func @transform_2(%arg0: i32) -> (i32, i32) {
    %c0_i32 = arith.constant 0 : i32
    %c0_i32_0 = arith.constant 0 : i32
    %c0_i32_1 = arith.constant 0 : i32
    return %c0_i32, %c0_i32_0 : i32, i32
  }
  func.func @transform_3(%arg0: i32) -> (i32, i32) {
    %c0_i32 = arith.constant 0 : i32
    %c0_i32_0 = arith.constant 0 : i32
    %c0_i32_1 = arith.constant 0 : i32
    return %c0_i32, %c0_i32_0 : i32, i32
  }
  func.func @transform_4(%arg0: i32) -> (i32, i32) {
    %c0_i32 = arith.constant 0 : i32
    %c0_i32_0 = arith.constant 0 : i32
    %c0_i32_1 = arith.constant 0 : i32
    return %c0_i32, %c0_i32_0 : i32, i32
  }
  func.func @transform_5(%arg0: i32) -> (i32, i32) {
    %c0_i32 = arith.constant 0 : i32
    %c0_i32_0 = arith.constant 0 : i32
    %c0_i32_1 = arith.constant 0 : i32
    return %c0_i32, %c0_i32_0 : i32, i32
  }
  func.func @transform_6(%arg0: i32) -> (i32, i32) {
    %c0_i32 = arith.constant 0 : i32
    %c0_i32_0 = arith.constant 0 : i32
    %c0_i32_1 = arith.constant 0 : i32
    return %c0_i32, %c0_i32_0 : i32, i32
  }
  func.func @transform_7(%arg0: i32) -> (i32, i32) {
    %c0_i32 = arith.constant 0 : i32
    %c0_i32_0 = arith.constant 0 : i32
    %c0_i32_1 = arith.constant 0 : i32
    return %c0_i32, %c0_i32_0 : i32, i32
  }
  func.func @transform_8(%arg0: i32) -> (i32, i32) {
    %c0_i32 = arith.constant 0 : i32
    %c0_i32_0 = arith.constant 0 : i32
    %c0_i32_1 = arith.constant 0 : i32
    return %c0_i32, %c0_i32_0 : i32, i32
  }
  func.func @transform_9(%arg0: i32) -> (i32, i32) {
    %c0_i32 = arith.constant 0 : i32
    %c0_i32_0 = arith.constant 0 : i32
    %c0_i32_1 = arith.constant 0 : i32
    return %c0_i32, %c0_i32_0 : i32, i32
  }
  func.func @transform_10(%arg0: i32) -> (i32, i32) {
    %c0_i32 = arith.constant 0 : i32
    %c0_i32_0 = arith.constant 0 : i32
    %c0_i32_1 = arith.constant 0 : i32
    return %c0_i32, %c0_i32_0 : i32, i32
  }
  func.func @transform_11(%arg0: i32) -> (i32, i32) {
    %c0_i32 = arith.constant 0 : i32
    %c0_i32_0 = arith.constant 0 : i32
    %c0_i32_1 = arith.constant 0 : i32
    return %c0_i32, %c0_i32_0 : i32, i32
  }
  func.func @transform_12(%arg0: i32) -> (i32, i32) {
    %c0_i32 = arith.constant 0 : i32
    %c0_i32_0 = arith.constant 0 : i32
    %c0_i32_1 = arith.constant 0 : i32
    return %c0_i32, %c0_i32_0 : i32, i32
  }
  func.func @transform_13(%arg0: i32) -> (i32, i32) {
    %c0_i32 = arith.constant 0 : i32
    %c0_i32_0 = arith.constant 0 : i32
    %c0_i32_1 = arith.constant 0 : i32
    return %c0_i32, %c0_i32_0 : i32, i32
  }
  func.func @transform_14(%arg0: i32) -> (i32, i32) {
    %c0_i32 = arith.constant 0 : i32
    %c0_i32_0 = arith.constant 0 : i32
    %c0_i32_1 = arith.constant 0 : i32
    return %c0_i32, %c0_i32_0 : i32, i32
  }
  func.func @transform_15(%arg0: i32) -> (i32, i32) {
    %c0_i32 = arith.constant 0 : i32
    %c0_i32_0 = arith.constant 0 : i32
    %c0_i32_1 = arith.constant 0 : i32
    return %c0_i32, %c0_i32_0 : i32, i32
  }
  func.func @transform_16(%arg0: i32) -> (i32, i32) {
    %c0_i32 = arith.constant 0 : i32
    %c0_i32_0 = arith.constant 0 : i32
    %c0_i32_1 = arith.constant 0 : i32
    return %c0_i32, %c0_i32_0 : i32, i32
  }
  func.func @transform_17(%arg0: i32) -> (i32, i32, i32) {
    %c0_i32 = arith.constant 0 : i32
    %c0_i32_0 = arith.constant 0 : i32
    %c0_i32_1 = arith.constant 0 : i32
    return %arg0, %c0_i32, %c0_i32_0 : i32, i32, i32
  }
}

module attributes {stable_mosaic.version = 11 : i64} {
  func.func @attblock_kernel(%arg0: i32, %arg1: memref<2x16x32xf32, #tpu.memory_space<vmem>>, %arg2: memref<1x32xf32, #tpu.memory_space<vmem>>, %arg3: memref<1x32xf32, #tpu.memory_space<vmem>>, %arg4: memref<32x96xbf16, #tpu.memory_space<vmem>>, %arg5: memref<1x96xf32, #tpu.memory_space<vmem>>, %arg6: memref<32x32xbf16, #tpu.memory_space<vmem>>, %arg7: memref<1x32xf32, #tpu.memory_space<vmem>>, %arg8: memref<1x32xf32, #tpu.memory_space<vmem>>, %arg9: memref<1x32xf32, #tpu.memory_space<vmem>>, %arg10: memref<1x32xf32, #tpu.memory_space<vmem>>, %arg11: memref<1x32xf32, #tpu.memory_space<vmem>>, %arg12: memref<32x64xbf16, #tpu.memory_space<vmem>>, %arg13: memref<1x64xf32, #tpu.memory_space<vmem>>, %arg14: memref<1x64xf32, #tpu.memory_space<vmem>>, %arg15: memref<1x64xf32, #tpu.memory_space<vmem>>, %arg16: memref<64x32xbf16, #tpu.memory_space<vmem>>, %arg17: memref<1x32xf32, #tpu.memory_space<vmem>>, %arg18: memref<2x16x32xf32, #tpu.memory_space<vmem>>) attributes {dimension_semantics = [#tpu.dimension_semantics<parallel>], iteration_bounds = array<i64: 2>, scalar_prefetch = 0 : i64, scratch_operands = 0 : i64, tpu.core_type = #tpu.core_type<tc>, window_params = [{transform_indices = @transform_0, window_bounds = array<i64: 2, 16, 32>}, {pipeline_mode = #tpu.pipeline_mode<synchronous>, transform_indices = @transform_1, window_bounds = array<i64: 1, 32>}, {pipeline_mode = #tpu.pipeline_mode<synchronous>, transform_indices = @transform_2, window_bounds = array<i64: 1, 32>}, {pipeline_mode = #tpu.pipeline_mode<synchronous>, transform_indices = @transform_3, window_bounds = array<i64: 32, 96>}, {pipeline_mode = #tpu.pipeline_mode<synchronous>, transform_indices = @transform_4, window_bounds = array<i64: 1, 96>}, {pipeline_mode = #tpu.pipeline_mode<synchronous>, transform_indices = @transform_5, window_bounds = array<i64: 32, 32>}, {pipeline_mode = #tpu.pipeline_mode<synchronous>, transform_indices = @transform_6, window_bounds = array<i64: 1, 32>}, {pipeline_mode = #tpu.pipeline_mode<synchronous>, transform_indices = @transform_7, window_bounds = array<i64: 1, 32>}, {pipeline_mode = #tpu.pipeline_mode<synchronous>, transform_indices = @transform_8, window_bounds = array<i64: 1, 32>}, {pipeline_mode = #tpu.pipeline_mode<synchronous>, transform_indices = @transform_9, window_bounds = array<i64: 1, 32>}, {pipeline_mode = #tpu.pipeline_mode<synchronous>, transform_indices = @transform_10, window_bounds = array<i64: 1, 32>}, {pipeline_mode = #tpu.pipeline_mode<synchronous>, transform_indices = @transform_11, window_bounds = array<i64: 32, 64>}, {pipeline_mode = #tpu.pipeline_mode<synchronous>, transform_indices = @transform_12, window_bounds = array<i64: 1, 64>}, {pipeline_mode = #tpu.pipeline_mode<synchronous>, transform_indices = @transform_13, window_bounds = array<i64: 1, 64>}, {pipeline_mode = #tpu.pipeline_mode<synchronous>, transform_indices = @transform_14, window_bounds = array<i64: 1, 64>}, {pipeline_mode = #tpu.pipeline_mode<synchronous>, transform_indices = @transform_15, window_bounds = array<i64: 64, 32>}, {pipeline_mode = #tpu.pipeline_mode<synchronous>, transform_indices = @transform_16, window_bounds = array<i64: 1, 32>}, {transform_indices = @transform_17, window_bounds = array<i64: 2, 16, 32>}]} {
    %c0 = arith.constant 0 : index
    %c0_0 = arith.constant 0 : index
    %c0_1 = arith.constant 0 : index
    %0 = vector.load %arg1[%c0, %c0_0, %c0_1] : memref<2x16x32xf32, #tpu.memory_space<vmem>>, vector<2x16x32xf32>
    %1 = vector.shape_cast %0 : vector<2x16x32xf32> to vector<32x32xf32>
    %c0_2 = arith.constant 0 : index
    %c0_3 = arith.constant 0 : index
    %2 = vector.load %arg2[%c0_2, %c0_3] : memref<1x32xf32, #tpu.memory_space<vmem>>, vector<1x32xf32>
    %c0_4 = arith.constant 0 : index
    %c0_5 = arith.constant 0 : index
    %3 = vector.load %arg3[%c0_4, %c0_5] : memref<1x32xf32, #tpu.memory_space<vmem>>, vector<1x32xf32>
    %cst = arith.constant dense<0.000000e+00> : vector<32xf32>
    %4 = vector.multi_reduction <add>, %1, %cst [1] : vector<32x32xf32> to vector<32xf32>
    %5 = vector.shape_cast %4 : vector<32xf32> to vector<32x1xf32>
    %cst_6 = arith.constant 3.200000e+01 : f32
    %6 = vector.broadcast %cst_6 : f32 to vector<32x1xf32>
    %7 = arith.divf %5, %6 : vector<32x1xf32>
    %8 = vector.broadcast %7 : vector<32x1xf32> to vector<32x32xf32>
    %9 = arith.subf %1, %8 : vector<32x32xf32>
    %10 = arith.mulf %9, %9 : vector<32x32xf32>
    %cst_7 = arith.constant dense<0.000000e+00> : vector<32xf32>
    %11 = vector.multi_reduction <add>, %10, %cst_7 [1] : vector<32x32xf32> to vector<32xf32>
    %12 = vector.shape_cast %11 : vector<32xf32> to vector<32x1xf32>
    %cst_8 = arith.constant 3.200000e+01 : f32
    %13 = vector.broadcast %cst_8 : f32 to vector<32x1xf32>
    %14 = arith.divf %12, %13 : vector<32x1xf32>
    %15 = vector.broadcast %7 : vector<32x1xf32> to vector<32x32xf32>
    %16 = arith.subf %1, %15 : vector<32x32xf32>
    %cst_9 = arith.constant 9.99999974E-6 : f32
    %17 = vector.broadcast %cst_9 : f32 to vector<32x1xf32>
    %18 = arith.addf %14, %17 : vector<32x1xf32>
    %19 = math.rsqrt %18 : vector<32x1xf32>
    %20 = vector.broadcast %19 : vector<32x1xf32> to vector<32x32xf32>
    %21 = arith.mulf %16, %20 : vector<32x32xf32>
    %22 = vector.broadcast %2 : vector<1x32xf32> to vector<32x32xf32>
    %23 = arith.mulf %21, %22 : vector<32x32xf32>
    %24 = vector.broadcast %3 : vector<1x32xf32> to vector<32x32xf32>
    %25 = arith.addf %23, %24 : vector<32x32xf32>
    %26 = arith.truncf %25 : vector<32x32xf32> to vector<32x32xbf16>
    %c0_10 = arith.constant 0 : index
    %c0_11 = arith.constant 0 : index
    %27 = vector.load %arg4[%c0_10, %c0_11] : memref<32x96xbf16, #tpu.memory_space<vmem>>, vector<32x96xbf16>
    %cst_12 = arith.constant dense<0.000000e+00> : vector<32x96xf32>
    %28 = tpu.matmul %26, %27, %cst_12 {dimension_numbers = #tpu.dot_dimension_numbers<[1], [0], [0], [1], [0, 0, 1, 1], [], []>} : vector<32x32xbf16>, vector<32x96xbf16>, vector<32x96xf32> -> vector<32x96xf32>
    %c0_13 = arith.constant 0 : index
    %c0_14 = arith.constant 0 : index
    %29 = vector.load %arg5[%c0_13, %c0_14] : memref<1x96xf32, #tpu.memory_space<vmem>>, vector<1x96xf32>
    %30 = vector.broadcast %29 : vector<1x96xf32> to vector<32x96xf32>
    %31 = arith.addf %28, %30 : vector<32x96xf32>
    %32 = vector.extract_strided_slice %31 {offsets = [0, 0], sizes = [32, 32], strides = [1, 1]} : vector<32x96xf32> to vector<32x32xf32>
    %33 = vector.extract_strided_slice %31 {offsets = [0, 32], sizes = [32, 32], strides = [1, 1]} : vector<32x96xf32> to vector<32x32xf32>
    %34 = vector.extract_strided_slice %31 {offsets = [0, 64], sizes = [32, 32], strides = [1, 1]} : vector<32x96xf32> to vector<32x32xf32>
    %35 = vector.extract_strided_slice %32 {offsets = [0, 0], sizes = [32, 4], strides = [1, 1]} : vector<32x32xf32> to vector<32x4xf32>
    %36 = vector.shape_cast %35 : vector<32x4xf32> to vector<2x16x4xf32>
    %37 = arith.truncf %36 : vector<2x16x4xf32> to vector<2x16x4xbf16>
    %38 = vector.extract_strided_slice %33 {offsets = [0, 0], sizes = [32, 4], strides = [1, 1]} : vector<32x32xf32> to vector<32x4xf32>
    %39 = vector.shape_cast %38 : vector<32x4xf32> to vector<2x16x4xf32>
    %40 = arith.truncf %39 : vector<2x16x4xf32> to vector<2x16x4xbf16>
    %41 = vector.extract_strided_slice %34 {offsets = [0, 0], sizes = [32, 4], strides = [1, 1]} : vector<32x32xf32> to vector<32x4xf32>
    %42 = vector.shape_cast %41 : vector<32x4xf32> to vector<2x16x4xf32>
    %43 = arith.truncf %42 : vector<2x16x4xf32> to vector<2x16x4xbf16>
    "tpu.trace_start"() <{level = 10 : i32, message = "bqd,bkd->bqk"}> : () -> ()
    %cst_15 = arith.constant dense<0.000000e+00> : vector<2x16x16xf32>
    %44 = tpu.matmul %37, %40, %cst_15 {dimension_numbers = #tpu.dot_dimension_numbers<[2], [2], [1], [1], [0, 0, 0, 1, 1, 1], [0], [0]>} : vector<2x16x4xbf16>, vector<2x16x4xbf16>, vector<2x16x16xf32> -> vector<2x16x16xf32>
    "tpu.trace_stop"() : () -> ()
    %cst_16 = arith.constant dense<0xFF800000> : vector<2x16xf32>
    %45 = vector.multi_reduction <maximumf>, %44, %cst_16 [2] : vector<2x16x16xf32> to vector<2x16xf32>
    %46 = vector.shape_cast %45 : vector<2x16xf32> to vector<2x16x1xf32>
    %47 = vector.broadcast %46 : vector<2x16x1xf32> to vector<2x16x16xf32>
    %48 = arith.subf %44, %47 : vector<2x16x16xf32>
    %49 = math.exp %48 : vector<2x16x16xf32>
    %cst_17 = arith.constant dense<0.000000e+00> : vector<2x16xf32>
    %50 = vector.multi_reduction <add>, %49, %cst_17 [2] : vector<2x16x16xf32> to vector<2x16xf32>
    %51 = vector.shape_cast %50 : vector<2x16xf32> to vector<2x16x1xf32>
    %52 = vector.broadcast %51 : vector<2x16x1xf32> to vector<2x16x16xf32>
    %53 = arith.divf %49, %52 : vector<2x16x16xf32>
    %54 = arith.truncf %53 : vector<2x16x16xf32> to vector<2x16x16xbf16>
    "tpu.trace_start"() <{level = 10 : i32, message = "bqk,bkd->bqd"}> : () -> ()
    %cst_18 = arith.constant dense<0.000000e+00> : vector<2x16x4xf32>
    %55 = tpu.matmul %54, %43, %cst_18 {dimension_numbers = #tpu.dot_dimension_numbers<[2], [1], [1], [2], [0, 0, 0, 1, 1, 2], [0], [0]>} : vector<2x16x16xbf16>, vector<2x16x4xbf16>, vector<2x16x4xf32> -> vector<2x16x4xf32>
    "tpu.trace_stop"() : () -> ()
    %56 = arith.truncf %55 : vector<2x16x4xf32> to vector<2x16x4xbf16>
    %57 = vector.extract_strided_slice %32 {offsets = [0, 4], sizes = [32, 4], strides = [1, 1]} : vector<32x32xf32> to vector<32x4xf32>
    %58 = vector.shape_cast %57 : vector<32x4xf32> to vector<2x16x4xf32>
    %59 = arith.truncf %58 : vector<2x16x4xf32> to vector<2x16x4xbf16>
    %60 = vector.extract_strided_slice %33 {offsets = [0, 4], sizes = [32, 4], strides = [1, 1]} : vector<32x32xf32> to vector<32x4xf32>
    %61 = vector.shape_cast %60 : vector<32x4xf32> to vector<2x16x4xf32>
    %62 = arith.truncf %61 : vector<2x16x4xf32> to vector<2x16x4xbf16>
    %63 = vector.extract_strided_slice %34 {offsets = [0, 4], sizes = [32, 4], strides = [1, 1]} : vector<32x32xf32> to vector<32x4xf32>
    %64 = vector.shape_cast %63 : vector<32x4xf32> to vector<2x16x4xf32>
    %65 = arith.truncf %64 : vector<2x16x4xf32> to vector<2x16x4xbf16>
    "tpu.trace_start"() <{level = 10 : i32, message = "bqd,bkd->bqk"}> : () -> ()
    %cst_19 = arith.constant dense<0.000000e+00> : vector<2x16x16xf32>
    %66 = tpu.matmul %59, %62, %cst_19 {dimension_numbers = #tpu.dot_dimension_numbers<[2], [2], [1], [1], [0, 0, 0, 1, 1, 1], [0], [0]>} : vector<2x16x4xbf16>, vector<2x16x4xbf16>, vector<2x16x16xf32> -> vector<2x16x16xf32>
    "tpu.trace_stop"() : () -> ()
    %cst_20 = arith.constant dense<0xFF800000> : vector<2x16xf32>
    %67 = vector.multi_reduction <maximumf>, %66, %cst_20 [2] : vector<2x16x16xf32> to vector<2x16xf32>
    %68 = vector.shape_cast %67 : vector<2x16xf32> to vector<2x16x1xf32>
    %69 = vector.broadcast %68 : vector<2x16x1xf32> to vector<2x16x16xf32>
    %70 = arith.subf %66, %69 : vector<2x16x16xf32>
    %71 = math.exp %70 : vector<2x16x16xf32>
    %cst_21 = arith.constant dense<0.000000e+00> : vector<2x16xf32>
    %72 = vector.multi_reduction <add>, %71, %cst_21 [2] : vector<2x16x16xf32> to vector<2x16xf32>
    %73 = vector.shape_cast %72 : vector<2x16xf32> to vector<2x16x1xf32>
    %74 = vector.broadcast %73 : vector<2x16x1xf32> to vector<2x16x16xf32>
    %75 = arith.divf %71, %74 : vector<2x16x16xf32>
    %76 = arith.truncf %75 : vector<2x16x16xf32> to vector<2x16x16xbf16>
    "tpu.trace_start"() <{level = 10 : i32, message = "bqk,bkd->bqd"}> : () -> ()
    %cst_22 = arith.constant dense<0.000000e+00> : vector<2x16x4xf32>
    %77 = tpu.matmul %76, %65, %cst_22 {dimension_numbers = #tpu.dot_dimension_numbers<[2], [1], [1], [2], [0, 0, 0, 1, 1, 2], [0], [0]>} : vector<2x16x16xbf16>, vector<2x16x4xbf16>, vector<2x16x4xf32> -> vector<2x16x4xf32>
    "tpu.trace_stop"() : () -> ()
    %78 = arith.truncf %77 : vector<2x16x4xf32> to vector<2x16x4xbf16>
    %79 = vector.extract_strided_slice %32 {offsets = [0, 8], sizes = [32, 4], strides = [1, 1]} : vector<32x32xf32> to vector<32x4xf32>
    %80 = vector.shape_cast %79 : vector<32x4xf32> to vector<2x16x4xf32>
    %81 = arith.truncf %80 : vector<2x16x4xf32> to vector<2x16x4xbf16>
    %82 = vector.extract_strided_slice %33 {offsets = [0, 8], sizes = [32, 4], strides = [1, 1]} : vector<32x32xf32> to vector<32x4xf32>
    %83 = vector.shape_cast %82 : vector<32x4xf32> to vector<2x16x4xf32>
    %84 = arith.truncf %83 : vector<2x16x4xf32> to vector<2x16x4xbf16>
    %85 = vector.extract_strided_slice %34 {offsets = [0, 8], sizes = [32, 4], strides = [1, 1]} : vector<32x32xf32> to vector<32x4xf32>
    %86 = vector.shape_cast %85 : vector<32x4xf32> to vector<2x16x4xf32>
    %87 = arith.truncf %86 : vector<2x16x4xf32> to vector<2x16x4xbf16>
    "tpu.trace_start"() <{level = 10 : i32, message = "bqd,bkd->bqk"}> : () -> ()
    %cst_23 = arith.constant dense<0.000000e+00> : vector<2x16x16xf32>
    %88 = tpu.matmul %81, %84, %cst_23 {dimension_numbers = #tpu.dot_dimension_numbers<[2], [2], [1], [1], [0, 0, 0, 1, 1, 1], [0], [0]>} : vector<2x16x4xbf16>, vector<2x16x4xbf16>, vector<2x16x16xf32> -> vector<2x16x16xf32>
    "tpu.trace_stop"() : () -> ()
    %cst_24 = arith.constant dense<0xFF800000> : vector<2x16xf32>
    %89 = vector.multi_reduction <maximumf>, %88, %cst_24 [2] : vector<2x16x16xf32> to vector<2x16xf32>
    %90 = vector.shape_cast %89 : vector<2x16xf32> to vector<2x16x1xf32>
    %91 = vector.broadcast %90 : vector<2x16x1xf32> to vector<2x16x16xf32>
    %92 = arith.subf %88, %91 : vector<2x16x16xf32>
    %93 = math.exp %92 : vector<2x16x16xf32>
    %cst_25 = arith.constant dense<0.000000e+00> : vector<2x16xf32>
    %94 = vector.multi_reduction <add>, %93, %cst_25 [2] : vector<2x16x16xf32> to vector<2x16xf32>
    %95 = vector.shape_cast %94 : vector<2x16xf32> to vector<2x16x1xf32>
    %96 = vector.broadcast %95 : vector<2x16x1xf32> to vector<2x16x16xf32>
    %97 = arith.divf %93, %96 : vector<2x16x16xf32>
    %98 = arith.truncf %97 : vector<2x16x16xf32> to vector<2x16x16xbf16>
    "tpu.trace_start"() <{level = 10 : i32, message = "bqk,bkd->bqd"}> : () -> ()
    %cst_26 = arith.constant dense<0.000000e+00> : vector<2x16x4xf32>
    %99 = tpu.matmul %98, %87, %cst_26 {dimension_numbers = #tpu.dot_dimension_numbers<[2], [1], [1], [2], [0, 0, 0, 1, 1, 2], [0], [0]>} : vector<2x16x16xbf16>, vector<2x16x4xbf16>, vector<2x16x4xf32> -> vector<2x16x4xf32>
    "tpu.trace_stop"() : () -> ()
    %100 = arith.truncf %99 : vector<2x16x4xf32> to vector<2x16x4xbf16>
    %101 = vector.extract_strided_slice %32 {offsets = [0, 12], sizes = [32, 4], strides = [1, 1]} : vector<32x32xf32> to vector<32x4xf32>
    %102 = vector.shape_cast %101 : vector<32x4xf32> to vector<2x16x4xf32>
    %103 = arith.truncf %102 : vector<2x16x4xf32> to vector<2x16x4xbf16>
    %104 = vector.extract_strided_slice %33 {offsets = [0, 12], sizes = [32, 4], strides = [1, 1]} : vector<32x32xf32> to vector<32x4xf32>
    %105 = vector.shape_cast %104 : vector<32x4xf32> to vector<2x16x4xf32>
    %106 = arith.truncf %105 : vector<2x16x4xf32> to vector<2x16x4xbf16>
    %107 = vector.extract_strided_slice %34 {offsets = [0, 12], sizes = [32, 4], strides = [1, 1]} : vector<32x32xf32> to vector<32x4xf32>
    %108 = vector.shape_cast %107 : vector<32x4xf32> to vector<2x16x4xf32>
    %109 = arith.truncf %108 : vector<2x16x4xf32> to vector<2x16x4xbf16>
    "tpu.trace_start"() <{level = 10 : i32, message = "bqd,bkd->bqk"}> : () -> ()
    %cst_27 = arith.constant dense<0.000000e+00> : vector<2x16x16xf32>
    %110 = tpu.matmul %103, %106, %cst_27 {dimension_numbers = #tpu.dot_dimension_numbers<[2], [2], [1], [1], [0, 0, 0, 1, 1, 1], [0], [0]>} : vector<2x16x4xbf16>, vector<2x16x4xbf16>, vector<2x16x16xf32> -> vector<2x16x16xf32>
    "tpu.trace_stop"() : () -> ()
    %cst_28 = arith.constant dense<0xFF800000> : vector<2x16xf32>
    %111 = vector.multi_reduction <maximumf>, %110, %cst_28 [2] : vector<2x16x16xf32> to vector<2x16xf32>
    %112 = vector.shape_cast %111 : vector<2x16xf32> to vector<2x16x1xf32>
    %113 = vector.broadcast %112 : vector<2x16x1xf32> to vector<2x16x16xf32>
    %114 = arith.subf %110, %113 : vector<2x16x16xf32>
    %115 = math.exp %114 : vector<2x16x16xf32>
    %cst_29 = arith.constant dense<0.000000e+00> : vector<2x16xf32>
    %116 = vector.multi_reduction <add>, %115, %cst_29 [2] : vector<2x16x16xf32> to vector<2x16xf32>
    %117 = vector.shape_cast %116 : vector<2x16xf32> to vector<2x16x1xf32>
    %118 = vector.broadcast %117 : vector<2x16x1xf32> to vector<2x16x16xf32>
    %119 = arith.divf %115, %118 : vector<2x16x16xf32>
    %120 = arith.truncf %119 : vector<2x16x16xf32> to vector<2x16x16xbf16>
    "tpu.trace_start"() <{level = 10 : i32, message = "bqk,bkd->bqd"}> : () -> ()
    %cst_30 = arith.constant dense<0.000000e+00> : vector<2x16x4xf32>
    %121 = tpu.matmul %120, %109, %cst_30 {dimension_numbers = #tpu.dot_dimension_numbers<[2], [1], [1], [2], [0, 0, 0, 1, 1, 2], [0], [0]>} : vector<2x16x16xbf16>, vector<2x16x4xbf16>, vector<2x16x4xf32> -> vector<2x16x4xf32>
    "tpu.trace_stop"() : () -> ()
    %122 = arith.truncf %121 : vector<2x16x4xf32> to vector<2x16x4xbf16>
    %123 = vector.extract_strided_slice %32 {offsets = [0, 16], sizes = [32, 4], strides = [1, 1]} : vector<32x32xf32> to vector<32x4xf32>
    %124 = vector.shape_cast %123 : vector<32x4xf32> to vector<2x16x4xf32>
    %125 = arith.truncf %124 : vector<2x16x4xf32> to vector<2x16x4xbf16>
    %126 = vector.extract_strided_slice %33 {offsets = [0, 16], sizes = [32, 4], strides = [1, 1]} : vector<32x32xf32> to vector<32x4xf32>
    %127 = vector.shape_cast %126 : vector<32x4xf32> to vector<2x16x4xf32>
    %128 = arith.truncf %127 : vector<2x16x4xf32> to vector<2x16x4xbf16>
    %129 = vector.extract_strided_slice %34 {offsets = [0, 16], sizes = [32, 4], strides = [1, 1]} : vector<32x32xf32> to vector<32x4xf32>
    %130 = vector.shape_cast %129 : vector<32x4xf32> to vector<2x16x4xf32>
    %131 = arith.truncf %130 : vector<2x16x4xf32> to vector<2x16x4xbf16>
    "tpu.trace_start"() <{level = 10 : i32, message = "bqd,bkd->bqk"}> : () -> ()
    %cst_31 = arith.constant dense<0.000000e+00> : vector<2x16x16xf32>
    %132 = tpu.matmul %125, %128, %cst_31 {dimension_numbers = #tpu.dot_dimension_numbers<[2], [2], [1], [1], [0, 0, 0, 1, 1, 1], [0], [0]>} : vector<2x16x4xbf16>, vector<2x16x4xbf16>, vector<2x16x16xf32> -> vector<2x16x16xf32>
    "tpu.trace_stop"() : () -> ()
    %cst_32 = arith.constant dense<0xFF800000> : vector<2x16xf32>
    %133 = vector.multi_reduction <maximumf>, %132, %cst_32 [2] : vector<2x16x16xf32> to vector<2x16xf32>
    %134 = vector.shape_cast %133 : vector<2x16xf32> to vector<2x16x1xf32>
    %135 = vector.broadcast %134 : vector<2x16x1xf32> to vector<2x16x16xf32>
    %136 = arith.subf %132, %135 : vector<2x16x16xf32>
    %137 = math.exp %136 : vector<2x16x16xf32>
    %cst_33 = arith.constant dense<0.000000e+00> : vector<2x16xf32>
    %138 = vector.multi_reduction <add>, %137, %cst_33 [2] : vector<2x16x16xf32> to vector<2x16xf32>
    %139 = vector.shape_cast %138 : vector<2x16xf32> to vector<2x16x1xf32>
    %140 = vector.broadcast %139 : vector<2x16x1xf32> to vector<2x16x16xf32>
    %141 = arith.divf %137, %140 : vector<2x16x16xf32>
    %142 = arith.truncf %141 : vector<2x16x16xf32> to vector<2x16x16xbf16>
    "tpu.trace_start"() <{level = 10 : i32, message = "bqk,bkd->bqd"}> : () -> ()
    %cst_34 = arith.constant dense<0.000000e+00> : vector<2x16x4xf32>
    %143 = tpu.matmul %142, %131, %cst_34 {dimension_numbers = #tpu.dot_dimension_numbers<[2], [1], [1], [2], [0, 0, 0, 1, 1, 2], [0], [0]>} : vector<2x16x16xbf16>, vector<2x16x4xbf16>, vector<2x16x4xf32> -> vector<2x16x4xf32>
    "tpu.trace_stop"() : () -> ()
    %144 = arith.truncf %143 : vector<2x16x4xf32> to vector<2x16x4xbf16>
    %145 = vector.extract_strided_slice %32 {offsets = [0, 20], sizes = [32, 4], strides = [1, 1]} : vector<32x32xf32> to vector<32x4xf32>
    %146 = vector.shape_cast %145 : vector<32x4xf32> to vector<2x16x4xf32>
    %147 = arith.truncf %146 : vector<2x16x4xf32> to vector<2x16x4xbf16>
    %148 = vector.extract_strided_slice %33 {offsets = [0, 20], sizes = [32, 4], strides = [1, 1]} : vector<32x32xf32> to vector<32x4xf32>
    %149 = vector.shape_cast %148 : vector<32x4xf32> to vector<2x16x4xf32>
    %150 = arith.truncf %149 : vector<2x16x4xf32> to vector<2x16x4xbf16>
    %151 = vector.extract_strided_slice %34 {offsets = [0, 20], sizes = [32, 4], strides = [1, 1]} : vector<32x32xf32> to vector<32x4xf32>
    %152 = vector.shape_cast %151 : vector<32x4xf32> to vector<2x16x4xf32>
    %153 = arith.truncf %152 : vector<2x16x4xf32> to vector<2x16x4xbf16>
    "tpu.trace_start"() <{level = 10 : i32, message = "bqd,bkd->bqk"}> : () -> ()
    %cst_35 = arith.constant dense<0.000000e+00> : vector<2x16x16xf32>
    %154 = tpu.matmul %147, %150, %cst_35 {dimension_numbers = #tpu.dot_dimension_numbers<[2], [2], [1], [1], [0, 0, 0, 1, 1, 1], [0], [0]>} : vector<2x16x4xbf16>, vector<2x16x4xbf16>, vector<2x16x16xf32> -> vector<2x16x16xf32>
    "tpu.trace_stop"() : () -> ()
    %cst_36 = arith.constant dense<0xFF800000> : vector<2x16xf32>
    %155 = vector.multi_reduction <maximumf>, %154, %cst_36 [2] : vector<2x16x16xf32> to vector<2x16xf32>
    %156 = vector.shape_cast %155 : vector<2x16xf32> to vector<2x16x1xf32>
    %157 = vector.broadcast %156 : vector<2x16x1xf32> to vector<2x16x16xf32>
    %158 = arith.subf %154, %157 : vector<2x16x16xf32>
    %159 = math.exp %158 : vector<2x16x16xf32>
    %cst_37 = arith.constant dense<0.000000e+00> : vector<2x16xf32>
    %160 = vector.multi_reduction <add>, %159, %cst_37 [2] : vector<2x16x16xf32> to vector<2x16xf32>
    %161 = vector.shape_cast %160 : vector<2x16xf32> to vector<2x16x1xf32>
    %162 = vector.broadcast %161 : vector<2x16x1xf32> to vector<2x16x16xf32>
    %163 = arith.divf %159, %162 : vector<2x16x16xf32>
    %164 = arith.truncf %163 : vector<2x16x16xf32> to vector<2x16x16xbf16>
    "tpu.trace_start"() <{level = 10 : i32, message = "bqk,bkd->bqd"}> : () -> ()
    %cst_38 = arith.constant dense<0.000000e+00> : vector<2x16x4xf32>
    %165 = tpu.matmul %164, %153, %cst_38 {dimension_numbers = #tpu.dot_dimension_numbers<[2], [1], [1], [2], [0, 0, 0, 1, 1, 2], [0], [0]>} : vector<2x16x16xbf16>, vector<2x16x4xbf16>, vector<2x16x4xf32> -> vector<2x16x4xf32>
    "tpu.trace_stop"() : () -> ()
    %166 = arith.truncf %165 : vector<2x16x4xf32> to vector<2x16x4xbf16>
    %167 = vector.extract_strided_slice %32 {offsets = [0, 24], sizes = [32, 4], strides = [1, 1]} : vector<32x32xf32> to vector<32x4xf32>
    %168 = vector.shape_cast %167 : vector<32x4xf32> to vector<2x16x4xf32>
    %169 = arith.truncf %168 : vector<2x16x4xf32> to vector<2x16x4xbf16>
    %170 = vector.extract_strided_slice %33 {offsets = [0, 24], sizes = [32, 4], strides = [1, 1]} : vector<32x32xf32> to vector<32x4xf32>
    %171 = vector.shape_cast %170 : vector<32x4xf32> to vector<2x16x4xf32>
    %172 = arith.truncf %171 : vector<2x16x4xf32> to vector<2x16x4xbf16>
    %173 = vector.extract_strided_slice %34 {offsets = [0, 24], sizes = [32, 4], strides = [1, 1]} : vector<32x32xf32> to vector<32x4xf32>
    %174 = vector.shape_cast %173 : vector<32x4xf32> to vector<2x16x4xf32>
    %175 = arith.truncf %174 : vector<2x16x4xf32> to vector<2x16x4xbf16>
    "tpu.trace_start"() <{level = 10 : i32, message = "bqd,bkd->bqk"}> : () -> ()
    %cst_39 = arith.constant dense<0.000000e+00> : vector<2x16x16xf32>
    %176 = tpu.matmul %169, %172, %cst_39 {dimension_numbers = #tpu.dot_dimension_numbers<[2], [2], [1], [1], [0, 0, 0, 1, 1, 1], [0], [0]>} : vector<2x16x4xbf16>, vector<2x16x4xbf16>, vector<2x16x16xf32> -> vector<2x16x16xf32>
    "tpu.trace_stop"() : () -> ()
    %cst_40 = arith.constant dense<0xFF800000> : vector<2x16xf32>
    %177 = vector.multi_reduction <maximumf>, %176, %cst_40 [2] : vector<2x16x16xf32> to vector<2x16xf32>
    %178 = vector.shape_cast %177 : vector<2x16xf32> to vector<2x16x1xf32>
    %179 = vector.broadcast %178 : vector<2x16x1xf32> to vector<2x16x16xf32>
    %180 = arith.subf %176, %179 : vector<2x16x16xf32>
    %181 = math.exp %180 : vector<2x16x16xf32>
    %cst_41 = arith.constant dense<0.000000e+00> : vector<2x16xf32>
    %182 = vector.multi_reduction <add>, %181, %cst_41 [2] : vector<2x16x16xf32> to vector<2x16xf32>
    %183 = vector.shape_cast %182 : vector<2x16xf32> to vector<2x16x1xf32>
    %184 = vector.broadcast %183 : vector<2x16x1xf32> to vector<2x16x16xf32>
    %185 = arith.divf %181, %184 : vector<2x16x16xf32>
    %186 = arith.truncf %185 : vector<2x16x16xf32> to vector<2x16x16xbf16>
    "tpu.trace_start"() <{level = 10 : i32, message = "bqk,bkd->bqd"}> : () -> ()
    %cst_42 = arith.constant dense<0.000000e+00> : vector<2x16x4xf32>
    %187 = tpu.matmul %186, %175, %cst_42 {dimension_numbers = #tpu.dot_dimension_numbers<[2], [1], [1], [2], [0, 0, 0, 1, 1, 2], [0], [0]>} : vector<2x16x16xbf16>, vector<2x16x4xbf16>, vector<2x16x4xf32> -> vector<2x16x4xf32>
    "tpu.trace_stop"() : () -> ()
    %188 = arith.truncf %187 : vector<2x16x4xf32> to vector<2x16x4xbf16>
    %189 = vector.extract_strided_slice %32 {offsets = [0, 28], sizes = [32, 4], strides = [1, 1]} : vector<32x32xf32> to vector<32x4xf32>
    %190 = vector.shape_cast %189 : vector<32x4xf32> to vector<2x16x4xf32>
    %191 = arith.truncf %190 : vector<2x16x4xf32> to vector<2x16x4xbf16>
    %192 = vector.extract_strided_slice %33 {offsets = [0, 28], sizes = [32, 4], strides = [1, 1]} : vector<32x32xf32> to vector<32x4xf32>
    %193 = vector.shape_cast %192 : vector<32x4xf32> to vector<2x16x4xf32>
    %194 = arith.truncf %193 : vector<2x16x4xf32> to vector<2x16x4xbf16>
    %195 = vector.extract_strided_slice %34 {offsets = [0, 28], sizes = [32, 4], strides = [1, 1]} : vector<32x32xf32> to vector<32x4xf32>
    %196 = vector.shape_cast %195 : vector<32x4xf32> to vector<2x16x4xf32>
    %197 = arith.truncf %196 : vector<2x16x4xf32> to vector<2x16x4xbf16>
    "tpu.trace_start"() <{level = 10 : i32, message = "bqd,bkd->bqk"}> : () -> ()
    %cst_43 = arith.constant dense<0.000000e+00> : vector<2x16x16xf32>
    %198 = tpu.matmul %191, %194, %cst_43 {dimension_numbers = #tpu.dot_dimension_numbers<[2], [2], [1], [1], [0, 0, 0, 1, 1, 1], [0], [0]>} : vector<2x16x4xbf16>, vector<2x16x4xbf16>, vector<2x16x16xf32> -> vector<2x16x16xf32>
    "tpu.trace_stop"() : () -> ()
    %cst_44 = arith.constant dense<0xFF800000> : vector<2x16xf32>
    %199 = vector.multi_reduction <maximumf>, %198, %cst_44 [2] : vector<2x16x16xf32> to vector<2x16xf32>
    %200 = vector.shape_cast %199 : vector<2x16xf32> to vector<2x16x1xf32>
    %201 = vector.broadcast %200 : vector<2x16x1xf32> to vector<2x16x16xf32>
    %202 = arith.subf %198, %201 : vector<2x16x16xf32>
    %203 = math.exp %202 : vector<2x16x16xf32>
    %cst_45 = arith.constant dense<0.000000e+00> : vector<2x16xf32>
    %204 = vector.multi_reduction <add>, %203, %cst_45 [2] : vector<2x16x16xf32> to vector<2x16xf32>
    %205 = vector.shape_cast %204 : vector<2x16xf32> to vector<2x16x1xf32>
    %206 = vector.broadcast %205 : vector<2x16x1xf32> to vector<2x16x16xf32>
    %207 = arith.divf %203, %206 : vector<2x16x16xf32>
    %208 = arith.truncf %207 : vector<2x16x16xf32> to vector<2x16x16xbf16>
    "tpu.trace_start"() <{level = 10 : i32, message = "bqk,bkd->bqd"}> : () -> ()
    %cst_46 = arith.constant dense<0.000000e+00> : vector<2x16x4xf32>
    %209 = tpu.matmul %208, %197, %cst_46 {dimension_numbers = #tpu.dot_dimension_numbers<[2], [1], [1], [2], [0, 0, 0, 1, 1, 2], [0], [0]>} : vector<2x16x16xbf16>, vector<2x16x4xbf16>, vector<2x16x4xf32> -> vector<2x16x4xf32>
    "tpu.trace_stop"() : () -> ()
    %210 = arith.truncf %209 : vector<2x16x4xf32> to vector<2x16x4xbf16>
    %211 = tpu.concatenate %56, %78, %100, %122, %144, %166, %188, %210 in 2 : vector<2x16x4xbf16>, vector<2x16x4xbf16>, vector<2x16x4xbf16>, vector<2x16x4xbf16>, vector<2x16x4xbf16>, vector<2x16x4xbf16>, vector<2x16x4xbf16>, vector<2x16x4xbf16> -> vector<2x16x32xbf16>
    %212 = vector.shape_cast %211 : vector<2x16x32xbf16> to vector<32x32xbf16>
    %c0_47 = arith.constant 0 : index
    %c0_48 = arith.constant 0 : index
    %213 = vector.load %arg6[%c0_47, %c0_48] : memref<32x32xbf16, #tpu.memory_space<vmem>>, vector<32x32xbf16>
    %cst_49 = arith.constant dense<0.000000e+00> : vector<32x32xf32>
    %214 = tpu.matmul %212, %213, %cst_49 {dimension_numbers = #tpu.dot_dimension_numbers<[1], [0], [0], [1], [0, 0, 1, 1], [], []>} : vector<32x32xbf16>, vector<32x32xbf16>, vector<32x32xf32> -> vector<32x32xf32>
    %c0_50 = arith.constant 0 : index
    %c0_51 = arith.constant 0 : index
    %215 = vector.load %arg7[%c0_50, %c0_51] : memref<1x32xf32, #tpu.memory_space<vmem>>, vector<1x32xf32>
    %216 = vector.broadcast %215 : vector<1x32xf32> to vector<32x32xf32>
    %217 = arith.addf %214, %216 : vector<32x32xf32>
    %c0_52 = arith.constant 0 : index
    %c0_53 = arith.constant 0 : index
    %218 = vector.load %arg8[%c0_52, %c0_53] : memref<1x32xf32, #tpu.memory_space<vmem>>, vector<1x32xf32>
    %c0_54 = arith.constant 0 : index
    %c0_55 = arith.constant 0 : index
    %219 = vector.load %arg9[%c0_54, %c0_55] : memref<1x32xf32, #tpu.memory_space<vmem>>, vector<1x32xf32>
    %cst_56 = arith.constant dense<0.000000e+00> : vector<32xf32>
    %220 = vector.multi_reduction <add>, %217, %cst_56 [1] : vector<32x32xf32> to vector<32xf32>
    %221 = vector.shape_cast %220 : vector<32xf32> to vector<32x1xf32>
    %cst_57 = arith.constant 3.200000e+01 : f32
    %222 = vector.broadcast %cst_57 : f32 to vector<32x1xf32>
    %223 = arith.divf %221, %222 : vector<32x1xf32>
    %224 = vector.broadcast %223 : vector<32x1xf32> to vector<32x32xf32>
    %225 = arith.subf %217, %224 : vector<32x32xf32>
    %226 = arith.mulf %225, %225 : vector<32x32xf32>
    %cst_58 = arith.constant dense<0.000000e+00> : vector<32xf32>
    %227 = vector.multi_reduction <add>, %226, %cst_58 [1] : vector<32x32xf32> to vector<32xf32>
    %228 = vector.shape_cast %227 : vector<32xf32> to vector<32x1xf32>
    %cst_59 = arith.constant 3.200000e+01 : f32
    %229 = vector.broadcast %cst_59 : f32 to vector<32x1xf32>
    %230 = arith.divf %228, %229 : vector<32x1xf32>
    %231 = vector.broadcast %223 : vector<32x1xf32> to vector<32x32xf32>
    %232 = arith.subf %217, %231 : vector<32x32xf32>
    %cst_60 = arith.constant 9.99999974E-6 : f32
    %233 = vector.broadcast %cst_60 : f32 to vector<32x1xf32>
    %234 = arith.addf %230, %233 : vector<32x1xf32>
    %235 = math.rsqrt %234 : vector<32x1xf32>
    %236 = vector.broadcast %235 : vector<32x1xf32> to vector<32x32xf32>
    %237 = arith.mulf %232, %236 : vector<32x32xf32>
    %238 = vector.broadcast %218 : vector<1x32xf32> to vector<32x32xf32>
    %239 = arith.mulf %237, %238 : vector<32x32xf32>
    %240 = vector.broadcast %219 : vector<1x32xf32> to vector<32x32xf32>
    %241 = arith.addf %239, %240 : vector<32x32xf32>
    %242 = arith.addf %25, %241 : vector<32x32xf32>
    %c0_61 = arith.constant 0 : index
    %c0_62 = arith.constant 0 : index
    %243 = vector.load %arg10[%c0_61, %c0_62] : memref<1x32xf32, #tpu.memory_space<vmem>>, vector<1x32xf32>
    %c0_63 = arith.constant 0 : index
    %c0_64 = arith.constant 0 : index
    %244 = vector.load %arg11[%c0_63, %c0_64] : memref<1x32xf32, #tpu.memory_space<vmem>>, vector<1x32xf32>
    %cst_65 = arith.constant dense<0.000000e+00> : vector<32xf32>
    %245 = vector.multi_reduction <add>, %242, %cst_65 [1] : vector<32x32xf32> to vector<32xf32>
    %246 = vector.shape_cast %245 : vector<32xf32> to vector<32x1xf32>
    %cst_66 = arith.constant 3.200000e+01 : f32
    %247 = vector.broadcast %cst_66 : f32 to vector<32x1xf32>
    %248 = arith.divf %246, %247 : vector<32x1xf32>
    %249 = vector.broadcast %248 : vector<32x1xf32> to vector<32x32xf32>
    %250 = arith.subf %242, %249 : vector<32x32xf32>
    %251 = arith.mulf %250, %250 : vector<32x32xf32>
    %cst_67 = arith.constant dense<0.000000e+00> : vector<32xf32>
    %252 = vector.multi_reduction <add>, %251, %cst_67 [1] : vector<32x32xf32> to vector<32xf32>
    %253 = vector.shape_cast %252 : vector<32xf32> to vector<32x1xf32>
    %cst_68 = arith.constant 3.200000e+01 : f32
    %254 = vector.broadcast %cst_68 : f32 to vector<32x1xf32>
    %255 = arith.divf %253, %254 : vector<32x1xf32>
    %256 = vector.broadcast %248 : vector<32x1xf32> to vector<32x32xf32>
    %257 = arith.subf %242, %256 : vector<32x32xf32>
    %cst_69 = arith.constant 9.99999974E-6 : f32
    %258 = vector.broadcast %cst_69 : f32 to vector<32x1xf32>
    %259 = arith.addf %255, %258 : vector<32x1xf32>
    %260 = math.rsqrt %259 : vector<32x1xf32>
    %261 = vector.broadcast %260 : vector<32x1xf32> to vector<32x32xf32>
    %262 = arith.mulf %257, %261 : vector<32x32xf32>
    %263 = vector.broadcast %243 : vector<1x32xf32> to vector<32x32xf32>
    %264 = arith.mulf %262, %263 : vector<32x32xf32>
    %265 = vector.broadcast %244 : vector<1x32xf32> to vector<32x32xf32>
    %266 = arith.addf %264, %265 : vector<32x32xf32>
    %267 = arith.truncf %266 : vector<32x32xf32> to vector<32x32xbf16>
    %c0_70 = arith.constant 0 : index
    %c0_71 = arith.constant 0 : index
    %268 = vector.load %arg12[%c0_70, %c0_71] : memref<32x64xbf16, #tpu.memory_space<vmem>>, vector<32x64xbf16>
    %cst_72 = arith.constant dense<0.000000e+00> : vector<32x64xf32>
    %269 = tpu.matmul %267, %268, %cst_72 {dimension_numbers = #tpu.dot_dimension_numbers<[1], [0], [0], [1], [0, 0, 1, 1], [], []>} : vector<32x32xbf16>, vector<32x64xbf16>, vector<32x64xf32> -> vector<32x64xf32>
    %c0_73 = arith.constant 0 : index
    %c0_74 = arith.constant 0 : index
    %270 = vector.load %arg13[%c0_73, %c0_74] : memref<1x64xf32, #tpu.memory_space<vmem>>, vector<1x64xf32>
    %271 = vector.broadcast %270 : vector<1x64xf32> to vector<32x64xf32>
    %272 = arith.addf %269, %271 : vector<32x64xf32>
    %cst_75 = arith.constant 5.000000e-01 : f32
    %273 = vector.broadcast %cst_75 : f32 to vector<32x64xf32>
    %274 = arith.mulf %273, %272 : vector<32x64xf32>
    %cst_76 = arith.constant 0.707106769 : f32
    %275 = vector.broadcast %cst_76 : f32 to vector<32x64xf32>
    %276 = arith.mulf %272, %275 : vector<32x64xf32>
    %277 = math.absf %276 : vector<32x64xf32>
    %cst_77 = arith.constant 0.327591091 : f32
    %278 = vector.broadcast %cst_77 : f32 to vector<32x64xf32>
    %279 = arith.mulf %278, %277 : vector<32x64xf32>
    %cst_78 = arith.constant 1.000000e+00 : f32
    %280 = vector.broadcast %cst_78 : f32 to vector<32x64xf32>
    %281 = arith.addf %280, %279 : vector<32x64xf32>
    %cst_79 = arith.constant 1.000000e+00 : f32
    %282 = vector.broadcast %cst_79 : f32 to vector<32x64xf32>
    %283 = arith.divf %282, %281 : vector<32x64xf32>
    %cst_80 = arith.constant 1.06140542 : f32
    %284 = vector.broadcast %cst_80 : f32 to vector<32x64xf32>
    %285 = arith.mulf %284, %283 : vector<32x64xf32>
    %cst_81 = arith.constant -1.45315206 : f32
    %286 = vector.broadcast %cst_81 : f32 to vector<32x64xf32>
    %287 = arith.addf %285, %286 : vector<32x64xf32>
    %288 = arith.mulf %287, %283 : vector<32x64xf32>
    %cst_82 = arith.constant 1.42141378 : f32
    %289 = vector.broadcast %cst_82 : f32 to vector<32x64xf32>
    %290 = arith.addf %288, %289 : vector<32x64xf32>
    %291 = arith.mulf %290, %283 : vector<32x64xf32>
    %cst_83 = arith.constant -0.284496725 : f32
    %292 = vector.broadcast %cst_83 : f32 to vector<32x64xf32>
    %293 = arith.addf %291, %292 : vector<32x64xf32>
    %294 = arith.mulf %293, %283 : vector<32x64xf32>
    %cst_84 = arith.constant 0.254829586 : f32
    %295 = vector.broadcast %cst_84 : f32 to vector<32x64xf32>
    %296 = arith.addf %294, %295 : vector<32x64xf32>
    %297 = arith.mulf %296, %283 : vector<32x64xf32>
    %cst_85 = arith.constant 0.000000e+00 : f32
    %298 = vector.broadcast %cst_85 : f32 to vector<32x64xf32>
    %299 = arith.subf %298, %277 : vector<32x64xf32>
    %300 = arith.mulf %299, %277 : vector<32x64xf32>
    %301 = math.exp %300 : vector<32x64xf32>
    %302 = arith.mulf %297, %301 : vector<32x64xf32>
    %cst_86 = arith.constant 1.000000e+00 : f32
    %303 = vector.broadcast %cst_86 : f32 to vector<32x64xf32>
    %304 = arith.subf %303, %302 : vector<32x64xf32>
    %cst_87 = arith.constant 0.000000e+00 : f32
    %305 = vector.broadcast %cst_87 : f32 to vector<32x64xf32>
    %306 = arith.cmpf olt, %276, %305 : vector<32x64xf32>
    %cst_88 = arith.constant 0.000000e+00 : f32
    %307 = vector.broadcast %cst_88 : f32 to vector<32x64xf32>
    %308 = arith.subf %307, %304 : vector<32x64xf32>
    %309 = arith.select %306, %308, %304 : vector<32x64xi1>, vector<32x64xf32>
    %cst_89 = arith.constant 1.000000e+00 : f32
    %310 = vector.broadcast %cst_89 : f32 to vector<32x64xf32>
    %311 = arith.addf %310, %309 : vector<32x64xf32>
    %312 = arith.mulf %274, %311 : vector<32x64xf32>
    %c0_90 = arith.constant 0 : index
    %c0_91 = arith.constant 0 : index
    %313 = vector.load %arg14[%c0_90, %c0_91] : memref<1x64xf32, #tpu.memory_space<vmem>>, vector<1x64xf32>
    %c0_92 = arith.constant 0 : index
    %c0_93 = arith.constant 0 : index
    %314 = vector.load %arg15[%c0_92, %c0_93] : memref<1x64xf32, #tpu.memory_space<vmem>>, vector<1x64xf32>
    %cst_94 = arith.constant dense<0.000000e+00> : vector<32xf32>
    %315 = vector.multi_reduction <add>, %312, %cst_94 [1] : vector<32x64xf32> to vector<32xf32>
    %316 = vector.shape_cast %315 : vector<32xf32> to vector<32x1xf32>
    %cst_95 = arith.constant 6.400000e+01 : f32
    %317 = vector.broadcast %cst_95 : f32 to vector<32x1xf32>
    %318 = arith.divf %316, %317 : vector<32x1xf32>
    %319 = vector.broadcast %318 : vector<32x1xf32> to vector<32x64xf32>
    %320 = arith.subf %312, %319 : vector<32x64xf32>
    %321 = arith.mulf %320, %320 : vector<32x64xf32>
    %cst_96 = arith.constant dense<0.000000e+00> : vector<32xf32>
    %322 = vector.multi_reduction <add>, %321, %cst_96 [1] : vector<32x64xf32> to vector<32xf32>
    %323 = vector.shape_cast %322 : vector<32xf32> to vector<32x1xf32>
    %cst_97 = arith.constant 6.400000e+01 : f32
    %324 = vector.broadcast %cst_97 : f32 to vector<32x1xf32>
    %325 = arith.divf %323, %324 : vector<32x1xf32>
    %326 = vector.broadcast %318 : vector<32x1xf32> to vector<32x64xf32>
    %327 = arith.subf %312, %326 : vector<32x64xf32>
    %cst_98 = arith.constant 9.99999974E-6 : f32
    %328 = vector.broadcast %cst_98 : f32 to vector<32x1xf32>
    %329 = arith.addf %325, %328 : vector<32x1xf32>
    %330 = math.rsqrt %329 : vector<32x1xf32>
    %331 = vector.broadcast %330 : vector<32x1xf32> to vector<32x64xf32>
    %332 = arith.mulf %327, %331 : vector<32x64xf32>
    %333 = vector.broadcast %313 : vector<1x64xf32> to vector<32x64xf32>
    %334 = arith.mulf %332, %333 : vector<32x64xf32>
    %335 = vector.broadcast %314 : vector<1x64xf32> to vector<32x64xf32>
    %336 = arith.addf %334, %335 : vector<32x64xf32>
    %337 = arith.truncf %336 : vector<32x64xf32> to vector<32x64xbf16>
    %c0_99 = arith.constant 0 : index
    %c0_100 = arith.constant 0 : index
    %338 = vector.load %arg16[%c0_99, %c0_100] : memref<64x32xbf16, #tpu.memory_space<vmem>>, vector<64x32xbf16>
    %cst_101 = arith.constant dense<0.000000e+00> : vector<32x32xf32>
    %339 = tpu.matmul %337, %338, %cst_101 {dimension_numbers = #tpu.dot_dimension_numbers<[1], [0], [0], [1], [0, 0, 1, 1], [], []>} : vector<32x64xbf16>, vector<64x32xbf16>, vector<32x32xf32> -> vector<32x32xf32>
    %c0_102 = arith.constant 0 : index
    %c0_103 = arith.constant 0 : index
    %340 = vector.load %arg17[%c0_102, %c0_103] : memref<1x32xf32, #tpu.memory_space<vmem>>, vector<1x32xf32>
    %341 = vector.broadcast %340 : vector<1x32xf32> to vector<32x32xf32>
    %342 = arith.addf %339, %341 : vector<32x32xf32>
    %343 = arith.addf %266, %342 : vector<32x32xf32>
    %344 = vector.shape_cast %343 : vector<32x32xf32> to vector<2x16x32xf32>
    %c0_104 = arith.constant 0 : index
    %c0_105 = arith.constant 0 : index
    %c0_106 = arith.constant 0 : index
    %345 = vector.load %arg18[%c0_104, %c0_105, %c0_106] : memref<2x16x32xf32, #tpu.memory_space<vmem>>, vector<2x16x32xf32>
    tpu.vector_store %arg18[%c0_104, %c0_105, %c0_106], %344 {strides = array<i32>} : memref<2x16x32xf32, #tpu.memory_space<vmem>>, vector<2x16x32xf32>,
    return
  }
  func.func @transform_0(%arg0: i32) -> (i32, i32, i32) {
    %c0_i32 = arith.constant 0 : i32
    %c0_i32_0 = arith.constant 0 : i32
    %c0_i32_1 = arith.constant 0 : i32
    return %arg0, %c0_i32, %c0_i32_0 : i32, i32, i32
  }
  func.func @transform_1(%arg0: i32) -> (i32, i32) {
    %c0_i32 = arith.constant 0 : i32
    %c0_i32_0 = arith.constant 0 : i32
    %c0_i32_1 = arith.constant 0 : i32
    return %c0_i32, %c0_i32_0 : i32, i32
  }
  func.func @transform_2(%arg0: i32) -> (i32, i32) {
    %c0_i32 = arith.constant 0 : i32
    %c0_i32_0 = arith.constant 0 : i32
    %c0_i32_1 = arith.constant 0 : i32
    return %c0_i32, %c0_i32_0 : i32, i32
  }
  func.func @transform_3(%arg0: i32) -> (i32, i32) {
    %c0_i32 = arith.constant 0 : i32
    %c0_i32_0 = arith.constant 0 : i32
    %c0_i32_1 = arith.constant 0 : i32
    return %c0_i32, %c0_i32_0 : i32, i32
  }
  func.func @transform_4(%arg0: i32) -> (i32, i32) {
    %c0_i32 = arith.constant 0 : i32
    %c0_i32_0 = arith.constant 0 : i32
    %c0_i32_1 = arith.constant 0 : i32
    return %c0_i32, %c0_i32_0 : i32, i32
  }
  func.func @transform_5(%arg0: i32) -> (i32, i32) {
    %c0_i32 = arith.constant 0 : i32
    %c0_i32_0 = arith.constant 0 : i32
    %c0_i32_1 = arith.constant 0 : i32
    return %c0_i32, %c0_i32_0 : i32, i32
  }
  func.func @transform_6(%arg0: i32) -> (i32, i32) {
    %c0_i32 = arith.constant 0 : i32
    %c0_i32_0 = arith.constant 0 : i32
    %c0_i32_1 = arith.constant 0 : i32
    return %c0_i32, %c0_i32_0 : i32, i32
  }
  func.func @transform_7(%arg0: i32) -> (i32, i32) {
    %c0_i32 = arith.constant 0 : i32
    %c0_i32_0 = arith.constant 0 : i32
    %c0_i32_1 = arith.constant 0 : i32
    return %c0_i32, %c0_i32_0 : i32, i32
  }
  func.func @transform_8(%arg0: i32) -> (i32, i32) {
    %c0_i32 = arith.constant 0 : i32
    %c0_i32_0 = arith.constant 0 : i32
    %c0_i32_1 = arith.constant 0 : i32
    return %c0_i32, %c0_i32_0 : i32, i32
  }
  func.func @transform_9(%arg0: i32) -> (i32, i32) {
    %c0_i32 = arith.constant 0 : i32
    %c0_i32_0 = arith.constant 0 : i32
    %c0_i32_1 = arith.constant 0 : i32
    return %c0_i32, %c0_i32_0 : i32, i32
  }
  func.func @transform_10(%arg0: i32) -> (i32, i32) {
    %c0_i32 = arith.constant 0 : i32
    %c0_i32_0 = arith.constant 0 : i32
    %c0_i32_1 = arith.constant 0 : i32
    return %c0_i32, %c0_i32_0 : i32, i32
  }
  func.func @transform_11(%arg0: i32) -> (i32, i32) {
    %c0_i32 = arith.constant 0 : i32
    %c0_i32_0 = arith.constant 0 : i32
    %c0_i32_1 = arith.constant 0 : i32
    return %c0_i32, %c0_i32_0 : i32, i32
  }
  func.func @transform_12(%arg0: i32) -> (i32, i32) {
    %c0_i32 = arith.constant 0 : i32
    %c0_i32_0 = arith.constant 0 : i32
    %c0_i32_1 = arith.constant 0 : i32
    return %c0_i32, %c0_i32_0 : i32, i32
  }
  func.func @transform_13(%arg0: i32) -> (i32, i32) {
    %c0_i32 = arith.constant 0 : i32
    %c0_i32_0 = arith.constant 0 : i32
    %c0_i32_1 = arith.constant 0 : i32
    return %c0_i32, %c0_i32_0 : i32, i32
  }
  func.func @transform_14(%arg0: i32) -> (i32, i32) {
    %c0_i32 = arith.constant 0 : i32
    %c0_i32_0 = arith.constant 0 : i32
    %c0_i32_1 = arith.constant 0 : i32
    return %c0_i32, %c0_i32_0 : i32, i32
  }
  func.func @transform_15(%arg0: i32) -> (i32, i32) {
    %c0_i32 = arith.constant 0 : i32
    %c0_i32_0 = arith.constant 0 : i32
    %c0_i32_1 = arith.constant 0 : i32
    return %c0_i32, %c0_i32_0 : i32, i32
  }
  func.func @transform_16(%arg0: i32) -> (i32, i32) {
    %c0_i32 = arith.constant 0 : i32
    %c0_i32_0 = arith.constant 0 : i32
    %c0_i32_1 = arith.constant 0 : i32
    return %c0_i32, %c0_i32_0 : i32, i32
  }
  func.func @transform_17(%arg0: i32) -> (i32, i32, i32) {
    %c0_i32 = arith.constant 0 : i32
    %c0_i32_0 = arith.constant 0 : i32
    %c0_i32_1 = arith.constant 0 : i32
    return %arg0, %c0_i32, %c0_i32_0 : i32, i32, i32
  }
}

</mosaic_0001>

<bundles_post_ra>
// kernel: tpu_custom_call.1
= control target key start
LH: loop header
LB: loop body
LE: loop exit
PB: predicated region body
PF: predicated region fallthrough
CT: control target
= control target key end

     0   :  { %s5399_s0 = inlined_call_operand.hbm [shape: f32[4,16,32], index: 0, kind: input, shape index: {}]   ;;  %s5400_s1 = inlined_call_operand.hbm [shape: f32[1,32], index: 1, kind: input, shape index: {}]   ;;  %s5401_s2 = inlined_call_operand.vmem [shape: f32[1,32], index: 2, kind: input, shape index: {}]   ;;  %s5402_s3 = inlined_call_operand.vmem [shape: bf16[32,96], index: 3, kind: input, shape index: {}]   ;;  %s5403_s4 = inlined_call_operand.vmem [shape: f32[1,96], index: 4, kind: input, shape index: {}]   ;;  %s5404_s5 = inlined_call_operand.vmem [shape: bf16[32,32], index: 5, kind: input, shape index: {}]   ;;  %s5405_s6 = inlined_call_operand.vmem [shape: f32[1,32], index: 6, kind: input, shape index: {}]   ;;  %s5406_s7 = inlined_call_operand.vmem [shape: f32[1,32], index: 7, kind: input, shape index: {}]   ;;  %s5407_s8 = inlined_call_operand.vmem [shape: f32[1,32], index: 8, kind: input, shape index: {}]   ;;  %s5408_s9 = inlined_call_operand.vmem [shape: f32[1,32], index: 9, kind: input, shape index: {}]   ;;  %s5409_s10 = inlined_call_operand.vmem [shape: f32[1,32], index: 10, kind: input, shape index: {}]   ;;  %s5410_s11 = inlined_call_operand.vmem [shape: bf16[32,64], index: 11, kind: input, shape index: {}]   ;;  %s5411_s12 = inlined_call_operand.vmem [shape: f32[1,64], index: 12, kind: input, shape index: {}]   ;;  %s5412_s13 = inlined_call_operand.vmem [shape: f32[1,64], index: 13, kind: input, shape index: {}]   ;;  %s5413_s14 = inlined_call_operand.vmem [shape: f32[1,64], index: 14, kind: input, shape index: {}]   ;;  %s5414_s15 = inlined_call_operand.vmem [shape: bf16[64,32], index: 15, kind: input, shape index: {}]   ;;  %s5415_s16 = inlined_call_operand.vmem [shape: f32[1,32], index: 16, kind: input, shape index: {}]   ;;  %s5416_s17 = inlined_call_operand.hbm [shape: f32[4,16,32], index: 17, kind: output, shape index: {}]  }
   0x1   :  { %5440 = sst [smem:[#allocation29_spill]] %s5399_s0 }
   0x2   :  { %5441 = sst [smem:[#allocation30_spill]] %s5400_s1 }
   0x3   :  { %5442 = sst [smem:[#allocation31_spill]] %s5411_s12 }
   0x4   :  { %5443 = sst [smem:[#allocation32_spill]] %s5412_s13 }
   0x5   :  { %5444 = sst [smem:[#allocation33_spill]] %s5413_s14 }
   0x6   :  { %5445 = sst [smem:[#allocation34_spill]] %s5414_s15 }
   0x7   :  { %5446 = sst [smem:[#allocation35_spill]] %s5415_s16 }
   0x8   :  { %5447 = sst [smem:[#allocation36_spill]] %s5416_s17 }
   0x9   :  { %22 = vsyncpa [#allocation3], 0 }
   0xa   :  { %24 = vsyncpa [#allocation3 + $0x1], 0 }
   0xb   :  { %25 = vsyncpa [#allocation6], 0 }
   0xc   :  { %26 = vsyncpa [#allocation4], 0 }
   0xd   :  { %28 = vsyncpa [#allocation4 + $0x1], 0  ;;  %s3921_s24 = smov 0   ;;  %s3923_s25 = smov 0  }
   0xe   :  { %s3925_s26 = smov 0   ;;  %s3927_s27 = smov 0  }
   0xf LB: > { %5448 = sst [smem:[#allocation11_spill]] %s3781_s24  ;;  %s3942_s28 = sadd.s32 4294967295, %s3793_s27   ;;  %s3793_s27 = sphi %s3927_s27, %s5554_s27   ;;  %s3789_s26 = sphi %s3925_s26, %s5556_s26   ;;  %s3785_s25 = sphi %s3923_s25, %s5558_s25   ;;  %s3781_s24 = sphi %s3921_s24, %s5557_s24  }
  0x10   : > { %5449 = sst [smem:[#allocation12_spill]] %s3789_s26  ;;  %s3267_s29 = sadd.s32 4294967294, %s3793_s27  }
  0x11   : > { %5450 = sst [smem:[#allocation13_spill]] %s3793_s27  ;;  %s3946_s0 = sadd.s32 1, %s3793_s27  }
  0x12   : > { %5451 = sst [smem:[#allocation14_spill]] %s3946_s0  ;;  %s41_s30 = sadd.s32 1, %s3789_s26 }
  0x13   : > { %s38_s18 = ssub.s32 %s3793_s27, %s3946_s0  ;;  %p48_p0 = scmp.ne.s32.totalorder %s3789_s26, %s3785_s25 }
  0x14   : > { %p39_p1 = scmp.eq.s32.totalorder %s38_s18, 0  ;;  %p49_p2 = scmp.eq.s32.totalorder %s3793_s27, 0 }
  0x15   : > { %p54_p3 = scmp.ne.s32.totalorder %s3785_s25, %s3781_s24  ;;  %p55_p4 = scmp.eq.s32.totalorder %s3942_s28, 0 }
  0x16   : > { %s3958_s19 = scalar_select %p39_p1, %s3789_s26, %s41_s30  }
  0x17   : > { %p3960_p5 = por %p49_p2, %p48_p0  ;;  %p3966_p6 = por %p55_p4, %p54_p3 }
  0x18   : > { %5452 = sst [smem:[#allocation15_spill]] %s3958_s19  ;;  %p414_p7 = scmp.eq.s32.totalorder %s3942_s28, 1 }
  0x19   : > { %p420_p8 = scmp.eq.s32.totalorder %s3267_s29, 1  ;;  %p3268_p9 = scmp.ge.s32.totalorder %s3793_s27, 1 }
  0x1a   : > { %p427_p10 = scmp.lt.s32.totalorder %s3793_s27, 3  ;;  %p3973_p11 = por %p414_p7, %p48_p0 }
  0x1b   : > { %p3977_p12 = por %p420_p8, %p54_p3  ;;  %s5460_s19 = sld [smem:[#allocation30_spill]] }
  0x1c   : > { %s5455_s21 = scalar_select %p3973_p11, 1, 0 }
  0x1d   : > { %s5457_s22 = scalar_select %p3977_p12, 1, 0 }
  0x1e   : > { %5456 = sst [smem:[#allocation16_spill]] %s5455_s21  ;;  %p3981_p13 = pnand %p3268_p9, %p427_p10 }
  0x1f   : > { %5458 = sst [smem:[#allocation17_spill]] %s5457_s22  ;;  %s3795_s0 = smov [#allocation5]  }
  0x20   : > { %p3387_p1 = pneg %p3981_p13  ;;  %s441_s24 = sshll.u32 %s3795_s0, 4  ;;  %s442_s24 = int_to_ptr.vmem [resolvable:$true] %s441_s24 }
  0x21   : > { %s439_s29 = sshll.u32 %s5460_s19, 4  ;;  %p3400_p3 = scmp.lt.s32.totalorder %s3793_s27, 2  ;;  %s440_s29 = int_to_ptr.hbm [resolvable:$true] %s439_s29 }
  0x22   : > { %p3388_p2 = pnand %p3387_p1, %p55_p4  ;;  %s497_s22 = sand.u32 1, %s3789_s26  }
  0x23   : > { %p3997_p7 = pnand %p3400_p3, %p3960_p5  ;;  %s3271_s30 = sshll.u32 %s497_s22, 5 }
  0x24   : > { %3390 = dma.hbm_to_vmem [thread:$0]  (!%p3388_p2), %s440_s29, 16, %s442_s24, [#allocation6]  }
  0x25   : > { %s3366_s19 = sshll.u32 %s3793_s27, 5  ;;  %s5462_s16 = sld [smem:[#allocation29_spill]] }
  0x26   : > { %s501_s13 = scalar_lea.vmem [#allocation2], %s3271_s30  ;;  %s498_s12 = scalar_lea.sflag [#allocation3], %s497_s22 }
  0x27   : > { %s510_s15 = sshll.u32 %s501_s13, 4  ;;  %p3697_p8 = pneg %p3997_p7  ;;  %s511_s15 = int_to_ptr.vmem [resolvable:$true] %s510_s15 }
  0x2b   : > { %s507_s14 = scalar_lea.hbm %s5462_s16, %s3366_s19  ;;  %s3700_s27 = scalar_lea.hbm %s5462_s16, 64 }
  0x2c   : > { %s508_s0 = sshll.u32 %s507_s14, 4  ;;  %s509_s0 = int_to_ptr.hbm [resolvable:$true] %s508_s0 }
  0x2d   : > { %s3693_s26 = sshra.s32 %s509_s0, 4  ;;  %s3694_s26 = int_to_ptr.hbm [resolvable:$true] %s3693_s26 }
  0x2e   : > { %s3695_s24 = scalar_lea.hbm %s3694_s26, 32  ;;  %p3701_p1 = scmp.lt.s32.totalorder %s3694_s26, %s5462_s16 }
  0x2f   : > { %p3696_p5 = scmp.ne.s32.totalorder %s3694_s26, %s3695_s24  ;;  %p3702_p2 = scmp.lt.s32.totalorder %s3700_s27, %s3695_s24 }
  0x31   : > { %p3698_p9 = pnand %p3697_p8, %p3696_p5  ;;  %p3703_p3 = por %p3702_p2, %p3701_p1 }
  0x33   : > { %p3699_p10 = pneg %p3698_p9 }
  0x35   : > { %p3704_p0 = pnand %p3703_p3, %p3699_p10 }
  0x37   : > { %3707 = shalt.err (!%p3704_p0)
}
  0x38   : > { %s3796_s13 = smov 128   ;;  %s3797_s14 = smov 8  }
  0x39   : > { %3394 = dma.hbm_to_vmem [thread:$0]  (!%p3997_p7), %s509_s0, 512, %s511_s15, %s498_s12, %s3796_s13, %s3796_s13, %s3797_s14  }
  0x3a   : > { %522 = sbr.rel (%p3981_p13) target bundleno = 2735 (0xaaf), region = 88 }
  0x3f   : > { %s4018_s22 = sand.u32 1, %s3785_s25  }
  0x40   : > { %s3276_s26 = sshll.u32 %s4018_s22, 5  ;;  %s525_s27 = scalar_lea.sflag [#allocation3], %s4018_s22 }
  0x41   : > { %s528_s30 = scalar_lea.vmem [#allocation2], %s3276_s26 }
  0x42   : > { %3768 = dma.done.wait (%p3966_p6), %s525_s27, 512  }
  0x43   : > { %3770 = vsyncadd (%p3966_p6), %s525_s27, 4294966784 }
  0x44   : > { %3772 = dma.done.wait (%p55_p4), [#allocation6], 16  }
  0x45   : > { %3774 = vsyncadd (%p55_p4), [#allocation6], 4294967280  ;;  %vm594_vm0 = vcmask 261120   ;;  %v590_v0 = vld [vmem:[%s528_s30 + $0x10] sm:$0xff]  ;;  %v588_v1 = vld [vmem:[%s528_s30] sm:$0xff]  ;;  %v3798_v8 = vmov 32.0  }
  0x46   : > { %v601_v2 = vsel %vm594_vm0, %v590_v0, 0.0  ;;  %v595_v3 = vsel %vm594_vm0, %v588_v1, 0.0  ;;  %v591_v4 = vld [vmem:[%s528_s30 + $0x18] sm:$0xff]  ;;  %v589_v5 = vld [vmem:[%s528_s30 + $0x8] sm:$0xff]  ;;  %3483 = vrcp.f32 %v3798_v8  ;;  %v3367_v39 = vld [vmem:[%s5402_s3] sm:$0xff]  ;;  %s3799_s1 = smov 92  }
  0x47   : > { %602 = vadd.xlane.f32.xlu1 %v601_v2  ;;  %596 = vadd.xlane.f32.xlu0 %v595_v3  ;;  %v604_v6 = vsel %vm594_vm0, %v591_v4, 0.0  ;;  %v598_v7 = vsel %vm594_vm0, %v589_v5, 0.0  ;;  %v3368_v35 = vld [vmem:[%s5402_s3 + $0x8] sm:$0xff]  ;;  %s3800_s29 = smov 96   ;;  %s3801_s21 = smov 84   ;;  %vm762_vm14 = vcmask 31744  }
  0x48   : > { %738 = vmatpush.bf16.msra.mxu0 %v3368_v35  ;;  %s3802_s19 = smov 120   ;;  %s3803_s13 = smov 124   ;;  %vm810_vm15 = vcmask 130048  }
  0x49   : > { %s3804_s14 = smov 112   ;;  %s3805_s27 = smov 80  }
  0x4a   : > { %s3806_s30 = smov 72   ;;  %s3807_s12 = smov 108  }
  0x4b   : > { %s3808_s15 = smov 88   ;;  %s3809_s17 = smov 116  }
  0x4c   : > { %v3484_v9 = vpop.eup %3483  ;;  %739 = vmatpush.bf16.msra.mxu0 %v3367_v39  ;;  %s3810_s20 = smov 100   ;;  %s3811_s23 = smov 68  }
  0x4d   : > { %v608_v10 = vmul.f32 32.0, %v3484_v9  ;;  %vm612_vm1 = vweird.f32 %v3484_v9  ;;  %s3812_s18 = smov 76   ;;  %s3813_s0 = smov 52  }
  0x4e   : > { %s3814_s24 = smov 64  }
  0x4f   : > { %605 = vadd.xlane.f32.xlu1 %v604_v6  ;;  %599 = vadd.xlane.f32.xlu0 %v598_v7  ;;  %v609_v11 = vsub.f32 1.0, %v608_v10 }
  0x51   : > { %v610_v12 = vmul.f32 %v3484_v9, %v609_v11 }
  0x53   : > { %v611_v13 = vadd.f32 %v3484_v9, %v610_v12  ;;  %v3472_v12 = vld [vmem:[%s5401_s2] ss:$0 sm:$0xff] }
  0x55   : > { %v4036_v14 = vsel %vm612_vm1, %v3484_v9, %v611_v13 }
  0x56   : > { %5463 = vst [vmem:[#allocation18_spill] sm:$0xff] %v4036_v14 }
  0xba   : > { %v603_v15 = vpop.xlane.xlu1 %602  ;;  %v597_v16 = vpop.xlane.xlu0 %596 }
  0xbb   : > { %v616_v17 = vmul.f32 %v4036_v14, %v603_v15  ;;  %v614_v18 = vmul.f32 %v4036_v14, %v597_v16 }
  0xbd   : > { %v4040_v19 = vsub.f32 %v590_v0, %v616_v17  ;;  %v618_v20 = vsub.f32 %v588_v1, %v614_v18 }
  0xbf   : > { %v624_v21 = vmul.f32 %v4040_v19, %v4040_v19  ;;  %v622_v22 = vmul.f32 %v618_v20, %v618_v20 }
  0xc1   : > { %v632_v23 = vsel %vm594_vm0, %v624_v21, 0.0  ;;  %v626_v24 = vsel %vm594_vm0, %v622_v22, 0.0 }
  0xc2   : > { %v606_v25 = vpop.xlane.xlu1 %605  ;;  %633 = vadd.xlane.f32.xlu0 %v632_v23  ;;  %627 = vadd.xlane.f32.xlu2 %v626_v24  ;;  %v600_v26 = vpop.xlane.xlu0 %599 }
  0xc3   : > { %v617_v27 = vmul.f32 %v4036_v14, %v606_v25  ;;  %v615_v28 = vmul.f32 %v4036_v14, %v600_v26 }
  0xc5   : > { %v4048_v29 = vsub.f32 %v591_v4, %v617_v27  ;;  %v619_v30 = vsub.f32 %v589_v5, %v615_v28  ;;  %v3471_v5 = vld [vmem:[#allocation5] ss:$0 sm:$0xff] }
  0xc7   : > { %v625_v31 = vmul.f32 %v4048_v29, %v4048_v29  ;;  %v623_v32 = vmul.f32 %v619_v30, %v619_v30 }
  0xc9   : > { %v635_v33 = vsel %vm594_vm0, %v625_v31, 0.0  ;;  %v629_v34 = vsel %vm594_vm0, %v623_v32, 0.0 }
  0xca   : > { %636 = vadd.xlane.f32.xlu1 %v635_v33  ;;  %630 = vadd.xlane.f32.xlu2 %v629_v34  ;;  %v3473_v33 = vld [vmem:[%s5403_s4] ss:$0 sm:$0xff] }
 0x135   : > { %v628_v36 = vpop.xlane.xlu2 %627  ;;  %v634_v38 = vpop.xlane.xlu0 %633 }
 0x136   : > { %v638_v37 = vmul.f32 %v628_v36, %v4036_v14  ;;  %v640_v41 = vmul.f32 %v634_v38, %v4036_v14 }
 0x138   : > { %v642_v40 = vadd.f32 1e-05, %v638_v37  ;;  %v644_v42 = vadd.f32 1e-05, %v640_v41 }
 0x13a   : > { %3485 = vrsqrt.f32 %v642_v40  ;;  %vm652_vm3 = vweird.f32 %v642_v40  ;;  %vm672_vm10 = vweird.f32 %v644_v42 }
 0x13b   : > { %3487 = vrsqrt.f32 %v644_v42 }
 0x13d   : > { %v637_v43 = vpop.xlane.xlu1 %636  ;;  %v631_v44 = vpop.xlane.xlu2 %630 }
 0x13e   : > { %v641_v45 = vmul.f32 %v637_v43, %v4036_v14  ;;  %v639_v46 = vmul.f32 %v631_v44, %v4036_v14 }
 0x140   : > { %v3486_v47 = vpop.eup %3485  ;;  %v645_v48 = vadd.f32 1e-05, %v641_v45  ;;  %v643_v49 = vadd.f32 1e-05, %v639_v46 }
 0x141   : > { %v647_v50 = vmul.f32 %v3486_v47, %v642_v40  ;;  %v3488_v53 = vpop.eup %3487  ;;  %vm653_vm2 = vweird.f32 %v3486_v47 }
 0x142   : > { %3489 = vrsqrt.f32 %v645_v48  ;;  %v667_v59 = vmul.f32 %v3488_v53, %v644_v42  ;;  %vm654_vm4 = vmor %vm652_vm3, %vm653_vm2  ;;  %vm662_vm6 = vweird.f32 %v643_v49  ;;  %vm682_vm8 = vweird.f32 %v645_v48 }
 0x143   : > { %v648_v51 = vmul.f32 %v3486_v47, %v647_v50  ;;  %3491 = vrsqrt.f32 %v643_v49  ;;  %vm673_vm11 = vweird.f32 %v3488_v53 }
 0x144   : > { %v668_v0 = vmul.f32 %v3488_v53, %v667_v59  ;;  %vm674_vm13 = vmor %vm672_vm10, %vm673_vm11 }
 0x145   : > { %v649_v52 = vmul.f32 0.5, %v648_v51 }
 0x146   : > { %v669_v6 = vmul.f32 0.5, %v668_v0 }
 0x147   : > { %v650_v54 = vsub.f32 1.5, %v649_v52 }
 0x148   : > { %v3490_v55 = vpop.eup %3489  ;;  %v670_v13 = vsub.f32 1.5, %v669_v6 }
 0x149   : > { %v3492_v56 = vpop.eup %3491  ;;  %v677_v57 = vmul.f32 %v3490_v55, %v645_v48  ;;  %v651_v58 = vmul.f32 %v3486_v47, %v650_v54  ;;  %vm683_vm9 = vweird.f32 %v3490_v55 }
 0x14a   : > { %v657_v60 = vmul.f32 %v3492_v56, %v643_v49  ;;  %vm663_vm5 = vweird.f32 %v3492_v56  ;;  %vm684_vm12 = vmor %vm682_vm8, %vm683_vm9 }
 0x14b   : > { %v678_v61 = vmul.f32 %v3490_v55, %v677_v57  ;;  %v655_v63 = vsel %vm654_vm4, %v3486_v47, %v651_v58  ;;  %vm664_vm7 = vmor %vm662_vm6, %vm663_vm5 }
 0x14c   : > { %v658_v62 = vmul.f32 %v3492_v56, %v657_v60  ;;  %v686_v4 = vmul.f32 %v655_v63, %v618_v20  ;;  %v671_v20 = vmul.f32 %v3488_v53, %v670_v13 }
 0x14d   : > { %v679_v2 = vmul.f32 0.5, %v678_v61 }
 0x14e   : > { %v659_v1 = vmul.f32 0.5, %v658_v62  ;;  %v693_v11 = vmul.f32 %v3471_v5, %v686_v4  ;;  %v675_v23 = vsel %vm674_vm13, %v3488_v53, %v671_v20 }
 0x14f   : > { %v680_v8 = vsub.f32 1.5, %v679_v2  ;;  %v688_v25 = vmul.f32 %v675_v23, %v4040_v19 }
 0x150   : > { %v660_v3 = vsub.f32 1.5, %v659_v1  ;;  %v4067_v17 = vadd.f32 %v3472_v12, %v693_v11 }
 0x151   : > { %v681_v16 = vmul.f32 %v3490_v55, %v680_v8  ;;  %v695_v27 = vmul.f32 %v3471_v5, %v688_v25 }
 0x152   : > { %v661_v7 = vmul.f32 %v3492_v56, %v660_v3  ;;  %5464 = vst [vmem:[#allocation19_spill] sm:$0xff] %v4067_v17 }
 0x153   : > { %v685_v22 = vsel %vm684_vm12, %v3490_v55, %v681_v16 }
 0x154   : > { %v665_v9 = vsel %vm664_vm7, %v3492_v56, %v661_v7  ;;  %v689_v24 = vmul.f32 %v685_v22, %v4048_v29 }
 0x155   : > { %v687_v10 = vmul.f32 %v665_v9, %v619_v30  ;;  %v4078_v30 = vadd.f32 %v3472_v12, %v695_v27 }
 0x156   : > { %v696_v26 = vmul.f32 %v3471_v5, %v689_v24 }
 0x157   : > { %v694_v15 = vmul.f32 %v3471_v5, %v687_v10  ;;  %5467 = vst [vmem:[#allocation22_spill] sm:$0xff] %v4078_v30 }
 0x158   : > { %v4076_v28 = vadd.f32 %v3472_v12, %v696_v26 }
 0x159   : > { %v4069_v18 = vadd.f32 %v3472_v12, %v694_v15 }
 0x15a   : > { %5466 = vst [vmem:[#allocation21_spill] sm:$0xff] %v4076_v28  ;;  %v705_v31 = vpack.c.bf16 %v4076_v28, %v4078_v30 }
 0x15b   : > { %5465 = vst [vmem:[#allocation20_spill] sm:$0xff] %v4069_v18  ;;  %v704_v21 = vpack.c.bf16 %v4069_v18, %v4067_v17 }
 0x15d   : > { %3287 = vmatmul.msk.bf16.vlgmr.msra.gmra.mxu0 %vm594_vm0, %v704_v21 }
 0x16d   : > { %3288 = vmatmul.msk.bf16.gmra.mxu0 %vm594_vm0, %v705_v31 }
 0x1da   : > { %v741_v32 = vpop.f32.mrf.mxu0 }
 0x1db   : > { %v742_v34 = vadd.f32 %v3473_v33, %v741_v32 }
 0x1dd   : > { %v751_v35 = vpack.c.bf16 %v742_v34, %v742_v34 }
 0x1df   : > { %v757_v37 = vunpack.c.l.b16 %v751_v35 }
 0x1e2   : > { %v743_v29 = vpop.f32.mrf.mxu0 }
 0x1e3   : > { %v744_v19 = vadd.f32 %v3473_v33, %v743_v29 }
 0x1e5   : > { %v752_v36 = vpack.c.bf16 %v744_v19, %v744_v19 }
 0x1e7   : > { %v758_v38 = vunpack.c.l.b16 %v752_v36 }
 0x1e9   : > { %v4086_v39 = vpack.c.b16 %v758_v38, %v757_v37 }
 0x1ea   : > { %v746_v40 = vpop.f32.mrf.mxu0 }
 0x1eb   : > { %967 = vrot.lane.b32.xlu1 %v4086_v39, %s3799_s1  ;;  %760 = vrot.lane.b32.xlu0 %v4086_v39, %s3800_s29  ;;  %v747_v41 = vadd.f32 %v3473_v33, %v746_v40 }
 0x1ed   : > { %v753_v43 = vpack.c.bf16 %v747_v41, %v747_v41 }
 0x1ef   : > { %v785_v46 = vunpack.c.l.b16 %v753_v43 }
 0x1f2   : > { %v748_v42 = vpop.f32.mrf.mxu0 }
 0x1f3   : > { %v749_v44 = vadd.f32 %v3473_v33, %v748_v42  ;;  %1371 = vrot.lane.b32.xlu1 %v4086_v39, %s3801_s21  ;;  %1167 = vrot.lane.b32.xlu0 %v4086_v39, %s3802_s19 }
 0x1f5   : > { %v754_v45 = vpack.c.bf16 %v749_v44, %v749_v44 }
 0x1f7   : > { %v786_v47 = vunpack.c.l.b16 %v754_v45 }
 0x1f9   : > { %v4092_v48 = vpack.c.b16 %v786_v47, %v785_v46 }
 0x1fb   : > { %989 = vrot.lane.b32.xlu1 %v4092_v48, %s3803_s13  ;;  %991 = vrot.lane.b32.xlu0 %v4092_v48, %s3799_s1  ;;  %s3815_s1 = smov 104  }
 0x1fc   : > { %788 = vrot.lane.b32.xlu2 %v4092_v48, %s3800_s29  ;;  %s3816_s29 = smov 48  }
 0x203   : > { %1571 = vrot.lane.b32.xlu1 %v4086_v39, %s3804_s14  ;;  %1573 = vrot.lane.b32.xlu0 %v4086_v39, %s3805_s27 }
 0x204   : > { %965 = vrot.lane.b32.xlu2 %v4086_v39, %s3803_s13  ;;  %s3819_s13 = smov 44  }
 0x20b   : > { %1977 = vrot.lane.b32.xlu1 %v4086_v39, %s3806_s30  ;;  %1773 = vrot.lane.b32.xlu0 %v4086_v39, %s3807_s12 }
 0x20c   : > { %1169 = vrot.lane.b32.xlu2 %v4086_v39, %s3808_s15 }
 0x213   : > { %1395 = vrot.lane.b32.xlu1 %v4092_v48, %s3801_s21  ;;  %1191 = vrot.lane.b32.xlu0 %v4092_v48, %s3802_s19  ;;  %s3817_s21 = smov 60   ;;  %s3818_s19 = smov 56  }
 0x214   : > { %1369 = vrot.lane.b32.xlu2 %v4086_v39, %s3809_s17 }
 0x21b   : > { %2177 = vrot.lane.b32.xlu1 %v4086_v39, %s3810_s20  ;;  %2179 = vrot.lane.b32.xlu0 %v4086_v39, %s3811_s23 }
 0x21c   : > { %1775 = vrot.lane.b32.xlu2 %v4086_v39, %s3812_s18 }
 0x223   : > { %1522 = vrot.lane.b32.xlu1 %v4086_v39, %s3813_s0  ;;  %916 = vrot.lane.b32.xlu0 %v4086_v39, %s3814_s24 }
 0x224   : > { %1193 = vrot.lane.b32.xlu2 %v4092_v48, %s3808_s15  ;;  %s3824_s15 = smov 12  }
 0x22b   : > { %1595 = vrot.lane.b32.xlu1 %v4092_v48, %s3804_s14  ;;  %1597 = vrot.lane.b32.xlu0 %v4092_v48, %s3805_s27  ;;  %s3820_s14 = smov 40   ;;  %s3821_s27 = smov 36  }
 0x22c   : > { %1975 = vrot.lane.b32.xlu2 %v4086_v39, %s3815_s1 }
 0x233   : > { %2001 = vrot.lane.b32.xlu1 %v4092_v48, %s3806_s30  ;;  %1724 = vrot.lane.b32.xlu0 %v4086_v39, %s3816_s29  ;;  %s3822_s30 = smov 4  }
 0x234   : > { %1118 = vrot.lane.b32.xlu2 %v4086_v39, %s3817_s21 }
 0x23b   : > { %941 = vrot.lane.b32.xlu1 %v4092_v48, %s3814_s24  ;;  %1797 = vrot.lane.b32.xlu0 %v4092_v48, %s3807_s12  ;;  %s3823_s12 = smov 8  }
 0x23c   : > { %1393 = vrot.lane.b32.xlu2 %v4092_v48, %s3809_s17  ;;  %s3825_s17 = smov 16  }
 0x243   : > { %1547 = vrot.lane.b32.xlu1 %v4092_v48, %s3813_s0  ;;  %2203 = vrot.lane.b32.xlu0 %v4092_v48, %s3811_s23  ;;  %s3827_s23 = smov 24  }
 0x244   : > { %1320 = vrot.lane.b32.xlu2 %v4086_v39, %s3818_s19 }
 0x24b   : > { %1143 = vrot.lane.b32.xlu0 %v4092_v48, %s3817_s21 }
 0x24c   : > { %1926 = vrot.lane.b32.xlu2 %v4086_v39, %s3819_s13 }
 0x254   : > { %1799 = vrot.lane.b32.xlu2 %v4092_v48, %s3812_s18  ;;  %s3828_s18 = smov 28  }
 0x256   : > { %v789_v49 = vpop.permute.xlu2 %788 }
 0x257   : > { %v794_v50 = vsel %vm762_vm14, %v789_v49, 0 }
 0x258   : > { %803 = vmatpush.bf16.xpose.msra.mxu2 %v794_v50 }
 0x25c   : > { %1999 = vrot.lane.b32.xlu2 %v4092_v48, %s3815_s1 }
 0x25d   : > { %v968_v51 = vpop.permute.xlu1 %967  ;;  %v761_v52 = vpop.permute.xlu0 %760 }
 0x25e   : > { %v966_v53 = vpop.permute.xlu2 %965  ;;  %v767_v54 = vsel %vm762_vm14, %v761_v52, 0  ;;  %v973_v55 = vsel %vm762_vm14, %v968_v51, 0 }
 0x25f   : > { %3290 = vmatmul.msk.bf16.vlgmr.msra.gmra.mxu2 %vm762_vm14, %v4092_v48  ;;  %776 = vmatpush.bf16.xpose.msra.mxu1 %v767_v54 }
 0x264   : > { %2201 = vrot.lane.b32.xlu2 %v4092_v48, %s3810_s20  ;;  %s3826_s20 = smov 20  }
 0x265   : > { %v1372_v56 = vpop.permute.xlu1 %1371  ;;  %v1168_v57 = vpop.permute.xlu0 %1167 }
 0x266   : > { %v1170_v58 = vpop.permute.xlu2 %1169  ;;  %3289 = vmatmul.msk.bf16.vlgmr.msra.gmra.mxu1 %vm762_vm14, %v4086_v39  ;;  %v1377_v2 = vsel %vm762_vm14, %v1372_v56, 0 }
 0x267   : > { %982 = vmatpush.bf16.xpose.msrb.mxu1 %v973_v55  ;;  %v1175_v59 = vsel %vm762_vm14, %v1170_v58, 0 }
 0x26c   : > { %1345 = vrot.lane.b32.xlu2 %v4092_v48, %s3818_s19  ;;  %s5541_s19 = sld [smem:[#allocation31_spill]] }
 0x26d   : > { %v990_v60 = vpop.permute.xlu1 %989  ;;  %v992_v61 = vpop.permute.xlu0 %991 }
 0x26e   : > { %v1370_v62 = vpop.permute.xlu2 %1369  ;;  %v997_v63 = vsel %vm762_vm14, %v992_v61, 0 }
 0x26f   : > { %1184 = vmatpush.bf16.xpose.msra.mxu1 %v1175_v59  ;;  %1006 = vmatpush.bf16.xpose.msrb.mxu2 %v997_v63 }
 0x275   : > { %v1572_v0 = vpop.permute.xlu1 %1571  ;;  %v1574_v1 = vpop.permute.xlu0 %1573 }
 0x276   : > { %v1776_v3 = vpop.permute.xlu2 %1775  ;;  %3293 = vmatmul.msk.bf16.vlgmr.msrb.gmra.mxu1 %vm762_vm14, %v966_v53  ;;  %3294 = vmatmul.msk.bf16.vlgmr.msrb.gmra.mxu2 %vm762_vm14, %v990_v60  ;;  %v1579_v10 = vsel %vm762_vm14, %v1574_v1, 0 }
 0x277   : > { %1386 = vmatpush.bf16.xpose.msrb.mxu1 %v1377_v2  ;;  %v1781_v22 = vsel %vm762_vm14, %v1776_v3, 0 }
 0x27d   : > { %v1978_v4 = vpop.permute.xlu1 %1977  ;;  %v1774_v5 = vpop.permute.xlu0 %1773 }
 0x27e   : > { %v1194_v6 = vpop.permute.xlu2 %1193  ;;  %v1983_v33 = vsel %vm762_vm14, %v1978_v4, 0 }
 0x27f   : > { %v1199_v7 = vsel %vm762_vm14, %v1194_v6, 0 }
 0x280   : > { %1208 = vmatpush.bf16.xpose.msra.mxu2 %v1199_v7 }
 0x285   : > { %v1396_v8 = vpop.permute.xlu1 %1395  ;;  %v1192_v9 = vpop.permute.xlu0 %1191 }
 0x286   : > { %v1401_v11 = vsel %vm762_vm14, %v1396_v8, 0  ;;  %v1976_v12 = vpop.permute.xlu2 %1975  ;;  %3297 = vmatmul.msk.bf16.vlgmr.msra.gmra.mxu1 %vm762_vm14, %v1168_v57 }
 0x287   : > { %3298 = vmatmul.msk.bf16.vlgmr.msra.gmra.mxu2 %vm762_vm14, %v1192_v9  ;;  %1588 = vmatpush.bf16.xpose.msra.mxu1 %v1579_v10 }
 0x288   : > { %1410 = vmatpush.bf16.xpose.msrb.mxu2 %v1401_v11 }
 0x28d   : > { %v2178_v13 = vpop.permute.xlu1 %2177  ;;  %v2180_v15 = vpop.permute.xlu0 %2179 }
 0x28e   : > { %v1119_v16 = vpop.permute.xlu2 %1118  ;;  %v2185_v40 = vsel %vm762_vm14, %v2180_v15, 0 }
 0x295   : > { %v4151_v20 = vpop.permute.xlu1 %1522  ;;  %v917_v21 = vpop.permute.xlu0 %916 }
 0x296   : > { %v1394_v23 = vpop.permute.xlu2 %1393  ;;  %929 = vmatpush.bf16.msrb.mxu0 %v917_v21  ;;  %3301 = vmatmul.msk.bf16.vlgmr.msrb.gmra.mxu1 %vm762_vm14, %v1370_v62 }
 0x297   : > { %3302 = vmatmul.msk.bf16.vlgmr.msrb.gmra.mxu2 %vm762_vm14, %v1394_v23  ;;  %1790 = vmatpush.bf16.xpose.msrb.mxu1 %v1781_v22 }
 0x29d   : > { %v1596_v24 = vpop.permute.xlu1 %1595  ;;  %v1598_v25 = vpop.permute.xlu0 %1597 }
 0x29e   : > { %v4156_v26 = vpop.permute.xlu2 %1320  ;;  %v1603_v27 = vsel %vm762_vm14, %v1598_v25, 0 }
 0x29f   : > { %1612 = vmatpush.bf16.xpose.msra.mxu2 %v1603_v27 }
 0x2a5   : > { %v2002_v31 = vpop.permute.xlu1 %2001  ;;  %v4159_v32 = vpop.permute.xlu0 %1724 }
 0x2a6   : > { %v4162_v34 = vpop.permute.xlu2 %1926  ;;  %3305 = vmatmul.msk.bf16.vlgmr.msra.gmra.mxu1 %vm762_vm14, %v1572_v0  ;;  %v2007_v37 = vsel %vm762_vm14, %v2002_v31, 0 }
 0x2a7   : > { %3306 = vmatmul.msk.bf16.vlgmr.msra.gmra.mxu2 %vm762_vm14, %v1596_v24  ;;  %1992 = vmatpush.bf16.xpose.msra.mxu1 %v1983_v33 }
 0x2ad   : > { %v942_v29 = vpop.permute.xlu1 %941  ;;  %v1798_v35 = vpop.permute.xlu0 %1797 }
 0x2ae   : > { %v1800_v19 = vpop.permute.xlu2 %1799  ;;  %954 = vmatpush.bf16.msra.mxu3 %v942_v29 }
 0x2af   : > { %v1805_v36 = vsel %vm762_vm14, %v1800_v19, 0 }
 0x2b0   : > { %1814 = vmatpush.bf16.xpose.msrb.mxu2 %v1805_v36 }
 0x2b2   : > { %1131 = vmatpush.bf16.msrb.mxu3 %v1119_v16 }
 0x2b5   : > { %v2204_v38 = vpop.permute.xlu0 %2203 }
 0x2b6   : > { %v2209_v41 = vsel %vm762_vm14, %v2204_v38, 0  ;;  %3309 = vmatmul.msk.bf16.vlgmr.msrb.gmra.mxu1 %vm762_vm14, %v1774_v5  ;;  %v2000_v43 = vpop.permute.xlu2 %1999 }
 0x2b7   : > { %3310 = vmatmul.msk.bf16.vlgmr.msrb.gmra.mxu2 %vm762_vm14, %v1798_v35  ;;  %2194 = vmatpush.bf16.xpose.msrb.mxu1 %v2185_v40 }
 0x2b8   : > { %2016 = vmatpush.bf16.xpose.msra.mxu2 %v2007_v37 }
 0x2bd   : > { %v1144_v42 = vpop.permute.xlu0 %1143 }
 0x2be   : > { %1156 = vmatpush.bf16.msra.mxu0 %v1144_v42  ;;  %v2202_v44 = vpop.permute.xlu2 %2201 }
 0x2c0   : > { %2218 = vmatpush.bf16.xpose.msrb.mxu2 %v2209_v41 }
 0x2c6   : > { %3313 = vmatmul.msk.bf16.vlgmr.msra.gmra.mxu1 %vm762_vm14, %v1976_v12 }
 0x2c7   : > { %3314 = vmatmul.msk.bf16.vlgmr.msra.gmra.mxu2 %vm762_vm14, %v2000_v43 }
 0x2d6   : > { %3317 = vmatmul.msk.bf16.vlgmr.msrb.gmra.mxu1 %vm762_vm14, %v2178_v13 }
 0x2d7   : > { %3318 = vmatmul.msk.bf16.vlgmr.msrb.gmra.mxu2 %vm762_vm14, %v2202_v44 }
 0x2e2   : > { %v4176_v45 = vpop.f32.mrf.mxu2 }
 0x2e3   : > { %v817_v46 = vsel %vm810_vm15, %v4176_v45, -inf  ;;  %v4180_v47 = vpop.f32.mrf.mxu1 }
 0x2e4   : > { %818 = vmax.xlane.f32.xlu1 %v817_v46  ;;  %v811_v49 = vsel %vm810_vm15, %v4180_v47, -inf }
 0x2e5   : > { %812 = vmax.xlane.f32.xlu0 %v811_v49 }
 0x2ea   : > { %v4184_v50 = vpop.f32.mrf.mxu2 }
 0x2eb   : > { %v4186_v51 = vpop.f32.mrf.mxu1  ;;  %v820_v52 = vsel %vm810_vm15, %v4184_v50, -inf }
 0x2ec   : > { %v814_v53 = vsel %vm810_vm15, %v4186_v51, -inf }
 0x2ed   : > { %821 = vmax.xlane.f32.xlu0 %v820_v52  ;;  %815 = vmax.xlane.f32.xlu2 %v814_v53  ;;  %v4286_v52 = vpop.permute.xlu2 %1345 }
 0x2f3   : > { %v4192_v54 = vpop.f32.mrf.mxu1 }
 0x2f4   : > { %v1013_v55 = vsel %vm810_vm15, %v4192_v54, -inf }
 0x2f5   : > { %1014 = vmax.xlane.f32.xlu2 %v1013_v55 }
 0x2f9   : > { %v4196_v56 = vpop.f32.mrf.mxu2 }
 0x2fa   : > { %v1019_v59 = vsel %vm810_vm15, %v4196_v56, -inf }
 0x2fb   : > { %v4198_v57 = vpop.f32.mrf.mxu1 }
 0x2fc   : > { %v1016_v58 = vsel %vm810_vm15, %v4198_v57, -inf }
 0x2fd   : > { %1017 = vmax.xlane.f32.xlu1 %v1016_v58  ;;  %1020 = vmax.xlane.f32.xlu2 %v1019_v59 }
 0x301   : > { %v4204_v60 = vpop.f32.mrf.mxu2 }
 0x302   : > { %v1022_v3 = vsel %vm810_vm15, %v4204_v60, -inf }
 0x303   : > { %v4206_v61 = vpop.f32.mrf.mxu1 }
 0x304   : > { %v1215_v62 = vsel %vm810_vm15, %v4206_v61, -inf }
 0x305   : > { %1216 = vmax.xlane.f32.xlu1 %v1215_v62 }
 0x30a   : > { %v4210_v63 = vpop.f32.mrf.mxu2 }
 0x30b   : > { %v4212_v0 = vpop.f32.mrf.mxu1  ;;  %v1221_v1 = vsel %vm810_vm15, %v4210_v63, -inf }
 0x30c   : > { %1222 = vmax.xlane.f32.xlu2 %v1221_v1  ;;  %v1218_v2 = vsel %vm810_vm15, %v4212_v0, -inf  ;;  %v4293_v1 = vpop.permute.xlu1 %1547 }
 0x30d   : > { %1219 = vmax.xlane.f32.xlu0 %v1218_v2  ;;  %1023 = vmax.xlane.f32.xlu1 %v1022_v3 }
 0x312   : > { %v4220_v4 = vpop.f32.mrf.mxu2 }
 0x313   : > { %v4222_v5 = vpop.f32.mrf.mxu1  ;;  %v1224_v7 = vsel %vm810_vm15, %v4220_v4, -inf }
 0x314   : > { %v1417_v6 = vsel %vm810_vm15, %v4222_v5, -inf }
 0x315   : > { %1418 = vmax.xlane.f32.xlu0 %v1417_v6  ;;  %1225 = vmax.xlane.f32.xlu1 %v1224_v7 }
 0x31a   : > { %v4228_v8 = vpop.f32.mrf.mxu2 }
 0x31b   : > { %v4230_v9 = vpop.f32.mrf.mxu1  ;;  %v1423_v16 = vsel %vm810_vm15, %v4228_v8, -inf }
 0x31c   : > { %v1420_v10 = vsel %vm810_vm15, %v4230_v9, -inf }
 0x31d   : > { %1421 = vmax.xlane.f32.xlu2 %v1420_v10 }
 0x322   : > { %v4234_v11 = vpop.f32.mrf.mxu2 }
 0x323   : > { %v4236_v12 = vpop.f32.mrf.mxu1  ;;  %v1426_v13 = vsel %vm810_vm15, %v4234_v11, -inf }
 0x324   : > { %1427 = vmax.xlane.f32.xlu1 %v1426_v13  ;;  %v1619_v15 = vsel %vm810_vm15, %v4236_v12, -inf }
 0x325   : > { %1620 = vmax.xlane.f32.xlu0 %v1619_v15  ;;  %1424 = vmax.xlane.f32.xlu2 %v1423_v16 }
 0x32a   : > { %v4244_v21 = vpop.f32.mrf.mxu2 }
 0x32b   : > { %v4246_v22 = vpop.f32.mrf.mxu1  ;;  %v1625_v35 = vsel %vm810_vm15, %v4244_v21, -inf }
 0x32c   : > { %v1622_v23 = vsel %vm810_vm15, %v4246_v22, -inf }
 0x32d   : > { %1623 = vmax.xlane.f32.xlu2 %v1622_v23 }
 0x332   : > { %v4250_v24 = vpop.f32.mrf.mxu2 }
 0x333   : > { %v4252_v25 = vpop.f32.mrf.mxu1  ;;  %v1628_v40 = vsel %vm810_vm15, %v4250_v24, -inf }
 0x334   : > { %v1821_v27 = vsel %vm810_vm15, %v4252_v25, -inf }
 0x335   : > { %1822 = vmax.xlane.f32.xlu0 %v1821_v27 }
 0x33a   : > { %v4256_v31 = vpop.f32.mrf.mxu2 }
 0x33b   : > { %v4258_v33 = vpop.f32.mrf.mxu1  ;;  %v1827_v42 = vsel %vm810_vm15, %v4256_v31, -inf }
 0x33c   : > { %v1824_v29 = vsel %vm810_vm15, %v4258_v33, -inf }
 0x33d   : > { %1825 = vmax.xlane.f32.xlu2 %v1824_v29  ;;  %1626 = vmax.xlane.f32.xlu0 %v1625_v35 }
 0x342   : > { %v4264_v19 = vpop.f32.mrf.mxu2 }
 0x343   : > { %v4266_v36 = vpop.f32.mrf.mxu1  ;;  %v1830_v37 = vsel %vm810_vm15, %v4264_v19, -inf }
 0x344   : > { %1831 = vmax.xlane.f32.xlu1 %v1830_v37  ;;  %v2023_v38 = vsel %vm810_vm15, %v4266_v36, -inf }
 0x345   : > { %2024 = vmax.xlane.f32.xlu0 %v2023_v38  ;;  %1629 = vmax.xlane.f32.xlu2 %v1628_v40 }
 0x34a   : > { %v4278_v43 = vpop.f32.mrf.mxu2 }
 0x34b   : > { %v4274_v41 = vpop.f32.mrf.mxu1  ;;  %v2029_v59 = vsel %vm810_vm15, %v4278_v43, -inf }
 0x34c   : > { %v2026_v46 = vsel %vm810_vm15, %v4274_v41, -inf }
 0x34d   : > { %1828 = vmax.xlane.f32.xlu0 %v1827_v42 }
 0x352   : > { %v4291_v62 = vpop.f32.mrf.mxu2 }
 0x353   : > { %v4280_v44 = vpop.f32.mrf.mxu1  ;;  %v2032_v38 = vsel %vm810_vm15, %v4291_v62, -inf }
 0x354   : > { %v2225_v49 = vsel %vm810_vm15, %v4280_v44, -inf }
 0x355   : > { %2027 = vmax.xlane.f32.xlu0 %v2026_v46  ;;  %2226 = vmax.xlane.f32.xlu1 %v2225_v49 }
 0x357   : > { %v819_v16 = vpop.xlane.xlu1 %818 }
 0x358   : > { %v813_v53 = vpop.xlane.xlu0 %812 }
 0x359   : > { %v823_v55 = vsub.f32 %v4180_v47, %v813_v53 }
 0x35a   : > { %v4304_v15 = vpop.f32.mrf.mxu2 }
 0x35b   : > { %v827_v58 = vmul.f32 1.442695, %v823_v55  ;;  %v4295_v3 = vpop.f32.mrf.mxu1  ;;  %v2231_v40 = vsel %vm810_vm15, %v4304_v15, -inf }
 0x35c   : > { %v2228_v47 = vsel %vm810_vm15, %v4295_v3, -inf }
 0x35d   : > { %3493 = vpow2.f32 %v827_v58  ;;  %2030 = vmax.xlane.f32.xlu1 %v2029_v59 }
 0x360   : > { %v816_v2 = vpop.xlane.xlu2 %815 }
 0x361   : > { %v824_v6 = vsub.f32 %v4186_v51, %v816_v2  ;;  %v825_v51 = vsub.f32 %v4176_v45, %v819_v16 }
 0x362   : > { %v4316_v53 = vpop.f32.mrf.mxu2 }
 0x363   : > { %v4298_v7 = vpop.eup %3493  ;;  %v829_v10 = vmul.f32 1.442695, %v824_v6  ;;  %v831_v42 = vmul.f32 1.442695, %v825_v51 }
 0x364   : > { %v835_v13 = vsel %vm810_vm15, %v4298_v7, 0.0 }
 0x365   : > { %3495 = vpow2.f32 %v829_v10  ;;  %2229 = vmax.xlane.f32.xlu1 %v2228_v47  ;;  %836 = vadd.xlane.f32.xlu0 %v835_v13  ;;  %v2234_v10 = vsel %vm810_vm15, %v4316_v53, -inf }
 0x368   : > { %v1015_v23 = vpop.xlane.xlu2 %1014 }
 0x369   : > { %v1025_v27 = vsub.f32 %v4192_v54, %v1015_v23  ;;  %v822_v54 = vpop.xlane.xlu0 %821 }
 0x36a   : > { %v826_v55 = vsub.f32 %v4184_v50, %v822_v54 }
 0x36b   : > { %v4307_v29 = vpop.eup %3495  ;;  %v1029_v35 = vmul.f32 1.442695, %v1025_v27 }
 0x36c   : > { %v838_v37 = vsel %vm810_vm15, %v4307_v29, 0.0  ;;  %v833_v47 = vmul.f32 1.442695, %v826_v55 }
 0x36d   : > { %3497 = vpow2.f32 %v1029_v35  ;;  %839 = vadd.xlane.f32.xlu2 %v838_v37  ;;  %2033 = vmax.xlane.f32.xlu1 %v2032_v38 }
 0x36e   : > { %2232 = vmax.xlane.f32.xlu0 %v2231_v40  ;;  %3499 = vpow2.f32 %v831_v42 }
 0x370   : > { %v1018_v46 = vpop.xlane.xlu1 %1017  ;;  %v1021_v49 = vpop.xlane.xlu2 %1020 }
 0x371   : > { %v1026_v45 = vsub.f32 %v4198_v57, %v1018_v46  ;;  %v1027_v2 = vsub.f32 %v4196_v56, %v1021_v49 }
 0x373   : > { %v4320_v58 = vpop.eup %3497  ;;  %v1031_v59 = vmul.f32 1.442695, %v1026_v45  ;;  %v1033_v13 = vmul.f32 1.442695, %v1027_v2 }
 0x374   : > { %v1037_v6 = vsel %vm810_vm15, %v4320_v58, 0.0  ;;  %v4327_v16 = vpop.eup %3499 }
 0x375   : > { %3501 = vpow2.f32 %v1031_v59  ;;  %1038 = vadd.xlane.f32.xlu1 %v1037_v6  ;;  %2235 = vmax.xlane.f32.xlu2 %v2234_v10  ;;  %v841_v23 = vsel %vm810_vm15, %v4327_v16, 0.0 }
 0x376   : > { %3503 = vpow2.f32 %v833_v47 }
 0x377   : > { %3505 = vpow2.f32 %v1033_v13 }
 0x378   : > { %v1217_v57 = vpop.xlane.xlu1 %1216 }
 0x379   : > { %v1227_v56 = vsub.f32 %v4206_v61, %v1217_v57 }
 0x37b   : > { %v4329_v50 = vpop.eup %3501  ;;  %v1231_v51 = vmul.f32 1.442695, %v1227_v56 }
 0x37c   : > { %v1040_v27 = vsel %vm810_vm15, %v4329_v50, 0.0  ;;  %v4336_v37 = vpop.eup %3503 }
 0x37d   : > { %842 = vadd.xlane.f32.xlu1 %v841_v23  ;;  %1041 = vadd.xlane.f32.xlu0 %v1040_v27  ;;  %v4339_v54 = vpop.eup %3505  ;;  %3507 = vpow2.f32 %v1231_v51  ;;  %v844_v59 = vsel %vm810_vm15, %v4336_v37, 0.0 }
 0x37e   : > { %v1043_v55 = vsel %vm810_vm15, %v4339_v54, 0.0 }
 0x37f   : > { %v1223_v35 = vpop.xlane.xlu2 %1222 }
 0x380   : > { %v1229_v38 = vsub.f32 %v4210_v63, %v1223_v35  ;;  %v1024_v40 = vpop.xlane.xlu1 %1023  ;;  %v1220_v42 = vpop.xlane.xlu0 %1219 }
 0x381   : > { %v1228_v61 = vsub.f32 %v4212_v0, %v1220_v42  ;;  %v1028_v49 = vsub.f32 %v4204_v60, %v1024_v40 }
 0x382   : > { %v1235_v46 = vmul.f32 1.442695, %v1229_v38 }
 0x383   : > { %v1233_v45 = vmul.f32 1.442695, %v1228_v61  ;;  %v1035_v63 = vmul.f32 1.442695, %v1028_v49  ;;  %v4347_v6 = vpop.eup %3507 }
 0x384   : > { %3509 = vpow2.f32 %v1235_v46  ;;  %v1239_v57 = vsel %vm810_vm15, %v4347_v6, 0.0 }
 0x385   : > { %1044 = vadd.xlane.f32.xlu1 %v1043_v55  ;;  %845 = vadd.xlane.f32.xlu0 %v844_v59  ;;  %3511 = vpow2.f32 %v1233_v45 }
 0x386   : > { %3513 = vpow2.f32 %v1035_v63 }
 0x388   : > { %v1419_v2 = vpop.xlane.xlu0 %1418 }
 0x389   : > { %v1429_v0 = vsub.f32 %v4222_v5, %v1419_v2  ;;  %v1226_v5 = vpop.xlane.xlu1 %1225 }
 0x38a   : > { %v4350_v10 = vpop.eup %3509  ;;  %v1230_v35 = vsub.f32 %v4220_v4, %v1226_v5 }
 0x38b   : > { %v1433_v60 = vmul.f32 1.442695, %v1429_v0  ;;  %v4352_v47 = vpop.eup %3511  ;;  %v1245_v13 = vsel %vm810_vm15, %v4350_v10, 0.0 }
 0x38c   : > { %v1242_v56 = vsel %vm810_vm15, %v4352_v47, 0.0  ;;  %v4360_v27 = vpop.eup %3513  ;;  %v1237_v46 = vmul.f32 1.442695, %v1230_v35 }
 0x38d   : > { %1246 = vadd.xlane.f32.xlu1 %v1245_v13  ;;  %1240 = vadd.xlane.f32.xlu0 %v1239_v57  ;;  %3515 = vpow2.f32 %v1433_v60  ;;  %v1046_v42 = vsel %vm810_vm15, %v4360_v27, 0.0 }
 0x38e   : > { %1243 = vadd.xlane.f32.xlu2 %v1242_v56 }
 0x390   : > { %v1422_v23 = vpop.xlane.xlu2 %1421 }
 0x391   : > { %v1430_v51 = vsub.f32 %v4230_v9, %v1422_v23 }
 0x393   : > { %v1435_v38 = vmul.f32 1.442695, %v1430_v51  ;;  %v4364_v40 = vpop.eup %3515 }
 0x394   : > { %v1441_v61 = vsel %vm810_vm15, %v4364_v40, 0.0 }
 0x395   : > { %3517 = vpow2.f32 %v1435_v38  ;;  %1047 = vadd.xlane.f32.xlu0 %v1046_v42 }
 0x396   : > { %1442 = vadd.xlane.f32.xlu2 %v1441_v61  ;;  %3519 = vpow2.f32 %v1237_v46 }
 0x397   : > { %v1428_v0 = vpop.xlane.xlu1 %1427 }
 0x398   : > { %v1425_v49 = vpop.xlane.xlu2 %1424  ;;  %v1621_v45 = vpop.xlane.xlu0 %1620 }
 0x399   : > { %v1431_v55 = vsub.f32 %v4228_v8, %v1425_v49  ;;  %v1631_v59 = vsub.f32 %v4236_v12, %v1621_v45  ;;  %v1432_v8 = vsub.f32 %v4234_v11, %v1428_v0 }
 0x39b   : > { %v4371_v9 = vpop.eup %3517  ;;  %v1437_v4 = vmul.f32 1.442695, %v1431_v55  ;;  %v1635_v2 = vmul.f32 1.442695, %v1631_v59  ;;  %v1439_v51 = vmul.f32 1.442695, %v1432_v8 }
 0x39c   : > { %v1444_v63 = vsel %vm810_vm15, %v4371_v9, 0.0  ;;  %v4376_v13 = vpop.eup %3519 }
 0x39d   : > { %3521 = vpow2.f32 %v1437_v4  ;;  %1445 = vadd.xlane.f32.xlu1 %v1444_v63  ;;  %v1248_v12 = vsel %vm810_vm15, %v4376_v13, 0.0 }
 0x39e   : > { %3523 = vpow2.f32 %v1635_v2 }
 0x3a0   : > { %v1624_v60 = vpop.xlane.xlu2 %1623 }
 0x3a1   : > { %v1632_v57 = vsub.f32 %v4246_v22, %v1624_v60 }
 0x3a3   : > { %v4379_v56 = vpop.eup %3521  ;;  %v1637_v5 = vmul.f32 1.442695, %v1632_v57 }
 0x3a4   : > { %v1447_v23 = vsel %vm810_vm15, %v4379_v56, 0.0  ;;  %v4386_v38 = vpop.eup %3523 }
 0x3a5   : > { %3525 = vpow2.f32 %v1637_v5  ;;  %1249 = vadd.xlane.f32.xlu1 %v1248_v12  ;;  %1448 = vadd.xlane.f32.xlu0 %v1447_v23  ;;  %v1643_v61 = vsel %vm810_vm15, %v4386_v38, 0.0 }
 0x3a6   : > { %3527 = vpow2.f32 %v1439_v51 }
 0x3a8   : > { %v1823_v35 = vpop.xlane.xlu0 %1822 }
 0x3a9   : > { %v1833_v11 = vsub.f32 %v4252_v25, %v1823_v35 }
 0x3ab   : > { %v4388_v22 = vpop.eup %3525  ;;  %v1837_v46 = vmul.f32 1.442695, %v1833_v11 }
 0x3ac   : > { %v1646_v42 = vsel %vm810_vm15, %v4388_v22, 0.0  ;;  %v4395_v55 = vpop.eup %3527 }
 0x3ad   : > { %1647 = vadd.xlane.f32.xlu2 %v1646_v42  ;;  %1644 = vadd.xlane.f32.xlu1 %v1643_v61  ;;  %3529 = vpow2.f32 %v1837_v46  ;;  %v1450_v25 = vsel %vm810_vm15, %v4395_v55, 0.0 }
 0x3b0   : > { %v1826_v49 = vpop.xlane.xlu2 %1825  ;;  %v1627_v45 = vpop.xlane.xlu0 %1626 }
 0x3b1   : > { %v1633_v4 = vsub.f32 %v4244_v21, %v1627_v45  ;;  %v1834_v59 = vsub.f32 %v4258_v33, %v1826_v49 }
 0x3b3   : > { %v1639_v63 = vmul.f32 1.442695, %v1633_v4  ;;  %v1839_v2 = vmul.f32 1.442695, %v1834_v59  ;;  %v4402_v8 = vpop.eup %3529 }
 0x3b4   : > { %v1845_v23 = vsel %vm810_vm15, %v4402_v8, 0.0 }
 0x3b5   : > { %1451 = vadd.xlane.f32.xlu1 %v1450_v25  ;;  %3531 = vpow2.f32 %v1639_v63 }
 0x3b6   : > { %3533 = vpow2.f32 %v1839_v2 }
 0x3b7   : > { %v1832_v0 = vpop.xlane.xlu1 %1831 }
 0x3b8   : > { %v1836_v60 = vsub.f32 %v4264_v19, %v1832_v0  ;;  %v2025_v57 = vpop.xlane.xlu0 %2024  ;;  %v1630_v5 = vpop.xlane.xlu2 %1629 }
 0x3b9   : > { %v1634_v33 = vsub.f32 %v4250_v24, %v1630_v5 }
 0x3ba   : > { %v1843_v12 = vmul.f32 1.442695, %v1836_v60 }
 0x3bb   : > { %v4404_v21 = vpop.eup %3531  ;;  %v1641_v19 = vmul.f32 1.442695, %v1634_v33 }
 0x3bc   : > { %3535 = vpow2.f32 %v1843_v12  ;;  %v1649_v51 = vsel %vm810_vm15, %v4404_v21, 0.0  ;;  %v4411_v11 = vpop.eup %3533 }
 0x3bd   : > { %1846 = vadd.xlane.f32.xlu1 %v1845_v23  ;;  %1650 = vadd.xlane.f32.xlu0 %v1649_v51  ;;  %3537 = vpow2.f32 %v1641_v19  ;;  %v1848_v24 = vsel %vm810_vm15, %v4411_v11, 0.0  ;;  %v2035_v51 = vsub.f32 %v4266_v36, %v2025_v57 }
 0x3c0   : > { %v1829_v35 = vpop.xlane.xlu0 %1828 }
 0x3c2   : > { %v4413_v42 = vpop.eup %3535 }
 0x3c3   : > { %v1854_v61 = vsel %vm810_vm15, %v4413_v42, 0.0  ;;  %v4422_v4 = vpop.eup %3537 }
 0x3c4   : > { %v1652_v25 = vsel %vm810_vm15, %v4422_v4, 0.0 }
 0x3c5   : > { %1749 = vrot.lane.b32.xlu2 %v4092_v48, %s3816_s29  ;;  %1855 = vadd.xlane.f32.xlu1 %v1854_v61  ;;  %s5544_s29 = sld [smem:[#allocation32_spill]] }
 0x3c6   : > { %1849 = vadd.xlane.f32.xlu0 %v1848_v24  ;;  %v2039_v24 = vmul.f32 1.442695, %v2035_v51 }
 0x3c8   : > { %v2227_v46 = vpop.xlane.xlu1 %2226  ;;  %v2028_v49 = vpop.xlane.xlu0 %2027 }
 0x3c9   : > { %v2036_v45 = vsub.f32 %v4274_v41, %v2028_v49  ;;  %v2237_v63 = vsub.f32 %v4280_v44, %v2227_v46 }
 0x3cb   : > { %v2041_v59 = vmul.f32 1.442695, %v2036_v45  ;;  %v2241_v2 = vmul.f32 1.442695, %v2237_v63 }
 0x3cd   : > { %3539 = vpow2.f32 %v2041_v59 }
 0x3ce   : > { %1653 = vadd.xlane.f32.xlu0 %v1652_v25  ;;  %3541 = vpow2.f32 %v2241_v2  ;;  %v1835_v25 = vsub.f32 %v4256_v31, %v1829_v35 }
 0x3d0   : > { %v2031_v0 = vpop.xlane.xlu1 %2030 }
 0x3d1   : > { %v2037_v5 = vsub.f32 %v4278_v43, %v2031_v0 }
 0x3d3   : > { %v4427_v60 = vpop.eup %3539  ;;  %v2043_v12 = vmul.f32 1.442695, %v2037_v5  ;;  %v1841_v5 = vmul.f32 1.442695, %v1835_v25 }
 0x3d4   : > { %v2050_v41 = vsel %vm810_vm15, %v4427_v60, 0.0  ;;  %v4432_v44 = vpop.eup %3541 }
 0x3d5   : > { %5468 = vst [vmem:[#allocation23_spill] sm:$0xff] %v4432_v44  ;;  %v2249_v19 = vsel %vm810_vm15, %v4432_v44, 0.0 }
 0x3d6   : > { %2051 = vadd.xlane.f32.xlu0 %v2050_v41 }
 0x3d8   : > { %v2230_v33 = vpop.xlane.xlu1 %2229  ;;  %v837_v23 = vpop.xlane.xlu0 %836 }
 0x3d9   : > { %3543 = vrcp.f32 %v837_v23  ;;  %v858_v31 = vand.u32 2147483648, %v837_v23  ;;  %vm852_vm2 = vweird.f32 %v837_v23 }
 0x3da   : > { %3545 = vpow2.f32 %v2043_v12 }
 0x3de   : > { %2250 = vadd.xlane.f32.xlu0 %v2249_v19 }
 0x3df   : > { %v3544_v61 = vpop.eup %3543 }
 0x3e0   : > { %v848_v43 = vmul.f32 %v3544_v61, %v837_v23  ;;  %v840_v46 = vpop.xlane.xlu2 %839  ;;  %v2034_v49 = vpop.xlane.xlu1 %2033  ;;  %vm853_vm1 = vweird.f32 %v3544_v61 }
 0x3e1   : > { %3547 = vrcp.f32 %v840_v46  ;;  %v4437_v45 = vpop.eup %3545  ;;  %v2038_v63 = vsub.f32 %v4291_v62, %v2034_v49  ;;  %v4443_v12 = vpop.xlane.xlu0 %2232  ;;  %vm4452_vm3 = vmor %vm852_vm2, %vm853_vm1  ;;  %vm867_vm5 = vweird.f32 %v840_v46 }
 0x3e2   : > { %5469 = vst [vmem:[#allocation24_spill] sm:$0xff] %v4437_v45  ;;  %v849_v59 = vsub.f32 1.0, %v848_v43  ;;  %3549 = vpow2.f32 %v2039_v24  ;;  %v2053_v2 = vsel %vm810_vm15, %v4437_v45, 0.0  ;;  %v856_v24 = vand.u32 2147483647, %v837_v23 }
 0x3e3   : > { %v2045_v36 = vmul.f32 1.442695, %v2038_v63  ;;  %v873_v43 = vand.u32 2147483648, %v840_v46 }
 0x3e4   : > { %v850_v57 = vmul.f32 %v3544_v61, %v849_v59  ;;  %v2238_v59 = vsub.f32 %v4295_v3, %v2230_v33  ;;  %vm857_vm6 = vcmp.eq.f32.partialorder %v856_v24, 8.507059e+37 }
 0x3e5   : > { %3551 = vpow2.f32 %v2045_v36  ;;  %v871_v36 = vand.u32 2147483647, %v840_v46  ;;  %v874_v3 = vor.u32 1.1754944e-38, %v873_v43 }
 0x3e6   : > { %2054 = vadd.xlane.f32.xlu0 %v2053_v2  ;;  %v851_v19 = vadd.f32 %v3544_v61, %v850_v57  ;;  %3553 = vpow2.f32 %v1841_v5  ;;  %v859_v5 = vor.u32 1.1754944e-38, %v858_v31  ;;  %v2243_v33 = vmul.f32 1.442695, %v2238_v59 }
 0x3e7   : > { %v3548_v0 = vpop.eup %3547  ;;  %vm872_vm8 = vcmp.eq.f32.partialorder %v871_v36, 8.507059e+37 }
 0x3e8   : > { %v863_v41 = vmul.f32 %v3548_v0, %v840_v46  ;;  %v4445_v51 = vpop.xlane.xlu1 %1038  ;;  %v4447_v62 = vpop.eup %3549  ;;  %vm868_vm4 = vweird.f32 %v3548_v0  ;;  %v855_v57 = vsel %vm4452_vm3, %v3544_v61, %v851_v19  ;;  %3555 = vpow2.f32 %v2243_v33 }
 0x3e9   : > { %v2047_v23 = vsel %vm810_vm15, %v4447_v62, 0.0  ;;  %vm869_vm7 = vmor %vm867_vm5, %vm868_vm4  ;;  %3557 = vrcp.f32 %v4445_v51  ;;  %vm1054_vm11 = vweird.f32 %v4445_v51 }
 0x3ea   : > { %v864_v35 = vsub.f32 1.0, %v863_v41 }
 0x3eb   : > { %v4449_v49 = vpop.eup %3551 }
 0x3ec   : > { %5470 = vst [vmem:[#allocation25_spill] sm:$0xff] %v4449_v49  ;;  %v865_v25 = vmul.f32 %v3548_v0, %v864_v35  ;;  %v2056_v2 = vsel %vm810_vm15, %v4449_v49, 0.0  ;;  %v860_v35 = vsel %vm857_vm6, %v859_v5, %v855_v57  ;;  %v4464_v61 = vpop.eup %3553 }
 0x3ed   : > { %2057 = vadd.xlane.f32.xlu1 %v2056_v2  ;;  %5473 = vst [vmem:[#allocation26_spill] sm:$0xff] %v4464_v61  ;;  %v861_v31 = vmul.f32 %v4298_v7, %v860_v35  ;;  %v1851_v24 = vsel %vm810_vm15, %v4464_v61, 0.0  ;;  %v2239_v2 = vsub.f32 %v4304_v15, %v4443_v12 }
 0x3ee   : > { %v866_v41 = vadd.f32 %v3548_v0, %v865_v25  ;;  %2048 = vadd.xlane.f32.xlu2 %v2047_v23  ;;  %v4476_v25 = vpop.eup %3555 }
 0x3ef   : > { %5474 = vst [vmem:[#allocation27_spill] sm:$0xff] %v4476_v25  ;;  %v4480_v7 = vpop.eup %3557  ;;  %v2252_v5 = vsel %vm810_vm15, %v4476_v25, 0.0  ;;  %v2245_v12 = vmul.f32 1.442695, %v2239_v2  ;;  %v1058_v2 = vand.u32 2147483647, %v4445_v51 }
 0x3f0   : > { %v870_v28 = vsel %vm869_vm7, %v3548_v0, %v866_v41  ;;  %v4462_v63 = vpop.xlane.xlu0 %1041  ;;  %v4466_v30 = vpop.xlane.xlu1 %842  ;;  %v907_v0 = vpack.c.bf16 %v861_v31, %v861_v31  ;;  %v1050_v41 = vmul.f32 %v4480_v7, %v4445_v51  ;;  %vm1055_vm9 = vweird.f32 %v4480_v7 }
 0x3f1   : > { %v875_v19 = vsel %vm872_vm8, %v874_v3, %v870_v28  ;;  %3559 = vrcp.f32 %v4466_v30  ;;  %vm4535_vm12 = vcmp.eq.f32.partialorder %v1058_v2, 8.507059e+37  ;;  %vm4542_vm13 = vmor %vm1054_vm11, %vm1055_vm9  ;;  %vm882_vm1 = vweird.f32 %v4466_v30 }
 0x3f2   : > { %v876_v46 = vmul.f32 %v4307_v29, %v875_v19  ;;  %v913_v36 = vunpack.c.l.b16 %v907_v0  ;;  %v1051_v35 = vsub.f32 1.0, %v1050_v41  ;;  %v2236_v19 = vpop.xlane.xlu2 %2235  ;;  %vm1069_vm6 = vweird.f32 %v4462_v63 }
 0x3f4   : > { %v908_v43 = vpack.c.bf16 %v876_v46, %v876_v46 }
 0x3f6   : > { %1852 = vadd.xlane.f32.xlu2 %v1851_v24  ;;  %v914_v28 = vunpack.c.l.b16 %v908_v43  ;;  %v2240_v43 = vsub.f32 %v4316_v53, %v2236_v19  ;;  %v888_v19 = vand.u32 2147483648, %v4466_v30 }
 0x3f7   : > { %v4485_v57 = vpop.eup %3559 }
 0x3f8   : > { %v4474_v59 = vpop.xlane.xlu0 %845  ;;  %v4482_v29 = vpop.xlane.xlu1 %1044  ;;  %v915_v23 = vpack.c.b16 %v914_v28, %v913_v36  ;;  %v878_v3 = vmul.f32 %v4485_v57, %v4466_v30  ;;  %vm883_vm10 = vweird.f32 %v4485_v57 }
 0x3f9   : > { %3561 = vrcp.f32 %v4474_v59  ;;  %vm4557_vm3 = vmor %vm882_vm1, %vm883_vm10  ;;  %vm1084_vm5 = vweird.f32 %v4482_v29  ;;  %vm897_vm7 = vweird.f32 %v4474_v59 }
 0x3fa   : > { %2128 = vrot.lane.b32.xlu0 %v4086_v39, %s3820_s14  ;;  %3563 = vrcp.f32 %v4482_v29  ;;  %3291 = vmatmul.msk.bf16.vlgmr.msrb.gmra.mxu0 %vm810_vm15, %v915_v23  ;;  %v879_v31 = vsub.f32 1.0, %v878_v3  ;;  %v1060_v23 = vand.u32 2147483648, %v4445_v51  ;;  %v2247_v3 = vmul.f32 1.442695, %v2240_v43 }
 0x3fb   : > { %1358 = vmatpush.bf16.msrb.mxu0 %v4286_v52  ;;  %3565 = vrcp.f32 %v4462_v63  ;;  %v1052_v52 = vmul.f32 %v4480_v7, %v1051_v35 }
 0x3fc   : > { %3567 = vpow2.f32 %v2245_v12  ;;  %v880_v0 = vmul.f32 %v4485_v57, %v879_v31  ;;  %v886_v12 = vand.u32 2147483647, %v4466_v30  ;;  %v1061_v17 = vor.u32 1.1754944e-38, %v1060_v23 }
 0x3fd   : > { %v1053_v35 = vadd.f32 %v4480_v7, %v1052_v52  ;;  %v889_v23 = vor.u32 1.1754944e-38, %v888_v19 }
 0x3fe   : > { %2253 = vadd.xlane.f32.xlu2 %v2252_v5  ;;  %vm4547_vm2 = vcmp.eq.f32.partialorder %v886_v12, 8.507059e+37 }
 0x3ff   : > { %v4500_v15 = vpop.eup %3561 }
 0x400   : > { %v4498_v33 = vpop.xlane.xlu0 %1240  ;;  %v4503_v46 = vpop.eup %3563  ;;  %v893_v24 = vmul.f32 %v4500_v15, %v4474_v59  ;;  %vm898_vm4 = vweird.f32 %v4500_v15 }
 0x401   : > { %v1080_v28 = vmul.f32 %v4503_v46, %v4482_v29  ;;  %v4514_v36 = vpop.eup %3565  ;;  %v4518_v41 = vpop.xlane.xlu1 %1246  ;;  %vm1085_vm8 = vweird.f32 %v4503_v46  ;;  %vm4597_vm9 = vmor %vm897_vm7, %vm898_vm4 }
 0x402   : > { %v894_v5 = vsub.f32 1.0, %v893_v24  ;;  %v4528_v31 = vpop.eup %3567  ;;  %v881_v24 = vadd.f32 %v4485_v57, %v880_v0  ;;  %v1065_v18 = vmul.f32 %v4514_v36, %v4462_v63  ;;  %v4540_v45 = vpop.xlane.xlu2 %1243  ;;  %vm1070_vm11 = vweird.f32 %v4514_v36 }
 0x403   : > { %5475 = vst [vmem:[#allocation28_spill] sm:$0xff] %v4528_v31  ;;  %v1081_v43 = vsub.f32 1.0, %v1080_v28  ;;  %v1057_v28 = vsel %vm4542_vm13, %v4480_v7, %v1053_v35  ;;  %v4564_v30 = vsel %vm810_vm15, %v4528_v31, 0.0  ;;  %v903_v35 = vand.u32 2147483648, %v4474_v59 }
 0x404   : > { %v895_v14 = vmul.f32 %v4500_v15, %v894_v5  ;;  %v1066_v12 = vsub.f32 1.0, %v1065_v18  ;;  %v885_v49 = vsel %vm4557_vm3, %v4485_v57, %v881_v24  ;;  %v1062_v18 = vsel %vm4535_vm12, %v1061_v17, %v1057_v28  ;;  %vm4614_vm12 = vmor %vm1084_vm5, %vm1085_vm8 }
 0x405   : > { %v1082_v51 = vmul.f32 %v4503_v46, %v1081_v43  ;;  %v1088_v43 = vand.u32 2147483647, %v4482_v29  ;;  %v901_v57 = vand.u32 2147483647, %v4474_v59  ;;  %v890_v24 = vsel %vm4547_vm2, %v889_v23, %v885_v49  ;;  %vm4648_vm5 = vmor %vm1069_vm6, %vm1070_vm11 }
 0x406   : > { %1951 = vrot.lane.b32.xlu1 %v4092_v48, %s3819_s13  ;;  %v896_v7 = vadd.f32 %v4500_v15, %v895_v14  ;;  %v1090_v14 = vand.u32 2147483648, %v4482_v29  ;;  %v1067_v17 = vmul.f32 %v4514_v36, %v1066_v12  ;;  %v904_v44 = vor.u32 1.1754944e-38, %v903_v35  ;;  %s5545_s13 = sld [smem:[#allocation33_spill]] }
 0x407   : > { %v1083_v52 = vadd.f32 %v4503_v46, %v1082_v51  ;;  %v891_v61 = vmul.f32 %v4327_v16, %v890_v24  ;;  %vm4618_vm13 = vcmp.eq.f32.partialorder %v1088_v43, 8.507059e+37  ;;  %vm902_vm1 = vcmp.eq.f32.partialorder %v901_v57, 8.507059e+37 }
 0x408   : > { %v4520_v53 = vpop.xlane.xlu0 %1047  ;;  %v900_v23 = vsel %vm4597_vm9, %v4500_v15, %v896_v7  ;;  %v1091_v15 = vor.u32 1.1754944e-38, %v1090_v14  ;;  %v1068_v43 = vadd.f32 %v4514_v36, %v1067_v17  ;;  %vm1286_vm6 = vweird.f32 %v4518_v41 }
 0x409   : > { %3569 = vrcp.f32 %v4520_v53  ;;  %v1105_v0 = vand.u32 2147483648, %v4520_v53  ;;  %v1103_v49 = vand.u32 2147483647, %v4520_v53  ;;  %v1087_v16 = vsel %vm4614_vm12, %v4503_v46, %v1083_v52 }
 0x40a   : > { %3571 = vrcp.f32 %v4518_v41  ;;  %vm1099_vm2 = vweird.f32 %v4520_v53  ;;  %v905_v7 = vsel %vm902_vm1, %v904_v44, %v900_v23  ;;  %v909_v46 = vpack.c.bf16 %v891_v61, %v891_v61 }
 0x40b   : > { %3573 = vpow2.f32 %v2247_v3  ;;  %v1106_v57 = vor.u32 1.1754944e-38, %v1105_v0  ;;  %vm1104_vm4 = vcmp.eq.f32.partialorder %v1103_v49, 8.507059e+37  ;;  %v906_v35 = vmul.f32 %v4336_v37, %v905_v7 }
 0x40c   : > { %3575 = vrcp.f32 %v4540_v45  ;;  %v4642_v52 = vmul.f32 %v4320_v58, %v1062_v18  ;;  %v5492_v37 = vand.u32 2147483647, %v4462_v63  ;;  %v1290_v49 = vand.u32 2147483647, %v4518_v41 }
 0x40d   : > { %3577 = vrcp.f32 %v4498_v33  ;;  %v910_v18 = vpack.c.bf16 %v906_v35, %v906_v35  ;;  %v1292_v7 = vand.u32 2147483648, %v4518_v41  ;;  %v1275_v35 = vand.u32 2147483647, %v4540_v45 }
 0x40e   : > { %vm4654_vm7 = vcmp.eq.f32.partialorder %v5492_v37, 8.507059e+37  ;;  %vm4682_vm8 = vcmp.eq.f32.partialorder %v1290_v49, 8.507059e+37  ;;  %v1277_v37 = vand.u32 2147483648, %v4540_v45  ;;  %vm1256_vm11 = vweird.f32 %v4498_v33 }
 0x40f   : > { %v3570_v3 = vpop.eup %3569  ;;  %vm4711_vm1 = vcmp.eq.f32.partialorder %v1275_v35, 8.507059e+37  ;;  %v1262_v35 = vand.u32 2147483648, %v4498_v33 }
 0x410   : > { %v1095_v19 = vmul.f32 %v3570_v3, %v4520_v53  ;;  %v4575_v5 = vpop.xlane.xlu1 %1445  ;;  %v4577_v31 = vpop.eup %3571  ;;  %vm1100_vm10 = vweird.f32 %v3570_v3  ;;  %v1092_v53 = vsel %vm4618_vm13, %v1091_v15, %v1087_v16 }
 0x411   : > { %v4590_v2 = vpop.eup %3573  ;;  %v1282_v59 = vmul.f32 %v4577_v31, %v4518_v41  ;;  %vm1101_vm3 = vmor %vm1099_vm2, %vm1100_vm10  ;;  %v4667_v15 = vpop.xlane.xlu2 %1442  ;;  %v1093_v16 = vmul.f32 %v4339_v54, %v1092_v53  ;;  %vm1287_vm9 = vweird.f32 %v4577_v31  ;;  %vm1271_vm10 = vweird.f32 %v4540_v45 }
 0x412   : > { %v1096_v25 = vsub.f32 1.0, %v1095_v19  ;;  %v4607_v51 = vpop.eup %3575  ;;  %vm4705_vm12 = vmor %vm1286_vm6, %vm1287_vm9 }
 0x413   : > { %v1283_v24 = vsub.f32 1.0, %v1282_v59  ;;  %v1267_v14 = vmul.f32 %v4607_v51, %v4540_v45  ;;  %v5495_v59 = vand.u32 2147483648, %v4462_v63  ;;  %v1111_v53 = vpack.c.bf16 %v1093_v16, %v1093_v16 }
 0x414   : > { %v1097_v12 = vmul.f32 %v3570_v3, %v1096_v25  ;;  %v4624_v25 = vpop.eup %3577  ;;  %vm1272_vm13 = vweird.f32 %v4607_v51 }
 0x415   : > { %v1252_v44 = vmul.f32 %v4624_v25, %v4498_v33  ;;  %v1076_v0 = vor.u32 1.1754944e-38, %v5495_v59  ;;  %v1268_v19 = vsub.f32 1.0, %v1267_v14  ;;  %v1284_v63 = vmul.f32 %v4577_v31, %v1283_v24 }
 0x416   : > { %2330 = vrot.lane.b32.xlu2 %v4086_v39, %s3821_s27  ;;  %v1098_v29 = vadd.f32 %v3570_v3, %v1097_v12  ;;  %v1072_v12 = vsel %vm4648_vm5, %v4514_v36, %v1068_v43  ;;  %v1109_v36 = vpack.c.bf16 %v4642_v52, %v4642_v52  ;;  %v1140_v16 = vunpack.c.l.b16 %v1111_v53 }
 0x417   : > { %v1077_v24 = vsel %vm4654_vm7, %v1076_v0, %v1072_v12  ;;  %vm1257_vm2 = vweird.f32 %v4624_v25 }
 0x418   : > { %v4634_v39 = vpop.xlane.xlu1 %1249  ;;  %v1102_v28 = vsel %vm1101_vm3, %v3570_v3, %v1098_v29  ;;  %v4661_v23 = vpop.xlane.xlu0 %1448  ;;  %v938_v29 = vunpack.c.l.b16 %v909_v46  ;;  %v1293_v3 = vor.u32 1.1754944e-38, %v1292_v7  ;;  %vm4736_vm3 = vmor %vm1271_vm10, %vm1272_vm13 }
 0x419   : > { %v1107_v17 = vsel %vm1104_vm4, %v1106_v57, %v1102_v28  ;;  %3579 = vrcp.f32 %v4634_v39  ;;  %v1253_v57 = vsub.f32 1.0, %v1252_v44  ;;  %v1269_v28 = vmul.f32 %v4607_v51, %v1268_v19  ;;  %vm4754_vm5 = vmor %vm1256_vm11, %vm1257_vm2 }
 0x41a   : > { %v1108_v58 = vmul.f32 %v4360_v27, %v1107_v17  ;;  %v939_v27 = vunpack.c.l.b16 %v910_v18  ;;  %3581 = vrcp.f32 %v4661_v23  ;;  %v1285_v44 = vadd.f32 %v4577_v31, %v1284_v63 }
 0x41b   : > { %3583 = vrcp.f32 %v4667_v15  ;;  %v1254_v61 = vmul.f32 %v4624_v25, %v1253_v57  ;;  %v1270_v49 = vadd.f32 %v4607_v51, %v1269_v28  ;;  %v1260_v19 = vand.u32 2147483647, %v4498_v33 }
 0x41c   : > { %v1112_v54 = vpack.c.bf16 %v1108_v58, %v1108_v58  ;;  %v940_v43 = vpack.c.b16 %v939_v27, %v938_v29  ;;  %3585 = vrcp.f32 %v4575_v5  ;;  %v1078_v58 = vmul.f32 %v4329_v50, %v1077_v24 }
 0x41d   : > { %v1289_v41 = vsel %vm4705_vm12, %v4577_v31, %v1285_v44  ;;  %v1255_v27 = vadd.f32 %v4624_v25, %v1254_v61  ;;  %v1305_v7 = vand.u32 2147483647, %v4634_v39  ;;  %v1307_v57 = vand.u32 2147483648, %v4634_v39 }
 0x41e   : > { %2153 = vrot.lane.b32.xlu2 %v4092_v48, %s3820_s14  ;;  %3292 = vmatmul.msk.bf16.vlgmr.msra.gmra.mxu3 %vm810_vm15, %v940_v43  ;;  %v1141_v59 = vunpack.c.l.b16 %v1112_v54  ;;  %v1110_v43 = vpack.c.bf16 %v1078_v58, %v1078_v58  ;;  %v1294_v28 = vsel %vm4682_vm8, %v1293_v3, %v1289_v41  ;;  %vm1301_vm7 = vweird.f32 %v4634_v39 }
 0x41f   : > { %v3580_v17 = vpop.eup %3579  ;;  %1333 = vmatpush.bf16.msra.mxu3 %v4156_v26  ;;  %vm4761_vm6 = vcmp.eq.f32.partialorder %v1260_v19, 8.507059e+37  ;;  %vm1306_vm9 = vcmp.eq.f32.partialorder %v1305_v7, 8.507059e+37  ;;  %vm1458_vm11 = vweird.f32 %v4667_v15  ;;  %vm1488_vm13 = vweird.f32 %v4661_v23 }
 0x420   : > { %v4688_v46 = vpop.xlane.xlu1 %1644  ;;  %v1297_v0 = vmul.f32 %v3580_v17, %v4634_v39  ;;  %v4701_v18 = vpop.eup %3581  ;;  %vm1302_vm4 = vweird.f32 %v3580_v17  ;;  %v1142_v24 = vpack.c.b16 %v1141_v59, %v1140_v16  ;;  %v1308_v59 = vor.u32 1.1754944e-38, %v1307_v57 }
 0x421   : > { %v4717_v50 = vpop.eup %3583  ;;  %v1484_v29 = vmul.f32 %v4701_v18, %v4661_v23  ;;  %vm1303_vm8 = vmor %vm1301_vm7, %vm1302_vm4  ;;  %v1259_v39 = vsel %vm4754_vm5, %v4624_v25, %v1255_v27  ;;  %v1116_v58 = vunpack.c.l.b16 %v1110_v43  ;;  %v1115_v25 = vunpack.c.l.b16 %v1109_v36 }
 0x422   : > { %v1298_v63 = vsub.f32 1.0, %v1297_v0  ;;  %v1454_v45 = vmul.f32 %v4717_v50, %v4667_v15  ;;  %3296 = vmatmul.msk.bf16.vlgmr.msra.gmra.mxu0 %vm810_vm15, %v1142_v24  ;;  %vm1459_vm10 = vweird.f32 %v4717_v50  ;;  %vm1489_vm12 = vweird.f32 %v4701_v18 }
 0x423   : > { %v1485_v3 = vsub.f32 1.0, %v1484_v29  ;;  %1560 = vmatpush.bf16.msra.mxu0 %v4293_v1  ;;  %v4777_v1 = vpop.xlane.xlu2 %1647  ;;  %v2258_v29 = vsel %vm810_vm15, %v4590_v2, 0.0  ;;  %v1117_v57 = vpack.c.b16 %v1116_v58, %v1115_v25 }
 0x424   : > { %2256 = vadd.xlane.f32.xlu0 %v4564_v30  ;;  %v4730_v30 = vpop.eup %3585  ;;  %v1299_v54 = vmul.f32 %v3580_v17, %v1298_v63  ;;  %v1455_v16 = vsub.f32 1.0, %v1454_v45  ;;  %v1492_v45 = vand.u32 2147483647, %v4661_v23 }
 0x425   : > { %v1469_v33 = vmul.f32 %v4730_v30, %v4575_v5  ;;  %v1486_v63 = vmul.f32 %v4701_v18, %v1485_v3  ;;  %vm1474_vm4 = vweird.f32 %v4730_v30 }
 0x426   : > { %2355 = vrot.lane.b32.xlu2 %v4092_v48, %s3821_s27  ;;  %v1274_v48 = vsel %vm4736_vm3, %v4607_v51, %v1270_v49  ;;  %v1300_v14 = vadd.f32 %v3580_v17, %v1299_v54  ;;  %v1278_v51 = vor.u32 1.1754944e-38, %v1277_v37  ;;  %v1295_v37 = vmul.f32 %v4350_v10, %v1294_v28  ;;  %s5542_s27 = sld [smem:[#allocation34_spill]] }
 0x427   : > { %v1263_v49 = vor.u32 1.1754944e-38, %v1262_v35  ;;  %v1462_v10 = vand.u32 2147483647, %v4667_v15  ;;  %v1470_v26 = vsub.f32 1.0, %v1469_v33  ;;  %v1456_v43 = vmul.f32 %v4717_v50, %v1455_v16 }
 0x428   : > { %v4748_v53 = vpop.xlane.xlu1 %1451  ;;  %v1304_v0 = vsel %vm1303_vm8, %v3580_v17, %v1300_v14  ;;  %v1279_v12 = vsel %vm4711_vm1, %v1278_v51, %v1274_v48  ;;  %v1313_v31 = vpack.c.bf16 %v1295_v37, %v1295_v37  ;;  %v1487_v24 = vadd.f32 %v4701_v18, %v1486_v63  ;;  %vm4807_vm1 = vmor %vm1488_vm13, %vm1489_vm12 }
 0x429   : > { %3587 = vrcp.f32 %v4748_v53  ;;  %v1309_v19 = vsel %vm1306_vm9, %v1308_v59, %v1304_v0  ;;  %v1264_v17 = vsel %vm4761_vm6, %v1263_v49, %v1259_v39  ;;  %v1280_v52 = vmul.f32 %v4352_v47, %v1279_v12  ;;  %vm4828_vm8 = vmor %vm1458_vm11, %vm1459_vm10 }
 0x42a   : > { %v1310_v41 = vmul.f32 %v4376_v13, %v1309_v19  ;;  %v1464_v13 = vand.u32 2147483648, %v4667_v15  ;;  %3589 = vrcp.f32 %v4777_v1  ;;  %v1265_v54 = vmul.f32 %v4347_v6, %v1264_v17 }
 0x42b   : > { %v1471_v47 = vmul.f32 %v4730_v30, %v1470_v26  ;;  %v1494_v48 = vand.u32 2147483648, %v4661_v23  ;;  %3591 = vrcp.f32 %v4688_v46  ;;  %v1509_v44 = vand.u32 2147483648, %v4748_v53  ;;  %v1750_v17 = vpop.permute.xlu2 %1749 }
 0x42c   : > { %v1314_v7 = vpack.c.bf16 %v1310_v41, %v1310_v41  ;;  %v1507_v51 = vand.u32 2147483647, %v4748_v53  ;;  %v1342_v61 = vunpack.c.l.b16 %v1313_v31  ;;  %v1311_v33 = vpack.c.bf16 %v1265_v54, %v1265_v54 }
 0x42d   : > { %v1491_v23 = vsel %vm4807_vm1, %v4701_v18, %v1487_v24  ;;  %v1457_v39 = vadd.f32 %v4717_v50, %v1456_v43  ;;  %v1495_v0 = vor.u32 1.1754944e-38, %v1494_v48  ;;  %vm1503_vm3 = vweird.f32 %v4748_v53 }
 0x42e   : > { %3295 = vmatmul.msk.bf16.vlgmr.msrb.gmra.mxu3 %vm810_vm15, %v1117_v57  ;;  %v1343_v35 = vunpack.c.l.b16 %v1314_v7  ;;  %vm1493_vm5 = vcmp.eq.f32.partialorder %v1492_v45, 8.507059e+37  ;;  %v1510_v37 = vor.u32 1.1754944e-38, %v1509_v44  ;;  %v1472_v49 = vadd.f32 %v4730_v30, %v1471_v47 }
 0x42f   : > { %v3588_v27 = vpop.eup %3587  ;;  %1535 = vmatpush.bf16.msrb.mxu3 %v4151_v20  ;;  %v1312_v20 = vpack.c.bf16 %v1280_v52, %v1280_v52  ;;  %v1496_v19 = vsel %vm1493_vm5, %v1495_v0, %v1491_v23  ;;  %vm1508_vm6 = vcmp.eq.f32.partialorder %v1507_v51, 8.507059e+37  ;;  %v1479_v63 = vand.u32 2147483648, %v4575_v5 }
 0x430   : > { %v1499_v36 = vmul.f32 %v3588_v27, %v4748_v53  ;;  %2259 = vadd.xlane.f32.xlu1 %v2258_v29  ;;  %v4798_v28 = vpop.xlane.xlu0 %1650  ;;  %vm1504_vm2 = vweird.f32 %v3588_v27  ;;  %v4816_v59 = vpop.eup %3589  ;;  %v1344_v12 = vpack.c.b16 %v1343_v35, %v1342_v61  ;;  %v1465_v53 = vor.u32 1.1754944e-38, %v1464_v13 }
 0x431   : > { %3593 = vrcp.f32 %v4798_v28  ;;  %vm1505_vm7 = vmor %vm1503_vm3, %vm1504_vm2  ;;  %v4822_v18 = vpop.eup %3591  ;;  %v1671_v25 = vmul.f32 %v4816_v59, %v4777_v1  ;;  %v1461_v7 = vsel %vm4828_vm8, %v4717_v50, %v1457_v39  ;;  %vm1473_vm9 = vweird.f32 %v4575_v5  ;;  %v4857_v14 = vpop.xlane.xlu1 %1846 }
 0x432   : > { %v1500_v6 = vsub.f32 1.0, %v1499_v36  ;;  %3300 = vmatmul.msk.bf16.vlgmr.msrb.gmra.mxu0 %vm810_vm15, %v1344_v12  ;;  %v1477_v13 = vand.u32 2147483647, %v4575_v5  ;;  %v1318_v31 = vunpack.c.l.b16 %v1312_v20  ;;  %v1317_v52 = vunpack.c.l.b16 %v1311_v33  ;;  %vm1475_vm10 = vmor %vm1473_vm9, %vm1474_vm4 }
 0x433   : > { %1762 = vmatpush.bf16.msrb.mxu0 %v1750_v17  ;;  %v1497_v36 = vmul.f32 %v4379_v56, %v1496_v19  ;;  %vm1463_vm11 = vcmp.eq.f32.partialorder %v1462_v10, 8.507059e+37  ;;  %v1476_v50 = vsel %vm1475_vm10, %v4730_v30, %v1472_v49  ;;  %v1656_v5 = vmul.f32 %v4822_v18, %v4688_v46 }
 0x434   : > { %v1501_v3 = vmul.f32 %v3588_v27, %v1500_v6  ;;  %v1480_v43 = vor.u32 1.1754944e-38, %v1479_v63  ;;  %v1672_v24 = vsub.f32 1.0, %v1671_v25  ;;  %vm1478_vm12 = vcmp.eq.f32.partialorder %v1477_v13, 8.507059e+37 }
 0x435   : > { %v1515_v6 = vpack.c.bf16 %v1497_v36, %v1497_v36  ;;  %v1319_v56 = vpack.c.b16 %v1318_v31, %v1317_v52  ;;  %v1657_v44 = vsub.f32 1.0, %v1656_v5  ;;  %vm1675_vm13 = vweird.f32 %v4777_v1 }
 0x436   : > { %v1502_v58 = vadd.f32 %v3588_v27, %v1501_v3  ;;  %v1481_v48 = vsel %vm1478_vm12, %v1480_v43, %v1476_v50  ;;  %v1673_v15 = vmul.f32 %v4816_v59, %v1672_v24  ;;  %vm1676_vm1 = vweird.f32 %v4816_v59 }
 0x437   : > { %v1482_v3 = vmul.f32 %v4371_v9, %v1481_v48  ;;  %v1544_v51 = vunpack.c.l.b16 %v1515_v6  ;;  %v1658_v20 = vmul.f32 %v4822_v18, %v1657_v44  ;;  %v1681_v39 = vand.u32 2147483648, %v4777_v1  ;;  %vm4879_vm3 = vmor %vm1675_vm13, %vm1676_vm1 }
 0x438   : > { %v1506_v16 = vsel %vm1505_vm7, %v3588_v27, %v1502_v58  ;;  %v4838_v27 = vpop.eup %3593  ;;  %v1674_v33 = vadd.f32 %v4816_v59, %v1673_v15  ;;  %v1664_v0 = vand.u32 2147483647, %v4688_v46  ;;  %v1666_v58 = vand.u32 2147483648, %v4688_v46 }
 0x439   : > { %v1511_v26 = vsel %vm1508_vm6, %v1510_v37, %v1506_v16  ;;  %v4836_v29 = vpop.xlane.xlu0 %1849  ;;  %v1686_v54 = vmul.f32 %v4838_v27, %v4798_v28  ;;  %v1514_v9 = vpack.c.bf16 %v1482_v3, %v1482_v3  ;;  %vm1691_vm2 = vweird.f32 %v4838_v27 }
 0x43a   : > { %v1512_v57 = vmul.f32 %v4395_v55, %v1511_v26  ;;  %v1466_v55 = vsel %vm1463_vm11, %v1465_v53, %v1461_v7  ;;  %v1659_v49 = vadd.f32 %v4822_v18, %v1658_v20  ;;  %vm1661_vm4 = vweird.f32 %v4822_v18  ;;  %v4901_v26 = vpop.xlane.xlu1 %1855 }
 0x43b   : > { %v1687_v35 = vsub.f32 1.0, %v1686_v54  ;;  %v1467_v45 = vmul.f32 %v4364_v40, %v1466_v55  ;;  %v1678_v41 = vsel %vm4879_vm3, %v4816_v59, %v1674_v33  ;;  %vm1690_vm5 = vweird.f32 %v4798_v28 }
 0x43c   : > { %v1516_v47 = vpack.c.bf16 %v1512_v57, %v1512_v57  ;;  %v1694_v53 = vand.u32 2147483647, %v4798_v28  ;;  %v1682_v25 = vor.u32 1.1754944e-38, %v1681_v39  ;;  %vm1660_vm6 = vweird.f32 %v4688_v46  ;;  %vm4897_vm8 = vmor %vm1690_vm5, %vm1691_vm2 }
 0x43d   : > { %v1688_v61 = vmul.f32 %v4838_v27, %v1687_v35  ;;  %v1513_v40 = vpack.c.bf16 %v1467_v45, %v1467_v45  ;;  %v1520_v7 = vunpack.c.l.b16 %v1514_v9  ;;  %vm4906_vm9 = vmor %vm1660_vm6, %vm1661_vm4  ;;  %vm4910_vm10 = vcmp.eq.f32.partialorder %v1664_v0, 8.507059e+37 }
 0x43e   : > { %v1545_v30 = vunpack.c.l.b16 %v1516_v47  ;;  %3299 = vmatmul.msk.bf16.vlgmr.msra.gmra.mxu3 %vm810_vm15, %v1319_v56  ;;  %v1667_v46 = vor.u32 1.1754944e-38, %v1666_v58  ;;  %v1663_v36 = vsel %vm4906_vm9, %v4822_v18, %v1659_v49  ;;  %vm1695_vm11 = vcmp.eq.f32.partialorder %v1694_v53, 8.507059e+37 }
 0x43f   : > { %1737 = vmatpush.bf16.msra.mxu3 %v4159_v32  ;;  %v1679_v32 = vand.u32 2147483647, %v4777_v1  ;;  %v1689_v37 = vadd.f32 %v4838_v27, %v1688_v61  ;;  %v1696_v1 = vand.u32 2147483648, %v4798_v28  ;;  %v1519_v16 = vunpack.c.l.b16 %v1513_v40 }
 0x440   : > { %v1546_v23 = vpack.c.b16 %v1545_v30, %v1544_v51  ;;  %v1668_v18 = vsel %vm4910_vm10, %v1667_v46, %v1663_v36  ;;  %v1883_v49 = vand.u32 2147483648, %v4836_v29  ;;  %vm1877_vm5 = vweird.f32 %v4836_v29 }
 0x441   : > { %v4861_v10 = vpop.xlane.xlu0 %1653  ;;  %vm1680_vm7 = vcmp.eq.f32.partialorder %v1679_v32, 8.507059e+37  ;;  %v1693_v57 = vsel %vm4897_vm8, %v4838_v27, %v1689_v37  ;;  %v1697_v54 = vor.u32 1.1754944e-38, %v1696_v1  ;;  %v1521_v6 = vpack.c.b16 %v1520_v7, %v1519_v16 }
 0x442   : > { %3595 = vrcp.f32 %v4861_v10  ;;  %3304 = vmatmul.msk.bf16.vlgmr.msra.gmra.mxu0 %vm810_vm15, %v1546_v23  ;;  %v1683_v52 = vsel %vm1680_vm7, %v1682_v25, %v1678_v41  ;;  %v1711_v55 = vand.u32 2147483648, %v4861_v10  ;;  %v1709_v47 = vand.u32 2147483647, %v4861_v10 }
 0x443   : > { %3597 = vrcp.f32 %v4836_v29  ;;  %v1698_v27 = vsel %vm1695_vm11, %v1697_v54, %v1693_v57  ;;  %v1684_v35 = vmul.f32 %v4388_v22, %v1683_v52  ;;  %vm1705_vm13 = vweird.f32 %v4861_v10 }
 0x444   : > { %3599 = vrcp.f32 %v4857_v14  ;;  %v1699_v45 = vmul.f32 %v4404_v21, %v1698_v27  ;;  %v1712_v15 = vor.u32 1.1754944e-38, %v1711_v55  ;;  %v1669_v30 = vmul.f32 %v4386_v38, %v1668_v18 }
 0x445   : > { %3601 = vrcp.f32 %v4901_v26  ;;  %vm1710_vm2 = vcmp.eq.f32.partialorder %v1709_v47, 8.507059e+37  ;;  %v1881_v16 = vand.u32 2147483647, %v4836_v29  ;;  %v1868_v53 = vand.u32 2147483648, %v4857_v14 }
 0x446   : > { %v1717_v20 = vpack.c.bf16 %v1699_v45, %v1699_v45  ;;  %v1715_v23 = vpack.c.bf16 %v1669_v30, %v1669_v30  ;;  %vm1862_vm6 = vweird.f32 %v4857_v14  ;;  %v1866_v25 = vand.u32 2147483647, %v4857_v14 }
 0x447   : > { %v1884_v28 = vor.u32 1.1754944e-38, %v1883_v49  ;;  %vm1882_vm9 = vcmp.eq.f32.partialorder %v1881_v16, 8.507059e+37  ;;  %v1869_v46 = vor.u32 1.1754944e-38, %v1868_v53 }
 0x448   : > { %v3596_v19 = vpop.eup %3595  ;;  %v1746_v0 = vunpack.c.l.b16 %v1717_v20  ;;  %v1721_v37 = vunpack.c.l.b16 %v1715_v23  ;;  %vm1867_vm10 = vcmp.eq.f32.partialorder %v1866_v25, 8.507059e+37 }
 0x449   : > { %v4892_v63 = vpop.eup %3597  ;;  %v1701_v59 = vmul.f32 %v3596_v19, %v4861_v10  ;;  %v4926_v43 = vpop.xlane.xlu0 %2051  ;;  %vm1706_vm12 = vweird.f32 %v3596_v19  ;;  %v1716_v10 = vpack.c.bf16 %v1684_v35, %v1684_v35 }
 0x44a   : > { %v4917_v31 = vpop.eup %3599  ;;  %v1873_v5 = vmul.f32 %v4892_v63, %v4836_v29  ;;  %3603 = vrcp.f32 %v4926_v43  ;;  %vm1707_vm1 = vmor %vm1705_vm13, %vm1706_vm12  ;;  %vm1878_vm3 = vweird.f32 %v4892_v63  ;;  %vm1907_vm12 = vweird.f32 %v4901_v26 }
 0x44b   : > { %v1702_v50 = vsub.f32 1.0, %v1701_v59  ;;  %v1858_v48 = vmul.f32 %v4917_v31, %v4857_v14  ;;  %v4940_v51 = vpop.eup %3601  ;;  %vm1863_vm4 = vweird.f32 %v4917_v31  ;;  %vm1879_vm7 = vmor %vm1877_vm5, %vm1878_vm3 }
 0x44c   : > { %v1874_v44 = vsub.f32 1.0, %v1873_v5  ;;  %v1903_v38 = vmul.f32 %v4940_v51, %v4901_v26  ;;  %vm1864_vm8 = vmor %vm1862_vm6, %vm1863_vm4  ;;  %vm1908_vm11 = vweird.f32 %v4940_v51 }
 0x44d   : > { %v1703_v24 = vmul.f32 %v3596_v19, %v1702_v50  ;;  %v1859_v22 = vsub.f32 1.0, %v1858_v48  ;;  %v1913_v50 = vand.u32 2147483648, %v4901_v26  ;;  %vm4987_vm13 = vmor %vm1907_vm12, %vm1908_vm11  ;;  %v2085_v48 = vand.u32 2147483648, %v4926_v43 }
 0x44e   : > { %3303 = vmatmul.msk.bf16.vlgmr.msrb.gmra.mxu3 %vm810_vm15, %v1521_v6  ;;  %v1875_v21 = vmul.f32 %v4892_v63, %v1874_v44  ;;  %v1904_v12 = vsub.f32 1.0, %v1903_v38 }
 0x44f   : > { %v1704_v56 = vadd.f32 %v3596_v19, %v1703_v24  ;;  %1939 = vmatpush.bf16.msrb.mxu3 %v4162_v34  ;;  %v1860_v32 = vmul.f32 %v4917_v31, %v1859_v22  ;;  %v1722_v34 = vunpack.c.l.b16 %v1716_v10 }
 0x450   : > { %v4944_v33 = vpop.eup %3603  ;;  %v1876_v58 = vadd.f32 %v4892_v63, %v1875_v21  ;;  %v1905_v7 = vmul.f32 %v4940_v51, %v1904_v12 }
 0x451   : > { %v1708_v3 = vsel %vm1707_vm1, %v3596_v19, %v1704_v56  ;;  %v4955_v1 = vpop.xlane.xlu0 %2250  ;;  %v1861_v19 = vadd.f32 %v4917_v31, %v1860_v32  ;;  %v1723_v13 = vpack.c.b16 %v1722_v34, %v1721_v37  ;;  %vm2080_vm1 = vweird.f32 %v4944_v33 }
 0x452   : > { %v1713_v61 = vsel %vm1710_vm2, %v1712_v15, %v1708_v3  ;;  %v1880_v17 = vsel %vm1879_vm7, %v4892_v63, %v1876_v58  ;;  %3605 = vrcp.f32 %v4955_v1  ;;  %v1906_v36 = vadd.f32 %v4940_v51, %v1905_v7 }
 0x453   : > { %v1714_v40 = vmul.f32 %v4422_v4, %v1713_v61  ;;  %v2075_v4 = vmul.f32 %v4944_v33, %v4926_v43  ;;  %v1865_v29 = vsel %vm1864_vm8, %v4917_v31, %v1861_v19  ;;  %v1885_v57 = vsel %vm1882_vm9, %v1884_v28, %v1880_v17 }
 0x454   : > { %v1870_v52 = vsel %vm1867_vm10, %v1869_v46, %v1865_v29  ;;  %v1886_v31 = vmul.f32 %v4411_v11, %v1885_v57  ;;  %v1911_v11 = vand.u32 2147483647, %v4901_v26  ;;  %v1910_v18 = vsel %vm4987_vm13, %v4940_v51, %v1906_v36 }
 0x455   : > { %v1718_v9 = vpack.c.bf16 %v1714_v40, %v1714_v40  ;;  %v2076_v59 = vsub.f32 1.0, %v2075_v4  ;;  %v1871_v27 = vmul.f32 %v4402_v8, %v1870_v52  ;;  %vm2079_vm2 = vweird.f32 %v4926_v43 }
 0x456   : > { %v1918_v6 = vpack.c.bf16 %v1886_v31, %v1886_v31  ;;  %v2083_v8 = vand.u32 2147483647, %v4926_v43  ;;  %v1914_v26 = vor.u32 1.1754944e-38, %v1913_v50  ;;  %vm2081_vm3 = vmor %vm2079_vm2, %vm2080_vm1  ;;  %vm1912_vm4 = vcmp.eq.f32.partialorder %v1911_v11, 8.507059e+37 }
 0x457   : > { %v1747_v39 = vunpack.c.l.b16 %v1718_v9  ;;  %v2077_v14 = vmul.f32 %v4944_v33, %v2076_v59  ;;  %v1917_v45 = vpack.c.bf16 %v1871_v27, %v1871_v27  ;;  %v2086_v3 = vor.u32 1.1754944e-38, %v2085_v48 }
 0x458   : > { %v4984_v55 = vpop.eup %3605  ;;  %v1915_v30 = vsel %vm1912_vm4, %v1914_v26, %v1910_v18  ;;  %v1924_v43 = vunpack.c.l.b16 %v1918_v6  ;;  %vm2084_vm5 = vcmp.eq.f32.partialorder %v2083_v8, 8.507059e+37  ;;  %v2270_v49 = vand.u32 2147483647, %v4955_v1 }
 0x459   : > { %v1748_v41 = vpack.c.b16 %v1747_v39, %v1746_v0  ;;  %v4982_v5 = vpop.xlane.xlu0 %2054  ;;  %v2078_v47 = vadd.f32 %v4944_v33, %v2077_v14  ;;  %v2262_v35 = vmul.f32 %v4984_v55, %v4955_v1  ;;  %v1923_v23 = vunpack.c.l.b16 %v1917_v45  ;;  %v5526_v45 = vld [vmem:[#allocation26_spill] sm:$0xff] }
 0x45a   : > { %vm2267_vm9 = vweird.f32 %v4984_v55  ;;  %vm2266_vm12 = vweird.f32 %v4955_v1  ;;  %vm5044_vm1 = vcmp.eq.f32.partialorder %v2270_v49, 8.507059e+37 }
 0x45b   : > { %3308 = vmatmul.msk.bf16.vlgmr.msrb.gmra.mxu0 %vm810_vm15, %v1748_v41  ;;  %v2082_v44 = vsel %vm2081_vm3, %v4944_v33, %v2078_v47  ;;  %v2263_v10 = vsub.f32 1.0, %v2262_v35  ;;  %v1916_v33 = vmul.f32 %v4413_v42, %v1915_v30  ;;  %v1925_v0 = vpack.c.b16 %v1924_v43, %v1923_v23  ;;  %vm5040_vm13 = vmor %vm2266_vm12, %vm2267_vm9 }
 0x45c   : > { %v2087_v61 = vsel %vm2084_vm5, %v2086_v3, %v2082_v44  ;;  %vm2094_vm9 = vweird.f32 %v4982_v5 }
 0x45d   : > { %v2088_v34 = vmul.f32 %v4427_v60, %v2087_v61  ;;  %v2264_v4 = vmul.f32 %v4984_v55, %v2263_v10  ;;  %v1920_v12 = vpack.c.bf16 %v1916_v33, %v1916_v33  ;;  %v2098_v33 = vand.u32 2147483647, %v4982_v5 }
 0x45e   : > { %3307 = vmatmul.msk.bf16.vlgmr.msra.gmra.mxu3 %vm810_vm15, %v1723_v13 }
 0x45f   : > { %v2120_v53 = vpack.c.bf16 %v2088_v34, %v2088_v34  ;;  %v2265_v7 = vadd.f32 %v4984_v55, %v2264_v4  ;;  %v5034_v14 = vunpack.c.l.b16 %v1920_v12 }
 0x460   : > { %v4977_v54 = vpop.xlane.xlu1 %2057 }
 0x461   : > { %v4972_v63 = vpop.xlane.xlu2 %2048  ;;  %v2126_v24 = vunpack.c.l.b16 %v2120_v53  ;;  %v2113_v35 = vand.u32 2147483647, %v4977_v54  ;;  %v2115_v3 = vand.u32 2147483648, %v4977_v54 }
 0x462   : > { %3607 = vrcp.f32 %v4972_v63  ;;  %v2070_v38 = vand.u32 2147483648, %v4972_v63  ;;  %v2068_v32 = vand.u32 2147483647, %v4972_v63  ;;  %vm2064_vm6 = vweird.f32 %v4972_v63 }
 0x463   : > { %3609 = vrcp.f32 %v4977_v54 }
 0x464   : > { %3611 = vrcp.f32 %v4982_v5  ;;  %v2071_v19 = vor.u32 1.1754944e-38, %v2070_v38  ;;  %vm2069_vm10 = vcmp.eq.f32.partialorder %v2068_v32, 8.507059e+37  ;;  %v2100_v38 = vand.u32 2147483648, %v4982_v5 }
 0x466   : > { %v2101_v12 = vor.u32 1.1754944e-38, %v2100_v38 }
 0x468   : > { %v3608_v56 = vpop.eup %3607 }
 0x469   : > { %v5005_v15 = vpop.xlane.xlu2 %1852  ;;  %v2060_v51 = vmul.f32 %v3608_v56, %v4972_v63  ;;  %v5009_v22 = vpop.eup %3609  ;;  %vm2065_vm7 = vweird.f32 %v3608_v56  ;;  %v2272_v63 = vand.u32 2147483648, %v4955_v1  ;;  %v2269_v1 = vsel %vm5040_vm13, %v4984_v55, %v2265_v7 }
 0x46a   : > { %3613 = vrcp.f32 %v5005_v15  ;;  %v5011_v21 = vpop.eup %3611  ;;  %v2105_v39 = vmul.f32 %v5009_v22, %v4977_v54  ;;  %vm2066_vm8 = vmor %vm2064_vm6, %vm2065_vm7  ;;  %v1898_v13 = vand.u32 2147483648, %v5005_v15  ;;  %v1896_v57 = vand.u32 2147483647, %v5005_v15 }
 0x46b   : > { %v2061_v40 = vsub.f32 1.0, %v2060_v51  ;;  %v2090_v37 = vmul.f32 %v5011_v21, %v4982_v5  ;;  %vm1892_vm2 = vweird.f32 %v5005_v15  ;;  %vm2095_vm5 = vweird.f32 %v5011_v21 }
 0x46c   : > { %v2129_v20 = vpop.permute.xlu0 %2128  ;;  %v2106_v25 = vsub.f32 1.0, %v2105_v39  ;;  %v1899_v47 = vor.u32 1.1754944e-38, %v1898_v13  ;;  %vm1897_vm4 = vcmp.eq.f32.partialorder %v1896_v57, 8.507059e+37  ;;  %vm2109_vm7 = vweird.f32 %v4977_v54 }
 0x46d   : > { %2141 = vmatpush.bf16.msra.mxu3 %v2129_v20  ;;  %v2062_v9 = vmul.f32 %v3608_v56, %v2061_v40  ;;  %v2091_v28 = vsub.f32 1.0, %v2090_v37  ;;  %vm2110_vm6 = vweird.f32 %v5009_v22  ;;  %v2273_v23 = vor.u32 1.1754944e-38, %v2272_v63 }
 0x46e   : > { %3311 = vmatmul.msk.bf16.vlgmr.msrb.gmra.mxu3 %vm810_vm15, %v1925_v0  ;;  %v2107_v31 = vmul.f32 %v5009_v22, %v2106_v25  ;;  %vm2114_vm13 = vcmp.eq.f32.partialorder %v2113_v35, 8.507059e+37  ;;  %v2116_v0 = vor.u32 1.1754944e-38, %v2115_v3 }
 0x46f   : > { %v2063_v42 = vadd.f32 %v3608_v56, %v2062_v9  ;;  %v2092_v11 = vmul.f32 %v5011_v21, %v2091_v28  ;;  %v2274_v54 = vsel %vm5044_vm1, %v2273_v23, %v2269_v1  ;;  %vm2099_vm1 = vcmp.eq.f32.partialorder %v2098_v33, 8.507059e+37 }
 0x470   : > { %v3614_v58 = vpop.eup %3613  ;;  %v2108_v55 = vadd.f32 %v5009_v22, %v2107_v31 }
 0x471   : > { %v1888_v60 = vmul.f32 %v3614_v58, %v5005_v15  ;;  %v5026_v16 = vpop.xlane.xlu2 %2253  ;;  %v2067_v41 = vsel %vm2066_vm8, %v3608_v56, %v2063_v42  ;;  %vm1893_vm11 = vweird.f32 %v3614_v58  ;;  %v2093_v30 = vadd.f32 %v5011_v21, %v2092_v11 }
 0x472   : > { %3615 = vrcp.f32 %v5026_v16  ;;  %v2072_v17 = vsel %vm2069_vm10, %v2071_v19, %v2067_v41  ;;  %vm1894_vm3 = vmor %vm1892_vm2, %vm1893_vm11  ;;  %v2285_v51 = vand.u32 2147483647, %v5026_v16  ;;  %v2287_v43 = vand.u32 2147483648, %v5026_v16  ;;  %v5532_v41 = vld [vmem:[#allocation27_spill] sm:$0xff] }
 0x473   : > { %v1889_v59 = vsub.f32 1.0, %v1888_v60  ;;  %v2073_v29 = vmul.f32 %v4447_v62, %v2072_v17  ;;  %vm5073_vm10 = vmor %vm2109_vm7, %vm2110_vm6  ;;  %vm2281_vm12 = vweird.f32 %v5026_v16  ;;  %v5531_v60 = vld [vmem:[#allocation23_spill] sm:$0xff] }
 0x474   : > { %vm5079_vm11 = vmor %vm2094_vm9, %vm2095_vm5  ;;  %v2112_v34 = vsel %vm5073_vm10, %v5009_v22, %v2108_v55 }
 0x475   : > { %v1890_v46 = vmul.f32 %v3614_v58, %v1889_v59  ;;  %v2119_v52 = vpack.c.bf16 %v2073_v29, %v2073_v29  ;;  %v2097_v4 = vsel %vm5079_vm11, %v5011_v21, %v2093_v30  ;;  %v2117_v49 = vsel %vm2114_vm13, %v2116_v0, %v2112_v34  ;;  %v5533_v59 = vld [vmem:[#allocation25_spill] sm:$0xff] }
 0x476   : > { %v2102_v21 = vsel %vm2099_vm1, %v2101_v12, %v2097_v4  ;;  %v2118_v7 = vmul.f32 %v5533_v59, %v2117_v49  ;;  %vm2498_vm13 = vcmask 97280   ;;  %vm2517_vm1 = vcmask 228352  }
 0x477   : > { %v1891_v50 = vadd.f32 %v3614_v58, %v1890_v46  ;;  %v2125_v18 = vunpack.c.l.b16 %v2119_v52  ;;  %v931_v61 = vpop.f32.mrf.mxu0  ;;  %v5534_v46 = vld [vmem:[#allocation24_spill] sm:$0xff] }
 0x478   : > { %v3616_v27 = vpop.eup %3615  ;;  %v1952_v8 = vpop.permute.xlu1 %1951  ;;  %v961_v25 = vpack.c.bf16 %v931_v61, %v931_v61  ;;  %v2103_v57 = vmul.f32 %v5534_v46, %v2102_v21  ;;  %v2122_v52 = vpack.c.bf16 %v2118_v7, %v2118_v7 }
 0x479   : > { %v1895_v48 = vsel %vm1894_vm3, %v3614_v58, %v1891_v50  ;;  %v2277_v6 = vmul.f32 %v3616_v27, %v5026_v16  ;;  %v2331_v26 = vpop.permute.xlu2 %2330  ;;  %1964 = vmatpush.bf16.msra.mxu0 %v1952_v8  ;;  %vm2282_vm8 = vweird.f32 %v3616_v27  ;;  %v2127_v20 = vpack.c.b16 %v2126_v24, %v2125_v18 }
 0x47a   : > { %v1900_v56 = vsel %vm1897_vm4, %v1899_v47, %v1895_v48  ;;  %2343 = vmatpush.bf16.msrb.mxu3 %v2331_v26  ;;  %vm2283_vm2 = vmor %vm2281_vm12, %vm2282_vm8  ;;  %v2288_v58 = vor.u32 1.1754944e-38, %v2287_v43  ;;  %vm2286_vm3 = vcmp.eq.f32.partialorder %v2285_v51, 8.507059e+37  ;;  %v2275_v16 = vmul.f32 %v5531_v60, %v2274_v54 }
 0x47b   : > { %v1901_v44 = vmul.f32 %v5526_v45, %v1900_v56  ;;  %v2278_v15 = vsub.f32 1.0, %v2277_v6  ;;  %v2151_v24 = vunpack.c.l.b16 %v2122_v52  ;;  %vm2493_vm12 = vcmask 64512  }
 0x47c   : > { %v2321_v13 = vpack.c.bf16 %v2275_v16, %v2275_v16 }
 0x47d   : > { %v1919_v10 = vpack.c.bf16 %v1901_v44, %v1901_v44  ;;  %v2279_v40 = vmul.f32 %v3616_v27, %v2278_v15 }
 0x47e   : > { %3315 = vmatmul.msk.bf16.vlgmr.msra.gmra.mxu3 %vm810_vm15, %v2127_v20  ;;  %v2327_v50 = vunpack.c.l.b16 %v2321_v13 }
 0x47f   : > { %v1948_v39 = vunpack.c.l.b16 %v1919_v10  ;;  %v2280_v5 = vadd.f32 %v3616_v27, %v2279_v40  ;;  %v933_v17 = vpop.f32.mrf.mxu0 }
 0x480   : > { %v962_v29 = vpack.c.bf16 %v933_v17, %v933_v17 }
 0x481   : > { %v2284_v37 = vsel %vm2283_vm2, %v3616_v27, %v2280_v5  ;;  %v2154_v22 = vpop.permute.xlu2 %2153  ;;  %v1950_v42 = vpack.c.b16 %v5034_v14, %v1948_v39  ;;  %v5100_v14 = vunpack.c.l.b16 %v961_v25  ;;  %v2121_v27 = vpack.c.bf16 %v2103_v57, %v2103_v57 }
 0x482   : > { %v2289_v19 = vsel %vm2286_vm3, %v2288_v58, %v2284_v37  ;;  %2166 = vmatpush.bf16.msrb.mxu0 %v2154_v22  ;;  %v5102_v63 = vunpack.c.l.b16 %v962_v29  ;;  %v5535_v37 = vld [vmem:[#allocation28_spill] sm:$0xff]  ;;  %vm2507_vm2 = vcmask 162816   ;;  %vm2512_vm3 = vcmask 195584  }
 0x483   : > { %v2290_v53 = vmul.f32 %v5532_v41, %v2289_v19  ;;  %3312 = vmatmul.msk.bf16.vlgmr.msra.gmra.mxu0 %vm810_vm15, %v1950_v42  ;;  %v2150_v11 = vunpack.c.l.b16 %v2121_v27 }
 0x484   : > { %v2387_v62 = vpack.c.b16 %v5102_v63, %v5100_v14 }
 0x485   : > { %v2322_v28 = vpack.c.bf16 %v2290_v53, %v2290_v53  ;;  %v2152_v47 = vpack.c.b16 %v2151_v24, %v2150_v11 }
 0x487   : > { %v2328_v36 = vunpack.c.l.b16 %v2322_v28 }
 0x489   : > { %v2356_v31 = vpop.permute.xlu2 %2355  ;;  %v2329_v1 = vpack.c.b16 %v2328_v36, %v2327_v50 }
 0x48a   : > { %2368 = vmatpush.bf16.msra.mxu0 %v2356_v31 }
 0x48e   : > { %3319 = vmatmul.msk.bf16.vlgmr.msrb.gmra.mxu3 %vm810_vm15, %v2329_v1 }
 0x493   : > { %3316 = vmatmul.msk.bf16.vlgmr.msrb.gmra.mxu0 %vm810_vm15, %v2152_v47 }
 0x497   : > { %v2257_v18 = vpop.xlane.xlu0 %2256 }
 0x498   : > { %3617 = vrcp.f32 %v2257_v18  ;;  %v2302_v44 = vand.u32 2147483648, %v2257_v18  ;;  %vm2296_vm5 = vweird.f32 %v2257_v18  ;;  %v2300_v15 = vand.u32 2147483647, %v2257_v18 }
 0x49a   : > { %v2303_v10 = vor.u32 1.1754944e-38, %v2302_v44  ;;  %vm2301_vm6 = vcmp.eq.f32.partialorder %v2300_v15, 8.507059e+37 }
 0x49e   : > { %v3618_v48 = vpop.eup %3617 }
 0x49f   : > { %v2292_v6 = vmul.f32 %v3618_v48, %v2257_v18  ;;  %v1158_v55 = vpop.f32.mrf.mxu0  ;;  %vm2297_vm4 = vweird.f32 %v3618_v48 }
 0x4a0   : > { %vm2298_vm7 = vmor %vm2296_vm5, %vm2297_vm4  ;;  %v1165_v20 = vpack.c.bf16 %v1158_v55, %v1158_v55 }
 0x4a1   : > { %v2293_v8 = vsub.f32 1.0, %v2292_v6  ;;  %v956_v26 = vpop.f32.mrf.mxu3 }
 0x4a2   : > { %v963_v3 = vpack.c.bf16 %v956_v26, %v956_v26  ;;  %v5114_v58 = vunpack.c.l.b16 %v1165_v20 }
 0x4a3   : > { %v2294_v35 = vmul.f32 %v3618_v48, %v2293_v8  ;;  %v2260_v56 = vpop.xlane.xlu1 %2259 }
 0x4a4   : > { %3619 = vrcp.f32 %v2260_v56  ;;  %v2317_v33 = vand.u32 2147483648, %v2260_v56  ;;  %v5108_v9 = vunpack.c.l.b16 %v963_v3  ;;  %v2315_v54 = vand.u32 2147483647, %v2260_v56 }
 0x4a5   : > { %v2295_v45 = vadd.f32 %v3618_v48, %v2294_v35  ;;  %vm2311_vm9 = vweird.f32 %v2260_v56 }
 0x4a6   : > { %v2318_v12 = vor.u32 1.1754944e-38, %v2317_v33  ;;  %vm2316_vm11 = vcmp.eq.f32.partialorder %v2315_v54, 8.507059e+37 }
 0x4a7   : > { %v2299_v51 = vsel %vm2298_vm7, %v3618_v48, %v2295_v45  ;;  %v1160_v38 = vpop.f32.mrf.mxu0 }
 0x4a8   : > { %v2304_v32 = vsel %vm2301_vm6, %v2303_v10, %v2299_v51  ;;  %v1166_v39 = vpack.c.bf16 %v1160_v38, %v1160_v38 }
 0x4a9   : > { %v958_v43 = vpop.f32.mrf.mxu3  ;;  %v2305_v22 = vmul.f32 %v5535_v37, %v2304_v32 }
 0x4aa   : > { %v3620_v30 = vpop.eup %3619  ;;  %v964_v40 = vpack.c.bf16 %v958_v43, %v958_v43  ;;  %v5116_v4 = vunpack.c.l.b16 %v1166_v39 }
 0x4ab   : > { %v2307_v61 = vmul.f32 %v3620_v30, %v2260_v56  ;;  %vm2312_vm8 = vweird.f32 %v3620_v30  ;;  %v2323_v41 = vpack.c.bf16 %v2305_v22, %v2305_v22 }
 0x4ac   : > { %v5110_v34 = vunpack.c.l.b16 %v964_v40  ;;  %vm2313_vm10 = vmor %vm2311_vm9, %vm2312_vm8  ;;  %v2398_v49 = vpack.c.b16 %v5116_v4, %v5114_v58 }
 0x4ad   : > { %v2308_v23 = vsub.f32 1.0, %v2307_v61  ;;  %v2352_v21 = vunpack.c.l.b16 %v2323_v41 }
 0x4ae   : > { %v2388_v0 = vpack.c.b16 %v5110_v34, %v5108_v9  ;;  %v3474_v34 = vld [vmem:[%s5405_s6] ss:$0 sm:$0xff] }
 0x4af   : > { %v2309_v5 = vmul.f32 %v3620_v30, %v2308_v23  ;;  %v1360_v36 = vpop.f32.mrf.mxu0 }
 0x4b0   : > { %v1367_v45 = vpack.c.bf16 %v1360_v36, %v1360_v36 }
 0x4b1   : > { %v2310_v42 = vadd.f32 %v3620_v30, %v2309_v5  ;;  %v1133_v60 = vpop.f32.mrf.mxu3 }
 0x4b2   : > { %v1163_v59 = vpack.c.bf16 %v1133_v60, %v1133_v60  ;;  %v2409_v3 = vunpack.c.l.b16 %v1367_v45 }
 0x4b3   : > { %v2314_v19 = vsel %vm2313_vm10, %v3620_v30, %v2310_v42 }
 0x4b4   : > { %v2319_v16 = vsel %vm2316_vm11, %v2318_v12, %v2314_v19  ;;  %v2393_v13 = vunpack.c.l.b16 %v1163_v59 }
 0x4b5   : > { %v2320_v53 = vmul.f32 %v4590_v2, %v2319_v16 }
 0x4b7   : > { %v2324_v25 = vpack.c.bf16 %v2320_v53, %v2320_v53  ;;  %v1362_v11 = vpop.f32.mrf.mxu0 }
 0x4b8   : > { %v1368_v56 = vpack.c.bf16 %v1362_v11, %v1362_v11 }
 0x4b9   : > { %v2353_v17 = vunpack.c.l.b16 %v2324_v25  ;;  %v1135_v7 = vpop.f32.mrf.mxu3 }
 0x4ba   : > { %v1164_v29 = vpack.c.bf16 %v1135_v7, %v1135_v7  ;;  %v2410_v15 = vunpack.c.l.b16 %v1368_v56 }
 0x4bb   : > { %v2354_v28 = vpack.c.b16 %v2353_v17, %v2352_v21 }
 0x4bc   : > { %v2394_v46 = vunpack.c.l.b16 %v1164_v29  ;;  %v2412_v51 = vpack.c.b16 %v2410_v15, %v2409_v3 }
 0x4bd   : > { %3320 = vmatmul.msk.bf16.vlgmr.msra.gmra.mxu0 %vm810_vm15, %v2354_v28 }
 0x4be   : > { %v2397_v57 = vpack.c.b16 %v2394_v46, %v2393_v13 }
 0x4bf   : > { %v5125_v48 = vpop.f32.mrf.mxu0 }
 0x4c0   : > { %2399 = vrot.lane.b32.xlu0 %v2397_v57, %s3822_s30 }
 0x4c1   : > { %v1335_v52 = vpop.f32.mrf.mxu3 }
 0x4c2   : > { %v1365_v31 = vpack.c.bf16 %v1335_v52, %v1335_v52 }
 0x4c4   : > { %v2407_v27 = vunpack.c.l.b16 %v1365_v31 }
 0x4c7   : > { %v1564_v30 = vpop.f32.mrf.mxu0 }
 0x4c9   : > { %v1337_v50 = vpop.f32.mrf.mxu3 }
 0x4ca   : > { %v1366_v2 = vpack.c.bf16 %v1337_v50, %v1337_v50 }
 0x4cc   : > { %v2408_v24 = vunpack.c.l.b16 %v1366_v2 }
 0x4ce   : > { %v2411_v1 = vpack.c.b16 %v2408_v24, %v2407_v27 }
 0x4d0   : > { %2413 = vrot.lane.b32.xlu2 %v2411_v1, %s3823_s12 }
 0x4d1   : > { %v1537_v47 = vpop.f32.mrf.mxu3 }
 0x4d2   : > { %v1567_v18 = vpack.c.bf16 %v1537_v47, %v1537_v47  ;;  %v1570_v47 = vpack.c.bf16 %v1564_v30, %v1564_v30 }
 0x4d4   : > { %v2421_v26 = vunpack.c.l.b16 %v1567_v18 }
 0x4d8   : > { %v1764_v40 = vpop.f32.mrf.mxu0 }
 0x4d9   : > { %v1539_v6 = vpop.f32.mrf.mxu3  ;;  %v1771_v52 = vpack.c.bf16 %v1764_v40, %v1764_v40  ;;  %v3369_v40 = vld [vmem:[%s5404_s5] sm:$0xff] }
 0x4da   : > { %v1568_v8 = vpack.c.bf16 %v1539_v6, %v1539_v6 }
 0x4db   : > { %v2437_v24 = vunpack.c.l.b16 %v1771_v52 }
 0x4dc   : > { %v2422_v35 = vunpack.c.l.b16 %v1568_v8  ;;  %v1569_v8 = vpack.c.bf16 %v5125_v48, %v5125_v48 }
 0x4de   : > { %v2425_v55 = vpack.c.b16 %v2422_v35, %v2421_v26  ;;  %v2424_v26 = vunpack.c.l.b16 %v1570_v47  ;;  %v2423_v4 = vunpack.c.l.b16 %v1569_v8  ;;  %v5536_v47 = vld [vmem:[#allocation18_spill] sm:$0xff] }
 0x4e0   : > { %2427 = vrot.lane.b32.xlu1 %v2425_v55, %s3824_s15  ;;  %v1766_v32 = vpop.f32.mrf.mxu0 }
 0x4e1   : > { %v1739_v44 = vpop.f32.mrf.mxu3  ;;  %v1772_v57 = vpack.c.bf16 %v1766_v32, %v1766_v32 }
 0x4e2   : > { %v1769_v43 = vpack.c.bf16 %v1739_v44, %v1739_v44 }
 0x4e3   : > { %v2438_v2 = vunpack.c.l.b16 %v1772_v57 }
 0x4e4   : > { %v2435_v20 = vunpack.c.l.b16 %v1769_v43 }
 0x4e5   : > { %v2440_v18 = vpack.c.b16 %v2438_v2, %v2437_v24 }
 0x4e8   : > { %2415 = vrot.lane.b32.xlu1 %v2412_v51, %s3823_s12 }
 0x4e9   : > { %v1741_v61 = vpop.f32.mrf.mxu3 }
 0x4ea   : > { %v1770_v10 = vpack.c.bf16 %v1741_v61, %v1741_v61 }
 0x4ec   : > { %v2436_v23 = vunpack.c.l.b16 %v1770_v10  ;;  %v3370_v10 = vld [vmem:[%s5404_s5 + $0x8] sm:$0xff] }
 0x4ed   : > { %2552 = vmatpush.bf16.msra.mxu1 %v3370_v10 }
 0x4ee   : > { %v2439_v33 = vpack.c.b16 %v2436_v23, %v2435_v20 }
 0x4f0   : > { %2441 = vrot.lane.b32.xlu2 %v2439_v33, %s3825_s17 }
 0x4f1   : > { %v1941_v38 = vpop.f32.mrf.mxu3  ;;  %2553 = vmatpush.bf16.msra.mxu1 %v3369_v40 }
 0x4f2   : > { %v1971_v39 = vpack.c.bf16 %v1941_v38, %v1941_v38 }
 0x4f4   : > { %v2449_v37 = vunpack.c.l.b16 %v1971_v39 }
 0x4f9   : > { %v1943_v5 = vpop.f32.mrf.mxu3 }
 0x4fa   : > { %v1972_v54 = vpack.c.bf16 %v1943_v5, %v1943_v5 }
 0x4fc   : > { %v2450_v22 = vunpack.c.l.b16 %v1972_v54 }
 0x4fe   : > { %v2453_v12 = vpack.c.b16 %v2450_v22, %v2449_v37 }
 0x500   : > { %v1966_v42 = vpop.f32.mrf.mxu0  ;;  %2455 = vrot.lane.b32.xlu0 %v2453_v12, %s3826_s20 }
 0x501   : > { %v2143_v19 = vpop.f32.mrf.mxu3  ;;  %v1973_v60 = vpack.c.bf16 %v1966_v42, %v1966_v42 }
 0x502   : > { %v2173_v53 = vpack.c.bf16 %v2143_v19, %v2143_v19 }
 0x503   : > { %v2451_v25 = vunpack.c.l.b16 %v1973_v60 }
 0x504   : > { %v2463_v28 = vunpack.c.l.b16 %v2173_v53 }
 0x508   : > { %v1968_v16 = vpop.f32.mrf.mxu0 }
 0x509   : > { %v1974_v41 = vpack.c.bf16 %v1968_v16, %v1968_v16  ;;  %v2145_v17 = vpop.f32.mrf.mxu3 }
 0x50a   : > { %v2174_v59 = vpack.c.bf16 %v2145_v17, %v2145_v17 }
 0x50b   : > { %v2452_v21 = vunpack.c.l.b16 %v1974_v41 }
 0x50c   : > { %v2464_v29 = vunpack.c.l.b16 %v2174_v59 }
 0x50d   : > { %v2454_v7 = vpack.c.b16 %v2452_v21, %v2451_v25 }
 0x50e   : > { %v2467_v13 = vpack.c.b16 %v2464_v29, %v2463_v28 }
 0x50f   : > { %2457 = vrot.lane.b32.xlu1 %v2454_v7, %s3826_s20  ;;  %s3378_s20 = sshll.u32 %s3942_s28, 5  ;;  %s3168_s28 = scalar_lea.sflag [#allocation4], %s4018_s22 }
 0x510   : > { %2469 = vrot.lane.b32.xlu2 %v2467_v13, %s3827_s23  ;;  %v2168_v31 = vpop.f32.mrf.mxu0 }
 0x511   : > { %v2345_v46 = vpop.f32.mrf.mxu3  ;;  %v2175_v56 = vpack.c.bf16 %v2168_v31, %v2168_v31 }
 0x512   : > { %v2375_v36 = vpack.c.bf16 %v2345_v46, %v2345_v46 }
 0x513   : > { %v2465_v45 = vunpack.c.l.b16 %v2175_v56 }
 0x514   : > { %v2477_v1 = vunpack.c.l.b16 %v2375_v36 }
 0x518   : > { %2401 = vrot.lane.b32.xlu2 %v2398_v49, %s3822_s30  ;;  %v2170_v58 = vpop.f32.mrf.mxu0  ;;  %v2426_v49 = vpack.c.b16 %v2424_v26, %v2423_v4  ;;  %s5543_s30 = smov %s5542_s27 }
 0x519   : > { %v2347_v50 = vpop.f32.mrf.mxu3  ;;  %v2176_v35 = vpack.c.bf16 %v2170_v58, %v2170_v58 }
 0x51a   : > { %v2376_v27 = vpack.c.bf16 %v2347_v50, %v2347_v50 }
 0x51b   : > { %v2466_v55 = vunpack.c.l.b16 %v2176_v35 }
 0x51c   : > { %v2478_v11 = vunpack.c.l.b16 %v2376_v27 }
 0x51d   : > { %v2468_v44 = vpack.c.b16 %v2466_v55, %v2465_v45 }
 0x51e   : > { %v2481_v6 = vpack.c.b16 %v2478_v11, %v2477_v1 }
 0x520   : > { %2483 = vrot.lane.b32.xlu0 %v2481_v6, %s3828_s18  ;;  %2443 = vrot.lane.b32.xlu2 %v2440_v18, %s3825_s17  ;;  %s584_s17 = scalar_lea.vmem [#allocation7], %s3276_s26  ;;  %s5548_s26 = sld [smem:[#allocation36_spill]] }
 0x526   : > { %s5549_s1 = smov %s5548_s26  ;;  %s3180_s24 = scalar_lea.hbm %s5548_s26, %s3378_s20 }
 0x527   : > { %s3183_s21 = sshll.u32 %s3180_s24, 4  ;;  %s3184_s21 = int_to_ptr.hbm [resolvable:$true] %s3183_s21 }
 0x528   : > { %2429 = vrot.lane.b32.xlu0 %v2426_v49, %s3824_s15  ;;  %s5546_s15 = sld [smem:[#allocation35_spill]] }
 0x52a   : > { %v2414_v20 = vpop.permute.xlu2 %2413 }
 0x530   : > { %2471 = vrot.lane.b32.xlu0 %v2468_v44, %s3827_s23 }
 0x532   : > { %v2400_v33 = vpop.permute.xlu0 %2399 }
 0x533   : > { %v2489_v32 = vsel %vm762_vm14, %v2387_v62, %v2400_v33 }
 0x534   : > { %v2495_v5 = vsel %vm2493_vm12, %v2489_v32, %v2414_v20 }
 0x53a   : > { %v2370_v15 = vpop.f32.mrf.mxu0 }
 0x53b   : > { %v2377_v30 = vpack.c.bf16 %v2370_v15, %v2370_v15 }
 0x53d   : > { %v2479_v51 = vunpack.c.l.b16 %v2377_v30 }
 0x542   : > { %v2372_v48 = vpop.f32.mrf.mxu0 }
 0x543   : > { %v2378_v3 = vpack.c.bf16 %v2372_v48, %v2372_v48 }
 0x545   : > { %v2480_v43 = vunpack.c.l.b16 %v2378_v3 }
 0x547   : > { %v2482_v61 = vpack.c.b16 %v2480_v43, %v2479_v51 }
 0x549   : > { %2485 = vrot.lane.b32.xlu2 %v2482_v61, %s3828_s18 }
 0x54a   : > { %v2442_v23 = vpop.permute.xlu2 %2441 }
 0x552   : > { %v2428_v39 = vpop.permute.xlu1 %2427 }
 0x553   : > { %v2500_v37 = vsel %vm2498_vm13, %v2495_v5, %v2428_v39 }
 0x554   : > { %v2504_v22 = vsel %vm810_vm15, %v2500_v37, %v2442_v23 }
 0x55a   : > { %v2416_v60 = vpop.permute.xlu1 %2415 }
 0x56a   : > { %v2470_v38 = vpop.permute.xlu2 %2469 }
 0x572   : > { %v2456_v54 = vpop.permute.xlu0 %2455  ;;  %v2402_v12 = vpop.permute.xlu2 %2401 }
 0x573   : > { %v2509_v42 = vsel %vm2507_vm2, %v2504_v22, %v2456_v54  ;;  %v2492_v19 = vsel %vm762_vm14, %v2388_v0, %v2402_v12 }
 0x574   : > { %v2514_v14 = vsel %vm2512_vm3, %v2509_v42, %v2470_v38  ;;  %v2497_v53 = vsel %vm2493_vm12, %v2492_v19, %v2416_v60  ;;  %v3475_v19 = vld [vmem:[%s5406_s7] ss:$0 sm:$0xff] }
 0x57a   : > { %v2444_v16 = vpop.permute.xlu2 %2443 }
 0x581   : > { %v2458_v17 = vpop.permute.xlu1 %2457 }
 0x592   : > { %v2484_v63 = vpop.permute.xlu0 %2483 }
 0x593   : > { %v2519_v62 = vsel %vm2517_vm1, %v2514_v14, %v2484_v63 }
 0x594   : > { %3329 = vmatmul.msk.bf16.vlgmr.msra.gmra.mxu1 %vm594_vm0, %v2519_v62 }
 0x59a   : > { %v2430_v41 = vpop.permute.xlu0 %2429 }
 0x59b   : > { %v2502_v25 = vsel %vm2498_vm13, %v2497_v53, %v2430_v41  ;;  %v3476_v53 = vld [vmem:[%s5407_s8] ss:$0 sm:$0xff] }
 0x59c   : > { %v2506_v21 = vsel %vm810_vm15, %v2502_v25, %v2444_v16 }
 0x59d   : > { %v2511_v7 = vsel %vm2507_vm2, %v2506_v21, %v2458_v17 }
 0x5a2   : > { %v2472_v28 = vpop.permute.xlu0 %2471 }
 0x5a3   : > { %v2486_v59 = vpop.permute.xlu2 %2485  ;;  %v2516_v29 = vsel %vm2512_vm3, %v2511_v7, %v2472_v28 }
 0x5a4   : > { %v2521_v9 = vsel %vm2517_vm1, %v2516_v29, %v2486_v59 }
 0x5a5   : > { %3330 = vmatmul.msk.bf16.gmra.mxu1 %vm594_vm0, %v2521_v9 }
 0x611   : > { %v2555_v0 = vpop.f32.mrf.mxu1 }
 0x612   : > { %v2556_v13 = vadd.f32 %v3474_v34, %v2555_v0 }
 0x614   : > { %v2567_v46 = vsel %vm594_vm0, %v2556_v13, 0.0 }
 0x615   : > { %2568 = vadd.xlane.f32.xlu1 %v2567_v46 }
 0x619   : > { %v2557_v57 = vpop.f32.mrf.mxu1 }
 0x61a   : > { %v2558_v52 = vadd.f32 %v3474_v34, %v2557_v57 }
 0x61c   : > { %v2570_v36 = vsel %vm594_vm0, %v2558_v52, 0.0 }
 0x61d   : > { %2571 = vadd.xlane.f32.xlu0 %v2570_v36 }
 0x622   : > { %v2560_v31 = vpop.f32.mrf.mxu1 }
 0x623   : > { %v2561_v50 = vadd.f32 %v3474_v34, %v2560_v31 }
 0x625   : > { %v2573_v2 = vsel %vm594_vm0, %v2561_v50, 0.0 }
 0x626   : > { %2574 = vadd.xlane.f32.xlu2 %v2573_v2 }
 0x62a   : > { %v2562_v27 = vpop.f32.mrf.mxu1 }
 0x62b   : > { %v2563_v24 = vadd.f32 %v3474_v34, %v2562_v27 }
 0x62d   : > { %v2576_v1 = vsel %vm594_vm0, %v2563_v24, 0.0 }
 0x62e   : > { %2577 = vadd.xlane.f32.xlu1 %v2576_v1 }
 0x688   : > { %v2569_v11 = vpop.xlane.xlu1 %2568 }
 0x689   : > { %v2579_v18 = vmul.f32 %v2569_v11, %v5536_v47 }
 0x68b   : > { %v2583_v6 = vsub.f32 %v2556_v13, %v2579_v18  ;;  %v5537_v13 = vld [vmem:[#allocation19_spill] sm:$0xff] }
 0x68d   : > { %v2587_v8 = vmul.f32 %v2583_v6, %v2583_v6 }
 0x68f   : > { %v2591_v26 = vsel %vm594_vm0, %v2587_v8, 0.0 }
 0x690   : > { %2592 = vadd.xlane.f32.xlu0 %v2591_v26  ;;  %v2572_v58 = vpop.xlane.xlu0 %2571 }
 0x691   : > { %v2580_v4 = vmul.f32 %v2572_v58, %v5536_v47 }
 0x693   : > { %v2584_v49 = vsub.f32 %v2558_v52, %v2580_v4 }
 0x695   : > { %v2588_v35 = vmul.f32 %v2584_v49, %v2584_v49 }
 0x697   : > { %v2594_v56 = vsel %vm594_vm0, %v2588_v35, 0.0 }
 0x698   : > { %2595 = vadd.xlane.f32.xlu2 %v2594_v56 }
 0x699   : > { %v2575_v55 = vpop.xlane.xlu2 %2574 }
 0x69a   : > { %v2581_v45 = vmul.f32 %v2575_v55, %v5536_v47 }
 0x69c   : > { %v5180_v44 = vsub.f32 %v2561_v50, %v2581_v45 }
 0x69e   : > { %v2589_v15 = vmul.f32 %v5180_v44, %v5180_v44 }
 0x6a0   : > { %v2597_v30 = vsel %vm594_vm0, %v2589_v15, 0.0 }
 0x6a1   : > { %v2578_v48 = vpop.xlane.xlu1 %2577  ;;  %2598 = vadd.xlane.f32.xlu1 %v2597_v30  ;;  %v5539_v30 = vld [vmem:[#allocation22_spill] sm:$0xff] }
 0x6a2   : > { %v2582_v3 = vmul.f32 %v2578_v48, %v5536_v47 }
 0x6a4   : > { %v5186_v51 = vsub.f32 %v2563_v24, %v2582_v3 }
 0x6a6   : > { %v2590_v43 = vmul.f32 %v5186_v51, %v5186_v51 }
 0x6a8   : > { %v2600_v61 = vsel %vm594_vm0, %v2590_v43, 0.0 }
 0x6a9   : > { %2601 = vadd.xlane.f32.xlu0 %v2600_v61 }
 0x703   : > { %v2593_v10 = vpop.xlane.xlu0 %2592 }
 0x704   : > { %v2603_v40 = vmul.f32 %v2593_v10, %v5536_v47 }
 0x706   : > { %v2607_v20 = vadd.f32 1e-05, %v2603_v40 }
 0x708   : > { %3621 = vrsqrt.f32 %v2607_v20  ;;  %vm2617_vm15 = vweird.f32 %v2607_v20 }
 0x70b   : > { %v2596_v23 = vpop.xlane.xlu2 %2595 }
 0x70c   : > { %v2604_v33 = vmul.f32 %v2596_v23, %v5536_v47 }
 0x70e   : > { %v3622_v38 = vpop.eup %3621  ;;  %v2608_v32 = vadd.f32 1e-05, %v2604_v33 }
 0x70f   : > { %v2612_v39 = vmul.f32 %v3622_v38, %v2607_v20  ;;  %vm2618_vm14 = vweird.f32 %v3622_v38  ;;  %v5540_v20 = vld [vmem:[#allocation21_spill] sm:$0xff] }
 0x710   : > { %3623 = vrsqrt.f32 %v2608_v32  ;;  %vm2619_vm4 = vmor %vm2617_vm15, %vm2618_vm14  ;;  %vm2627_vm7 = vweird.f32 %v2608_v32 }
 0x711   : > { %v2613_v5 = vmul.f32 %v3622_v38, %v2612_v39 }
 0x713   : > { %v2614_v54 = vmul.f32 0.5, %v2613_v5 }
 0x714   : > { %v2599_v37 = vpop.xlane.xlu1 %2598 }
 0x715   : > { %v2615_v22 = vsub.f32 1.5, %v2614_v54  ;;  %v2605_v42 = vmul.f32 %v2599_v37, %v5536_v47 }
 0x716   : > { %v3624_v12 = vpop.eup %3623 }
 0x717   : > { %v2616_v14 = vmul.f32 %v3622_v38, %v2615_v22  ;;  %v2622_v63 = vmul.f32 %v3624_v12, %v2608_v32  ;;  %v2609_v62 = vadd.f32 1e-05, %v2605_v42  ;;  %vm2628_vm5 = vweird.f32 %v3624_v12 }
 0x718   : > { %vm2629_vm6 = vmor %vm2627_vm7, %vm2628_vm5 }
 0x719   : > { %v2620_v60 = vsel %vm2619_vm4, %v3622_v38, %v2616_v14  ;;  %v2623_v16 = vmul.f32 %v3624_v12, %v2622_v63  ;;  %3625 = vrsqrt.f32 %v2609_v62  ;;  %vm2637_vm9 = vweird.f32 %v2609_v62 }
 0x71a   : > { %v2651_v41 = vmul.f32 %v2620_v60, %v2583_v6  ;;  %v5538_v6 = vld [vmem:[#allocation20_spill] sm:$0xff] }
 0x71b   : > { %v2624_v25 = vmul.f32 0.5, %v2623_v16 }
 0x71c   : > { %v2602_v21 = vpop.xlane.xlu0 %2601  ;;  %v2658_v17 = vmul.f32 %v3475_v19, %v2651_v41 }
 0x71d   : > { %v2625_v59 = vsub.f32 1.5, %v2624_v25  ;;  %v2606_v7 = vmul.f32 %v2602_v21, %v5536_v47 }
 0x71e   : > { %v2665_v28 = vadd.f32 %v3476_v53, %v2658_v17 }
 0x71f   : > { %v3626_v29 = vpop.eup %3625  ;;  %v2626_v9 = vmul.f32 %v3624_v12, %v2625_v59  ;;  %v2610_v34 = vadd.f32 1e-05, %v2606_v7 }
 0x720   : > { %v2632_v0 = vmul.f32 %v3626_v29, %v2609_v62  ;;  %v2669_v46 = vadd.f32 %v2665_v28, %v5537_v13  ;;  %vm2638_vm8 = vweird.f32 %v3626_v29  ;;  %v3372_v28 = vld [vmem:[%s5410_s11 + $0x8] sm:$0xff] }
 0x721   : > { %v2630_v57 = vsel %vm2629_vm6, %v3624_v12, %v2626_v9  ;;  %3627 = vrsqrt.f32 %v2610_v34  ;;  %vm2639_vm10 = vmor %vm2637_vm9, %vm2638_vm8  ;;  %vm2647_vm12 = vweird.f32 %v2610_v34  ;;  %2811 = vmatpush.bf16.msra.mxu2 %v3372_v28 }
 0x722   : > { %v2633_v52 = vmul.f32 %v3626_v29, %v2632_v0  ;;  %v2675_v36 = vsel %vm594_vm0, %v2669_v46, 0.0  ;;  %v2652_v31 = vmul.f32 %v2630_v57, %v2584_v49  ;;  %v3371_v57 = vld [vmem:[%s5410_s11] sm:$0xff] }
 0x723   : > { %2676 = vadd.xlane.f32.xlu2 %v2675_v36 }
 0x724   : > { %v2634_v50 = vmul.f32 0.5, %v2633_v52  ;;  %v2659_v2 = vmul.f32 %v3475_v19, %v2652_v31 }
 0x725   : > { %2812 = vmatpush.bf16.msra.mxu2 %v3371_v57 }
 0x726   : > { %v2635_v27 = vsub.f32 1.5, %v2634_v50  ;;  %v2666_v24 = vadd.f32 %v3476_v53, %v2659_v2 }
 0x727   : > { %v3628_v1 = vpop.eup %3627 }
 0x728   : > { %v2636_v11 = vmul.f32 %v3626_v29, %v2635_v27  ;;  %v2642_v18 = vmul.f32 %v3628_v1, %v2610_v34  ;;  %v2670_v8 = vadd.f32 %v2666_v24, %v5538_v6  ;;  %vm2648_vm11 = vweird.f32 %v3628_v1 }
 0x729   : > { %vm2649_vm13 = vmor %vm2647_vm12, %vm2648_vm11 }
 0x72a   : > { %v2640_v26 = vsel %vm2639_vm10, %v3626_v29, %v2636_v11  ;;  %v2643_v58 = vmul.f32 %v3628_v1, %v2642_v18  ;;  %v2678_v4 = vsel %vm594_vm0, %v2670_v8, 0.0 }
 0x72b   : > { %2679 = vadd.xlane.f32.xlu1 %v2678_v4  ;;  %v2653_v49 = vmul.f32 %v2640_v26, %v5180_v44 }
 0x72c   : > { %v2644_v35 = vmul.f32 0.5, %v2643_v58  ;;  %v3477_v58 = vld [vmem:[%s5408_s9] ss:$0 sm:$0xff] }
 0x72d   : > { %v2660_v56 = vmul.f32 %v3475_v19, %v2653_v49 }
 0x72e   : > { %v2645_v55 = vsub.f32 1.5, %v2644_v35 }
 0x72f   : > { %v2667_v45 = vadd.f32 %v3476_v53, %v2660_v56 }
 0x730   : > { %v2646_v15 = vmul.f32 %v3628_v1, %v2645_v55 }
 0x731   : > { %v2671_v48 = vadd.f32 %v2667_v45, %v5539_v30 }
 0x732   : > { %v2650_v3 = vsel %vm2649_vm13, %v3628_v1, %v2646_v15  ;;  %v3478_v15 = vld [vmem:[%s5409_s10] ss:$0 sm:$0xff] }
 0x733   : > { %v2681_v43 = vsel %vm594_vm0, %v2671_v48, 0.0  ;;  %v2654_v61 = vmul.f32 %v2650_v3, %v5186_v51 }
 0x734   : > { %2682 = vadd.xlane.f32.xlu0 %v2681_v43 }
 0x735   : > { %v2661_v10 = vmul.f32 %v3475_v19, %v2654_v61 }
 0x737   : > { %v2668_v40 = vadd.f32 %v3476_v53, %v2661_v10 }
 0x739   : > { %v2672_v44 = vadd.f32 %v2668_v40, %v5540_v20 }
 0x73b   : > { %v2684_v23 = vsel %vm594_vm0, %v2672_v44, 0.0 }
 0x73c   : > { %2685 = vadd.xlane.f32.xlu2 %v2684_v23 }
 0x796   : > { %v2677_v33 = vpop.xlane.xlu2 %2676 }
 0x797   : > { %v2687_v38 = vmul.f32 %v2677_v33, %v5536_v47 }
 0x799   : > { %v2691_v32 = vsub.f32 %v2669_v46, %v2687_v38 }
 0x79b   : > { %v2695_v39 = vmul.f32 %v2691_v32, %v2691_v32 }
 0x79d   : > { %v2699_v5 = vsel %vm594_vm0, %v2695_v39, 0.0 }
 0x79e   : > { %v2680_v54 = vpop.xlane.xlu1 %2679  ;;  %2700 = vadd.xlane.f32.xlu1 %v2699_v5 }
 0x79f   : > { %v2688_v37 = vmul.f32 %v2680_v54, %v5536_v47 }
 0x7a1   : > { %v2692_v51 = vsub.f32 %v2670_v8, %v2688_v37 }
 0x7a3   : > { %v2696_v22 = vmul.f32 %v2692_v51, %v2692_v51 }
 0x7a5   : > { %v2702_v42 = vsel %vm594_vm0, %v2696_v22, 0.0 }
 0x7a6   : > { %2703 = vadd.xlane.f32.xlu0 %v2702_v42 }
 0x7a7   : > { %v2683_v12 = vpop.xlane.xlu0 %2682 }
 0x7a8   : > { %v2689_v14 = vmul.f32 %v2683_v12, %v5536_v47 }
 0x7aa   : > { %v5216_v63 = vsub.f32 %v2671_v48, %v2689_v14 }
 0x7ac   : > { %v2697_v62 = vmul.f32 %v5216_v63, %v5216_v63 }
 0x7ae   : > { %v2705_v19 = vsel %vm594_vm0, %v2697_v62, 0.0 }
 0x7af   : > { %v2686_v60 = vpop.xlane.xlu2 %2685  ;;  %2706 = vadd.xlane.f32.xlu2 %v2705_v19 }
 0x7b0   : > { %v2690_v16 = vmul.f32 %v2686_v60, %v5536_v47 }
 0x7b2   : > { %v5222_v41 = vsub.f32 %v2672_v44, %v2690_v16 }
 0x7b4   : > { %v2698_v53 = vmul.f32 %v5222_v41, %v5222_v41 }
 0x7b6   : > { %v2708_v25 = vsel %vm594_vm0, %v2698_v53, 0.0 }
 0x7b7   : > { %2709 = vadd.xlane.f32.xlu1 %v2708_v25 }
 0x811   : > { %v2701_v21 = vpop.xlane.xlu1 %2700 }
 0x812   : > { %v2711_v17 = vmul.f32 %v2701_v21, %v5536_v47 }
 0x814   : > { %v2715_v59 = vadd.f32 1e-05, %v2711_v17 }
 0x816   : > { %3629 = vrsqrt.f32 %v2715_v59  ;;  %vm2725_vm3 = vweird.f32 %v2715_v59 }
 0x819   : > { %v2704_v7 = vpop.xlane.xlu0 %2703 }
 0x81a   : > { %v2712_v29 = vmul.f32 %v2704_v7, %v5536_v47 }
 0x81c   : > { %v3630_v9 = vpop.eup %3629  ;;  %v2716_v34 = vadd.f32 1e-05, %v2712_v29 }
 0x81d   : > { %v2720_v0 = vmul.f32 %v3630_v9, %v2715_v59  ;;  %vm2726_vm2 = vweird.f32 %v3630_v9 }
 0x81e   : > { %3631 = vrsqrt.f32 %v2716_v34  ;;  %vm2727_vm1 = vmor %vm2725_vm3, %vm2726_vm2  ;;  %vm2735_vm15 = vweird.f32 %v2716_v34 }
 0x81f   : > { %v2721_v13 = vmul.f32 %v3630_v9, %v2720_v0 }
 0x821   : > { %v2722_v46 = vmul.f32 0.5, %v2721_v13 }
 0x822   : > { %v2707_v52 = vpop.xlane.xlu2 %2706 }
 0x823   : > { %v2723_v36 = vsub.f32 1.5, %v2722_v46  ;;  %v2713_v31 = vmul.f32 %v2707_v52, %v5536_v47 }
 0x824   : > { %v3632_v50 = vpop.eup %3631 }
 0x825   : > { %v2724_v2 = vmul.f32 %v3630_v9, %v2723_v36  ;;  %v2730_v27 = vmul.f32 %v3632_v50, %v2716_v34  ;;  %v2717_v24 = vadd.f32 1e-05, %v2713_v31  ;;  %vm2736_vm14 = vweird.f32 %v3632_v50 }
 0x826   : > { %vm2737_vm4 = vmor %vm2735_vm15, %vm2736_vm14 }
 0x827   : > { %v2731_v1 = vmul.f32 %v3632_v50, %v2730_v27  ;;  %3633 = vrsqrt.f32 %v2717_v24  ;;  %v2728_v11 = vsel %vm2727_vm1, %v3630_v9, %v2724_v2  ;;  %vm2745_vm7 = vweird.f32 %v2717_v24 }
 0x828   : > { %v2759_v4 = vmul.f32 %v2728_v11, %v2691_v32 }
 0x829   : > { %v2732_v18 = vmul.f32 0.5, %v2731_v1 }
 0x82a   : > { %v2710_v6 = vpop.xlane.xlu1 %2709  ;;  %v2766_v30 = vmul.f32 %v3477_v58, %v2759_v4 }
 0x82b   : > { %v2733_v8 = vsub.f32 1.5, %v2732_v18  ;;  %v2714_v26 = vmul.f32 %v2710_v6, %v5536_v47 }
 0x82c   : > { %v5243_v61 = vadd.f32 %v3478_v15, %v2766_v30 }
 0x82d   : > { %v3634_v49 = vpop.eup %3633  ;;  %v2734_v35 = vmul.f32 %v3632_v50, %v2733_v8  ;;  %v2718_v56 = vadd.f32 1e-05, %v2714_v26 }
 0x82e   : > { %v2740_v55 = vmul.f32 %v3634_v49, %v2717_v24  ;;  %vm2746_vm5 = vweird.f32 %v3634_v49 }
 0x82f   : > { %v2738_v45 = vsel %vm2737_vm4, %v3632_v50, %v2734_v35  ;;  %3635 = vrsqrt.f32 %v2718_v56  ;;  %vm2747_vm6 = vmor %vm2745_vm7, %vm2746_vm5  ;;  %vm2755_vm9 = vweird.f32 %v2718_v56 }
 0x830   : > { %v2760_v48 = vmul.f32 %v2738_v45, %v2692_v51  ;;  %v2741_v47 = vmul.f32 %v3634_v49, %v2740_v55 }
 0x832   : > { %v2767_v3 = vmul.f32 %v3477_v58, %v2760_v48  ;;  %v2742_v43 = vmul.f32 0.5, %v2741_v47 }
 0x834   : > { %v5245_v10 = vadd.f32 %v3478_v15, %v2767_v3  ;;  %v2743_v40 = vsub.f32 1.5, %v2742_v43 }
 0x835   : > { %v3636_v20 = vpop.eup %3635 }
 0x836   : > { %v2744_v44 = vmul.f32 %v3634_v49, %v2743_v40  ;;  %v2750_v23 = vmul.f32 %v3636_v20, %v2718_v56  ;;  %v2777_v33 = vpack.c.bf16 %v5245_v10, %v5243_v61  ;;  %vm2756_vm8 = vweird.f32 %v3636_v20 }
 0x837   : > { %vm2757_vm10 = vmor %vm2755_vm9, %vm2756_vm8 }
 0x838   : > { %v2751_v38 = vmul.f32 %v3636_v20, %v2750_v23  ;;  %3339 = vmatmul.msk.bf16.vlgmr.msra.gmra.mxu2 %vm594_vm0, %v2777_v33  ;;  %v2748_v32 = vsel %vm2747_vm6, %v3634_v49, %v2744_v44 }
 0x839   : > { %v2761_v54 = vmul.f32 %v2748_v32, %v5216_v63  ;;  %v3479_v63 = vld [vmem:[%s5541_s19] ss:$0 sm:$0xff]  ;;  %s3737_s19 = sshra.s32 %s3184_s21, 4  ;;  %s3738_s19 = int_to_ptr.hbm [resolvable:$true] %s3737_s19 }
 0x83a   : > { %v2752_v39 = vmul.f32 0.5, %v2751_v38  ;;  %p3744_p0 = scmp.lt.s32.totalorder %s3738_s19, %s5549_s1 }
 0x83b   : > { %v2768_v42 = vmul.f32 %v3477_v58, %v2761_v54 }
 0x83c   : > { %v2753_v5 = vsub.f32 1.5, %v2752_v39 }
 0x83d   : > { %v5252_v14 = vadd.f32 %v3478_v15, %v2768_v42 }
 0x83e   : > { %v2754_v37 = vmul.f32 %v3636_v20, %v2753_v5 }
 0x840   : > { %v2758_v51 = vsel %vm2757_vm10, %v3636_v20, %v2754_v37 }
 0x841   : > { %v2762_v22 = vmul.f32 %v2758_v51, %v5222_v41 }
 0x843   : > { %v2769_v12 = vmul.f32 %v3477_v58, %v2762_v22 }
 0x845   : > { %v5254_v62 = vadd.f32 %v3478_v15, %v2769_v12 }
 0x847   : > { %v2778_v19 = vpack.c.bf16 %v5254_v62, %v5252_v14 }
 0x849   : > { %3340 = vmatmul.msk.bf16.gmra.mxu2 %vm594_vm0, %v2778_v19 }
 0x8bb   : > { %v2814_v60 = vpop.f32.mrf.mxu2 }
 0x8bc   : > { %v5262_v16 = vadd.f32 %v3479_v63, %v2814_v60 }
 0x8be   : > { %v5265_v41 = vmul.f32 0.70710677, %v5262_v16 }
 0x8c0   : > { %v2832_v53 = vand.u32 2147483647, %v5265_v41 }
 0x8c2   : > { %v2836_v25 = vmul.f32 0.3275911, %v2832_v53  ;;  %v2940_v56 = vsub.f32 0.0, %v2832_v53 }
 0x8c3   : > { %v2816_v21 = vpop.f32.mrf.mxu2 }
 0x8c4   : > { %v2840_v17 = vadd.f32 1.0, %v2836_v25  ;;  %v5268_v59 = vadd.f32 %v3479_v63, %v2816_v21  ;;  %v2944_v40 = vmul.f32 %v2940_v56, %v2832_v53 }
 0x8c6   : > { %3637 = vrcp.f32 %v2840_v17  ;;  %v5271_v7 = vmul.f32 0.70710677, %v5268_v59  ;;  %v2855_v31 = vand.u32 2147483648, %v2840_v17  ;;  %v2853_v2 = vand.u32 2147483647, %v2840_v17 }
 0x8c7   : > { %vm2849_vm12 = vweird.f32 %v2840_v17  ;;  %v2948_v37 = vmul.f32 1.442695, %v2944_v40 }
 0x8c8   : > { %v2833_v28 = vand.u32 2147483647, %v5271_v7  ;;  %v2856_v18 = vor.u32 1.1754944e-38, %v2855_v31  ;;  %vm2854_vm2 = vcmp.eq.f32.partialorder %v2853_v2, 8.507059e+37 }
 0x8ca   : > { %v2837_v29 = vmul.f32 0.3275911, %v2833_v28  ;;  %v2941_v33 = vsub.f32 0.0, %v2833_v28 }
 0x8cc   : > { %v3638_v9 = vpop.eup %3637  ;;  %v2819_v34 = vpop.f32.mrf.mxu2  ;;  %v2841_v13 = vadd.f32 1.0, %v2837_v29  ;;  %v2945_v42 = vmul.f32 %v2941_v33, %v2833_v28 }
 0x8cd   : > { %v2845_v0 = vmul.f32 %v3638_v9, %v2840_v17  ;;  %v5274_v46 = vadd.f32 %v3479_v63, %v2819_v34  ;;  %vm2850_vm11 = vweird.f32 %v3638_v9 }
 0x8ce   : > { %3639 = vrcp.f32 %v2841_v13  ;;  %vm2851_vm13 = vmor %vm2849_vm12, %vm2850_vm11  ;;  %v2870_v15 = vand.u32 2147483648, %v2841_v13  ;;  %v2868_v47 = vand.u32 2147483647, %v2841_v13  ;;  %vm2864_vm1 = vweird.f32 %v2841_v13 }
 0x8cf   : > { %v2846_v57 = vsub.f32 1.0, %v2845_v0  ;;  %v5277_v52 = vmul.f32 0.70710677, %v5274_v46  ;;  %vm2964_vm12 = vcmp.lt.f32.partialorder %v5265_v41, 0.0 }
 0x8d0   : > { %v2871_v23 = vor.u32 1.1754944e-38, %v2870_v15  ;;  %vm2869_vm15 = vcmp.eq.f32.partialorder %v2868_v47, 8.507059e+37 }
 0x8d1   : > { %v2847_v36 = vmul.f32 %v3638_v9, %v2846_v57  ;;  %v5280_v50 = vand.u32 2147483647, %v5277_v52 }
 0x8d3   : > { %v2848_v27 = vadd.f32 %v3638_v9, %v2847_v36  ;;  %v2838_v24 = vmul.f32 0.3275911, %v5280_v50  ;;  %v2942_v28 = vsub.f32 0.0, %v5280_v50 }
 0x8d4   : > { %v2821_v1 = vpop.f32.mrf.mxu2  ;;  %v3640_v11 = vpop.eup %3639 }
 0x8d5   : > { %v5283_v6 = vadd.f32 %v3479_v63, %v2821_v1  ;;  %v2852_v8 = vsel %vm2851_vm13, %v3638_v9, %v2848_v27  ;;  %v2860_v26 = vmul.f32 %v3640_v11, %v2841_v13  ;;  %v2842_v58 = vadd.f32 1.0, %v2838_v24 }
 0x8d6   : > { %v2857_v49 = vsel %vm2854_vm2, %v2856_v18, %v2852_v8  ;;  %vm2865_vm3 = vweird.f32 %v3640_v11  ;;  %v2950_v13 = vmul.f32 1.442695, %v2945_v42  ;;  %vm2986_vm13 = vcmask 523264  }
 0x8d7   : > { %v5286_v4 = vmul.f32 0.70710677, %v5283_v6  ;;  %v2861_v35 = vsub.f32 1.0, %v2860_v26  ;;  %3641 = vrcp.f32 %v2842_v58  ;;  %v2904_v30 = vmul.f32 1.0614054, %v2857_v49  ;;  %vm2866_vm14 = vmor %vm2864_vm1, %vm2865_vm3 }
 0x8d8   : > { %v2885_v12 = vand.u32 2147483648, %v2842_v58  ;;  %v2883_v53 = vand.u32 2147483647, %v2842_v58  ;;  %vm2879_vm5 = vweird.f32 %v2842_v58  ;;  %vm2965_vm2 = vcmp.lt.f32.partialorder %v5271_v7, 0.0 }
 0x8d9   : > { %v5289_v55 = vand.u32 2147483647, %v5286_v4  ;;  %v2862_v45 = vmul.f32 %v3640_v11, %v2861_v35  ;;  %v2908_v3 = vadd.f32 -1.4531521, %v2904_v30  ;;  %vm2966_vm3 = vcmp.lt.f32.partialorder %v5277_v52, 0.0 }
 0x8da   : > { %v2886_v0 = vor.u32 1.1754944e-38, %v2885_v12  ;;  %vm2884_vm6 = vcmp.eq.f32.partialorder %v2883_v53, 8.507059e+37  ;;  %vm2967_vm1 = vcmp.lt.f32.partialorder %v5286_v4, 0.0 }
 0x8db   : > { %v2839_v48 = vmul.f32 0.3275911, %v5289_v55  ;;  %v2863_v43 = vadd.f32 %v3640_v11, %v2862_v45  ;;  %v2912_v38 = vmul.f32 %v2908_v3, %v2857_v49  ;;  %v2946_v45 = vmul.f32 %v2942_v28, %v5280_v50 }
 0x8dd   : > { %v2843_v20 = vadd.f32 1.0, %v2839_v48  ;;  %v3642_v44 = vpop.eup %3641  ;;  %v2867_v32 = vsel %vm2866_vm14, %v3640_v11, %v2863_v43  ;;  %v2916_v5 = vadd.f32 1.4214138, %v2912_v38  ;;  %v2952_v38 = vmul.f32 1.442695, %v2946_v45 }
 0x8de   : > { %v2875_v39 = vmul.f32 %v3642_v44, %v2842_v58  ;;  %v2872_v54 = vsel %vm2869_vm15, %v2871_v23, %v2867_v32  ;;  %vm2880_vm4 = vweird.f32 %v3642_v44 }
 0x8df   : > { %3643 = vrcp.f32 %v2843_v20  ;;  %v2905_v22 = vmul.f32 1.0614054, %v2872_v54  ;;  %v2920_v19 = vmul.f32 %v2916_v5, %v2857_v49  ;;  %vm2881_vm7 = vmor %vm2879_vm5, %vm2880_vm4  ;;  %v2900_v24 = vand.u32 2147483648, %v2843_v20 }
 0x8e0   : > { %v2876_v51 = vsub.f32 1.0, %v2875_v39  ;;  %3645 = vpow2.f32 %v2948_v37  ;;  %v2898_v26 = vand.u32 2147483647, %v2843_v20  ;;  %vm2894_vm9 = vweird.f32 %v2843_v20 }
 0x8e1   : > { %v2909_v60 = vadd.f32 -1.4531521, %v2905_v22  ;;  %v2924_v25 = vadd.f32 -0.28449672, %v2920_v19  ;;  %3647 = vpow2.f32 %v2950_v13  ;;  %v2901_v48 = vor.u32 1.1754944e-38, %v2900_v24 }
 0x8e2   : > { %v2877_v63 = vmul.f32 %v3642_v44, %v2876_v51  ;;  %vm2899_vm11 = vcmp.eq.f32.partialorder %v2898_v26, 8.507059e+37  ;;  %v2824_v37 = vmul.f32 0.5, %v5262_v16  ;;  %3649 = vpow2.f32 %v2952_v38 }
 0x8e3   : > { %v2913_v17 = vmul.f32 %v2909_v60, %v2872_v54  ;;  %v2928_v34 = vmul.f32 %v2924_v25, %v2857_v49  ;;  %v2825_v13 = vmul.f32 0.5, %v5268_v59  ;;  %v2826_v26 = vmul.f32 0.5, %v5274_v46 }
 0x8e4   : > { %v2878_v29 = vadd.f32 %v3642_v44, %v2877_v63 }
 0x8e5   : > { %v3644_v21 = vpop.eup %3643  ;;  %v2917_v57 = vadd.f32 1.4214138, %v2913_v17  ;;  %v2932_v2 = vadd.f32 0.2548296, %v2928_v34 }
 0x8e6   : > { %v2890_v9 = vmul.f32 %v3644_v21, %v2843_v20  ;;  %v2882_v36 = vsel %vm2881_vm7, %v3642_v44, %v2878_v29  ;;  %vm2895_vm8 = vweird.f32 %v3644_v21  ;;  %v3646_v58 = vpop.eup %3645  ;;  %v2943_v44 = vsub.f32 0.0, %v5289_v55 }
 0x8e7   : > { %v2887_v27 = vsel %vm2884_vm6, %v2886_v0, %v2882_v36  ;;  %v2921_v1 = vmul.f32 %v2917_v57, %v2872_v54  ;;  %v2936_v8 = vmul.f32 %v2932_v2, %v2857_v49  ;;  %vm2896_vm10 = vmor %vm2894_vm9, %vm2895_vm8  ;;  %v3648_v5 = vpop.eup %3647 }
 0x8e8   : > { %v2891_v31 = vsub.f32 1.0, %v2890_v9  ;;  %v2906_v11 = vmul.f32 1.0614054, %v2887_v27  ;;  %v2947_v42 = vmul.f32 %v2943_v44, %v5289_v55  ;;  %v3650_v0 = vpop.eup %3649 }
 0x8e9   : > { %v2925_v35 = vadd.f32 -0.28449672, %v2921_v1  ;;  %v2956_v15 = vmul.f32 %v3646_v58, %v2936_v8 }
 0x8ea   : > { %v2892_v18 = vmul.f32 %v3644_v21, %v2891_v31  ;;  %v2910_v56 = vadd.f32 -1.4531521, %v2906_v11  ;;  %v2954_v29 = vmul.f32 1.442695, %v2947_v42 }
 0x8eb   : > { %v2929_v47 = vmul.f32 %v2925_v35, %v2872_v54  ;;  %v2960_v43 = vsub.f32 1.0, %v2956_v15 }
 0x8ec   : > { %v2893_v30 = vadd.f32 %v3644_v21, %v2892_v18  ;;  %v2914_v3 = vmul.f32 %v2910_v56, %v2887_v27  ;;  %3651 = vpow2.f32 %v2954_v29 }
 0x8ed   : > { %v2933_v49 = vadd.f32 0.2548296, %v2929_v47  ;;  %v2968_v32 = vsub.f32 0.0, %v2960_v43 }
 0x8ee   : > { %v2897_v40 = vsel %vm2896_vm10, %v3644_v21, %v2893_v30  ;;  %v2918_v23 = vadd.f32 1.4214138, %v2914_v3 }
 0x8ef   : > { %v2902_v33 = vsel %vm2899_vm11, %v2901_v48, %v2897_v40  ;;  %v2937_v50 = vmul.f32 %v2933_v49, %v2872_v54  ;;  %v2972_v51 = vsel %vm2964_vm12, %v2968_v32, %v2960_v43  ;;  %v2827_v48 = vmul.f32 0.5, %v5283_v6 }
 0x8f0   : > { %v2907_v39 = vmul.f32 1.0614054, %v2902_v33  ;;  %v2922_v20 = vmul.f32 %v2918_v23, %v2887_v27  ;;  %v2976_v12 = vadd.f32 1.0, %v2972_v51  ;;  %v3829_v43 = vmov 64.0  }
 0x8f1   : > { %v2957_v19 = vmul.f32 %v3648_v5, %v2937_v50  ;;  %3653 = vrcp.f32 %v3829_v43 }
 0x8f2   : > { %v2911_v22 = vadd.f32 -1.4531521, %v2907_v39  ;;  %v2926_v63 = vadd.f32 -0.28449672, %v2922_v20  ;;  %v2980_v53 = vmul.f32 %v2976_v12, %v2824_v37  ;;  %v3652_v8 = vpop.eup %3651 }
 0x8f3   : > { %v2961_v25 = vsub.f32 1.0, %v2957_v19 }
 0x8f4   : > { %v2915_v60 = vmul.f32 %v2911_v22, %v2902_v33  ;;  %v2930_v21 = vmul.f32 %v2926_v63, %v2887_v27  ;;  %v2987_v41 = vsel %vm2986_vm13, %v2980_v53, 0.0 }
 0x8f5   : > { %v2969_v54 = vsub.f32 0.0, %v2961_v25  ;;  %2988 = vadd.xlane.f32.xlu0 %v2987_v41 }
 0x8f6   : > { %v2919_v17 = vadd.f32 1.4214138, %v2915_v60  ;;  %v2934_v9 = vadd.f32 0.2548296, %v2930_v21 }
 0x8f7   : > { %v2973_v55 = vsel %vm2965_vm2, %v2969_v54, %v2961_v25  ;;  %v3654_v46 = vpop.eup %3653 }
 0x8f8   : > { %v2923_v16 = vmul.f32 %v2919_v17, %v2902_v33  ;;  %v2938_v34 = vmul.f32 %v2934_v9, %v2887_v27  ;;  %v2977_v57 = vadd.f32 1.0, %v2973_v55  ;;  %v3000_v40 = vmul.f32 64.0, %v3654_v46  ;;  %v3376_v9 = vld [vmem:[%s5542_s27 + $0x18] sm:$0xff] }
 0x8f9   : > { %vm3004_vm14 = vweird.f32 %v3654_v46  ;;  %3144 = vmatpush.bf16.msra.mxu3 %v3376_v9 }
 0x8fa   : > { %v2927_v36 = vadd.f32 -0.28449672, %v2923_v16  ;;  %v2958_v28 = vmul.f32 %v3650_v0, %v2938_v34  ;;  %v2981_v31 = vmul.f32 %v2977_v57, %v2825_v13  ;;  %v3001_v44 = vsub.f32 1.0, %v3000_v40  ;;  %v3375_v34 = vld [vmem:[%s5543_s30 + $0x10] sm:$0xff]  ;;  %v3481_v40 = vld [vmem:[%s5545_s13] ss:$0 sm:$0xff] }
 0x8fb   : > { %s3739_s13 = scalar_lea.hbm %s3738_s19, 32 }
 0x8fc   : > { %v2931_v2 = vmul.f32 %v2927_v36, %v2902_v33  ;;  %v2962_v24 = vsub.f32 1.0, %v2958_v28  ;;  %v2990_v1 = vsel %vm2986_vm13, %v2981_v31, 0.0  ;;  %v3002_v49 = vmul.f32 %v3654_v46, %v3001_v44  ;;  %v3374_v28 = vld [vmem:[%s5543_s30 + $0x8] sm:$0xff]  ;;  %p3740_p4 = scmp.ne.s32.totalorder %s3738_s19, %s3739_s13 }
 0x8fd   : > { %2991 = vadd.xlane.f32.xlu2 %v2990_v1  ;;  %3145 = vmatpush.bf16.msra.mxu3 %v3375_v34  ;;  %v3373_v1 = vld [vmem:[%s5543_s30] sm:$0xff] }
 0x8fe   : > { %v2935_v11 = vadd.f32 0.2548296, %v2931_v2  ;;  %v2970_v18 = vsub.f32 0.0, %v2962_v24  ;;  %v3003_v23 = vadd.f32 %v3654_v46, %v3002_v49  ;;  %p3741_p6 = pnand %p3740_p4, %p3973_p11 }
 0x900   : > { %v2939_v7 = vmul.f32 %v2935_v11, %v2902_v33  ;;  %v2974_v27 = vsel %vm2966_vm3, %v2970_v18, %v2962_v24  ;;  %v3005_v33 = vsel %vm3004_vm14, %v3654_v46, %v3003_v23  ;;  %p3742_p13 = pneg %p3741_p6 }
 0x901   : > { %v2978_v59 = vadd.f32 1.0, %v2974_v27  ;;  %3146 = vmatpush.bf16.msra.mxu3 %v3374_v28 }
 0x902   : > { %v2959_v58 = vmul.f32 %v3652_v8, %v2939_v7 }
 0x903   : > { %v2982_v35 = vmul.f32 %v2978_v59, %v2826_v26 }
 0x904   : > { %v2963_v56 = vsub.f32 1.0, %v2959_v58 }
 0x905   : > { %v2993_v45 = vsel %vm2986_vm13, %v2982_v35, 0.0  ;;  %3147 = vmatpush.bf16.msra.mxu3 %v3373_v1 }
 0x906   : > { %v2971_v15 = vsub.f32 0.0, %v2963_v56  ;;  %2994 = vadd.xlane.f32.xlu1 %v2993_v45 }
 0x908   : > { %v2975_v30 = vsel %vm2967_vm1, %v2971_v15, %v2963_v56 }
 0x909   : > { %v2979_v47 = vadd.f32 1.0, %v2975_v30 }
 0x90b   : > { %v2983_v52 = vmul.f32 %v2979_v47, %v2827_v48  ;;  %v3480_v48 = vld [vmem:[%s5544_s29] ss:$0 sm:$0xff]  ;;  %s3181_s29 = sshll.u32 %s584_s17, 4  ;;  %s3182_s29 = int_to_ptr.vmem [resolvable:$true] %s3181_s29 }
 0x90d   : > { %v2996_v3 = vsel %vm2986_vm13, %v2983_v52, 0.0 }
 0x90e   : > { %2997 = vadd.xlane.f32.xlu0 %v2996_v3 }
 0x968   : > { %v2989_v38 = vpop.xlane.xlu0 %2988 }
 0x969   : > { %v3006_v4 = vmul.f32 %v3005_v33, %v2989_v38 }
 0x96b   : > { %v5308_v32 = vsub.f32 %v2980_v53, %v3006_v4 }
 0x96d   : > { %v3014_v6 = vmul.f32 %v5308_v32, %v5308_v32 }
 0x96f   : > { %v3018_v5 = vsel %vm2986_vm13, %v3014_v6, 0.0 }
 0x970   : > { %v2992_v39 = vpop.xlane.xlu2 %2991  ;;  %3019 = vadd.xlane.f32.xlu2 %v3018_v5 }
 0x971   : > { %v3007_v50 = vmul.f32 %v3005_v33, %v2992_v39 }
 0x973   : > { %v5313_v20 = vsub.f32 %v2981_v31, %v3007_v50 }
 0x975   : > { %v3015_v37 = vmul.f32 %v5313_v20, %v5313_v20 }
 0x977   : > { %v3021_v51 = vsel %vm2986_vm13, %v3015_v37, 0.0 }
 0x978   : > { %3022 = vadd.xlane.f32.xlu1 %v3021_v51 }
 0x979   : > { %v2995_v22 = vpop.xlane.xlu1 %2994 }
 0x97a   : > { %v3008_v42 = vmul.f32 %v3005_v33, %v2995_v22 }
 0x97c   : > { %v5318_v12 = vsub.f32 %v2982_v35, %v3008_v42 }
 0x97e   : > { %v3016_v19 = vmul.f32 %v5318_v12, %v5318_v12 }
 0x980   : > { %v3024_v63 = vsel %vm2986_vm13, %v3016_v19, 0.0 }
 0x981   : > { %v2998_v60 = vpop.xlane.xlu0 %2997  ;;  %3025 = vadd.xlane.f32.xlu0 %v3024_v63 }
 0x982   : > { %v3009_v53 = vmul.f32 %v3005_v33, %v2998_v60 }
 0x984   : > { %v5323_v25 = vsub.f32 %v2983_v52, %v3009_v53 }
 0x986   : > { %v3017_v21 = vmul.f32 %v5323_v25, %v5323_v25 }
 0x988   : > { %v3027_v17 = vsel %vm2986_vm13, %v3017_v21, 0.0 }
 0x989   : > { %3028 = vadd.xlane.f32.xlu2 %v3027_v17 }
 0x9e3   : > { %v3020_v29 = vpop.xlane.xlu2 %3019 }
 0x9e4   : > { %v3030_v41 = vmul.f32 %v3020_v29, %v3005_v33 }
 0x9e6   : > { %v3034_v54 = vadd.f32 1e-05, %v3030_v41 }
 0x9e8   : > { %3655 = vrsqrt.f32 %v3034_v54  ;;  %vm3044_vm4 = vweird.f32 %v3034_v54 }
 0x9eb   : > { %v3023_v16 = vpop.xlane.xlu1 %3022 }
 0x9ec   : > { %v3031_v55 = vmul.f32 %v3023_v16, %v3005_v33 }
 0x9ee   : > { %v3035_v0 = vadd.f32 1e-05, %v3031_v55  ;;  %v3656_v13 = vpop.eup %3655 }
 0x9ef   : > { %v3039_v57 = vmul.f32 %v3656_v13, %v3034_v54  ;;  %vm3045_vm15 = vweird.f32 %v3656_v13  ;;  %v3482_v54 = vld [vmem:[%s5546_s15] ss:$0 sm:$0xff]  ;;  %s3743_s15 = scalar_lea.hbm %s5549_s1, 64 }
 0x9f0   : > { %3657 = vrsqrt.f32 %v3035_v0  ;;  %vm3046_vm5 = vmor %vm3044_vm4, %vm3045_vm15  ;;  %vm3054_vm6 = vweird.f32 %v3035_v0  ;;  %p3745_p7 = scmp.lt.s32.totalorder %s3743_s15, %s3739_s13 }
 0x9f1   : > { %v3040_v36 = vmul.f32 %v3656_v13, %v3039_v57 }
 0x9f2   : > { %p3746_p5 = por %p3745_p7, %p3744_p0 }
 0x9f3   : > { %v3041_v2 = vmul.f32 0.5, %v3040_v36 }
 0x9f4   : > { %v3026_v31 = vpop.xlane.xlu0 %3025  ;;  %p3747_p8 = pnand %p3746_p5, %p3742_p13 }
 0x9f5   : > { %v3032_v24 = vmul.f32 %v3026_v31, %v3005_v33  ;;  %v3042_v18 = vsub.f32 1.5, %v3041_v2 }
 0x9f6   : > { %v3658_v11 = vpop.eup %3657 }
 0x9f7   : > { %v3036_v7 = vadd.f32 1e-05, %v3032_v24  ;;  %v3049_v8 = vmul.f32 %v3658_v11, %v3035_v0  ;;  %v3043_v27 = vmul.f32 %v3656_v13, %v3042_v18  ;;  %vm3055_vm7 = vweird.f32 %v3658_v11 }
 0x9f8   : > { %vm3056_vm8 = vmor %vm3054_vm6, %vm3055_vm7 }
 0x9f9   : > { %3659 = vrsqrt.f32 %v3036_v7  ;;  %v3050_v26 = vmul.f32 %v3658_v11, %v3049_v8  ;;  %v3047_v58 = vsel %vm3046_vm5, %v3656_v13, %v3043_v27  ;;  %vm3064_vm10 = vweird.f32 %v3036_v7 }
 0x9fa   : > { %v3078_v47 = vmul.f32 %v3047_v58, %v5308_v32 }
 0x9fb   : > { %v3051_v35 = vmul.f32 0.5, %v3050_v26 }
 0x9fc   : > { %v3029_v59 = vpop.xlane.xlu2 %3028  ;;  %v3085_v44 = vmul.f32 %v3480_v48, %v3078_v47 }
 0x9fd   : > { %v3033_v56 = vmul.f32 %v3029_v59, %v3005_v33  ;;  %v3052_v45 = vsub.f32 1.5, %v3051_v35 }
 0x9fe   : > { %v3092_v6 = vadd.f32 %v3481_v40, %v3085_v44 }
 0x9ff   : > { %v3037_v15 = vadd.f32 1e-05, %v3033_v56  ;;  %v3660_v30 = vpop.eup %3659  ;;  %v3053_v52 = vmul.f32 %v3658_v11, %v3052_v45 }
 0xa00   : > { %v3059_v3 = vmul.f32 %v3660_v30, %v3036_v7  ;;  %vm3065_vm9 = vweird.f32 %v3660_v30 }
 0xa01   : > { %3661 = vrsqrt.f32 %v3037_v15  ;;  %v3057_v43 = vsel %vm3056_vm8, %v3658_v11, %v3053_v52  ;;  %vm3066_vm11 = vmor %vm3064_vm10, %vm3065_vm9  ;;  %vm3074_vm2 = vweird.f32 %v3037_v15 }
 0xa02   : > { %v3060_v46 = vmul.f32 %v3660_v30, %v3059_v3  ;;  %v3079_v49 = vmul.f32 %v3057_v43, %v5313_v20 }
 0xa04   : > { %v3061_v23 = vmul.f32 0.5, %v3060_v46  ;;  %v3086_v33 = vmul.f32 %v3480_v48, %v3079_v49 }
 0xa06   : > { %v3062_v38 = vsub.f32 1.5, %v3061_v23  ;;  %v3093_v32 = vadd.f32 %v3481_v40, %v3086_v33 }
 0xa07   : > { %v3662_v4 = vpop.eup %3661 }
 0xa08   : > { %v3063_v39 = vmul.f32 %v3660_v30, %v3062_v38  ;;  %v3069_v5 = vmul.f32 %v3662_v4, %v3037_v15  ;;  %v3096_v50 = vpack.c.bf16 %v3093_v32, %v3092_v6  ;;  %vm3075_vm12 = vweird.f32 %v3662_v4 }
 0xa09   : > { %vm3076_vm3 = vmor %vm3074_vm2, %vm3075_vm12 }
 0xa0a   : > { %v3070_v37 = vmul.f32 %v3662_v4, %v3069_v5  ;;  %3357 = vmatmul.msk.bf16.vlgmr.msra.gmra.mxu3 %vm2986_vm13, %v3096_v50  ;;  %v3067_v51 = vsel %vm3066_vm11, %v3660_v30, %v3063_v39 }
 0xa0b   : > { %v3080_v20 = vmul.f32 %v3067_v51, %v5318_v12 }
 0xa0c   : > { %v3071_v22 = vmul.f32 0.5, %v3070_v37 }
 0xa0d   : > { %v3087_v53 = vmul.f32 %v3480_v48, %v3080_v20 }
 0xa0e   : > { %v3072_v42 = vsub.f32 1.5, %v3071_v22 }
 0xa0f   : > { %v3094_v17 = vadd.f32 %v3481_v40, %v3087_v53 }
 0xa10   : > { %v3073_v19 = vmul.f32 %v3662_v4, %v3072_v42 }
 0xa12   : > { %v3077_v63 = vsel %vm3076_vm3, %v3662_v4, %v3073_v19 }
 0xa13   : > { %v3081_v60 = vmul.f32 %v3077_v63, %v5323_v25 }
 0xa15   : > { %v3088_v21 = vmul.f32 %v3480_v48, %v3081_v60 }
 0xa17   : > { %v3095_v29 = vadd.f32 %v3481_v40, %v3088_v21 }
 0xa19   : > { %v3097_v41 = vpack.c.bf16 %v3095_v29, %v3094_v17 }
 0xa1b   : > { %3358 = vmatmul.msk.bf16.gmra.mxu3 %vm2986_vm13, %v3097_v41 }
 0xa8d   : > { %v3149_v12 = vpop.f32.mrf.mxu3 }
 0xa8e   : > { %v3150_v9 = vadd.f32 %v3482_v54, %v3149_v12 }
 0xa90   : > { %v3159_v16 = vadd.f32 %v3150_v9, %v5243_v61 }
 0xa92   : > { %3163 = vst.msk [vmem:[%s584_s17] sm:$0xff] %vm594_vm0, %v3159_v16 }
 0xa95   : > { %v3151_v25 = vpop.f32.mrf.mxu3 }
 0xa96   : > { %v3152_v55 = vadd.f32 %v3482_v54, %v3151_v25 }
 0xa98   : > { %v3160_v34 = vadd.f32 %v3152_v55, %v5245_v10 }
 0xa9a   : > { %3164 = vst.msk [vmem:[%s584_s17 + $0x8] sm:$0xff] %vm594_vm0, %v3160_v34 }
 0xa9e   : > { %v3154_v0 = vpop.f32.mrf.mxu3 }
 0xa9f   : > { %v3155_v13 = vadd.f32 %v3482_v54, %v3154_v0 }
 0xaa1   : > { %v3161_v57 = vadd.f32 %v3155_v13, %v5252_v14 }
 0xaa3   : > { %3165 = vst.msk [vmem:[%s584_s17 + $0x10] sm:$0xff] %vm594_vm0, %v3161_v57 }
 0xaa6   : > { %v3156_v61 = vpop.f32.mrf.mxu3 }
 0xaa7   : > { %v3157_v36 = vadd.f32 %v3482_v54, %v3156_v61 }
 0xaa9   : > { %v3162_v10 = vadd.f32 %v3157_v36, %v5254_v62 }
 0xaab   : > { %3166 = vst.msk [vmem:[%s584_s17 + $0x18] sm:$0xff] %vm594_vm0, %v3162_v10 }
 0xaac   : > { %3750 = shalt.err (!%p3747_p8)
}
 0xaad   : > { %s3830_s22 = smov 128  }
 0xaae   : > { %3385 = dma.vmem_to_hbm [thread:$0]  (%p3973_p11), %s3182_s29, 512, %s3184_s21, %s3168_s28, %s3830_s22, %s3830_s22, %s3823_s12  }
 0xaaf PF: > { %s5550_s17 = sld [smem:[#allocation11_spill]] }
 0xab0   : > { %s5552_s26 = sld [smem:[#allocation13_spill]] }
 0xab5   : > { %s3198_s24 = sand.u32 1, %s5550_s17  }
 0xab6   : > { %p5553_p9 = scmp.ge.s32.totalorder %s5552_s26, 2  ;;  %s3199_s14 = scalar_lea.sflag [#allocation4], %s3198_s24 }
 0xab8   : > { %p3396_p10 = pnand %p5553_p9, %p3977_p12 }
 0xaba   : > { %p3397_p1 = pneg %p3396_p10 }
 0xabc   : > { %3776 = dma.done.wait (%p3397_p1), %s3199_s14, 512  }
 0xabd   : > { %3778 = vsyncadd (%p3397_p1), %s3199_s14, 4294966784  ;;  %s5554_s27 = sld [smem:[#allocation14_spill]]  ;;  %s5557_s24 = smov %s3785_s25 }
 0xabe   : > { %s5555_s19 = sld [smem:[#allocation12_spill]] }
 0xabf   : > { %s5556_s26 = sld [smem:[#allocation15_spill]] }
 0xac3   : > { %p31_p2 = scmp.ge.s32.totalorder %s5554_s27, 4  }
 0xac4   : > { %s5558_s25 = smov %s5555_s19 }
 0xac5   :  { %33 = sbr.rel (!%p31_p2) target bundleno = 15 (0xf), region = 137 }
 0xaca   :  { %3205 = vsyncpa [#allocation3], 1 }
 0xacb   :  { %3207 = vsyncpa [#allocation3 + $0x1], 1 }
 0xacc   :  { %3208 = vsyncpa [#allocation6], 1 }
 0xacd   :  { %3209 = vsyncpa [#allocation4], 1 }
 0xace   :  { %3211 = vsyncpa [#allocation4 + $0x1], 1 }

// kernel: tpu_custom_call.1
= control target key start
LH: loop header
LB: loop body
LE: loop exit
PB: predicated region body
PF: predicated region fallthrough
CT: control target
= control target key end

     0   :  { %s5399_s0 = inlined_call_operand.hbm [shape: f32[4,16,32], index: 0, kind: input, shape index: {}]   ;;  %s5400_s1 = inlined_call_operand.hbm [shape: f32[1,32], index: 1, kind: input, shape index: {}]   ;;  %s5401_s2 = inlined_call_operand.vmem [shape: f32[1,32], index: 2, kind: input, shape index: {}]   ;;  %s5402_s3 = inlined_call_operand.vmem [shape: bf16[32,96], index: 3, kind: input, shape index: {}]   ;;  %s5403_s4 = inlined_call_operand.vmem [shape: f32[1,96], index: 4, kind: input, shape index: {}]   ;;  %s5404_s5 = inlined_call_operand.vmem [shape: bf16[32,32], index: 5, kind: input, shape index: {}]   ;;  %s5405_s6 = inlined_call_operand.vmem [shape: f32[1,32], index: 6, kind: input, shape index: {}]   ;;  %s5406_s7 = inlined_call_operand.vmem [shape: f32[1,32], index: 7, kind: input, shape index: {}]   ;;  %s5407_s8 = inlined_call_operand.vmem [shape: f32[1,32], index: 8, kind: input, shape index: {}]   ;;  %s5408_s9 = inlined_call_operand.vmem [shape: f32[1,32], index: 9, kind: input, shape index: {}]   ;;  %s5409_s10 = inlined_call_operand.vmem [shape: f32[1,32], index: 10, kind: input, shape index: {}]   ;;  %s5410_s11 = inlined_call_operand.vmem [shape: bf16[32,64], index: 11, kind: input, shape index: {}]   ;;  %s5411_s12 = inlined_call_operand.vmem [shape: f32[1,64], index: 12, kind: input, shape index: {}]   ;;  %s5412_s13 = inlined_call_operand.vmem [shape: f32[1,64], index: 13, kind: input, shape index: {}]   ;;  %s5413_s14 = inlined_call_operand.vmem [shape: f32[1,64], index: 14, kind: input, shape index: {}]   ;;  %s5414_s15 = inlined_call_operand.vmem [shape: bf16[64,32], index: 15, kind: input, shape index: {}]   ;;  %s5415_s16 = inlined_call_operand.vmem [shape: f32[1,32], index: 16, kind: input, shape index: {}]   ;;  %s5416_s17 = inlined_call_operand.hbm [shape: f32[4,16,32], index: 17, kind: output, shape index: {}]  }
   0x1   :  { %5440 = sst [smem:[#allocation29_spill]] %s5399_s0 }
   0x2   :  { %5441 = sst [smem:[#allocation30_spill]] %s5400_s1 }
   0x3   :  { %5442 = sst [smem:[#allocation31_spill]] %s5411_s12 }
   0x4   :  { %5443 = sst [smem:[#allocation32_spill]] %s5412_s13 }
   0x5   :  { %5444 = sst [smem:[#allocation33_spill]] %s5413_s14 }
   0x6   :  { %5445 = sst [smem:[#allocation34_spill]] %s5414_s15 }
   0x7   :  { %5446 = sst [smem:[#allocation35_spill]] %s5415_s16 }
   0x8   :  { %5447 = sst [smem:[#allocation36_spill]] %s5416_s17 }
   0x9   :  { %22 = vsyncpa [#allocation3], 0 }
   0xa   :  { %24 = vsyncpa [#allocation3 + $0x1], 0 }
   0xb   :  { %25 = vsyncpa [#allocation6], 0 }
   0xc   :  { %26 = vsyncpa [#allocation4], 0 }
   0xd   :  { %28 = vsyncpa [#allocation4 + $0x1], 0  ;;  %s3921_s24 = smov 0   ;;  %s3923_s25 = smov 0  }
   0xe   :  { %s3925_s26 = smov 0   ;;  %s3927_s27 = smov 0  }
   0xf LB: > { %5448 = sst [smem:[#allocation11_spill]] %s3781_s24  ;;  %s3942_s28 = sadd.s32 4294967295, %s3793_s27   ;;  %s3793_s27 = sphi %s3927_s27, %s5554_s27   ;;  %s3789_s26 = sphi %s3925_s26, %s5556_s26   ;;  %s3785_s25 = sphi %s3923_s25, %s5558_s25   ;;  %s3781_s24 = sphi %s3921_s24, %s5557_s24  }
  0x10   : > { %5449 = sst [smem:[#allocation12_spill]] %s3789_s26  ;;  %s3267_s29 = sadd.s32 4294967294, %s3793_s27  }
  0x11   : > { %5450 = sst [smem:[#allocation13_spill]] %s3793_s27  ;;  %s3946_s0 = sadd.s32 1, %s3793_s27  }
  0x12   : > { %5451 = sst [smem:[#allocation14_spill]] %s3946_s0  ;;  %s41_s30 = sadd.s32 1, %s3789_s26 }
  0x13   : > { %s38_s18 = ssub.s32 %s3793_s27, %s3946_s0  ;;  %p48_p0 = scmp.ne.s32.totalorder %s3789_s26, %s3785_s25 }
  0x14   : > { %p39_p1 = scmp.eq.s32.totalorder %s38_s18, 0  ;;  %p49_p2 = scmp.eq.s32.totalorder %s3793_s27, 0 }
  0x15   : > { %p54_p3 = scmp.ne.s32.totalorder %s3785_s25, %s3781_s24  ;;  %p55_p4 = scmp.eq.s32.totalorder %s3942_s28, 0 }
  0x16   : > { %s3958_s19 = scalar_select %p39_p1, %s3789_s26, %s41_s30  }
  0x17   : > { %p3960_p5 = por %p49_p2, %p48_p0  ;;  %p3966_p6 = por %p55_p4, %p54_p3 }
  0x18   : > { %5452 = sst [smem:[#allocation15_spill]] %s3958_s19  ;;  %p414_p7 = scmp.eq.s32.totalorder %s3942_s28, 1 }
  0x19   : > { %p420_p8 = scmp.eq.s32.totalorder %s3267_s29, 1  ;;  %p3268_p9 = scmp.ge.s32.totalorder %s3793_s27, 1 }
  0x1a   : > { %p427_p10 = scmp.lt.s32.totalorder %s3793_s27, 3  ;;  %p3973_p11 = por %p414_p7, %p48_p0 }
  0x1b   : > { %p3977_p12 = por %p420_p8, %p54_p3  ;;  %s5460_s19 = sld [smem:[#allocation30_spill]] }
  0x1c   : > { %s5455_s21 = scalar_select %p3973_p11, 1, 0 }
  0x1d   : > { %s5457_s22 = scalar_select %p3977_p12, 1, 0 }
  0x1e   : > { %5456 = sst [smem:[#allocation16_spill]] %s5455_s21  ;;  %p3981_p13 = pnand %p3268_p9, %p427_p10 }
  0x1f   : > { %5458 = sst [smem:[#allocation17_spill]] %s5457_s22  ;;  %s3795_s0 = smov [#allocation5]  }
  0x20   : > { %p3387_p1 = pneg %p3981_p13  ;;  %s441_s24 = sshll.u32 %s3795_s0, 4  ;;  %s442_s24 = int_to_ptr.vmem [resolvable:$true] %s441_s24 }
  0x21   : > { %s439_s29 = sshll.u32 %s5460_s19, 4  ;;  %p3400_p3 = scmp.lt.s32.totalorder %s3793_s27, 2  ;;  %s440_s29 = int_to_ptr.hbm [resolvable:$true] %s439_s29 }
  0x22   : > { %p3388_p2 = pnand %p3387_p1, %p55_p4  ;;  %s497_s22 = sand.u32 1, %s3789_s26  }
  0x23   : > { %p3997_p7 = pnand %p3400_p3, %p3960_p5  ;;  %s3271_s30 = sshll.u32 %s497_s22, 5 }
  0x24   : > { %3390 = dma.hbm_to_vmem [thread:$0]  (!%p3388_p2), %s440_s29, 16, %s442_s24, [#allocation6]  }
  0x25   : > { %s3366_s19 = sshll.u32 %s3793_s27, 5  ;;  %s5462_s16 = sld [smem:[#allocation29_spill]] }
  0x26   : > { %s501_s13 = scalar_lea.vmem [#allocation2], %s3271_s30  ;;  %s498_s12 = scalar_lea.sflag [#allocation3], %s497_s22 }
  0x27   : > { %s510_s15 = sshll.u32 %s501_s13, 4  ;;  %p3697_p8 = pneg %p3997_p7  ;;  %s511_s15 = int_to_ptr.vmem [resolvable:$true] %s510_s15 }
  0x2b   : > { %s507_s14 = scalar_lea.hbm %s5462_s16, %s3366_s19  ;;  %s3700_s27 = scalar_lea.hbm %s5462_s16, 64 }
  0x2c   : > { %s508_s0 = sshll.u32 %s507_s14, 4  ;;  %s509_s0 = int_to_ptr.hbm [resolvable:$true] %s508_s0 }
  0x2d   : > { %s3693_s26 = sshra.s32 %s509_s0, 4  ;;  %s3694_s26 = int_to_ptr.hbm [resolvable:$true] %s3693_s26 }
  0x2e   : > { %s3695_s24 = scalar_lea.hbm %s3694_s26, 32  ;;  %p3701_p1 = scmp.lt.s32.totalorder %s3694_s26, %s5462_s16 }
  0x2f   : > { %p3696_p5 = scmp.ne.s32.totalorder %s3694_s26, %s3695_s24  ;;  %p3702_p2 = scmp.lt.s32.totalorder %s3700_s27, %s3695_s24 }
  0x31   : > { %p3698_p9 = pnand %p3697_p8, %p3696_p5  ;;  %p3703_p3 = por %p3702_p2, %p3701_p1 }
  0x33   : > { %p3699_p10 = pneg %p3698_p9 }
  0x35   : > { %p3704_p0 = pnand %p3703_p3, %p3699_p10 }
  0x37   : > { %3707 = shalt.err (!%p3704_p0)
}
  0x38   : > { %s3796_s13 = smov 128   ;;  %s3797_s14 = smov 8  }
  0x39   : > { %3394 = dma.hbm_to_vmem [thread:$0]  (!%p3997_p7), %s509_s0, 512, %s511_s15, %s498_s12, %s3796_s13, %s3796_s13, %s3797_s14  }
  0x3a   : > { %522 = sbr.rel (%p3981_p13) target bundleno = 2735 (0xaaf), region = 88 }
  0x3f   : > { %s4018_s22 = sand.u32 1, %s3785_s25  }
  0x40   : > { %s3276_s26 = sshll.u32 %s4018_s22, 5  ;;  %s525_s27 = scalar_lea.sflag [#allocation3], %s4018_s22 }
  0x41   : > { %s528_s30 = scalar_lea.vmem [#allocation2], %s3276_s26 }
  0x42   : > { %3768 = dma.done.wait (%p3966_p6), %s525_s27, 512  }
  0x43   : > { %3770 = vsyncadd (%p3966_p6), %s525_s27, 4294966784 }
  0x44   : > { %3772 = dma.done.wait (%p55_p4), [#allocation6], 16  }
  0x45   : > { %3774 = vsyncadd (%p55_p4), [#allocation6], 4294967280  ;;  %vm594_vm0 = vcmask 261120   ;;  %v590_v0 = vld [vmem:[%s528_s30 + $0x10] sm:$0xff]  ;;  %v588_v1 = vld [vmem:[%s528_s30] sm:$0xff]  ;;  %v3798_v8 = vmov 32.0  }
  0x46   : > { %v601_v2 = vsel %vm594_vm0, %v590_v0, 0.0  ;;  %v595_v3 = vsel %vm594_vm0, %v588_v1, 0.0  ;;  %v591_v4 = vld [vmem:[%s528_s30 + $0x18] sm:$0xff]  ;;  %v589_v5 = vld [vmem:[%s528_s30 + $0x8] sm:$0xff]  ;;  %3483 = vrcp.f32 %v3798_v8  ;;  %v3367_v39 = vld [vmem:[%s5402_s3] sm:$0xff]  ;;  %s3799_s1 = smov 92  }
  0x47   : > { %602 = vadd.xlane.f32.xlu1 %v601_v2  ;;  %596 = vadd.xlane.f32.xlu0 %v595_v3  ;;  %v604_v6 = vsel %vm594_vm0, %v591_v4, 0.0  ;;  %v598_v7 = vsel %vm594_vm0, %v589_v5, 0.0  ;;  %v3368_v35 = vld [vmem:[%s5402_s3 + $0x8] sm:$0xff]  ;;  %s3800_s29 = smov 96   ;;  %s3801_s21 = smov 84   ;;  %vm762_vm14 = vcmask 31744  }
  0x48   : > { %738 = vmatpush.bf16.msra.mxu0 %v3368_v35  ;;  %s3802_s19 = smov 120   ;;  %s3803_s13 = smov 124   ;;  %vm810_vm15 = vcmask 130048  }
  0x49   : > { %s3804_s14 = smov 112   ;;  %s3805_s27 = smov 80  }
  0x4a   : > { %s3806_s30 = smov 72   ;;  %s3807_s12 = smov 108  }
  0x4b   : > { %s3808_s15 = smov 88   ;;  %s3809_s17 = smov 116  }
  0x4c   : > { %v3484_v9 = vpop.eup %3483  ;;  %739 = vmatpush.bf16.msra.mxu0 %v3367_v39  ;;  %s3810_s20 = smov 100   ;;  %s3811_s23 = smov 68  }
  0x4d   : > { %v608_v10 = vmul.f32 32.0, %v3484_v9  ;;  %vm612_vm1 = vweird.f32 %v3484_v9  ;;  %s3812_s18 = smov 76   ;;  %s3813_s0 = smov 52  }
  0x4e   : > { %s3814_s24 = smov 64  }
  0x4f   : > { %605 = vadd.xlane.f32.xlu1 %v604_v6  ;;  %599 = vadd.xlane.f32.xlu0 %v598_v7  ;;  %v609_v11 = vsub.f32 1.0, %v608_v10 }
  0x51   : > { %v610_v12 = vmul.f32 %v3484_v9, %v609_v11 }
  0x53   : > { %v611_v13 = vadd.f32 %v3484_v9, %v610_v12  ;;  %v3472_v12 = vld [vmem:[%s5401_s2] ss:$0 sm:$0xff] }
  0x55   : > { %v4036_v14 = vsel %vm612_vm1, %v3484_v9, %v611_v13 }
  0x56   : > { %5463 = vst [vmem:[#allocation18_spill] sm:$0xff] %v4036_v14 }
  0xba   : > { %v603_v15 = vpop.xlane.xlu1 %602  ;;  %v597_v16 = vpop.xlane.xlu0 %596 }
  0xbb   : > { %v616_v17 = vmul.f32 %v4036_v14, %v603_v15  ;;  %v614_v18 = vmul.f32 %v4036_v14, %v597_v16 }
  0xbd   : > { %v4040_v19 = vsub.f32 %v590_v0, %v616_v17  ;;  %v618_v20 = vsub.f32 %v588_v1, %v614_v18 }
  0xbf   : > { %v624_v21 = vmul.f32 %v4040_v19, %v4040_v19  ;;  %v622_v22 = vmul.f32 %v618_v20, %v618_v20 }
  0xc1   : > { %v632_v23 = vsel %vm594_vm0, %v624_v21, 0.0  ;;  %v626_v24 = vsel %vm594_vm0, %v622_v22, 0.0 }
  0xc2   : > { %v606_v25 = vpop.xlane.xlu1 %605  ;;  %633 = vadd.xlane.f32.xlu0 %v632_v23  ;;  %627 = vadd.xlane.f32.xlu2 %v626_v24  ;;  %v600_v26 = vpop.xlane.xlu0 %599 }
  0xc3   : > { %v617_v27 = vmul.f32 %v4036_v14, %v606_v25  ;;  %v615_v28 = vmul.f32 %v4036_v14, %v600_v26 }
  0xc5   : > { %v4048_v29 = vsub.f32 %v591_v4, %v617_v27  ;;  %v619_v30 = vsub.f32 %v589_v5, %v615_v28  ;;  %v3471_v5 = vld [vmem:[#allocation5] ss:$0 sm:$0xff] }
  0xc7   : > { %v625_v31 = vmul.f32 %v4048_v29, %v4048_v29  ;;  %v623_v32 = vmul.f32 %v619_v30, %v619_v30 }
  0xc9   : > { %v635_v33 = vsel %vm594_vm0, %v625_v31, 0.0  ;;  %v629_v34 = vsel %vm594_vm0, %v623_v32, 0.0 }
  0xca   : > { %636 = vadd.xlane.f32.xlu1 %v635_v33  ;;  %630 = vadd.xlane.f32.xlu2 %v629_v34  ;;  %v3473_v33 = vld [vmem:[%s5403_s4] ss:$0 sm:$0xff] }
 0x135   : > { %v628_v36 = vpop.xlane.xlu2 %627  ;;  %v634_v38 = vpop.xlane.xlu0 %633 }
 0x136   : > { %v638_v37 = vmul.f32 %v628_v36, %v4036_v14  ;;  %v640_v41 = vmul.f32 %v634_v38, %v4036_v14 }
 0x138   : > { %v642_v40 = vadd.f32 1e-05, %v638_v37  ;;  %v644_v42 = vadd.f32 1e-05, %v640_v41 }
 0x13a   : > { %3485 = vrsqrt.f32 %v642_v40  ;;  %vm652_vm3 = vweird.f32 %v642_v40  ;;  %vm672_vm10 = vweird.f32 %v644_v42 }
 0x13b   : > { %3487 = vrsqrt.f32 %v644_v42 }
 0x13d   : > { %v637_v43 = vpop.xlane.xlu1 %636  ;;  %v631_v44 = vpop.xlane.xlu2 %630 }
 0x13e   : > { %v641_v45 = vmul.f32 %v637_v43, %v4036_v14  ;;  %v639_v46 = vmul.f32 %v631_v44, %v4036_v14 }
 0x140   : > { %v3486_v47 = vpop.eup %3485  ;;  %v645_v48 = vadd.f32 1e-05, %v641_v45  ;;  %v643_v49 = vadd.f32 1e-05, %v639_v46 }
 0x141   : > { %v647_v50 = vmul.f32 %v3486_v47, %v642_v40  ;;  %v3488_v53 = vpop.eup %3487  ;;  %vm653_vm2 = vweird.f32 %v3486_v47 }
 0x142   : > { %3489 = vrsqrt.f32 %v645_v48  ;;  %v667_v59 = vmul.f32 %v3488_v53, %v644_v42  ;;  %vm654_vm4 = vmor %vm652_vm3, %vm653_vm2  ;;  %vm662_vm6 = vweird.f32 %v643_v49  ;;  %vm682_vm8 = vweird.f32 %v645_v48 }
 0x143   : > { %v648_v51 = vmul.f32 %v3486_v47, %v647_v50  ;;  %3491 = vrsqrt.f32 %v643_v49  ;;  %vm673_vm11 = vweird.f32 %v3488_v53 }
 0x144   : > { %v668_v0 = vmul.f32 %v3488_v53, %v667_v59  ;;  %vm674_vm13 = vmor %vm672_vm10, %vm673_vm11 }
 0x145   : > { %v649_v52 = vmul.f32 0.5, %v648_v51 }
 0x146   : > { %v669_v6 = vmul.f32 0.5, %v668_v0 }
 0x147   : > { %v650_v54 = vsub.f32 1.5, %v649_v52 }
 0x148   : > { %v3490_v55 = vpop.eup %3489  ;;  %v670_v13 = vsub.f32 1.5, %v669_v6 }
 0x149   : > { %v3492_v56 = vpop.eup %3491  ;;  %v677_v57 = vmul.f32 %v3490_v55, %v645_v48  ;;  %v651_v58 = vmul.f32 %v3486_v47, %v650_v54  ;;  %vm683_vm9 = vweird.f32 %v3490_v55 }
 0x14a   : > { %v657_v60 = vmul.f32 %v3492_v56, %v643_v49  ;;  %vm663_vm5 = vweird.f32 %v3492_v56  ;;  %vm684_vm12 = vmor %vm682_vm8, %vm683_vm9 }
 0x14b   : > { %v678_v61 = vmul.f32 %v3490_v55, %v677_v57  ;;  %v655_v63 = vsel %vm654_vm4, %v3486_v47, %v651_v58  ;;  %vm664_vm7 = vmor %vm662_vm6, %vm663_vm5 }
 0x14c   : > { %v658_v62 = vmul.f32 %v3492_v56, %v657_v60  ;;  %v686_v4 = vmul.f32 %v655_v63, %v618_v20  ;;  %v671_v20 = vmul.f32 %v3488_v53, %v670_v13 }
 0x14d   : > { %v679_v2 = vmul.f32 0.5, %v678_v61 }
 0x14e   : > { %v659_v1 = vmul.f32 0.5, %v658_v62  ;;  %v693_v11 = vmul.f32 %v3471_v5, %v686_v4  ;;  %v675_v23 = vsel %vm674_vm13, %v3488_v53, %v671_v20 }
 0x14f   : > { %v680_v8 = vsub.f32 1.5, %v679_v2  ;;  %v688_v25 = vmul.f32 %v675_v23, %v4040_v19 }
 0x150   : > { %v660_v3 = vsub.f32 1.5, %v659_v1  ;;  %v4067_v17 = vadd.f32 %v3472_v12, %v693_v11 }
 0x151   : > { %v681_v16 = vmul.f32 %v3490_v55, %v680_v8  ;;  %v695_v27 = vmul.f32 %v3471_v5, %v688_v25 }
 0x152   : > { %v661_v7 = vmul.f32 %v3492_v56, %v660_v3  ;;  %5464 = vst [vmem:[#allocation19_spill] sm:$0xff] %v4067_v17 }
 0x153   : > { %v685_v22 = vsel %vm684_vm12, %v3490_v55, %v681_v16 }
 0x154   : > { %v665_v9 = vsel %vm664_vm7, %v3492_v56, %v661_v7  ;;  %v689_v24 = vmul.f32 %v685_v22, %v4048_v29 }
 0x155   : > { %v687_v10 = vmul.f32 %v665_v9, %v619_v30  ;;  %v4078_v30 = vadd.f32 %v3472_v12, %v695_v27 }
 0x156   : > { %v696_v26 = vmul.f32 %v3471_v5, %v689_v24 }
 0x157   : > { %v694_v15 = vmul.f32 %v3471_v5, %v687_v10  ;;  %5467 = vst [vmem:[#allocation22_spill] sm:$0xff] %v4078_v30 }
 0x158   : > { %v4076_v28 = vadd.f32 %v3472_v12, %v696_v26 }
 0x159   : > { %v4069_v18 = vadd.f32 %v3472_v12, %v694_v15 }
 0x15a   : > { %5466 = vst [vmem:[#allocation21_spill] sm:$0xff] %v4076_v28  ;;  %v705_v31 = vpack.c.bf16 %v4076_v28, %v4078_v30 }
 0x15b   : > { %5465 = vst [vmem:[#allocation20_spill] sm:$0xff] %v4069_v18  ;;  %v704_v21 = vpack.c.bf16 %v4069_v18, %v4067_v17 }
 0x15d   : > { %3287 = vmatmul.msk.bf16.vlgmr.msra.gmra.mxu0 %vm594_vm0, %v704_v21 }
 0x16d   : > { %3288 = vmatmul.msk.bf16.gmra.mxu0 %vm594_vm0, %v705_v31 }
 0x1da   : > { %v741_v32 = vpop.f32.mrf.mxu0 }
 0x1db   : > { %v742_v34 = vadd.f32 %v3473_v33, %v741_v32 }
 0x1dd   : > { %v751_v35 = vpack.c.bf16 %v742_v34, %v742_v34 }
 0x1df   : > { %v757_v37 = vunpack.c.l.b16 %v751_v35 }
 0x1e2   : > { %v743_v29 = vpop.f32.mrf.mxu0 }
 0x1e3   : > { %v744_v19 = vadd.f32 %v3473_v33, %v743_v29 }
 0x1e5   : > { %v752_v36 = vpack.c.bf16 %v744_v19, %v744_v19 }
 0x1e7   : > { %v758_v38 = vunpack.c.l.b16 %v752_v36 }
 0x1e9   : > { %v4086_v39 = vpack.c.b16 %v758_v38, %v757_v37 }
 0x1ea   : > { %v746_v40 = vpop.f32.mrf.mxu0 }
 0x1eb   : > { %967 = vrot.lane.b32.xlu1 %v4086_v39, %s3799_s1  ;;  %760 = vrot.lane.b32.xlu0 %v4086_v39, %s3800_s29  ;;  %v747_v41 = vadd.f32 %v3473_v33, %v746_v40 }
 0x1ed   : > { %v753_v43 = vpack.c.bf16 %v747_v41, %v747_v41 }
 0x1ef   : > { %v785_v46 = vunpack.c.l.b16 %v753_v43 }
 0x1f2   : > { %v748_v42 = vpop.f32.mrf.mxu0 }
 0x1f3   : > { %v749_v44 = vadd.f32 %v3473_v33, %v748_v42  ;;  %1371 = vrot.lane.b32.xlu1 %v4086_v39, %s3801_s21  ;;  %1167 = vrot.lane.b32.xlu0 %v4086_v39, %s3802_s19 }
 0x1f5   : > { %v754_v45 = vpack.c.bf16 %v749_v44, %v749_v44 }
 0x1f7   : > { %v786_v47 = vunpack.c.l.b16 %v754_v45 }
 0x1f9   : > { %v4092_v48 = vpack.c.b16 %v786_v47, %v785_v46 }
 0x1fb   : > { %989 = vrot.lane.b32.xlu1 %v4092_v48, %s3803_s13  ;;  %991 = vrot.lane.b32.xlu0 %v4092_v48, %s3799_s1  ;;  %s3815_s1 = smov 104  }
 0x1fc   : > { %788 = vrot.lane.b32.xlu2 %v4092_v48, %s3800_s29  ;;  %s3816_s29 = smov 48  }
 0x203   : > { %1571 = vrot.lane.b32.xlu1 %v4086_v39, %s3804_s14  ;;  %1573 = vrot.lane.b32.xlu0 %v4086_v39, %s3805_s27 }
 0x204   : > { %965 = vrot.lane.b32.xlu2 %v4086_v39, %s3803_s13  ;;  %s3819_s13 = smov 44  }
 0x20b   : > { %1977 = vrot.lane.b32.xlu1 %v4086_v39, %s3806_s30  ;;  %1773 = vrot.lane.b32.xlu0 %v4086_v39, %s3807_s12 }
 0x20c   : > { %1169 = vrot.lane.b32.xlu2 %v4086_v39, %s3808_s15 }
 0x213   : > { %1395 = vrot.lane.b32.xlu1 %v4092_v48, %s3801_s21  ;;  %1191 = vrot.lane.b32.xlu0 %v4092_v48, %s3802_s19  ;;  %s3817_s21 = smov 60   ;;  %s3818_s19 = smov 56  }
 0x214   : > { %1369 = vrot.lane.b32.xlu2 %v4086_v39, %s3809_s17 }
 0x21b   : > { %2177 = vrot.lane.b32.xlu1 %v4086_v39, %s3810_s20  ;;  %2179 = vrot.lane.b32.xlu0 %v4086_v39, %s3811_s23 }
 0x21c   : > { %1775 = vrot.lane.b32.xlu2 %v4086_v39, %s3812_s18 }
 0x223   : > { %1522 = vrot.lane.b32.xlu1 %v4086_v39, %s3813_s0  ;;  %916 = vrot.lane.b32.xlu0 %v4086_v39, %s3814_s24 }
 0x224   : > { %1193 = vrot.lane.b32.xlu2 %v4092_v48, %s3808_s15  ;;  %s3824_s15 = smov 12  }
 0x22b   : > { %1595 = vrot.lane.b32.xlu1 %v4092_v48, %s3804_s14  ;;  %1597 = vrot.lane.b32.xlu0 %v4092_v48, %s3805_s27  ;;  %s3820_s14 = smov 40   ;;  %s3821_s27 = smov 36  }
 0x22c   : > { %1975 = vrot.lane.b32.xlu2 %v4086_v39, %s3815_s1 }
 0x233   : > { %2001 = vrot.lane.b32.xlu1 %v4092_v48, %s3806_s30  ;;  %1724 = vrot.lane.b32.xlu0 %v4086_v39, %s3816_s29  ;;  %s3822_s30 = smov 4  }
 0x234   : > { %1118 = vrot.lane.b32.xlu2 %v4086_v39, %s3817_s21 }
 0x23b   : > { %941 = vrot.lane.b32.xlu1 %v4092_v48, %s3814_s24  ;;  %1797 = vrot.lane.b32.xlu0 %v4092_v48, %s3807_s12  ;;  %s3823_s12 = smov 8  }
 0x23c   : > { %1393 = vrot.lane.b32.xlu2 %v4092_v48, %s3809_s17  ;;  %s3825_s17 = smov 16  }
 0x243   : > { %1547 = vrot.lane.b32.xlu1 %v4092_v48, %s3813_s0  ;;  %2203 = vrot.lane.b32.xlu0 %v4092_v48, %s3811_s23  ;;  %s3827_s23 = smov 24  }
 0x244   : > { %1320 = vrot.lane.b32.xlu2 %v4086_v39, %s3818_s19 }
 0x24b   : > { %1143 = vrot.lane.b32.xlu0 %v4092_v48, %s3817_s21 }
 0x24c   : > { %1926 = vrot.lane.b32.xlu2 %v4086_v39, %s3819_s13 }
 0x254   : > { %1799 = vrot.lane.b32.xlu2 %v4092_v48, %s3812_s18  ;;  %s3828_s18 = smov 28  }
 0x256   : > { %v789_v49 = vpop.permute.xlu2 %788 }
 0x257   : > { %v794_v50 = vsel %vm762_vm14, %v789_v49, 0 }
 0x258   : > { %803 = vmatpush.bf16.xpose.msra.mxu2 %v794_v50 }
 0x25c   : > { %1999 = vrot.lane.b32.xlu2 %v4092_v48, %s3815_s1 }
 0x25d   : > { %v968_v51 = vpop.permute.xlu1 %967  ;;  %v761_v52 = vpop.permute.xlu0 %760 }
 0x25e   : > { %v966_v53 = vpop.permute.xlu2 %965  ;;  %v767_v54 = vsel %vm762_vm14, %v761_v52, 0  ;;  %v973_v55 = vsel %vm762_vm14, %v968_v51, 0 }
 0x25f   : > { %3290 = vmatmul.msk.bf16.vlgmr.msra.gmra.mxu2 %vm762_vm14, %v4092_v48  ;;  %776 = vmatpush.bf16.xpose.msra.mxu1 %v767_v54 }
 0x264   : > { %2201 = vrot.lane.b32.xlu2 %v4092_v48, %s3810_s20  ;;  %s3826_s20 = smov 20  }
 0x265   : > { %v1372_v56 = vpop.permute.xlu1 %1371  ;;  %v1168_v57 = vpop.permute.xlu0 %1167 }
 0x266   : > { %v1170_v58 = vpop.permute.xlu2 %1169  ;;  %3289 = vmatmul.msk.bf16.vlgmr.msra.gmra.mxu1 %vm762_vm14, %v4086_v39  ;;  %v1377_v2 = vsel %vm762_vm14, %v1372_v56, 0 }
 0x267   : > { %982 = vmatpush.bf16.xpose.msrb.mxu1 %v973_v55  ;;  %v1175_v59 = vsel %vm762_vm14, %v1170_v58, 0 }
 0x26c   : > { %1345 = vrot.lane.b32.xlu2 %v4092_v48, %s3818_s19  ;;  %s5541_s19 = sld [smem:[#allocation31_spill]] }
 0x26d   : > { %v990_v60 = vpop.permute.xlu1 %989  ;;  %v992_v61 = vpop.permute.xlu0 %991 }
 0x26e   : > { %v1370_v62 = vpop.permute.xlu2 %1369  ;;  %v997_v63 = vsel %vm762_vm14, %v992_v61, 0 }
 0x26f   : > { %1184 = vmatpush.bf16.xpose.msra.mxu1 %v1175_v59  ;;  %1006 = vmatpush.bf16.xpose.msrb.mxu2 %v997_v63 }
 0x275   : > { %v1572_v0 = vpop.permute.xlu1 %1571  ;;  %v1574_v1 = vpop.permute.xlu0 %1573 }
 0x276   : > { %v1776_v3 = vpop.permute.xlu2 %1775  ;;  %3293 = vmatmul.msk.bf16.vlgmr.msrb.gmra.mxu1 %vm762_vm14, %v966_v53  ;;  %3294 = vmatmul.msk.bf16.vlgmr.msrb.gmra.mxu2 %vm762_vm14, %v990_v60  ;;  %v1579_v10 = vsel %vm762_vm14, %v1574_v1, 0 }
 0x277   : > { %1386 = vmatpush.bf16.xpose.msrb.mxu1 %v1377_v2  ;;  %v1781_v22 = vsel %vm762_vm14, %v1776_v3, 0 }
 0x27d   : > { %v1978_v4 = vpop.permute.xlu1 %1977  ;;  %v1774_v5 = vpop.permute.xlu0 %1773 }
 0x27e   : > { %v1194_v6 = vpop.permute.xlu2 %1193  ;;  %v1983_v33 = vsel %vm762_vm14, %v1978_v4, 0 }
 0x27f   : > { %v1199_v7 = vsel %vm762_vm14, %v1194_v6, 0 }
 0x280   : > { %1208 = vmatpush.bf16.xpose.msra.mxu2 %v1199_v7 }
 0x285   : > { %v1396_v8 = vpop.permute.xlu1 %1395  ;;  %v1192_v9 = vpop.permute.xlu0 %1191 }
 0x286   : > { %v1401_v11 = vsel %vm762_vm14, %v1396_v8, 0  ;;  %v1976_v12 = vpop.permute.xlu2 %1975  ;;  %3297 = vmatmul.msk.bf16.vlgmr.msra.gmra.mxu1 %vm762_vm14, %v1168_v57 }
 0x287   : > { %3298 = vmatmul.msk.bf16.vlgmr.msra.gmra.mxu2 %vm762_vm14, %v1192_v9  ;;  %1588 = vmatpush.bf16.xpose.msra.mxu1 %v1579_v10 }
 0x288   : > { %1410 = vmatpush.bf16.xpose.msrb.mxu2 %v1401_v11 }
 0x28d   : > { %v2178_v13 = vpop.permute.xlu1 %2177  ;;  %v2180_v15 = vpop.permute.xlu0 %2179 }
 0x28e   : > { %v1119_v16 = vpop.permute.xlu2 %1118  ;;  %v2185_v40 = vsel %vm762_vm14, %v2180_v15, 0 }
 0x295   : > { %v4151_v20 = vpop.permute.xlu1 %1522  ;;  %v917_v21 = vpop.permute.xlu0 %916 }
 0x296   : > { %v1394_v23 = vpop.permute.xlu2 %1393  ;;  %929 = vmatpush.bf16.msrb.mxu0 %v917_v21  ;;  %3301 = vmatmul.msk.bf16.vlgmr.msrb.gmra.mxu1 %vm762_vm14, %v1370_v62 }
 0x297   : > { %3302 = vmatmul.msk.bf16.vlgmr.msrb.gmra.mxu2 %vm762_vm14, %v1394_v23  ;;  %1790 = vmatpush.bf16.xpose.msrb.mxu1 %v1781_v22 }
 0x29d   : > { %v1596_v24 = vpop.permute.xlu1 %1595  ;;  %v1598_v25 = vpop.permute.xlu0 %1597 }
 0x29e   : > { %v4156_v26 = vpop.permute.xlu2 %1320  ;;  %v1603_v27 = vsel %vm762_vm14, %v1598_v25, 0 }
 0x29f   : > { %1612 = vmatpush.bf16.xpose.msra.mxu2 %v1603_v27 }
 0x2a5   : > { %v2002_v31 = vpop.permute.xlu1 %2001  ;;  %v4159_v32 = vpop.permute.xlu0 %1724 }
 0x2a6   : > { %v4162_v34 = vpop.permute.xlu2 %1926  ;;  %3305 = vmatmul.msk.bf16.vlgmr.msra.gmra.mxu1 %vm762_vm14, %v1572_v0  ;;  %v2007_v37 = vsel %vm762_vm14, %v2002_v31, 0 }
 0x2a7   : > { %3306 = vmatmul.msk.bf16.vlgmr.msra.gmra.mxu2 %vm762_vm14, %v1596_v24  ;;  %1992 = vmatpush.bf16.xpose.msra.mxu1 %v1983_v33 }
 0x2ad   : > { %v942_v29 = vpop.permute.xlu1 %941  ;;  %v1798_v35 = vpop.permute.xlu0 %1797 }
 0x2ae   : > { %v1800_v19 = vpop.permute.xlu2 %1799  ;;  %954 = vmatpush.bf16.msra.mxu3 %v942_v29 }
 0x2af   : > { %v1805_v36 = vsel %vm762_vm14, %v1800_v19, 0 }
 0x2b0   : > { %1814 = vmatpush.bf16.xpose.msrb.mxu2 %v1805_v36 }
 0x2b2   : > { %1131 = vmatpush.bf16.msrb.mxu3 %v1119_v16 }
 0x2b5   : > { %v2204_v38 = vpop.permute.xlu0 %2203 }
 0x2b6   : > { %v2209_v41 = vsel %vm762_vm14, %v2204_v38, 0  ;;  %3309 = vmatmul.msk.bf16.vlgmr.msrb.gmra.mxu1 %vm762_vm14, %v1774_v5  ;;  %v2000_v43 = vpop.permute.xlu2 %1999 }
 0x2b7   : > { %3310 = vmatmul.msk.bf16.vlgmr.msrb.gmra.mxu2 %vm762_vm14, %v1798_v35  ;;  %2194 = vmatpush.bf16.xpose.msrb.mxu1 %v2185_v40 }
 0x2b8   : > { %2016 = vmatpush.bf16.xpose.msra.mxu2 %v2007_v37 }
 0x2bd   : > { %v1144_v42 = vpop.permute.xlu0 %1143 }
 0x2be   : > { %1156 = vmatpush.bf16.msra.mxu0 %v1144_v42  ;;  %v2202_v44 = vpop.permute.xlu2 %2201 }
 0x2c0   : > { %2218 = vmatpush.bf16.xpose.msrb.mxu2 %v2209_v41 }
 0x2c6   : > { %3313 = vmatmul.msk.bf16.vlgmr.msra.gmra.mxu1 %vm762_vm14, %v1976_v12 }
 0x2c7   : > { %3314 = vmatmul.msk.bf16.vlgmr.msra.gmra.mxu2 %vm762_vm14, %v2000_v43 }
 0x2d6   : > { %3317 = vmatmul.msk.bf16.vlgmr.msrb.gmra.mxu1 %vm762_vm14, %v2178_v13 }
 0x2d7   : > { %3318 = vmatmul.msk.bf16.vlgmr.msrb.gmra.mxu2 %vm762_vm14, %v2202_v44 }
 0x2e2   : > { %v4176_v45 = vpop.f32.mrf.mxu2 }
 0x2e3   : > { %v817_v46 = vsel %vm810_vm15, %v4176_v45, -inf  ;;  %v4180_v47 = vpop.f32.mrf.mxu1 }
 0x2e4   : > { %818 = vmax.xlane.f32.xlu1 %v817_v46  ;;  %v811_v49 = vsel %vm810_vm15, %v4180_v47, -inf }
 0x2e5   : > { %812 = vmax.xlane.f32.xlu0 %v811_v49 }
 0x2ea   : > { %v4184_v50 = vpop.f32.mrf.mxu2 }
 0x2eb   : > { %v4186_v51 = vpop.f32.mrf.mxu1  ;;  %v820_v52 = vsel %vm810_vm15, %v4184_v50, -inf }
 0x2ec   : > { %v814_v53 = vsel %vm810_vm15, %v4186_v51, -inf }
 0x2ed   : > { %821 = vmax.xlane.f32.xlu0 %v820_v52  ;;  %815 = vmax.xlane.f32.xlu2 %v814_v53  ;;  %v4286_v52 = vpop.permute.xlu2 %1345 }
 0x2f3   : > { %v4192_v54 = vpop.f32.mrf.mxu1 }
 0x2f4   : > { %v1013_v55 = vsel %vm810_vm15, %v4192_v54, -inf }
 0x2f5   : > { %1014 = vmax.xlane.f32.xlu2 %v1013_v55 }
 0x2f9   : > { %v4196_v56 = vpop.f32.mrf.mxu2 }
 0x2fa   : > { %v1019_v59 = vsel %vm810_vm15, %v4196_v56, -inf }
 0x2fb   : > { %v4198_v57 = vpop.f32.mrf.mxu1 }
 0x2fc   : > { %v1016_v58 = vsel %vm810_vm15, %v4198_v57, -inf }
 0x2fd   : > { %1017 = vmax.xlane.f32.xlu1 %v1016_v58  ;;  %1020 = vmax.xlane.f32.xlu2 %v1019_v59 }
 0x301   : > { %v4204_v60 = vpop.f32.mrf.mxu2 }
 0x302   : > { %v1022_v3 = vsel %vm810_vm15, %v4204_v60, -inf }
 0x303   : > { %v4206_v61 = vpop.f32.mrf.mxu1 }
 0x304   : > { %v1215_v62 = vsel %vm810_vm15, %v4206_v61, -inf }
 0x305   : > { %1216 = vmax.xlane.f32.xlu1 %v1215_v62 }
 0x30a   : > { %v4210_v63 = vpop.f32.mrf.mxu2 }
 0x30b   : > { %v4212_v0 = vpop.f32.mrf.mxu1  ;;  %v1221_v1 = vsel %vm810_vm15, %v4210_v63, -inf }
 0x30c   : > { %1222 = vmax.xlane.f32.xlu2 %v1221_v1  ;;  %v1218_v2 = vsel %vm810_vm15, %v4212_v0, -inf  ;;  %v4293_v1 = vpop.permute.xlu1 %1547 }
 0x30d   : > { %1219 = vmax.xlane.f32.xlu0 %v1218_v2  ;;  %1023 = vmax.xlane.f32.xlu1 %v1022_v3 }
 0x312   : > { %v4220_v4 = vpop.f32.mrf.mxu2 }
 0x313   : > { %v4222_v5 = vpop.f32.mrf.mxu1  ;;  %v1224_v7 = vsel %vm810_vm15, %v4220_v4, -inf }
 0x314   : > { %v1417_v6 = vsel %vm810_vm15, %v4222_v5, -inf }
 0x315   : > { %1418 = vmax.xlane.f32.xlu0 %v1417_v6  ;;  %1225 = vmax.xlane.f32.xlu1 %v1224_v7 }
 0x31a   : > { %v4228_v8 = vpop.f32.mrf.mxu2 }
 0x31b   : > { %v4230_v9 = vpop.f32.mrf.mxu1  ;;  %v1423_v16 = vsel %vm810_vm15, %v4228_v8, -inf }
 0x31c   : > { %v1420_v10 = vsel %vm810_vm15, %v4230_v9, -inf }
 0x31d   : > { %1421 = vmax.xlane.f32.xlu2 %v1420_v10 }
 0x322   : > { %v4234_v11 = vpop.f32.mrf.mxu2 }
 0x323   : > { %v4236_v12 = vpop.f32.mrf.mxu1  ;;  %v1426_v13 = vsel %vm810_vm15, %v4234_v11, -inf }
 0x324   : > { %1427 = vmax.xlane.f32.xlu1 %v1426_v13  ;;  %v1619_v15 = vsel %vm810_vm15, %v4236_v12, -inf }
 0x325   : > { %1620 = vmax.xlane.f32.xlu0 %v1619_v15  ;;  %1424 = vmax.xlane.f32.xlu2 %v1423_v16 }
 0x32a   : > { %v4244_v21 = vpop.f32.mrf.mxu2 }
 0x32b   : > { %v4246_v22 = vpop.f32.mrf.mxu1  ;;  %v1625_v35 = vsel %vm810_vm15, %v4244_v21, -inf }
 0x32c   : > { %v1622_v23 = vsel %vm810_vm15, %v4246_v22, -inf }
 0x32d   : > { %1623 = vmax.xlane.f32.xlu2 %v1622_v23 }
 0x332   : > { %v4250_v24 = vpop.f32.mrf.mxu2 }
 0x333   : > { %v4252_v25 = vpop.f32.mrf.mxu1  ;;  %v1628_v40 = vsel %vm810_vm15, %v4250_v24, -inf }
 0x334   : > { %v1821_v27 = vsel %vm810_vm15, %v4252_v25, -inf }
 0x335   : > { %1822 = vmax.xlane.f32.xlu0 %v1821_v27 }
 0x33a   : > { %v4256_v31 = vpop.f32.mrf.mxu2 }
 0x33b   : > { %v4258_v33 = vpop.f32.mrf.mxu1  ;;  %v1827_v42 = vsel %vm810_vm15, %v4256_v31, -inf }
 0x33c   : > { %v1824_v29 = vsel %vm810_vm15, %v4258_v33, -inf }
 0x33d   : > { %1825 = vmax.xlane.f32.xlu2 %v1824_v29  ;;  %1626 = vmax.xlane.f32.xlu0 %v1625_v35 }
 0x342   : > { %v4264_v19 = vpop.f32.mrf.mxu2 }
 0x343   : > { %v4266_v36 = vpop.f32.mrf.mxu1  ;;  %v1830_v37 = vsel %vm810_vm15, %v4264_v19, -inf }
 0x344   : > { %1831 = vmax.xlane.f32.xlu1 %v1830_v37  ;;  %v2023_v38 = vsel %vm810_vm15, %v4266_v36, -inf }
 0x345   : > { %2024 = vmax.xlane.f32.xlu0 %v2023_v38  ;;  %1629 = vmax.xlane.f32.xlu2 %v1628_v40 }
 0x34a   : > { %v4278_v43 = vpop.f32.mrf.mxu2 }
 0x34b   : > { %v4274_v41 = vpop.f32.mrf.mxu1  ;;  %v2029_v59 = vsel %vm810_vm15, %v4278_v43, -inf }
 0x34c   : > { %v2026_v46 = vsel %vm810_vm15, %v4274_v41, -inf }
 0x34d   : > { %1828 = vmax.xlane.f32.xlu0 %v1827_v42 }
 0x352   : > { %v4291_v62 = vpop.f32.mrf.mxu2 }
 0x353   : > { %v4280_v44 = vpop.f32.mrf.mxu1  ;;  %v2032_v38 = vsel %vm810_vm15, %v4291_v62, -inf }
 0x354   : > { %v2225_v49 = vsel %vm810_vm15, %v4280_v44, -inf }
 0x355   : > { %2027 = vmax.xlane.f32.xlu0 %v2026_v46  ;;  %2226 = vmax.xlane.f32.xlu1 %v2225_v49 }
 0x357   : > { %v819_v16 = vpop.xlane.xlu1 %818 }
 0x358   : > { %v813_v53 = vpop.xlane.xlu0 %812 }
 0x359   : > { %v823_v55 = vsub.f32 %v4180_v47, %v813_v53 }
 0x35a   : > { %v4304_v15 = vpop.f32.mrf.mxu2 }
 0x35b   : > { %v827_v58 = vmul.f32 1.442695, %v823_v55  ;;  %v4295_v3 = vpop.f32.mrf.mxu1  ;;  %v2231_v40 = vsel %vm810_vm15, %v4304_v15, -inf }
 0x35c   : > { %v2228_v47 = vsel %vm810_vm15, %v4295_v3, -inf }
 0x35d   : > { %3493 = vpow2.f32 %v827_v58  ;;  %2030 = vmax.xlane.f32.xlu1 %v2029_v59 }
 0x360   : > { %v816_v2 = vpop.xlane.xlu2 %815 }
 0x361   : > { %v824_v6 = vsub.f32 %v4186_v51, %v816_v2  ;;  %v825_v51 = vsub.f32 %v4176_v45, %v819_v16 }
 0x362   : > { %v4316_v53 = vpop.f32.mrf.mxu2 }
 0x363   : > { %v4298_v7 = vpop.eup %3493  ;;  %v829_v10 = vmul.f32 1.442695, %v824_v6  ;;  %v831_v42 = vmul.f32 1.442695, %v825_v51 }
 0x364   : > { %v835_v13 = vsel %vm810_vm15, %v4298_v7, 0.0 }
 0x365   : > { %3495 = vpow2.f32 %v829_v10  ;;  %2229 = vmax.xlane.f32.xlu1 %v2228_v47  ;;  %836 = vadd.xlane.f32.xlu0 %v835_v13  ;;  %v2234_v10 = vsel %vm810_vm15, %v4316_v53, -inf }
 0x368   : > { %v1015_v23 = vpop.xlane.xlu2 %1014 }
 0x369   : > { %v1025_v27 = vsub.f32 %v4192_v54, %v1015_v23  ;;  %v822_v54 = vpop.xlane.xlu0 %821 }
 0x36a   : > { %v826_v55 = vsub.f32 %v4184_v50, %v822_v54 }
 0x36b   : > { %v4307_v29 = vpop.eup %3495  ;;  %v1029_v35 = vmul.f32 1.442695, %v1025_v27 }
 0x36c   : > { %v838_v37 = vsel %vm810_vm15, %v4307_v29, 0.0  ;;  %v833_v47 = vmul.f32 1.442695, %v826_v55 }
 0x36d   : > { %3497 = vpow2.f32 %v1029_v35  ;;  %839 = vadd.xlane.f32.xlu2 %v838_v37  ;;  %2033 = vmax.xlane.f32.xlu1 %v2032_v38 }
 0x36e   : > { %2232 = vmax.xlane.f32.xlu0 %v2231_v40  ;;  %3499 = vpow2.f32 %v831_v42 }
 0x370   : > { %v1018_v46 = vpop.xlane.xlu1 %1017  ;;  %v1021_v49 = vpop.xlane.xlu2 %1020 }
 0x371   : > { %v1026_v45 = vsub.f32 %v4198_v57, %v1018_v46  ;;  %v1027_v2 = vsub.f32 %v4196_v56, %v1021_v49 }
 0x373   : > { %v4320_v58 = vpop.eup %3497  ;;  %v1031_v59 = vmul.f32 1.442695, %v1026_v45  ;;  %v1033_v13 = vmul.f32 1.442695, %v1027_v2 }
 0x374   : > { %v1037_v6 = vsel %vm810_vm15, %v4320_v58, 0.0  ;;  %v4327_v16 = vpop.eup %3499 }
 0x375   : > { %3501 = vpow2.f32 %v1031_v59  ;;  %1038 = vadd.xlane.f32.xlu1 %v1037_v6  ;;  %2235 = vmax.xlane.f32.xlu2 %v2234_v10  ;;  %v841_v23 = vsel %vm810_vm15, %v4327_v16, 0.0 }
 0x376   : > { %3503 = vpow2.f32 %v833_v47 }
 0x377   : > { %3505 = vpow2.f32 %v1033_v13 }
 0x378   : > { %v1217_v57 = vpop.xlane.xlu1 %1216 }
 0x379   : > { %v1227_v56 = vsub.f32 %v4206_v61, %v1217_v57 }
 0x37b   : > { %v4329_v50 = vpop.eup %3501  ;;  %v1231_v51 = vmul.f32 1.442695, %v1227_v56 }
 0x37c   : > { %v1040_v27 = vsel %vm810_vm15, %v4329_v50, 0.0  ;;  %v4336_v37 = vpop.eup %3503 }
 0x37d   : > { %842 = vadd.xlane.f32.xlu1 %v841_v23  ;;  %1041 = vadd.xlane.f32.xlu0 %v1040_v27  ;;  %v4339_v54 = vpop.eup %3505  ;;  %3507 = vpow2.f32 %v1231_v51  ;;  %v844_v59 = vsel %vm810_vm15, %v4336_v37, 0.0 }
 0x37e   : > { %v1043_v55 = vsel %vm810_vm15, %v4339_v54, 0.0 }
 0x37f   : > { %v1223_v35 = vpop.xlane.xlu2 %1222 }
 0x380   : > { %v1229_v38 = vsub.f32 %v4210_v63, %v1223_v35  ;;  %v1024_v40 = vpop.xlane.xlu1 %1023  ;;  %v1220_v42 = vpop.xlane.xlu0 %1219 }
 0x381   : > { %v1228_v61 = vsub.f32 %v4212_v0, %v1220_v42  ;;  %v1028_v49 = vsub.f32 %v4204_v60, %v1024_v40 }
 0x382   : > { %v1235_v46 = vmul.f32 1.442695, %v1229_v38 }
 0x383   : > { %v1233_v45 = vmul.f32 1.442695, %v1228_v61  ;;  %v1035_v63 = vmul.f32 1.442695, %v1028_v49  ;;  %v4347_v6 = vpop.eup %3507 }
 0x384   : > { %3509 = vpow2.f32 %v1235_v46  ;;  %v1239_v57 = vsel %vm810_vm15, %v4347_v6, 0.0 }
 0x385   : > { %1044 = vadd.xlane.f32.xlu1 %v1043_v55  ;;  %845 = vadd.xlane.f32.xlu0 %v844_v59  ;;  %3511 = vpow2.f32 %v1233_v45 }
 0x386   : > { %3513 = vpow2.f32 %v1035_v63 }
 0x388   : > { %v1419_v2 = vpop.xlane.xlu0 %1418 }
 0x389   : > { %v1429_v0 = vsub.f32 %v4222_v5, %v1419_v2  ;;  %v1226_v5 = vpop.xlane.xlu1 %1225 }
 0x38a   : > { %v4350_v10 = vpop.eup %3509  ;;  %v1230_v35 = vsub.f32 %v4220_v4, %v1226_v5 }
 0x38b   : > { %v1433_v60 = vmul.f32 1.442695, %v1429_v0  ;;  %v4352_v47 = vpop.eup %3511  ;;  %v1245_v13 = vsel %vm810_vm15, %v4350_v10, 0.0 }
 0x38c   : > { %v1242_v56 = vsel %vm810_vm15, %v4352_v47, 0.0  ;;  %v4360_v27 = vpop.eup %3513  ;;  %v1237_v46 = vmul.f32 1.442695, %v1230_v35 }
 0x38d   : > { %1246 = vadd.xlane.f32.xlu1 %v1245_v13  ;;  %1240 = vadd.xlane.f32.xlu0 %v1239_v57  ;;  %3515 = vpow2.f32 %v1433_v60  ;;  %v1046_v42 = vsel %vm810_vm15, %v4360_v27, 0.0 }
 0x38e   : > { %1243 = vadd.xlane.f32.xlu2 %v1242_v56 }
 0x390   : > { %v1422_v23 = vpop.xlane.xlu2 %1421 }
 0x391   : > { %v1430_v51 = vsub.f32 %v4230_v9, %v1422_v23 }
 0x393   : > { %v1435_v38 = vmul.f32 1.442695, %v1430_v51  ;;  %v4364_v40 = vpop.eup %3515 }
 0x394   : > { %v1441_v61 = vsel %vm810_vm15, %v4364_v40, 0.0 }
 0x395   : > { %3517 = vpow2.f32 %v1435_v38  ;;  %1047 = vadd.xlane.f32.xlu0 %v1046_v42 }
 0x396   : > { %1442 = vadd.xlane.f32.xlu2 %v1441_v61  ;;  %3519 = vpow2.f32 %v1237_v46 }
 0x397   : > { %v1428_v0 = vpop.xlane.xlu1 %1427 }
 0x398   : > { %v1425_v49 = vpop.xlane.xlu2 %1424  ;;  %v1621_v45 = vpop.xlane.xlu0 %1620 }
 0x399   : > { %v1431_v55 = vsub.f32 %v4228_v8, %v1425_v49  ;;  %v1631_v59 = vsub.f32 %v4236_v12, %v1621_v45  ;;  %v1432_v8 = vsub.f32 %v4234_v11, %v1428_v0 }
 0x39b   : > { %v4371_v9 = vpop.eup %3517  ;;  %v1437_v4 = vmul.f32 1.442695, %v1431_v55  ;;  %v1635_v2 = vmul.f32 1.442695, %v1631_v59  ;;  %v1439_v51 = vmul.f32 1.442695, %v1432_v8 }
 0x39c   : > { %v1444_v63 = vsel %vm810_vm15, %v4371_v9, 0.0  ;;  %v4376_v13 = vpop.eup %3519 }
 0x39d   : > { %3521 = vpow2.f32 %v1437_v4  ;;  %1445 = vadd.xlane.f32.xlu1 %v1444_v63  ;;  %v1248_v12 = vsel %vm810_vm15, %v4376_v13, 0.0 }
 0x39e   : > { %3523 = vpow2.f32 %v1635_v2 }
 0x3a0   : > { %v1624_v60 = vpop.xlane.xlu2 %1623 }
 0x3a1   : > { %v1632_v57 = vsub.f32 %v4246_v22, %v1624_v60 }
 0x3a3   : > { %v4379_v56 = vpop.eup %3521  ;;  %v1637_v5 = vmul.f32 1.442695, %v1632_v57 }
 0x3a4   : > { %v1447_v23 = vsel %vm810_vm15, %v4379_v56, 0.0  ;;  %v4386_v38 = vpop.eup %3523 }
 0x3a5   : > { %3525 = vpow2.f32 %v1637_v5  ;;  %1249 = vadd.xlane.f32.xlu1 %v1248_v12  ;;  %1448 = vadd.xlane.f32.xlu0 %v1447_v23  ;;  %v1643_v61 = vsel %vm810_vm15, %v4386_v38, 0.0 }
 0x3a6   : > { %3527 = vpow2.f32 %v1439_v51 }
 0x3a8   : > { %v1823_v35 = vpop.xlane.xlu0 %1822 }
 0x3a9   : > { %v1833_v11 = vsub.f32 %v4252_v25, %v1823_v35 }
 0x3ab   : > { %v4388_v22 = vpop.eup %3525  ;;  %v1837_v46 = vmul.f32 1.442695, %v1833_v11 }
 0x3ac   : > { %v1646_v42 = vsel %vm810_vm15, %v4388_v22, 0.0  ;;  %v4395_v55 = vpop.eup %3527 }
 0x3ad   : > { %1647 = vadd.xlane.f32.xlu2 %v1646_v42  ;;  %1644 = vadd.xlane.f32.xlu1 %v1643_v61  ;;  %3529 = vpow2.f32 %v1837_v46  ;;  %v1450_v25 = vsel %vm810_vm15, %v4395_v55, 0.0 }
 0x3b0   : > { %v1826_v49 = vpop.xlane.xlu2 %1825  ;;  %v1627_v45 = vpop.xlane.xlu0 %1626 }
 0x3b1   : > { %v1633_v4 = vsub.f32 %v4244_v21, %v1627_v45  ;;  %v1834_v59 = vsub.f32 %v4258_v33, %v1826_v49 }
 0x3b3   : > { %v1639_v63 = vmul.f32 1.442695, %v1633_v4  ;;  %v1839_v2 = vmul.f32 1.442695, %v1834_v59  ;;  %v4402_v8 = vpop.eup %3529 }
 0x3b4   : > { %v1845_v23 = vsel %vm810_vm15, %v4402_v8, 0.0 }
 0x3b5   : > { %1451 = vadd.xlane.f32.xlu1 %v1450_v25  ;;  %3531 = vpow2.f32 %v1639_v63 }
 0x3b6   : > { %3533 = vpow2.f32 %v1839_v2 }
 0x3b7   : > { %v1832_v0 = vpop.xlane.xlu1 %1831 }
 0x3b8   : > { %v1836_v60 = vsub.f32 %v4264_v19, %v1832_v0  ;;  %v2025_v57 = vpop.xlane.xlu0 %2024  ;;  %v1630_v5 = vpop.xlane.xlu2 %1629 }
 0x3b9   : > { %v1634_v33 = vsub.f32 %v4250_v24, %v1630_v5 }
 0x3ba   : > { %v1843_v12 = vmul.f32 1.442695, %v1836_v60 }
 0x3bb   : > { %v4404_v21 = vpop.eup %3531  ;;  %v1641_v19 = vmul.f32 1.442695, %v1634_v33 }
 0x3bc   : > { %3535 = vpow2.f32 %v1843_v12  ;;  %v1649_v51 = vsel %vm810_vm15, %v4404_v21, 0.0  ;;  %v4411_v11 = vpop.eup %3533 }
 0x3bd   : > { %1846 = vadd.xlane.f32.xlu1 %v1845_v23  ;;  %1650 = vadd.xlane.f32.xlu0 %v1649_v51  ;;  %3537 = vpow2.f32 %v1641_v19  ;;  %v1848_v24 = vsel %vm810_vm15, %v4411_v11, 0.0  ;;  %v2035_v51 = vsub.f32 %v4266_v36, %v2025_v57 }
 0x3c0   : > { %v1829_v35 = vpop.xlane.xlu0 %1828 }
 0x3c2   : > { %v4413_v42 = vpop.eup %3535 }
 0x3c3   : > { %v1854_v61 = vsel %vm810_vm15, %v4413_v42, 0.0  ;;  %v4422_v4 = vpop.eup %3537 }
 0x3c4   : > { %v1652_v25 = vsel %vm810_vm15, %v4422_v4, 0.0 }
 0x3c5   : > { %1749 = vrot.lane.b32.xlu2 %v4092_v48, %s3816_s29  ;;  %1855 = vadd.xlane.f32.xlu1 %v1854_v61  ;;  %s5544_s29 = sld [smem:[#allocation32_spill]] }
 0x3c6   : > { %1849 = vadd.xlane.f32.xlu0 %v1848_v24  ;;  %v2039_v24 = vmul.f32 1.442695, %v2035_v51 }
 0x3c8   : > { %v2227_v46 = vpop.xlane.xlu1 %2226  ;;  %v2028_v49 = vpop.xlane.xlu0 %2027 }
 0x3c9   : > { %v2036_v45 = vsub.f32 %v4274_v41, %v2028_v49  ;;  %v2237_v63 = vsub.f32 %v4280_v44, %v2227_v46 }
 0x3cb   : > { %v2041_v59 = vmul.f32 1.442695, %v2036_v45  ;;  %v2241_v2 = vmul.f32 1.442695, %v2237_v63 }
 0x3cd   : > { %3539 = vpow2.f32 %v2041_v59 }
 0x3ce   : > { %1653 = vadd.xlane.f32.xlu0 %v1652_v25  ;;  %3541 = vpow2.f32 %v2241_v2  ;;  %v1835_v25 = vsub.f32 %v4256_v31, %v1829_v35 }
 0x3d0   : > { %v2031_v0 = vpop.xlane.xlu1 %2030 }
 0x3d1   : > { %v2037_v5 = vsub.f32 %v4278_v43, %v2031_v0 }
 0x3d3   : > { %v4427_v60 = vpop.eup %3539  ;;  %v2043_v12 = vmul.f32 1.442695, %v2037_v5  ;;  %v1841_v5 = vmul.f32 1.442695, %v1835_v25 }
 0x3d4   : > { %v2050_v41 = vsel %vm810_vm15, %v4427_v60, 0.0  ;;  %v4432_v44 = vpop.eup %3541 }
 0x3d5   : > { %5468 = vst [vmem:[#allocation23_spill] sm:$0xff] %v4432_v44  ;;  %v2249_v19 = vsel %vm810_vm15, %v4432_v44, 0.0 }
 0x3d6   : > { %2051 = vadd.xlane.f32.xlu0 %v2050_v41 }
 0x3d8   : > { %v2230_v33 = vpop.xlane.xlu1 %2229  ;;  %v837_v23 = vpop.xlane.xlu0 %836 }
 0x3d9   : > { %3543 = vrcp.f32 %v837_v23  ;;  %v858_v31 = vand.u32 2147483648, %v837_v23  ;;  %vm852_vm2 = vweird.f32 %v837_v23 }
 0x3da   : > { %3545 = vpow2.f32 %v2043_v12 }
 0x3de   : > { %2250 = vadd.xlane.f32.xlu0 %v2249_v19 }
 0x3df   : > { %v3544_v61 = vpop.eup %3543 }
 0x3e0   : > { %v848_v43 = vmul.f32 %v3544_v61, %v837_v23  ;;  %v840_v46 = vpop.xlane.xlu2 %839  ;;  %v2034_v49 = vpop.xlane.xlu1 %2033  ;;  %vm853_vm1 = vweird.f32 %v3544_v61 }
 0x3e1   : > { %3547 = vrcp.f32 %v840_v46  ;;  %v4437_v45 = vpop.eup %3545  ;;  %v2038_v63 = vsub.f32 %v4291_v62, %v2034_v49  ;;  %v4443_v12 = vpop.xlane.xlu0 %2232  ;;  %vm4452_vm3 = vmor %vm852_vm2, %vm853_vm1  ;;  %vm867_vm5 = vweird.f32 %v840_v46 }
 0x3e2   : > { %5469 = vst [vmem:[#allocation24_spill] sm:$0xff] %v4437_v45  ;;  %v849_v59 = vsub.f32 1.0, %v848_v43  ;;  %3549 = vpow2.f32 %v2039_v24  ;;  %v2053_v2 = vsel %vm810_vm15, %v4437_v45, 0.0  ;;  %v856_v24 = vand.u32 2147483647, %v837_v23 }
 0x3e3   : > { %v2045_v36 = vmul.f32 1.442695, %v2038_v63  ;;  %v873_v43 = vand.u32 2147483648, %v840_v46 }
 0x3e4   : > { %v850_v57 = vmul.f32 %v3544_v61, %v849_v59  ;;  %v2238_v59 = vsub.f32 %v4295_v3, %v2230_v33  ;;  %vm857_vm6 = vcmp.eq.f32.partialorder %v856_v24, 8.507059e+37 }
 0x3e5   : > { %3551 = vpow2.f32 %v2045_v36  ;;  %v871_v36 = vand.u32 2147483647, %v840_v46  ;;  %v874_v3 = vor.u32 1.1754944e-38, %v873_v43 }
 0x3e6   : > { %2054 = vadd.xlane.f32.xlu0 %v2053_v2  ;;  %v851_v19 = vadd.f32 %v3544_v61, %v850_v57  ;;  %3553 = vpow2.f32 %v1841_v5  ;;  %v859_v5 = vor.u32 1.1754944e-38, %v858_v31  ;;  %v2243_v33 = vmul.f32 1.442695, %v2238_v59 }
 0x3e7   : > { %v3548_v0 = vpop.eup %3547  ;;  %vm872_vm8 = vcmp.eq.f32.partialorder %v871_v36, 8.507059e+37 }
 0x3e8   : > { %v863_v41 = vmul.f32 %v3548_v0, %v840_v46  ;;  %v4445_v51 = vpop.xlane.xlu1 %1038  ;;  %v4447_v62 = vpop.eup %3549  ;;  %vm868_vm4 = vweird.f32 %v3548_v0  ;;  %v855_v57 = vsel %vm4452_vm3, %v3544_v61, %v851_v19  ;;  %3555 = vpow2.f32 %v2243_v33 }
 0x3e9   : > { %v2047_v23 = vsel %vm810_vm15, %v4447_v62, 0.0  ;;  %vm869_vm7 = vmor %vm867_vm5, %vm868_vm4  ;;  %3557 = vrcp.f32 %v4445_v51  ;;  %vm1054_vm11 = vweird.f32 %v4445_v51 }
 0x3ea   : > { %v864_v35 = vsub.f32 1.0, %v863_v41 }
 0x3eb   : > { %v4449_v49 = vpop.eup %3551 }
 0x3ec   : > { %5470 = vst [vmem:[#allocation25_spill] sm:$0xff] %v4449_v49  ;;  %v865_v25 = vmul.f32 %v3548_v0, %v864_v35  ;;  %v2056_v2 = vsel %vm810_vm15, %v4449_v49, 0.0  ;;  %v860_v35 = vsel %vm857_vm6, %v859_v5, %v855_v57  ;;  %v4464_v61 = vpop.eup %3553 }
 0x3ed   : > { %2057 = vadd.xlane.f32.xlu1 %v2056_v2  ;;  %5473 = vst [vmem:[#allocation26_spill] sm:$0xff] %v4464_v61  ;;  %v861_v31 = vmul.f32 %v4298_v7, %v860_v35  ;;  %v1851_v24 = vsel %vm810_vm15, %v4464_v61, 0.0  ;;  %v2239_v2 = vsub.f32 %v4304_v15, %v4443_v12 }
 0x3ee   : > { %v866_v41 = vadd.f32 %v3548_v0, %v865_v25  ;;  %2048 = vadd.xlane.f32.xlu2 %v2047_v23  ;;  %v4476_v25 = vpop.eup %3555 }
 0x3ef   : > { %5474 = vst [vmem:[#allocation27_spill] sm:$0xff] %v4476_v25  ;;  %v4480_v7 = vpop.eup %3557  ;;  %v2252_v5 = vsel %vm810_vm15, %v4476_v25, 0.0  ;;  %v2245_v12 = vmul.f32 1.442695, %v2239_v2  ;;  %v1058_v2 = vand.u32 2147483647, %v4445_v51 }
 0x3f0   : > { %v870_v28 = vsel %vm869_vm7, %v3548_v0, %v866_v41  ;;  %v4462_v63 = vpop.xlane.xlu0 %1041  ;;  %v4466_v30 = vpop.xlane.xlu1 %842  ;;  %v907_v0 = vpack.c.bf16 %v861_v31, %v861_v31  ;;  %v1050_v41 = vmul.f32 %v4480_v7, %v4445_v51  ;;  %vm1055_vm9 = vweird.f32 %v4480_v7 }
 0x3f1   : > { %v875_v19 = vsel %vm872_vm8, %v874_v3, %v870_v28  ;;  %3559 = vrcp.f32 %v4466_v30  ;;  %vm4535_vm12 = vcmp.eq.f32.partialorder %v1058_v2, 8.507059e+37  ;;  %vm4542_vm13 = vmor %vm1054_vm11, %vm1055_vm9  ;;  %vm882_vm1 = vweird.f32 %v4466_v30 }
 0x3f2   : > { %v876_v46 = vmul.f32 %v4307_v29, %v875_v19  ;;  %v913_v36 = vunpack.c.l.b16 %v907_v0  ;;  %v1051_v35 = vsub.f32 1.0, %v1050_v41  ;;  %v2236_v19 = vpop.xlane.xlu2 %2235  ;;  %vm1069_vm6 = vweird.f32 %v4462_v63 }
 0x3f4   : > { %v908_v43 = vpack.c.bf16 %v876_v46, %v876_v46 }
 0x3f6   : > { %1852 = vadd.xlane.f32.xlu2 %v1851_v24  ;;  %v914_v28 = vunpack.c.l.b16 %v908_v43  ;;  %v2240_v43 = vsub.f32 %v4316_v53, %v2236_v19  ;;  %v888_v19 = vand.u32 2147483648, %v4466_v30 }
 0x3f7   : > { %v4485_v57 = vpop.eup %3559 }
 0x3f8   : > { %v4474_v59 = vpop.xlane.xlu0 %845  ;;  %v4482_v29 = vpop.xlane.xlu1 %1044  ;;  %v915_v23 = vpack.c.b16 %v914_v28, %v913_v36  ;;  %v878_v3 = vmul.f32 %v4485_v57, %v4466_v30  ;;  %vm883_vm10 = vweird.f32 %v4485_v57 }
 0x3f9   : > { %3561 = vrcp.f32 %v4474_v59  ;;  %vm4557_vm3 = vmor %vm882_vm1, %vm883_vm10  ;;  %vm1084_vm5 = vweird.f32 %v4482_v29  ;;  %vm897_vm7 = vweird.f32 %v4474_v59 }
 0x3fa   : > { %2128 = vrot.lane.b32.xlu0 %v4086_v39, %s3820_s14  ;;  %3563 = vrcp.f32 %v4482_v29  ;;  %3291 = vmatmul.msk.bf16.vlgmr.msrb.gmra.mxu0 %vm810_vm15, %v915_v23  ;;  %v879_v31 = vsub.f32 1.0, %v878_v3  ;;  %v1060_v23 = vand.u32 2147483648, %v4445_v51  ;;  %v2247_v3 = vmul.f32 1.442695, %v2240_v43 }
 0x3fb   : > { %1358 = vmatpush.bf16.msrb.mxu0 %v4286_v52  ;;  %3565 = vrcp.f32 %v4462_v63  ;;  %v1052_v52 = vmul.f32 %v4480_v7, %v1051_v35 }
 0x3fc   : > { %3567 = vpow2.f32 %v2245_v12  ;;  %v880_v0 = vmul.f32 %v4485_v57, %v879_v31  ;;  %v886_v12 = vand.u32 2147483647, %v4466_v30  ;;  %v1061_v17 = vor.u32 1.1754944e-38, %v1060_v23 }
 0x3fd   : > { %v1053_v35 = vadd.f32 %v4480_v7, %v1052_v52  ;;  %v889_v23 = vor.u32 1.1754944e-38, %v888_v19 }
 0x3fe   : > { %2253 = vadd.xlane.f32.xlu2 %v2252_v5  ;;  %vm4547_vm2 = vcmp.eq.f32.partialorder %v886_v12, 8.507059e+37 }
 0x3ff   : > { %v4500_v15 = vpop.eup %3561 }
 0x400   : > { %v4498_v33 = vpop.xlane.xlu0 %1240  ;;  %v4503_v46 = vpop.eup %3563  ;;  %v893_v24 = vmul.f32 %v4500_v15, %v4474_v59  ;;  %vm898_vm4 = vweird.f32 %v4500_v15 }
 0x401   : > { %v1080_v28 = vmul.f32 %v4503_v46, %v4482_v29  ;;  %v4514_v36 = vpop.eup %3565  ;;  %v4518_v41 = vpop.xlane.xlu1 %1246  ;;  %vm1085_vm8 = vweird.f32 %v4503_v46  ;;  %vm4597_vm9 = vmor %vm897_vm7, %vm898_vm4 }
 0x402   : > { %v894_v5 = vsub.f32 1.0, %v893_v24  ;;  %v4528_v31 = vpop.eup %3567  ;;  %v881_v24 = vadd.f32 %v4485_v57, %v880_v0  ;;  %v1065_v18 = vmul.f32 %v4514_v36, %v4462_v63  ;;  %v4540_v45 = vpop.xlane.xlu2 %1243  ;;  %vm1070_vm11 = vweird.f32 %v4514_v36 }
 0x403   : > { %5475 = vst [vmem:[#allocation28_spill] sm:$0xff] %v4528_v31  ;;  %v1081_v43 = vsub.f32 1.0, %v1080_v28  ;;  %v1057_v28 = vsel %vm4542_vm13, %v4480_v7, %v1053_v35  ;;  %v4564_v30 = vsel %vm810_vm15, %v4528_v31, 0.0  ;;  %v903_v35 = vand.u32 2147483648, %v4474_v59 }
 0x404   : > { %v895_v14 = vmul.f32 %v4500_v15, %v894_v5  ;;  %v1066_v12 = vsub.f32 1.0, %v1065_v18  ;;  %v885_v49 = vsel %vm4557_vm3, %v4485_v57, %v881_v24  ;;  %v1062_v18 = vsel %vm4535_vm12, %v1061_v17, %v1057_v28  ;;  %vm4614_vm12 = vmor %vm1084_vm5, %vm1085_vm8 }
 0x405   : > { %v1082_v51 = vmul.f32 %v4503_v46, %v1081_v43  ;;  %v1088_v43 = vand.u32 2147483647, %v4482_v29  ;;  %v901_v57 = vand.u32 2147483647, %v4474_v59  ;;  %v890_v24 = vsel %vm4547_vm2, %v889_v23, %v885_v49  ;;  %vm4648_vm5 = vmor %vm1069_vm6, %vm1070_vm11 }
 0x406   : > { %1951 = vrot.lane.b32.xlu1 %v4092_v48, %s3819_s13  ;;  %v896_v7 = vadd.f32 %v4500_v15, %v895_v14  ;;  %v1090_v14 = vand.u32 2147483648, %v4482_v29  ;;  %v1067_v17 = vmul.f32 %v4514_v36, %v1066_v12  ;;  %v904_v44 = vor.u32 1.1754944e-38, %v903_v35  ;;  %s5545_s13 = sld [smem:[#allocation33_spill]] }
 0x407   : > { %v1083_v52 = vadd.f32 %v4503_v46, %v1082_v51  ;;  %v891_v61 = vmul.f32 %v4327_v16, %v890_v24  ;;  %vm4618_vm13 = vcmp.eq.f32.partialorder %v1088_v43, 8.507059e+37  ;;  %vm902_vm1 = vcmp.eq.f32.partialorder %v901_v57, 8.507059e+37 }
 0x408   : > { %v4520_v53 = vpop.xlane.xlu0 %1047  ;;  %v900_v23 = vsel %vm4597_vm9, %v4500_v15, %v896_v7  ;;  %v1091_v15 = vor.u32 1.1754944e-38, %v1090_v14  ;;  %v1068_v43 = vadd.f32 %v4514_v36, %v1067_v17  ;;  %vm1286_vm6 = vweird.f32 %v4518_v41 }
 0x409   : > { %3569 = vrcp.f32 %v4520_v53  ;;  %v1105_v0 = vand.u32 2147483648, %v4520_v53  ;;  %v1103_v49 = vand.u32 2147483647, %v4520_v53  ;;  %v1087_v16 = vsel %vm4614_vm12, %v4503_v46, %v1083_v52 }
 0x40a   : > { %3571 = vrcp.f32 %v4518_v41  ;;  %vm1099_vm2 = vweird.f32 %v4520_v53  ;;  %v905_v7 = vsel %vm902_vm1, %v904_v44, %v900_v23  ;;  %v909_v46 = vpack.c.bf16 %v891_v61, %v891_v61 }
 0x40b   : > { %3573 = vpow2.f32 %v2247_v3  ;;  %v1106_v57 = vor.u32 1.1754944e-38, %v1105_v0  ;;  %vm1104_vm4 = vcmp.eq.f32.partialorder %v1103_v49, 8.507059e+37  ;;  %v906_v35 = vmul.f32 %v4336_v37, %v905_v7 }
 0x40c   : > { %3575 = vrcp.f32 %v4540_v45  ;;  %v4642_v52 = vmul.f32 %v4320_v58, %v1062_v18  ;;  %v5492_v37 = vand.u32 2147483647, %v4462_v63  ;;  %v1290_v49 = vand.u32 2147483647, %v4518_v41 }
 0x40d   : > { %3577 = vrcp.f32 %v4498_v33  ;;  %v910_v18 = vpack.c.bf16 %v906_v35, %v906_v35  ;;  %v1292_v7 = vand.u32 2147483648, %v4518_v41  ;;  %v1275_v35 = vand.u32 2147483647, %v4540_v45 }
 0x40e   : > { %vm4654_vm7 = vcmp.eq.f32.partialorder %v5492_v37, 8.507059e+37  ;;  %vm4682_vm8 = vcmp.eq.f32.partialorder %v1290_v49, 8.507059e+37  ;;  %v1277_v37 = vand.u32 2147483648, %v4540_v45  ;;  %vm1256_vm11 = vweird.f32 %v4498_v33 }
 0x40f   : > { %v3570_v3 = vpop.eup %3569  ;;  %vm4711_vm1 = vcmp.eq.f32.partialorder %v1275_v35, 8.507059e+37  ;;  %v1262_v35 = vand.u32 2147483648, %v4498_v33 }
 0x410   : > { %v1095_v19 = vmul.f32 %v3570_v3, %v4520_v53  ;;  %v4575_v5 = vpop.xlane.xlu1 %1445  ;;  %v4577_v31 = vpop.eup %3571  ;;  %vm1100_vm10 = vweird.f32 %v3570_v3  ;;  %v1092_v53 = vsel %vm4618_vm13, %v1091_v15, %v1087_v16 }
 0x411   : > { %v4590_v2 = vpop.eup %3573  ;;  %v1282_v59 = vmul.f32 %v4577_v31, %v4518_v41  ;;  %vm1101_vm3 = vmor %vm1099_vm2, %vm1100_vm10  ;;  %v4667_v15 = vpop.xlane.xlu2 %1442  ;;  %v1093_v16 = vmul.f32 %v4339_v54, %v1092_v53  ;;  %vm1287_vm9 = vweird.f32 %v4577_v31  ;;  %vm1271_vm10 = vweird.f32 %v4540_v45 }
 0x412   : > { %v1096_v25 = vsub.f32 1.0, %v1095_v19  ;;  %v4607_v51 = vpop.eup %3575  ;;  %vm4705_vm12 = vmor %vm1286_vm6, %vm1287_vm9 }
 0x413   : > { %v1283_v24 = vsub.f32 1.0, %v1282_v59  ;;  %v1267_v14 = vmul.f32 %v4607_v51, %v4540_v45  ;;  %v5495_v59 = vand.u32 2147483648, %v4462_v63  ;;  %v1111_v53 = vpack.c.bf16 %v1093_v16, %v1093_v16 }
 0x414   : > { %v1097_v12 = vmul.f32 %v3570_v3, %v1096_v25  ;;  %v4624_v25 = vpop.eup %3577  ;;  %vm1272_vm13 = vweird.f32 %v4607_v51 }
 0x415   : > { %v1252_v44 = vmul.f32 %v4624_v25, %v4498_v33  ;;  %v1076_v0 = vor.u32 1.1754944e-38, %v5495_v59  ;;  %v1268_v19 = vsub.f32 1.0, %v1267_v14  ;;  %v1284_v63 = vmul.f32 %v4577_v31, %v1283_v24 }
 0x416   : > { %2330 = vrot.lane.b32.xlu2 %v4086_v39, %s3821_s27  ;;  %v1098_v29 = vadd.f32 %v3570_v3, %v1097_v12  ;;  %v1072_v12 = vsel %vm4648_vm5, %v4514_v36, %v1068_v43  ;;  %v1109_v36 = vpack.c.bf16 %v4642_v52, %v4642_v52  ;;  %v1140_v16 = vunpack.c.l.b16 %v1111_v53 }
 0x417   : > { %v1077_v24 = vsel %vm4654_vm7, %v1076_v0, %v1072_v12  ;;  %vm1257_vm2 = vweird.f32 %v4624_v25 }
 0x418   : > { %v4634_v39 = vpop.xlane.xlu1 %1249  ;;  %v1102_v28 = vsel %vm1101_vm3, %v3570_v3, %v1098_v29  ;;  %v4661_v23 = vpop.xlane.xlu0 %1448  ;;  %v938_v29 = vunpack.c.l.b16 %v909_v46  ;;  %v1293_v3 = vor.u32 1.1754944e-38, %v1292_v7  ;;  %vm4736_vm3 = vmor %vm1271_vm10, %vm1272_vm13 }
 0x419   : > { %v1107_v17 = vsel %vm1104_vm4, %v1106_v57, %v1102_v28  ;;  %3579 = vrcp.f32 %v4634_v39  ;;  %v1253_v57 = vsub.f32 1.0, %v1252_v44  ;;  %v1269_v28 = vmul.f32 %v4607_v51, %v1268_v19  ;;  %vm4754_vm5 = vmor %vm1256_vm11, %vm1257_vm2 }
 0x41a   : > { %v1108_v58 = vmul.f32 %v4360_v27, %v1107_v17  ;;  %v939_v27 = vunpack.c.l.b16 %v910_v18  ;;  %3581 = vrcp.f32 %v4661_v23  ;;  %v1285_v44 = vadd.f32 %v4577_v31, %v1284_v63 }
 0x41b   : > { %3583 = vrcp.f32 %v4667_v15  ;;  %v1254_v61 = vmul.f32 %v4624_v25, %v1253_v57  ;;  %v1270_v49 = vadd.f32 %v4607_v51, %v1269_v28  ;;  %v1260_v19 = vand.u32 2147483647, %v4498_v33 }
 0x41c   : > { %v1112_v54 = vpack.c.bf16 %v1108_v58, %v1108_v58  ;;  %v940_v43 = vpack.c.b16 %v939_v27, %v938_v29  ;;  %3585 = vrcp.f32 %v4575_v5  ;;  %v1078_v58 = vmul.f32 %v4329_v50, %v1077_v24 }
 0x41d   : > { %v1289_v41 = vsel %vm4705_vm12, %v4577_v31, %v1285_v44  ;;  %v1255_v27 = vadd.f32 %v4624_v25, %v1254_v61  ;;  %v1305_v7 = vand.u32 2147483647, %v4634_v39  ;;  %v1307_v57 = vand.u32 2147483648, %v4634_v39 }
 0x41e   : > { %2153 = vrot.lane.b32.xlu2 %v4092_v48, %s3820_s14  ;;  %3292 = vmatmul.msk.bf16.vlgmr.msra.gmra.mxu3 %vm810_vm15, %v940_v43  ;;  %v1141_v59 = vunpack.c.l.b16 %v1112_v54  ;;  %v1110_v43 = vpack.c.bf16 %v1078_v58, %v1078_v58  ;;  %v1294_v28 = vsel %vm4682_vm8, %v1293_v3, %v1289_v41  ;;  %vm1301_vm7 = vweird.f32 %v4634_v39 }
 0x41f   : > { %v3580_v17 = vpop.eup %3579  ;;  %1333 = vmatpush.bf16.msra.mxu3 %v4156_v26  ;;  %vm4761_vm6 = vcmp.eq.f32.partialorder %v1260_v19, 8.507059e+37  ;;  %vm1306_vm9 = vcmp.eq.f32.partialorder %v1305_v7, 8.507059e+37  ;;  %vm1458_vm11 = vweird.f32 %v4667_v15  ;;  %vm1488_vm13 = vweird.f32 %v4661_v23 }
 0x420   : > { %v4688_v46 = vpop.xlane.xlu1 %1644  ;;  %v1297_v0 = vmul.f32 %v3580_v17, %v4634_v39  ;;  %v4701_v18 = vpop.eup %3581  ;;  %vm1302_vm4 = vweird.f32 %v3580_v17  ;;  %v1142_v24 = vpack.c.b16 %v1141_v59, %v1140_v16  ;;  %v1308_v59 = vor.u32 1.1754944e-38, %v1307_v57 }
 0x421   : > { %v4717_v50 = vpop.eup %3583  ;;  %v1484_v29 = vmul.f32 %v4701_v18, %v4661_v23  ;;  %vm1303_vm8 = vmor %vm1301_vm7, %vm1302_vm4  ;;  %v1259_v39 = vsel %vm4754_vm5, %v4624_v25, %v1255_v27  ;;  %v1116_v58 = vunpack.c.l.b16 %v1110_v43  ;;  %v1115_v25 = vunpack.c.l.b16 %v1109_v36 }
 0x422   : > { %v1298_v63 = vsub.f32 1.0, %v1297_v0  ;;  %v1454_v45 = vmul.f32 %v4717_v50, %v4667_v15  ;;  %3296 = vmatmul.msk.bf16.vlgmr.msra.gmra.mxu0 %vm810_vm15, %v1142_v24  ;;  %vm1459_vm10 = vweird.f32 %v4717_v50  ;;  %vm1489_vm12 = vweird.f32 %v4701_v18 }
 0x423   : > { %v1485_v3 = vsub.f32 1.0, %v1484_v29  ;;  %1560 = vmatpush.bf16.msra.mxu0 %v4293_v1  ;;  %v4777_v1 = vpop.xlane.xlu2 %1647  ;;  %v2258_v29 = vsel %vm810_vm15, %v4590_v2, 0.0  ;;  %v1117_v57 = vpack.c.b16 %v1116_v58, %v1115_v25 }
 0x424   : > { %2256 = vadd.xlane.f32.xlu0 %v4564_v30  ;;  %v4730_v30 = vpop.eup %3585  ;;  %v1299_v54 = vmul.f32 %v3580_v17, %v1298_v63  ;;  %v1455_v16 = vsub.f32 1.0, %v1454_v45  ;;  %v1492_v45 = vand.u32 2147483647, %v4661_v23 }
 0x425   : > { %v1469_v33 = vmul.f32 %v4730_v30, %v4575_v5  ;;  %v1486_v63 = vmul.f32 %v4701_v18, %v1485_v3  ;;  %vm1474_vm4 = vweird.f32 %v4730_v30 }
 0x426   : > { %2355 = vrot.lane.b32.xlu2 %v4092_v48, %s3821_s27  ;;  %v1274_v48 = vsel %vm4736_vm3, %v4607_v51, %v1270_v49  ;;  %v1300_v14 = vadd.f32 %v3580_v17, %v1299_v54  ;;  %v1278_v51 = vor.u32 1.1754944e-38, %v1277_v37  ;;  %v1295_v37 = vmul.f32 %v4350_v10, %v1294_v28  ;;  %s5542_s27 = sld [smem:[#allocation34_spill]] }
 0x427   : > { %v1263_v49 = vor.u32 1.1754944e-38, %v1262_v35  ;;  %v1462_v10 = vand.u32 2147483647, %v4667_v15  ;;  %v1470_v26 = vsub.f32 1.0, %v1469_v33  ;;  %v1456_v43 = vmul.f32 %v4717_v50, %v1455_v16 }
 0x428   : > { %v4748_v53 = vpop.xlane.xlu1 %1451  ;;  %v1304_v0 = vsel %vm1303_vm8, %v3580_v17, %v1300_v14  ;;  %v1279_v12 = vsel %vm4711_vm1, %v1278_v51, %v1274_v48  ;;  %v1313_v31 = vpack.c.bf16 %v1295_v37, %v1295_v37  ;;  %v1487_v24 = vadd.f32 %v4701_v18, %v1486_v63  ;;  %vm4807_vm1 = vmor %vm1488_vm13, %vm1489_vm12 }
 0x429   : > { %3587 = vrcp.f32 %v4748_v53  ;;  %v1309_v19 = vsel %vm1306_vm9, %v1308_v59, %v1304_v0  ;;  %v1264_v17 = vsel %vm4761_vm6, %v1263_v49, %v1259_v39  ;;  %v1280_v52 = vmul.f32 %v4352_v47, %v1279_v12  ;;  %vm4828_vm8 = vmor %vm1458_vm11, %vm1459_vm10 }
 0x42a   : > { %v1310_v41 = vmul.f32 %v4376_v13, %v1309_v19  ;;  %v1464_v13 = vand.u32 2147483648, %v4667_v15  ;;  %3589 = vrcp.f32 %v4777_v1  ;;  %v1265_v54 = vmul.f32 %v4347_v6, %v1264_v17 }
 0x42b   : > { %v1471_v47 = vmul.f32 %v4730_v30, %v1470_v26  ;;  %v1494_v48 = vand.u32 2147483648, %v4661_v23  ;;  %3591 = vrcp.f32 %v4688_v46  ;;  %v1509_v44 = vand.u32 2147483648, %v4748_v53  ;;  %v1750_v17 = vpop.permute.xlu2 %1749 }
 0x42c   : > { %v1314_v7 = vpack.c.bf16 %v1310_v41, %v1310_v41  ;;  %v1507_v51 = vand.u32 2147483647, %v4748_v53  ;;  %v1342_v61 = vunpack.c.l.b16 %v1313_v31  ;;  %v1311_v33 = vpack.c.bf16 %v1265_v54, %v1265_v54 }
 0x42d   : > { %v1491_v23 = vsel %vm4807_vm1, %v4701_v18, %v1487_v24  ;;  %v1457_v39 = vadd.f32 %v4717_v50, %v1456_v43  ;;  %v1495_v0 = vor.u32 1.1754944e-38, %v1494_v48  ;;  %vm1503_vm3 = vweird.f32 %v4748_v53 }
 0x42e   : > { %3295 = vmatmul.msk.bf16.vlgmr.msrb.gmra.mxu3 %vm810_vm15, %v1117_v57  ;;  %v1343_v35 = vunpack.c.l.b16 %v1314_v7  ;;  %vm1493_vm5 = vcmp.eq.f32.partialorder %v1492_v45, 8.507059e+37  ;;  %v1510_v37 = vor.u32 1.1754944e-38, %v1509_v44  ;;  %v1472_v49 = vadd.f32 %v4730_v30, %v1471_v47 }
 0x42f   : > { %v3588_v27 = vpop.eup %3587  ;;  %1535 = vmatpush.bf16.msrb.mxu3 %v4151_v20  ;;  %v1312_v20 = vpack.c.bf16 %v1280_v52, %v1280_v52  ;;  %v1496_v19 = vsel %vm1493_vm5, %v1495_v0, %v1491_v23  ;;  %vm1508_vm6 = vcmp.eq.f32.partialorder %v1507_v51, 8.507059e+37  ;;  %v1479_v63 = vand.u32 2147483648, %v4575_v5 }
 0x430   : > { %v1499_v36 = vmul.f32 %v3588_v27, %v4748_v53  ;;  %2259 = vadd.xlane.f32.xlu1 %v2258_v29  ;;  %v4798_v28 = vpop.xlane.xlu0 %1650  ;;  %vm1504_vm2 = vweird.f32 %v3588_v27  ;;  %v4816_v59 = vpop.eup %3589  ;;  %v1344_v12 = vpack.c.b16 %v1343_v35, %v1342_v61  ;;  %v1465_v53 = vor.u32 1.1754944e-38, %v1464_v13 }
 0x431   : > { %3593 = vrcp.f32 %v4798_v28  ;;  %vm1505_vm7 = vmor %vm1503_vm3, %vm1504_vm2  ;;  %v4822_v18 = vpop.eup %3591  ;;  %v1671_v25 = vmul.f32 %v4816_v59, %v4777_v1  ;;  %v1461_v7 = vsel %vm4828_vm8, %v4717_v50, %v1457_v39  ;;  %vm1473_vm9 = vweird.f32 %v4575_v5  ;;  %v4857_v14 = vpop.xlane.xlu1 %1846 }
 0x432   : > { %v1500_v6 = vsub.f32 1.0, %v1499_v36  ;;  %3300 = vmatmul.msk.bf16.vlgmr.msrb.gmra.mxu0 %vm810_vm15, %v1344_v12  ;;  %v1477_v13 = vand.u32 2147483647, %v4575_v5  ;;  %v1318_v31 = vunpack.c.l.b16 %v1312_v20  ;;  %v1317_v52 = vunpack.c.l.b16 %v1311_v33  ;;  %vm1475_vm10 = vmor %vm1473_vm9, %vm1474_vm4 }
 0x433   : > { %1762 = vmatpush.bf16.msrb.mxu0 %v1750_v17  ;;  %v1497_v36 = vmul.f32 %v4379_v56, %v1496_v19  ;;  %vm1463_vm11 = vcmp.eq.f32.partialorder %v1462_v10, 8.507059e+37  ;;  %v1476_v50 = vsel %vm1475_vm10, %v4730_v30, %v1472_v49  ;;  %v1656_v5 = vmul.f32 %v4822_v18, %v4688_v46 }
 0x434   : > { %v1501_v3 = vmul.f32 %v3588_v27, %v1500_v6  ;;  %v1480_v43 = vor.u32 1.1754944e-38, %v1479_v63  ;;  %v1672_v24 = vsub.f32 1.0, %v1671_v25  ;;  %vm1478_vm12 = vcmp.eq.f32.partialorder %v1477_v13, 8.507059e+37 }
 0x435   : > { %v1515_v6 = vpack.c.bf16 %v1497_v36, %v1497_v36  ;;  %v1319_v56 = vpack.c.b16 %v1318_v31, %v1317_v52  ;;  %v1657_v44 = vsub.f32 1.0, %v1656_v5  ;;  %vm1675_vm13 = vweird.f32 %v4777_v1 }
 0x436   : > { %v1502_v58 = vadd.f32 %v3588_v27, %v1501_v3  ;;  %v1481_v48 = vsel %vm1478_vm12, %v1480_v43, %v1476_v50  ;;  %v1673_v15 = vmul.f32 %v4816_v59, %v1672_v24  ;;  %vm1676_vm1 = vweird.f32 %v4816_v59 }
 0x437   : > { %v1482_v3 = vmul.f32 %v4371_v9, %v1481_v48  ;;  %v1544_v51 = vunpack.c.l.b16 %v1515_v6  ;;  %v1658_v20 = vmul.f32 %v4822_v18, %v1657_v44  ;;  %v1681_v39 = vand.u32 2147483648, %v4777_v1  ;;  %vm4879_vm3 = vmor %vm1675_vm13, %vm1676_vm1 }
 0x438   : > { %v1506_v16 = vsel %vm1505_vm7, %v3588_v27, %v1502_v58  ;;  %v4838_v27 = vpop.eup %3593  ;;  %v1674_v33 = vadd.f32 %v4816_v59, %v1673_v15  ;;  %v1664_v0 = vand.u32 2147483647, %v4688_v46  ;;  %v1666_v58 = vand.u32 2147483648, %v4688_v46 }
 0x439   : > { %v1511_v26 = vsel %vm1508_vm6, %v1510_v37, %v1506_v16  ;;  %v4836_v29 = vpop.xlane.xlu0 %1849  ;;  %v1686_v54 = vmul.f32 %v4838_v27, %v4798_v28  ;;  %v1514_v9 = vpack.c.bf16 %v1482_v3, %v1482_v3  ;;  %vm1691_vm2 = vweird.f32 %v4838_v27 }
 0x43a   : > { %v1512_v57 = vmul.f32 %v4395_v55, %v1511_v26  ;;  %v1466_v55 = vsel %vm1463_vm11, %v1465_v53, %v1461_v7  ;;  %v1659_v49 = vadd.f32 %v4822_v18, %v1658_v20  ;;  %vm1661_vm4 = vweird.f32 %v4822_v18  ;;  %v4901_v26 = vpop.xlane.xlu1 %1855 }
 0x43b   : > { %v1687_v35 = vsub.f32 1.0, %v1686_v54  ;;  %v1467_v45 = vmul.f32 %v4364_v40, %v1466_v55  ;;  %v1678_v41 = vsel %vm4879_vm3, %v4816_v59, %v1674_v33  ;;  %vm1690_vm5 = vweird.f32 %v4798_v28 }
 0x43c   : > { %v1516_v47 = vpack.c.bf16 %v1512_v57, %v1512_v57  ;;  %v1694_v53 = vand.u32 2147483647, %v4798_v28  ;;  %v1682_v25 = vor.u32 1.1754944e-38, %v1681_v39  ;;  %vm1660_vm6 = vweird.f32 %v4688_v46  ;;  %vm4897_vm8 = vmor %vm1690_vm5, %vm1691_vm2 }
 0x43d   : > { %v1688_v61 = vmul.f32 %v4838_v27, %v1687_v35  ;;  %v1513_v40 = vpack.c.bf16 %v1467_v45, %v1467_v45  ;;  %v1520_v7 = vunpack.c.l.b16 %v1514_v9  ;;  %vm4906_vm9 = vmor %vm1660_vm6, %vm1661_vm4  ;;  %vm4910_vm10 = vcmp.eq.f32.partialorder %v1664_v0, 8.507059e+37 }
 0x43e   : > { %v1545_v30 = vunpack.c.l.b16 %v1516_v47  ;;  %3299 = vmatmul.msk.bf16.vlgmr.msra.gmra.mxu3 %vm810_vm15, %v1319_v56  ;;  %v1667_v46 = vor.u32 1.1754944e-38, %v1666_v58  ;;  %v1663_v36 = vsel %vm4906_vm9, %v4822_v18, %v1659_v49  ;;  %vm1695_vm11 = vcmp.eq.f32.partialorder %v1694_v53, 8.507059e+37 }
 0x43f   : > { %1737 = vmatpush.bf16.msra.mxu3 %v4159_v32  ;;  %v1679_v32 = vand.u32 2147483647, %v4777_v1  ;;  %v1689_v37 = vadd.f32 %v4838_v27, %v1688_v61  ;;  %v1696_v1 = vand.u32 2147483648, %v4798_v28  ;;  %v1519_v16 = vunpack.c.l.b16 %v1513_v40 }
 0x440   : > { %v1546_v23 = vpack.c.b16 %v1545_v30, %v1544_v51  ;;  %v1668_v18 = vsel %vm4910_vm10, %v1667_v46, %v1663_v36  ;;  %v1883_v49 = vand.u32 2147483648, %v4836_v29  ;;  %vm1877_vm5 = vweird.f32 %v4836_v29 }
 0x441   : > { %v4861_v10 = vpop.xlane.xlu0 %1653  ;;  %vm1680_vm7 = vcmp.eq.f32.partialorder %v1679_v32, 8.507059e+37  ;;  %v1693_v57 = vsel %vm4897_vm8, %v4838_v27, %v1689_v37  ;;  %v1697_v54 = vor.u32 1.1754944e-38, %v1696_v1  ;;  %v1521_v6 = vpack.c.b16 %v1520_v7, %v1519_v16 }
 0x442   : > { %3595 = vrcp.f32 %v4861_v10  ;;  %3304 = vmatmul.msk.bf16.vlgmr.msra.gmra.mxu0 %vm810_vm15, %v1546_v23  ;;  %v1683_v52 = vsel %vm1680_vm7, %v1682_v25, %v1678_v41  ;;  %v1711_v55 = vand.u32 2147483648, %v4861_v10  ;;  %v1709_v47 = vand.u32 2147483647, %v4861_v10 }
 0x443   : > { %3597 = vrcp.f32 %v4836_v29  ;;  %v1698_v27 = vsel %vm1695_vm11, %v1697_v54, %v1693_v57  ;;  %v1684_v35 = vmul.f32 %v4388_v22, %v1683_v52  ;;  %vm1705_vm13 = vweird.f32 %v4861_v10 }
 0x444   : > { %3599 = vrcp.f32 %v4857_v14  ;;  %v1699_v45 = vmul.f32 %v4404_v21, %v1698_v27  ;;  %v1712_v15 = vor.u32 1.1754944e-38, %v1711_v55  ;;  %v1669_v30 = vmul.f32 %v4386_v38, %v1668_v18 }
 0x445   : > { %3601 = vrcp.f32 %v4901_v26  ;;  %vm1710_vm2 = vcmp.eq.f32.partialorder %v1709_v47, 8.507059e+37  ;;  %v1881_v16 = vand.u32 2147483647, %v4836_v29  ;;  %v1868_v53 = vand.u32 2147483648, %v4857_v14 }
 0x446   : > { %v1717_v20 = vpack.c.bf16 %v1699_v45, %v1699_v45  ;;  %v1715_v23 = vpack.c.bf16 %v1669_v30, %v1669_v30  ;;  %vm1862_vm6 = vweird.f32 %v4857_v14  ;;  %v1866_v25 = vand.u32 2147483647, %v4857_v14 }
 0x447   : > { %v1884_v28 = vor.u32 1.1754944e-38, %v1883_v49  ;;  %vm1882_vm9 = vcmp.eq.f32.partialorder %v1881_v16, 8.507059e+37  ;;  %v1869_v46 = vor.u32 1.1754944e-38, %v1868_v53 }
 0x448   : > { %v3596_v19 = vpop.eup %3595  ;;  %v1746_v0 = vunpack.c.l.b16 %v1717_v20  ;;  %v1721_v37 = vunpack.c.l.b16 %v1715_v23  ;;  %vm1867_vm10 = vcmp.eq.f32.partialorder %v1866_v25, 8.507059e+37 }
 0x449   : > { %v4892_v63 = vpop.eup %3597  ;;  %v1701_v59 = vmul.f32 %v3596_v19, %v4861_v10  ;;  %v4926_v43 = vpop.xlane.xlu0 %2051  ;;  %vm1706_vm12 = vweird.f32 %v3596_v19  ;;  %v1716_v10 = vpack.c.bf16 %v1684_v35, %v1684_v35 }
 0x44a   : > { %v4917_v31 = vpop.eup %3599  ;;  %v1873_v5 = vmul.f32 %v4892_v63, %v4836_v29  ;;  %3603 = vrcp.f32 %v4926_v43  ;;  %vm1707_vm1 = vmor %vm1705_vm13, %vm1706_vm12  ;;  %vm1878_vm3 = vweird.f32 %v4892_v63  ;;  %vm1907_vm12 = vweird.f32 %v4901_v26 }
 0x44b   : > { %v1702_v50 = vsub.f32 1.0, %v1701_v59  ;;  %v1858_v48 = vmul.f32 %v4917_v31, %v4857_v14  ;;  %v4940_v51 = vpop.eup %3601  ;;  %vm1863_vm4 = vweird.f32 %v4917_v31  ;;  %vm1879_vm7 = vmor %vm1877_vm5, %vm1878_vm3 }
 0x44c   : > { %v1874_v44 = vsub.f32 1.0, %v1873_v5  ;;  %v1903_v38 = vmul.f32 %v4940_v51, %v4901_v26  ;;  %vm1864_vm8 = vmor %vm1862_vm6, %vm1863_vm4  ;;  %vm1908_vm11 = vweird.f32 %v4940_v51 }
 0x44d   : > { %v1703_v24 = vmul.f32 %v3596_v19, %v1702_v50  ;;  %v1859_v22 = vsub.f32 1.0, %v1858_v48  ;;  %v1913_v50 = vand.u32 2147483648, %v4901_v26  ;;  %vm4987_vm13 = vmor %vm1907_vm12, %vm1908_vm11  ;;  %v2085_v48 = vand.u32 2147483648, %v4926_v43 }
 0x44e   : > { %3303 = vmatmul.msk.bf16.vlgmr.msrb.gmra.mxu3 %vm810_vm15, %v1521_v6  ;;  %v1875_v21 = vmul.f32 %v4892_v63, %v1874_v44  ;;  %v1904_v12 = vsub.f32 1.0, %v1903_v38 }
 0x44f   : > { %v1704_v56 = vadd.f32 %v3596_v19, %v1703_v24  ;;  %1939 = vmatpush.bf16.msrb.mxu3 %v4162_v34  ;;  %v1860_v32 = vmul.f32 %v4917_v31, %v1859_v22  ;;  %v1722_v34 = vunpack.c.l.b16 %v1716_v10 }
 0x450   : > { %v4944_v33 = vpop.eup %3603  ;;  %v1876_v58 = vadd.f32 %v4892_v63, %v1875_v21  ;;  %v1905_v7 = vmul.f32 %v4940_v51, %v1904_v12 }
 0x451   : > { %v1708_v3 = vsel %vm1707_vm1, %v3596_v19, %v1704_v56  ;;  %v4955_v1 = vpop.xlane.xlu0 %2250  ;;  %v1861_v19 = vadd.f32 %v4917_v31, %v1860_v32  ;;  %v1723_v13 = vpack.c.b16 %v1722_v34, %v1721_v37  ;;  %vm2080_vm1 = vweird.f32 %v4944_v33 }
 0x452   : > { %v1713_v61 = vsel %vm1710_vm2, %v1712_v15, %v1708_v3  ;;  %v1880_v17 = vsel %vm1879_vm7, %v4892_v63, %v1876_v58  ;;  %3605 = vrcp.f32 %v4955_v1  ;;  %v1906_v36 = vadd.f32 %v4940_v51, %v1905_v7 }
 0x453   : > { %v1714_v40 = vmul.f32 %v4422_v4, %v1713_v61  ;;  %v2075_v4 = vmul.f32 %v4944_v33, %v4926_v43  ;;  %v1865_v29 = vsel %vm1864_vm8, %v4917_v31, %v1861_v19  ;;  %v1885_v57 = vsel %vm1882_vm9, %v1884_v28, %v1880_v17 }
 0x454   : > { %v1870_v52 = vsel %vm1867_vm10, %v1869_v46, %v1865_v29  ;;  %v1886_v31 = vmul.f32 %v4411_v11, %v1885_v57  ;;  %v1911_v11 = vand.u32 2147483647, %v4901_v26  ;;  %v1910_v18 = vsel %vm4987_vm13, %v4940_v51, %v1906_v36 }
 0x455   : > { %v1718_v9 = vpack.c.bf16 %v1714_v40, %v1714_v40  ;;  %v2076_v59 = vsub.f32 1.0, %v2075_v4  ;;  %v1871_v27 = vmul.f32 %v4402_v8, %v1870_v52  ;;  %vm2079_vm2 = vweird.f32 %v4926_v43 }
 0x456   : > { %v1918_v6 = vpack.c.bf16 %v1886_v31, %v1886_v31  ;;  %v2083_v8 = vand.u32 2147483647, %v4926_v43  ;;  %v1914_v26 = vor.u32 1.1754944e-38, %v1913_v50  ;;  %vm2081_vm3 = vmor %vm2079_vm2, %vm2080_vm1  ;;  %vm1912_vm4 = vcmp.eq.f32.partialorder %v1911_v11, 8.507059e+37 }
 0x457   : > { %v1747_v39 = vunpack.c.l.b16 %v1718_v9  ;;  %v2077_v14 = vmul.f32 %v4944_v33, %v2076_v59  ;;  %v1917_v45 = vpack.c.bf16 %v1871_v27, %v1871_v27  ;;  %v2086_v3 = vor.u32 1.1754944e-38, %v2085_v48 }
 0x458   : > { %v4984_v55 = vpop.eup %3605  ;;  %v1915_v30 = vsel %vm1912_vm4, %v1914_v26, %v1910_v18  ;;  %v1924_v43 = vunpack.c.l.b16 %v1918_v6  ;;  %vm2084_vm5 = vcmp.eq.f32.partialorder %v2083_v8, 8.507059e+37  ;;  %v2270_v49 = vand.u32 2147483647, %v4955_v1 }
 0x459   : > { %v1748_v41 = vpack.c.b16 %v1747_v39, %v1746_v0  ;;  %v4982_v5 = vpop.xlane.xlu0 %2054  ;;  %v2078_v47 = vadd.f32 %v4944_v33, %v2077_v14  ;;  %v2262_v35 = vmul.f32 %v4984_v55, %v4955_v1  ;;  %v1923_v23 = vunpack.c.l.b16 %v1917_v45  ;;  %v5526_v45 = vld [vmem:[#allocation26_spill] sm:$0xff] }
 0x45a   : > { %vm2267_vm9 = vweird.f32 %v4984_v55  ;;  %vm2266_vm12 = vweird.f32 %v4955_v1  ;;  %vm5044_vm1 = vcmp.eq.f32.partialorder %v2270_v49, 8.507059e+37 }
 0x45b   : > { %3308 = vmatmul.msk.bf16.vlgmr.msrb.gmra.mxu0 %vm810_vm15, %v1748_v41  ;;  %v2082_v44 = vsel %vm2081_vm3, %v4944_v33, %v2078_v47  ;;  %v2263_v10 = vsub.f32 1.0, %v2262_v35  ;;  %v1916_v33 = vmul.f32 %v4413_v42, %v1915_v30  ;;  %v1925_v0 = vpack.c.b16 %v1924_v43, %v1923_v23  ;;  %vm5040_vm13 = vmor %vm2266_vm12, %vm2267_vm9 }
 0x45c   : > { %v2087_v61 = vsel %vm2084_vm5, %v2086_v3, %v2082_v44  ;;  %vm2094_vm9 = vweird.f32 %v4982_v5 }
 0x45d   : > { %v2088_v34 = vmul.f32 %v4427_v60, %v2087_v61  ;;  %v2264_v4 = vmul.f32 %v4984_v55, %v2263_v10  ;;  %v1920_v12 = vpack.c.bf16 %v1916_v33, %v1916_v33  ;;  %v2098_v33 = vand.u32 2147483647, %v4982_v5 }
 0x45e   : > { %3307 = vmatmul.msk.bf16.vlgmr.msra.gmra.mxu3 %vm810_vm15, %v1723_v13 }
 0x45f   : > { %v2120_v53 = vpack.c.bf16 %v2088_v34, %v2088_v34  ;;  %v2265_v7 = vadd.f32 %v4984_v55, %v2264_v4  ;;  %v5034_v14 = vunpack.c.l.b16 %v1920_v12 }
 0x460   : > { %v4977_v54 = vpop.xlane.xlu1 %2057 }
 0x461   : > { %v4972_v63 = vpop.xlane.xlu2 %2048  ;;  %v2126_v24 = vunpack.c.l.b16 %v2120_v53  ;;  %v2113_v35 = vand.u32 2147483647, %v4977_v54  ;;  %v2115_v3 = vand.u32 2147483648, %v4977_v54 }
 0x462   : > { %3607 = vrcp.f32 %v4972_v63  ;;  %v2070_v38 = vand.u32 2147483648, %v4972_v63  ;;  %v2068_v32 = vand.u32 2147483647, %v4972_v63  ;;  %vm2064_vm6 = vweird.f32 %v4972_v63 }
 0x463   : > { %3609 = vrcp.f32 %v4977_v54 }
 0x464   : > { %3611 = vrcp.f32 %v4982_v5  ;;  %v2071_v19 = vor.u32 1.1754944e-38, %v2070_v38  ;;  %vm2069_vm10 = vcmp.eq.f32.partialorder %v2068_v32, 8.507059e+37  ;;  %v2100_v38 = vand.u32 2147483648, %v4982_v5 }
 0x466   : > { %v2101_v12 = vor.u32 1.1754944e-38, %v2100_v38 }
 0x468   : > { %v3608_v56 = vpop.eup %3607 }
 0x469   : > { %v5005_v15 = vpop.xlane.xlu2 %1852  ;;  %v2060_v51 = vmul.f32 %v3608_v56, %v4972_v63  ;;  %v5009_v22 = vpop.eup %3609  ;;  %vm2065_vm7 = vweird.f32 %v3608_v56  ;;  %v2272_v63 = vand.u32 2147483648, %v4955_v1  ;;  %v2269_v1 = vsel %vm5040_vm13, %v4984_v55, %v2265_v7 }
 0x46a   : > { %3613 = vrcp.f32 %v5005_v15  ;;  %v5011_v21 = vpop.eup %3611  ;;  %v2105_v39 = vmul.f32 %v5009_v22, %v4977_v54  ;;  %vm2066_vm8 = vmor %vm2064_vm6, %vm2065_vm7  ;;  %v1898_v13 = vand.u32 2147483648, %v5005_v15  ;;  %v1896_v57 = vand.u32 2147483647, %v5005_v15 }
 0x46b   : > { %v2061_v40 = vsub.f32 1.0, %v2060_v51  ;;  %v2090_v37 = vmul.f32 %v5011_v21, %v4982_v5  ;;  %vm1892_vm2 = vweird.f32 %v5005_v15  ;;  %vm2095_vm5 = vweird.f32 %v5011_v21 }
 0x46c   : > { %v2129_v20 = vpop.permute.xlu0 %2128  ;;  %v2106_v25 = vsub.f32 1.0, %v2105_v39  ;;  %v1899_v47 = vor.u32 1.1754944e-38, %v1898_v13  ;;  %vm1897_vm4 = vcmp.eq.f32.partialorder %v1896_v57, 8.507059e+37  ;;  %vm2109_vm7 = vweird.f32 %v4977_v54 }
 0x46d   : > { %2141 = vmatpush.bf16.msra.mxu3 %v2129_v20  ;;  %v2062_v9 = vmul.f32 %v3608_v56, %v2061_v40  ;;  %v2091_v28 = vsub.f32 1.0, %v2090_v37  ;;  %vm2110_vm6 = vweird.f32 %v5009_v22  ;;  %v2273_v23 = vor.u32 1.1754944e-38, %v2272_v63 }
 0x46e   : > { %3311 = vmatmul.msk.bf16.vlgmr.msrb.gmra.mxu3 %vm810_vm15, %v1925_v0  ;;  %v2107_v31 = vmul.f32 %v5009_v22, %v2106_v25  ;;  %vm2114_vm13 = vcmp.eq.f32.partialorder %v2113_v35, 8.507059e+37  ;;  %v2116_v0 = vor.u32 1.1754944e-38, %v2115_v3 }
 0x46f   : > { %v2063_v42 = vadd.f32 %v3608_v56, %v2062_v9  ;;  %v2092_v11 = vmul.f32 %v5011_v21, %v2091_v28  ;;  %v2274_v54 = vsel %vm5044_vm1, %v2273_v23, %v2269_v1  ;;  %vm2099_vm1 = vcmp.eq.f32.partialorder %v2098_v33, 8.507059e+37 }
 0x470   : > { %v3614_v58 = vpop.eup %3613  ;;  %v2108_v55 = vadd.f32 %v5009_v22, %v2107_v31 }
 0x471   : > { %v1888_v60 = vmul.f32 %v3614_v58, %v5005_v15  ;;  %v5026_v16 = vpop.xlane.xlu2 %2253  ;;  %v2067_v41 = vsel %vm2066_vm8, %v3608_v56, %v2063_v42  ;;  %vm1893_vm11 = vweird.f32 %v3614_v58  ;;  %v2093_v30 = vadd.f32 %v5011_v21, %v2092_v11 }
 0x472   : > { %3615 = vrcp.f32 %v5026_v16  ;;  %v2072_v17 = vsel %vm2069_vm10, %v2071_v19, %v2067_v41  ;;  %vm1894_vm3 = vmor %vm1892_vm2, %vm1893_vm11  ;;  %v2285_v51 = vand.u32 2147483647, %v5026_v16  ;;  %v2287_v43 = vand.u32 2147483648, %v5026_v16  ;;  %v5532_v41 = vld [vmem:[#allocation27_spill] sm:$0xff] }
 0x473   : > { %v1889_v59 = vsub.f32 1.0, %v1888_v60  ;;  %v2073_v29 = vmul.f32 %v4447_v62, %v2072_v17  ;;  %vm5073_vm10 = vmor %vm2109_vm7, %vm2110_vm6  ;;  %vm2281_vm12 = vweird.f32 %v5026_v16  ;;  %v5531_v60 = vld [vmem:[#allocation23_spill] sm:$0xff] }
 0x474   : > { %vm5079_vm11 = vmor %vm2094_vm9, %vm2095_vm5  ;;  %v2112_v34 = vsel %vm5073_vm10, %v5009_v22, %v2108_v55 }
 0x475   : > { %v1890_v46 = vmul.f32 %v3614_v58, %v1889_v59  ;;  %v2119_v52 = vpack.c.bf16 %v2073_v29, %v2073_v29  ;;  %v2097_v4 = vsel %vm5079_vm11, %v5011_v21, %v2093_v30  ;;  %v2117_v49 = vsel %vm2114_vm13, %v2116_v0, %v2112_v34  ;;  %v5533_v59 = vld [vmem:[#allocation25_spill] sm:$0xff] }
 0x476   : > { %v2102_v21 = vsel %vm2099_vm1, %v2101_v12, %v2097_v4  ;;  %v2118_v7 = vmul.f32 %v5533_v59, %v2117_v49  ;;  %vm2498_vm13 = vcmask 97280   ;;  %vm2517_vm1 = vcmask 228352  }
 0x477   : > { %v1891_v50 = vadd.f32 %v3614_v58, %v1890_v46  ;;  %v2125_v18 = vunpack.c.l.b16 %v2119_v52  ;;  %v931_v61 = vpop.f32.mrf.mxu0  ;;  %v5534_v46 = vld [vmem:[#allocation24_spill] sm:$0xff] }
 0x478   : > { %v3616_v27 = vpop.eup %3615  ;;  %v1952_v8 = vpop.permute.xlu1 %1951  ;;  %v961_v25 = vpack.c.bf16 %v931_v61, %v931_v61  ;;  %v2103_v57 = vmul.f32 %v5534_v46, %v2102_v21  ;;  %v2122_v52 = vpack.c.bf16 %v2118_v7, %v2118_v7 }
 0x479   : > { %v1895_v48 = vsel %vm1894_vm3, %v3614_v58, %v1891_v50  ;;  %v2277_v6 = vmul.f32 %v3616_v27, %v5026_v16  ;;  %v2331_v26 = vpop.permute.xlu2 %2330  ;;  %1964 = vmatpush.bf16.msra.mxu0 %v1952_v8  ;;  %vm2282_vm8 = vweird.f32 %v3616_v27  ;;  %v2127_v20 = vpack.c.b16 %v2126_v24, %v2125_v18 }
 0x47a   : > { %v1900_v56 = vsel %vm1897_vm4, %v1899_v47, %v1895_v48  ;;  %2343 = vmatpush.bf16.msrb.mxu3 %v2331_v26  ;;  %vm2283_vm2 = vmor %vm2281_vm12, %vm2282_vm8  ;;  %v2288_v58 = vor.u32 1.1754944e-38, %v2287_v43  ;;  %vm2286_vm3 = vcmp.eq.f32.partialorder %v2285_v51, 8.507059e+37  ;;  %v2275_v16 = vmul.f32 %v5531_v60, %v2274_v54 }
 0x47b   : > { %v1901_v44 = vmul.f32 %v5526_v45, %v1900_v56  ;;  %v2278_v15 = vsub.f32 1.0, %v2277_v6  ;;  %v2151_v24 = vunpack.c.l.b16 %v2122_v52  ;;  %vm2493_vm12 = vcmask 64512  }
 0x47c   : > { %v2321_v13 = vpack.c.bf16 %v2275_v16, %v2275_v16 }
 0x47d   : > { %v1919_v10 = vpack.c.bf16 %v1901_v44, %v1901_v44  ;;  %v2279_v40 = vmul.f32 %v3616_v27, %v2278_v15 }
 0x47e   : > { %3315 = vmatmul.msk.bf16.vlgmr.msra.gmra.mxu3 %vm810_vm15, %v2127_v20  ;;  %v2327_v50 = vunpack.c.l.b16 %v2321_v13 }
 0x47f   : > { %v1948_v39 = vunpack.c.l.b16 %v1919_v10  ;;  %v2280_v5 = vadd.f32 %v3616_v27, %v2279_v40  ;;  %v933_v17 = vpop.f32.mrf.mxu0 }
 0x480   : > { %v962_v29 = vpack.c.bf16 %v933_v17, %v933_v17 }
 0x481   : > { %v2284_v37 = vsel %vm2283_vm2, %v3616_v27, %v2280_v5  ;;  %v2154_v22 = vpop.permute.xlu2 %2153  ;;  %v1950_v42 = vpack.c.b16 %v5034_v14, %v1948_v39  ;;  %v5100_v14 = vunpack.c.l.b16 %v961_v25  ;;  %v2121_v27 = vpack.c.bf16 %v2103_v57, %v2103_v57 }
 0x482   : > { %v2289_v19 = vsel %vm2286_vm3, %v2288_v58, %v2284_v37  ;;  %2166 = vmatpush.bf16.msrb.mxu0 %v2154_v22  ;;  %v5102_v63 = vunpack.c.l.b16 %v962_v29  ;;  %v5535_v37 = vld [vmem:[#allocation28_spill] sm:$0xff]  ;;  %vm2507_vm2 = vcmask 162816   ;;  %vm2512_vm3 = vcmask 195584  }
 0x483   : > { %v2290_v53 = vmul.f32 %v5532_v41, %v2289_v19  ;;  %3312 = vmatmul.msk.bf16.vlgmr.msra.gmra.mxu0 %vm810_vm15, %v1950_v42  ;;  %v2150_v11 = vunpack.c.l.b16 %v2121_v27 }
 0x484   : > { %v2387_v62 = vpack.c.b16 %v5102_v63, %v5100_v14 }
 0x485   : > { %v2322_v28 = vpack.c.bf16 %v2290_v53, %v2290_v53  ;;  %v2152_v47 = vpack.c.b16 %v2151_v24, %v2150_v11 }
 0x487   : > { %v2328_v36 = vunpack.c.l.b16 %v2322_v28 }
 0x489   : > { %v2356_v31 = vpop.permute.xlu2 %2355  ;;  %v2329_v1 = vpack.c.b16 %v2328_v36, %v2327_v50 }
 0x48a   : > { %2368 = vmatpush.bf16.msra.mxu0 %v2356_v31 }
 0x48e   : > { %3319 = vmatmul.msk.bf16.vlgmr.msrb.gmra.mxu3 %vm810_vm15, %v2329_v1 }
 0x493   : > { %3316 = vmatmul.msk.bf16.vlgmr.msrb.gmra.mxu0 %vm810_vm15, %v2152_v47 }
 0x497   : > { %v2257_v18 = vpop.xlane.xlu0 %2256 }
 0x498   : > { %3617 = vrcp.f32 %v2257_v18  ;;  %v2302_v44 = vand.u32 2147483648, %v2257_v18  ;;  %vm2296_vm5 = vweird.f32 %v2257_v18  ;;  %v2300_v15 = vand.u32 2147483647, %v2257_v18 }
 0x49a   : > { %v2303_v10 = vor.u32 1.1754944e-38, %v2302_v44  ;;  %vm2301_vm6 = vcmp.eq.f32.partialorder %v2300_v15, 8.507059e+37 }
 0x49e   : > { %v3618_v48 = vpop.eup %3617 }
 0x49f   : > { %v2292_v6 = vmul.f32 %v3618_v48, %v2257_v18  ;;  %v1158_v55 = vpop.f32.mrf.mxu0  ;;  %vm2297_vm4 = vweird.f32 %v3618_v48 }
 0x4a0   : > { %vm2298_vm7 = vmor %vm2296_vm5, %vm2297_vm4  ;;  %v1165_v20 = vpack.c.bf16 %v1158_v55, %v1158_v55 }
 0x4a1   : > { %v2293_v8 = vsub.f32 1.0, %v2292_v6  ;;  %v956_v26 = vpop.f32.mrf.mxu3 }
 0x4a2   : > { %v963_v3 = vpack.c.bf16 %v956_v26, %v956_v26  ;;  %v5114_v58 = vunpack.c.l.b16 %v1165_v20 }
 0x4a3   : > { %v2294_v35 = vmul.f32 %v3618_v48, %v2293_v8  ;;  %v2260_v56 = vpop.xlane.xlu1 %2259 }
 0x4a4   : > { %3619 = vrcp.f32 %v2260_v56  ;;  %v2317_v33 = vand.u32 2147483648, %v2260_v56  ;;  %v5108_v9 = vunpack.c.l.b16 %v963_v3  ;;  %v2315_v54 = vand.u32 2147483647, %v2260_v56 }
 0x4a5   : > { %v2295_v45 = vadd.f32 %v3618_v48, %v2294_v35  ;;  %vm2311_vm9 = vweird.f32 %v2260_v56 }
 0x4a6   : > { %v2318_v12 = vor.u32 1.1754944e-38, %v2317_v33  ;;  %vm2316_vm11 = vcmp.eq.f32.partialorder %v2315_v54, 8.507059e+37 }
 0x4a7   : > { %v2299_v51 = vsel %vm2298_vm7, %v3618_v48, %v2295_v45  ;;  %v1160_v38 = vpop.f32.mrf.mxu0 }
 0x4a8   : > { %v2304_v32 = vsel %vm2301_vm6, %v2303_v10, %v2299_v51  ;;  %v1166_v39 = vpack.c.bf16 %v1160_v38, %v1160_v38 }
 0x4a9   : > { %v958_v43 = vpop.f32.mrf.mxu3  ;;  %v2305_v22 = vmul.f32 %v5535_v37, %v2304_v32 }
 0x4aa   : > { %v3620_v30 = vpop.eup %3619  ;;  %v964_v40 = vpack.c.bf16 %v958_v43, %v958_v43  ;;  %v5116_v4 = vunpack.c.l.b16 %v1166_v39 }
 0x4ab   : > { %v2307_v61 = vmul.f32 %v3620_v30, %v2260_v56  ;;  %vm2312_vm8 = vweird.f32 %v3620_v30  ;;  %v2323_v41 = vpack.c.bf16 %v2305_v22, %v2305_v22 }
 0x4ac   : > { %v5110_v34 = vunpack.c.l.b16 %v964_v40  ;;  %vm2313_vm10 = vmor %vm2311_vm9, %vm2312_vm8  ;;  %v2398_v49 = vpack.c.b16 %v5116_v4, %v5114_v58 }
 0x4ad   : > { %v2308_v23 = vsub.f32 1.0, %v2307_v61  ;;  %v2352_v21 = vunpack.c.l.b16 %v2323_v41 }
 0x4ae   : > { %v2388_v0 = vpack.c.b16 %v5110_v34, %v5108_v9  ;;  %v3474_v34 = vld [vmem:[%s5405_s6] ss:$0 sm:$0xff] }
 0x4af   : > { %v2309_v5 = vmul.f32 %v3620_v30, %v2308_v23  ;;  %v1360_v36 = vpop.f32.mrf.mxu0 }
 0x4b0   : > { %v1367_v45 = vpack.c.bf16 %v1360_v36, %v1360_v36 }
 0x4b1   : > { %v2310_v42 = vadd.f32 %v3620_v30, %v2309_v5  ;;  %v1133_v60 = vpop.f32.mrf.mxu3 }
 0x4b2   : > { %v1163_v59 = vpack.c.bf16 %v1133_v60, %v1133_v60  ;;  %v2409_v3 = vunpack.c.l.b16 %v1367_v45 }
 0x4b3   : > { %v2314_v19 = vsel %vm2313_vm10, %v3620_v30, %v2310_v42 }
 0x4b4   : > { %v2319_v16 = vsel %vm2316_vm11, %v2318_v12, %v2314_v19  ;;  %v2393_v13 = vunpack.c.l.b16 %v1163_v59 }
 0x4b5   : > { %v2320_v53 = vmul.f32 %v4590_v2, %v2319_v16 }
 0x4b7   : > { %v2324_v25 = vpack.c.bf16 %v2320_v53, %v2320_v53  ;;  %v1362_v11 = vpop.f32.mrf.mxu0 }
 0x4b8   : > { %v1368_v56 = vpack.c.bf16 %v1362_v11, %v1362_v11 }
 0x4b9   : > { %v2353_v17 = vunpack.c.l.b16 %v2324_v25  ;;  %v1135_v7 = vpop.f32.mrf.mxu3 }
 0x4ba   : > { %v1164_v29 = vpack.c.bf16 %v1135_v7, %v1135_v7  ;;  %v2410_v15 = vunpack.c.l.b16 %v1368_v56 }
 0x4bb   : > { %v2354_v28 = vpack.c.b16 %v2353_v17, %v2352_v21 }
 0x4bc   : > { %v2394_v46 = vunpack.c.l.b16 %v1164_v29  ;;  %v2412_v51 = vpack.c.b16 %v2410_v15, %v2409_v3 }
 0x4bd   : > { %3320 = vmatmul.msk.bf16.vlgmr.msra.gmra.mxu0 %vm810_vm15, %v2354_v28 }
 0x4be   : > { %v2397_v57 = vpack.c.b16 %v2394_v46, %v2393_v13 }
 0x4bf   : > { %v5125_v48 = vpop.f32.mrf.mxu0 }
 0x4c0   : > { %2399 = vrot.lane.b32.xlu0 %v2397_v57, %s3822_s30 }
 0x4c1   : > { %v1335_v52 = vpop.f32.mrf.mxu3 }
 0x4c2   : > { %v1365_v31 = vpack.c.bf16 %v1335_v52, %v1335_v52 }
 0x4c4   : > { %v2407_v27 = vunpack.c.l.b16 %v1365_v31 }
 0x4c7   : > { %v1564_v30 = vpop.f32.mrf.mxu0 }
 0x4c9   : > { %v1337_v50 = vpop.f32.mrf.mxu3 }
 0x4ca   : > { %v1366_v2 = vpack.c.bf16 %v1337_v50, %v1337_v50 }
 0x4cc   : > { %v2408_v24 = vunpack.c.l.b16 %v1366_v2 }
 0x4ce   : > { %v2411_v1 = vpack.c.b16 %v2408_v24, %v2407_v27 }
 0x4d0   : > { %2413 = vrot.lane.b32.xlu2 %v2411_v1, %s3823_s12 }
 0x4d1   : > { %v1537_v47 = vpop.f32.mrf.mxu3 }
 0x4d2   : > { %v1567_v18 = vpack.c.bf16 %v1537_v47, %v1537_v47  ;;  %v1570_v47 = vpack.c.bf16 %v1564_v30, %v1564_v30 }
 0x4d4   : > { %v2421_v26 = vunpack.c.l.b16 %v1567_v18 }
 0x4d8   : > { %v1764_v40 = vpop.f32.mrf.mxu0 }
 0x4d9   : > { %v1539_v6 = vpop.f32.mrf.mxu3  ;;  %v1771_v52 = vpack.c.bf16 %v1764_v40, %v1764_v40  ;;  %v3369_v40 = vld [vmem:[%s5404_s5] sm:$0xff] }
 0x4da   : > { %v1568_v8 = vpack.c.bf16 %v1539_v6, %v1539_v6 }
 0x4db   : > { %v2437_v24 = vunpack.c.l.b16 %v1771_v52 }
 0x4dc   : > { %v2422_v35 = vunpack.c.l.b16 %v1568_v8  ;;  %v1569_v8 = vpack.c.bf16 %v5125_v48, %v5125_v48 }
 0x4de   : > { %v2425_v55 = vpack.c.b16 %v2422_v35, %v2421_v26  ;;  %v2424_v26 = vunpack.c.l.b16 %v1570_v47  ;;  %v2423_v4 = vunpack.c.l.b16 %v1569_v8  ;;  %v5536_v47 = vld [vmem:[#allocation18_spill] sm:$0xff] }
 0x4e0   : > { %2427 = vrot.lane.b32.xlu1 %v2425_v55, %s3824_s15  ;;  %v1766_v32 = vpop.f32.mrf.mxu0 }
 0x4e1   : > { %v1739_v44 = vpop.f32.mrf.mxu3  ;;  %v1772_v57 = vpack.c.bf16 %v1766_v32, %v1766_v32 }
 0x4e2   : > { %v1769_v43 = vpack.c.bf16 %v1739_v44, %v1739_v44 }
 0x4e3   : > { %v2438_v2 = vunpack.c.l.b16 %v1772_v57 }
 0x4e4   : > { %v2435_v20 = vunpack.c.l.b16 %v1769_v43 }
 0x4e5   : > { %v2440_v18 = vpack.c.b16 %v2438_v2, %v2437_v24 }
 0x4e8   : > { %2415 = vrot.lane.b32.xlu1 %v2412_v51, %s3823_s12 }
 0x4e9   : > { %v1741_v61 = vpop.f32.mrf.mxu3 }
 0x4ea   : > { %v1770_v10 = vpack.c.bf16 %v1741_v61, %v1741_v61 }
 0x4ec   : > { %v2436_v23 = vunpack.c.l.b16 %v1770_v10  ;;  %v3370_v10 = vld [vmem:[%s5404_s5 + $0x8] sm:$0xff] }
 0x4ed   : > { %2552 = vmatpush.bf16.msra.mxu1 %v3370_v10 }
 0x4ee   : > { %v2439_v33 = vpack.c.b16 %v2436_v23, %v2435_v20 }
 0x4f0   : > { %2441 = vrot.lane.b32.xlu2 %v2439_v33, %s3825_s17 }
 0x4f1   : > { %v1941_v38 = vpop.f32.mrf.mxu3  ;;  %2553 = vmatpush.bf16.msra.mxu1 %v3369_v40 }
 0x4f2   : > { %v1971_v39 = vpack.c.bf16 %v1941_v38, %v1941_v38 }
 0x4f4   : > { %v2449_v37 = vunpack.c.l.b16 %v1971_v39 }
 0x4f9   : > { %v1943_v5 = vpop.f32.mrf.mxu3 }
 0x4fa   : > { %v1972_v54 = vpack.c.bf16 %v1943_v5, %v1943_v5 }
 0x4fc   : > { %v2450_v22 = vunpack.c.l.b16 %v1972_v54 }
 0x4fe   : > { %v2453_v12 = vpack.c.b16 %v2450_v22, %v2449_v37 }
 0x500   : > { %v1966_v42 = vpop.f32.mrf.mxu0  ;;  %2455 = vrot.lane.b32.xlu0 %v2453_v12, %s3826_s20 }
 0x501   : > { %v2143_v19 = vpop.f32.mrf.mxu3  ;;  %v1973_v60 = vpack.c.bf16 %v1966_v42, %v1966_v42 }
 0x502   : > { %v2173_v53 = vpack.c.bf16 %v2143_v19, %v2143_v19 }
 0x503   : > { %v2451_v25 = vunpack.c.l.b16 %v1973_v60 }
 0x504   : > { %v2463_v28 = vunpack.c.l.b16 %v2173_v53 }
 0x508   : > { %v1968_v16 = vpop.f32.mrf.mxu0 }
 0x509   : > { %v1974_v41 = vpack.c.bf16 %v1968_v16, %v1968_v16  ;;  %v2145_v17 = vpop.f32.mrf.mxu3 }
 0x50a   : > { %v2174_v59 = vpack.c.bf16 %v2145_v17, %v2145_v17 }
 0x50b   : > { %v2452_v21 = vunpack.c.l.b16 %v1974_v41 }
 0x50c   : > { %v2464_v29 = vunpack.c.l.b16 %v2174_v59 }
 0x50d   : > { %v2454_v7 = vpack.c.b16 %v2452_v21, %v2451_v25 }
 0x50e   : > { %v2467_v13 = vpack.c.b16 %v2464_v29, %v2463_v28 }
 0x50f   : > { %2457 = vrot.lane.b32.xlu1 %v2454_v7, %s3826_s20  ;;  %s3378_s20 = sshll.u32 %s3942_s28, 5  ;;  %s3168_s28 = scalar_lea.sflag [#allocation4], %s4018_s22 }
 0x510   : > { %2469 = vrot.lane.b32.xlu2 %v2467_v13, %s3827_s23  ;;  %v2168_v31 = vpop.f32.mrf.mxu0 }
 0x511   : > { %v2345_v46 = vpop.f32.mrf.mxu3  ;;  %v2175_v56 = vpack.c.bf16 %v2168_v31, %v2168_v31 }
 0x512   : > { %v2375_v36 = vpack.c.bf16 %v2345_v46, %v2345_v46 }
 0x513   : > { %v2465_v45 = vunpack.c.l.b16 %v2175_v56 }
 0x514   : > { %v2477_v1 = vunpack.c.l.b16 %v2375_v36 }
 0x518   : > { %2401 = vrot.lane.b32.xlu2 %v2398_v49, %s3822_s30  ;;  %v2170_v58 = vpop.f32.mrf.mxu0  ;;  %v2426_v49 = vpack.c.b16 %v2424_v26, %v2423_v4  ;;  %s5543_s30 = smov %s5542_s27 }
 0x519   : > { %v2347_v50 = vpop.f32.mrf.mxu3  ;;  %v2176_v35 = vpack.c.bf16 %v2170_v58, %v2170_v58 }
 0x51a   : > { %v2376_v27 = vpack.c.bf16 %v2347_v50, %v2347_v50 }
 0x51b   : > { %v2466_v55 = vunpack.c.l.b16 %v2176_v35 }
 0x51c   : > { %v2478_v11 = vunpack.c.l.b16 %v2376_v27 }
 0x51d   : > { %v2468_v44 = vpack.c.b16 %v2466_v55, %v2465_v45 }
 0x51e   : > { %v2481_v6 = vpack.c.b16 %v2478_v11, %v2477_v1 }
 0x520   : > { %2483 = vrot.lane.b32.xlu0 %v2481_v6, %s3828_s18  ;;  %2443 = vrot.lane.b32.xlu2 %v2440_v18, %s3825_s17  ;;  %s584_s17 = scalar_lea.vmem [#allocation7], %s3276_s26  ;;  %s5548_s26 = sld [smem:[#allocation36_spill]] }
 0x526   : > { %s5549_s1 = smov %s5548_s26  ;;  %s3180_s24 = scalar_lea.hbm %s5548_s26, %s3378_s20 }
 0x527   : > { %s3183_s21 = sshll.u32 %s3180_s24, 4  ;;  %s3184_s21 = int_to_ptr.hbm [resolvable:$true] %s3183_s21 }
 0x528   : > { %2429 = vrot.lane.b32.xlu0 %v2426_v49, %s3824_s15  ;;  %s5546_s15 = sld [smem:[#allocation35_spill]] }
 0x52a   : > { %v2414_v20 = vpop.permute.xlu2 %2413 }
 0x530   : > { %2471 = vrot.lane.b32.xlu0 %v2468_v44, %s3827_s23 }
 0x532   : > { %v2400_v33 = vpop.permute.xlu0 %2399 }
 0x533   : > { %v2489_v32 = vsel %vm762_vm14, %v2387_v62, %v2400_v33 }
 0x534   : > { %v2495_v5 = vsel %vm2493_vm12, %v2489_v32, %v2414_v20 }
 0x53a   : > { %v2370_v15 = vpop.f32.mrf.mxu0 }
 0x53b   : > { %v2377_v30 = vpack.c.bf16 %v2370_v15, %v2370_v15 }
 0x53d   : > { %v2479_v51 = vunpack.c.l.b16 %v2377_v30 }
 0x542   : > { %v2372_v48 = vpop.f32.mrf.mxu0 }
 0x543   : > { %v2378_v3 = vpack.c.bf16 %v2372_v48, %v2372_v48 }
 0x545   : > { %v2480_v43 = vunpack.c.l.b16 %v2378_v3 }
 0x547   : > { %v2482_v61 = vpack.c.b16 %v2480_v43, %v2479_v51 }
 0x549   : > { %2485 = vrot.lane.b32.xlu2 %v2482_v61, %s3828_s18 }
 0x54a   : > { %v2442_v23 = vpop.permute.xlu2 %2441 }
 0x552   : > { %v2428_v39 = vpop.permute.xlu1 %2427 }
 0x553   : > { %v2500_v37 = vsel %vm2498_vm13, %v2495_v5, %v2428_v39 }
 0x554   : > { %v2504_v22 = vsel %vm810_vm15, %v2500_v37, %v2442_v23 }
 0x55a   : > { %v2416_v60 = vpop.permute.xlu1 %2415 }
 0x56a   : > { %v2470_v38 = vpop.permute.xlu2 %2469 }
 0x572   : > { %v2456_v54 = vpop.permute.xlu0 %2455  ;;  %v2402_v12 = vpop.permute.xlu2 %2401 }
 0x573   : > { %v2509_v42 = vsel %vm2507_vm2, %v2504_v22, %v2456_v54  ;;  %v2492_v19 = vsel %vm762_vm14, %v2388_v0, %v2402_v12 }
 0x574   : > { %v2514_v14 = vsel %vm2512_vm3, %v2509_v42, %v2470_v38  ;;  %v2497_v53 = vsel %vm2493_vm12, %v2492_v19, %v2416_v60  ;;  %v3475_v19 = vld [vmem:[%s5406_s7] ss:$0 sm:$0xff] }
 0x57a   : > { %v2444_v16 = vpop.permute.xlu2 %2443 }
 0x581   : > { %v2458_v17 = vpop.permute.xlu1 %2457 }
 0x592   : > { %v2484_v63 = vpop.permute.xlu0 %2483 }
 0x593   : > { %v2519_v62 = vsel %vm2517_vm1, %v2514_v14, %v2484_v63 }
 0x594   : > { %3329 = vmatmul.msk.bf16.vlgmr.msra.gmra.mxu1 %vm594_vm0, %v2519_v62 }
 0x59a   : > { %v2430_v41 = vpop.permute.xlu0 %2429 }
 0x59b   : > { %v2502_v25 = vsel %vm2498_vm13, %v2497_v53, %v2430_v41  ;;  %v3476_v53 = vld [vmem:[%s5407_s8] ss:$0 sm:$0xff] }
 0x59c   : > { %v2506_v21 = vsel %vm810_vm15, %v2502_v25, %v2444_v16 }
 0x59d   : > { %v2511_v7 = vsel %vm2507_vm2, %v2506_v21, %v2458_v17 }
 0x5a2   : > { %v2472_v28 = vpop.permute.xlu0 %2471 }
 0x5a3   : > { %v2486_v59 = vpop.permute.xlu2 %2485  ;;  %v2516_v29 = vsel %vm2512_vm3, %v2511_v7, %v2472_v28 }
 0x5a4   : > { %v2521_v9 = vsel %vm2517_vm1, %v2516_v29, %v2486_v59 }
 0x5a5   : > { %3330 = vmatmul.msk.bf16.gmra.mxu1 %vm594_vm0, %v2521_v9 }
 0x611   : > { %v2555_v0 = vpop.f32.mrf.mxu1 }
 0x612   : > { %v2556_v13 = vadd.f32 %v3474_v34, %v2555_v0 }
 0x614   : > { %v2567_v46 = vsel %vm594_vm0, %v2556_v13, 0.0 }
 0x615   : > { %2568 = vadd.xlane.f32.xlu1 %v2567_v46 }
 0x619   : > { %v2557_v57 = vpop.f32.mrf.mxu1 }
 0x61a   : > { %v2558_v52 = vadd.f32 %v3474_v34, %v2557_v57 }
 0x61c   : > { %v2570_v36 = vsel %vm594_vm0, %v2558_v52, 0.0 }
 0x61d   : > { %2571 = vadd.xlane.f32.xlu0 %v2570_v36 }
 0x622   : > { %v2560_v31 = vpop.f32.mrf.mxu1 }
 0x623   : > { %v2561_v50 = vadd.f32 %v3474_v34, %v2560_v31 }
 0x625   : > { %v2573_v2 = vsel %vm594_vm0, %v2561_v50, 0.0 }
 0x626   : > { %2574 = vadd.xlane.f32.xlu2 %v2573_v2 }
 0x62a   : > { %v2562_v27 = vpop.f32.mrf.mxu1 }
 0x62b   : > { %v2563_v24 = vadd.f32 %v3474_v34, %v2562_v27 }
 0x62d   : > { %v2576_v1 = vsel %vm594_vm0, %v2563_v24, 0.0 }
 0x62e   : > { %2577 = vadd.xlane.f32.xlu1 %v2576_v1 }
 0x688   : > { %v2569_v11 = vpop.xlane.xlu1 %2568 }
 0x689   : > { %v2579_v18 = vmul.f32 %v2569_v11, %v5536_v47 }
 0x68b   : > { %v2583_v6 = vsub.f32 %v2556_v13, %v2579_v18  ;;  %v5537_v13 = vld [vmem:[#allocation19_spill] sm:$0xff] }
 0x68d   : > { %v2587_v8 = vmul.f32 %v2583_v6, %v2583_v6 }
 0x68f   : > { %v2591_v26 = vsel %vm594_vm0, %v2587_v8, 0.0 }
 0x690   : > { %2592 = vadd.xlane.f32.xlu0 %v2591_v26  ;;  %v2572_v58 = vpop.xlane.xlu0 %2571 }
 0x691   : > { %v2580_v4 = vmul.f32 %v2572_v58, %v5536_v47 }
 0x693   : > { %v2584_v49 = vsub.f32 %v2558_v52, %v2580_v4 }
 0x695   : > { %v2588_v35 = vmul.f32 %v2584_v49, %v2584_v49 }
 0x697   : > { %v2594_v56 = vsel %vm594_vm0, %v2588_v35, 0.0 }
 0x698   : > { %2595 = vadd.xlane.f32.xlu2 %v2594_v56 }
 0x699   : > { %v2575_v55 = vpop.xlane.xlu2 %2574 }
 0x69a   : > { %v2581_v45 = vmul.f32 %v2575_v55, %v5536_v47 }
 0x69c   : > { %v5180_v44 = vsub.f32 %v2561_v50, %v2581_v45 }
 0x69e   : > { %v2589_v15 = vmul.f32 %v5180_v44, %v5180_v44 }
 0x6a0   : > { %v2597_v30 = vsel %vm594_vm0, %v2589_v15, 0.0 }
 0x6a1   : > { %v2578_v48 = vpop.xlane.xlu1 %2577  ;;  %2598 = vadd.xlane.f32.xlu1 %v2597_v30  ;;  %v5539_v30 = vld [vmem:[#allocation22_spill] sm:$0xff] }
 0x6a2   : > { %v2582_v3 = vmul.f32 %v2578_v48, %v5536_v47 }
 0x6a4   : > { %v5186_v51 = vsub.f32 %v2563_v24, %v2582_v3 }
 0x6a6   : > { %v2590_v43 = vmul.f32 %v5186_v51, %v5186_v51 }
 0x6a8   : > { %v2600_v61 = vsel %vm594_vm0, %v2590_v43, 0.0 }
 0x6a9   : > { %2601 = vadd.xlane.f32.xlu0 %v2600_v61 }
 0x703   : > { %v2593_v10 = vpop.xlane.xlu0 %2592 }
 0x704   : > { %v2603_v40 = vmul.f32 %v2593_v10, %v5536_v47 }
 0x706   : > { %v2607_v20 = vadd.f32 1e-05, %v2603_v40 }
 0x708   : > { %3621 = vrsqrt.f32 %v2607_v20  ;;  %vm2617_vm15 = vweird.f32 %v2607_v20 }
 0x70b   : > { %v2596_v23 = vpop.xlane.xlu2 %2595 }
 0x70c   : > { %v2604_v33 = vmul.f32 %v2596_v23, %v5536_v47 }
 0x70e   : > { %v3622_v38 = vpop.eup %3621  ;;  %v2608_v32 = vadd.f32 1e-05, %v2604_v33 }
 0x70f   : > { %v2612_v39 = vmul.f32 %v3622_v38, %v2607_v20  ;;  %vm2618_vm14 = vweird.f32 %v3622_v38  ;;  %v5540_v20 = vld [vmem:[#allocation21_spill] sm:$0xff] }
 0x710   : > { %3623 = vrsqrt.f32 %v2608_v32  ;;  %vm2619_vm4 = vmor %vm2617_vm15, %vm2618_vm14  ;;  %vm2627_vm7 = vweird.f32 %v2608_v32 }
 0x711   : > { %v2613_v5 = vmul.f32 %v3622_v38, %v2612_v39 }
 0x713   : > { %v2614_v54 = vmul.f32 0.5, %v2613_v5 }
 0x714   : > { %v2599_v37 = vpop.xlane.xlu1 %2598 }
 0x715   : > { %v2615_v22 = vsub.f32 1.5, %v2614_v54  ;;  %v2605_v42 = vmul.f32 %v2599_v37, %v5536_v47 }
 0x716   : > { %v3624_v12 = vpop.eup %3623 }
 0x717   : > { %v2616_v14 = vmul.f32 %v3622_v38, %v2615_v22  ;;  %v2622_v63 = vmul.f32 %v3624_v12, %v2608_v32  ;;  %v2609_v62 = vadd.f32 1e-05, %v2605_v42  ;;  %vm2628_vm5 = vweird.f32 %v3624_v12 }
 0x718   : > { %vm2629_vm6 = vmor %vm2627_vm7, %vm2628_vm5 }
 0x719   : > { %v2620_v60 = vsel %vm2619_vm4, %v3622_v38, %v2616_v14  ;;  %v2623_v16 = vmul.f32 %v3624_v12, %v2622_v63  ;;  %3625 = vrsqrt.f32 %v2609_v62  ;;  %vm2637_vm9 = vweird.f32 %v2609_v62 }
 0x71a   : > { %v2651_v41 = vmul.f32 %v2620_v60, %v2583_v6  ;;  %v5538_v6 = vld [vmem:[#allocation20_spill] sm:$0xff] }
 0x71b   : > { %v2624_v25 = vmul.f32 0.5, %v2623_v16 }
 0x71c   : > { %v2602_v21 = vpop.xlane.xlu0 %2601  ;;  %v2658_v17 = vmul.f32 %v3475_v19, %v2651_v41 }
 0x71d   : > { %v2625_v59 = vsub.f32 1.5, %v2624_v25  ;;  %v2606_v7 = vmul.f32 %v2602_v21, %v5536_v47 }
 0x71e   : > { %v2665_v28 = vadd.f32 %v3476_v53, %v2658_v17 }
 0x71f   : > { %v3626_v29 = vpop.eup %3625  ;;  %v2626_v9 = vmul.f32 %v3624_v12, %v2625_v59  ;;  %v2610_v34 = vadd.f32 1e-05, %v2606_v7 }
 0x720   : > { %v2632_v0 = vmul.f32 %v3626_v29, %v2609_v62  ;;  %v2669_v46 = vadd.f32 %v2665_v28, %v5537_v13  ;;  %vm2638_vm8 = vweird.f32 %v3626_v29  ;;  %v3372_v28 = vld [vmem:[%s5410_s11 + $0x8] sm:$0xff] }
 0x721   : > { %v2630_v57 = vsel %vm2629_vm6, %v3624_v12, %v2626_v9  ;;  %3627 = vrsqrt.f32 %v2610_v34  ;;  %vm2639_vm10 = vmor %vm2637_vm9, %vm2638_vm8  ;;  %vm2647_vm12 = vweird.f32 %v2610_v34  ;;  %2811 = vmatpush.bf16.msra.mxu2 %v3372_v28 }
 0x722   : > { %v2633_v52 = vmul.f32 %v3626_v29, %v2632_v0  ;;  %v2675_v36 = vsel %vm594_vm0, %v2669_v46, 0.0  ;;  %v2652_v31 = vmul.f32 %v2630_v57, %v2584_v49  ;;  %v3371_v57 = vld [vmem:[%s5410_s11] sm:$0xff] }
 0x723   : > { %2676 = vadd.xlane.f32.xlu2 %v2675_v36 }
 0x724   : > { %v2634_v50 = vmul.f32 0.5, %v2633_v52  ;;  %v2659_v2 = vmul.f32 %v3475_v19, %v2652_v31 }
 0x725   : > { %2812 = vmatpush.bf16.msra.mxu2 %v3371_v57 }
 0x726   : > { %v2635_v27 = vsub.f32 1.5, %v2634_v50  ;;  %v2666_v24 = vadd.f32 %v3476_v53, %v2659_v2 }
 0x727   : > { %v3628_v1 = vpop.eup %3627 }
 0x728   : > { %v2636_v11 = vmul.f32 %v3626_v29, %v2635_v27  ;;  %v2642_v18 = vmul.f32 %v3628_v1, %v2610_v34  ;;  %v2670_v8 = vadd.f32 %v2666_v24, %v5538_v6  ;;  %vm2648_vm11 = vweird.f32 %v3628_v1 }
 0x729   : > { %vm2649_vm13 = vmor %vm2647_vm12, %vm2648_vm11 }
 0x72a   : > { %v2640_v26 = vsel %vm2639_vm10, %v3626_v29, %v2636_v11  ;;  %v2643_v58 = vmul.f32 %v3628_v1, %v2642_v18  ;;  %v2678_v4 = vsel %vm594_vm0, %v2670_v8, 0.0 }
 0x72b   : > { %2679 = vadd.xlane.f32.xlu1 %v2678_v4  ;;  %v2653_v49 = vmul.f32 %v2640_v26, %v5180_v44 }
 0x72c   : > { %v2644_v35 = vmul.f32 0.5, %v2643_v58  ;;  %v3477_v58 = vld [vmem:[%s5408_s9] ss:$0 sm:$0xff] }
 0x72d   : > { %v2660_v56 = vmul.f32 %v3475_v19, %v2653_v49 }
 0x72e   : > { %v2645_v55 = vsub.f32 1.5, %v2644_v35 }
 0x72f   : > { %v2667_v45 = vadd.f32 %v3476_v53, %v2660_v56 }
 0x730   : > { %v2646_v15 = vmul.f32 %v3628_v1, %v2645_v55 }
 0x731   : > { %v2671_v48 = vadd.f32 %v2667_v45, %v5539_v30 }
 0x732   : > { %v2650_v3 = vsel %vm2649_vm13, %v3628_v1, %v2646_v15  ;;  %v3478_v15 = vld [vmem:[%s5409_s10] ss:$0 sm:$0xff] }
 0x733   : > { %v2681_v43 = vsel %vm594_vm0, %v2671_v48, 0.0  ;;  %v2654_v61 = vmul.f32 %v2650_v3, %v5186_v51 }
 0x734   : > { %2682 = vadd.xlane.f32.xlu0 %v2681_v43 }
 0x735   : > { %v2661_v10 = vmul.f32 %v3475_v19, %v2654_v61 }
 0x737   : > { %v2668_v40 = vadd.f32 %v3476_v53, %v2661_v10 }
 0x739   : > { %v2672_v44 = vadd.f32 %v2668_v40, %v5540_v20 }
 0x73b   : > { %v2684_v23 = vsel %vm594_vm0, %v2672_v44, 0.0 }
 0x73c   : > { %2685 = vadd.xlane.f32.xlu2 %v2684_v23 }
 0x796   : > { %v2677_v33 = vpop.xlane.xlu2 %2676 }
 0x797   : > { %v2687_v38 = vmul.f32 %v2677_v33, %v5536_v47 }
 0x799   : > { %v2691_v32 = vsub.f32 %v2669_v46, %v2687_v38 }
 0x79b   : > { %v2695_v39 = vmul.f32 %v2691_v32, %v2691_v32 }
 0x79d   : > { %v2699_v5 = vsel %vm594_vm0, %v2695_v39, 0.0 }
 0x79e   : > { %v2680_v54 = vpop.xlane.xlu1 %2679  ;;  %2700 = vadd.xlane.f32.xlu1 %v2699_v5 }
 0x79f   : > { %v2688_v37 = vmul.f32 %v2680_v54, %v5536_v47 }
 0x7a1   : > { %v2692_v51 = vsub.f32 %v2670_v8, %v2688_v37 }
 0x7a3   : > { %v2696_v22 = vmul.f32 %v2692_v51, %v2692_v51 }
 0x7a5   : > { %v2702_v42 = vsel %vm594_vm0, %v2696_v22, 0.0 }
 0x7a6   : > { %2703 = vadd.xlane.f32.xlu0 %v2702_v42 }
 0x7a7   : > { %v2683_v12 = vpop.xlane.xlu0 %2682 }
 0x7a8   : > { %v2689_v14 = vmul.f32 %v2683_v12, %v5536_v47 }
 0x7aa   : > { %v5216_v63 = vsub.f32 %v2671_v48, %v2689_v14 }
 0x7ac   : > { %v2697_v62 = vmul.f32 %v5216_v63, %v5216_v63 }
 0x7ae   : > { %v2705_v19 = vsel %vm594_vm0, %v2697_v62, 0.0 }
 0x7af   : > { %v2686_v60 = vpop.xlane.xlu2 %2685  ;;  %2706 = vadd.xlane.f32.xlu2 %v2705_v19 }
 0x7b0   : > { %v2690_v16 = vmul.f32 %v2686_v60, %v5536_v47 }
 0x7b2   : > { %v5222_v41 = vsub.f32 %v2672_v44, %v2690_v16 }
 0x7b4   : > { %v2698_v53 = vmul.f32 %v5222_v41, %v5222_v41 }
 0x7b6   : > { %v2708_v25 = vsel %vm594_vm0, %v2698_v53, 0.0 }
 0x7b7   : > { %2709 = vadd.xlane.f32.xlu1 %v2708_v25 }
 0x811   : > { %v2701_v21 = vpop.xlane.xlu1 %2700 }
 0x812   : > { %v2711_v17 = vmul.f32 %v2701_v21, %v5536_v47 }
 0x814   : > { %v2715_v59 = vadd.f32 1e-05, %v2711_v17 }
 0x816   : > { %3629 = vrsqrt.f32 %v2715_v59  ;;  %vm2725_vm3 = vweird.f32 %v2715_v59 }
 0x819   : > { %v2704_v7 = vpop.xlane.xlu0 %2703 }
 0x81a   : > { %v2712_v29 = vmul.f32 %v2704_v7, %v5536_v47 }
 0x81c   : > { %v3630_v9 = vpop.eup %3629  ;;  %v2716_v34 = vadd.f32 1e-05, %v2712_v29 }
 0x81d   : > { %v2720_v0 = vmul.f32 %v3630_v9, %v2715_v59  ;;  %vm2726_vm2 = vweird.f32 %v3630_v9 }
 0x81e   : > { %3631 = vrsqrt.f32 %v2716_v34  ;;  %vm2727_vm1 = vmor %vm2725_vm3, %vm2726_vm2  ;;  %vm2735_vm15 = vweird.f32 %v2716_v34 }
 0x81f   : > { %v2721_v13 = vmul.f32 %v3630_v9, %v2720_v0 }
 0x821   : > { %v2722_v46 = vmul.f32 0.5, %v2721_v13 }
 0x822   : > { %v2707_v52 = vpop.xlane.xlu2 %2706 }
 0x823   : > { %v2723_v36 = vsub.f32 1.5, %v2722_v46  ;;  %v2713_v31 = vmul.f32 %v2707_v52, %v5536_v47 }
 0x824   : > { %v3632_v50 = vpop.eup %3631 }
 0x825   : > { %v2724_v2 = vmul.f32 %v3630_v9, %v2723_v36  ;;  %v2730_v27 = vmul.f32 %v3632_v50, %v2716_v34  ;;  %v2717_v24 = vadd.f32 1e-05, %v2713_v31  ;;  %vm2736_vm14 = vweird.f32 %v3632_v50 }
 0x826   : > { %vm2737_vm4 = vmor %vm2735_vm15, %vm2736_vm14 }
 0x827   : > { %v2731_v1 = vmul.f32 %v3632_v50, %v2730_v27  ;;  %3633 = vrsqrt.f32 %v2717_v24  ;;  %v2728_v11 = vsel %vm2727_vm1, %v3630_v9, %v2724_v2  ;;  %vm2745_vm7 = vweird.f32 %v2717_v24 }
 0x828   : > { %v2759_v4 = vmul.f32 %v2728_v11, %v2691_v32 }
 0x829   : > { %v2732_v18 = vmul.f32 0.5, %v2731_v1 }
 0x82a   : > { %v2710_v6 = vpop.xlane.xlu1 %2709  ;;  %v2766_v30 = vmul.f32 %v3477_v58, %v2759_v4 }
 0x82b   : > { %v2733_v8 = vsub.f32 1.5, %v2732_v18  ;;  %v2714_v26 = vmul.f32 %v2710_v6, %v5536_v47 }
 0x82c   : > { %v5243_v61 = vadd.f32 %v3478_v15, %v2766_v30 }
 0x82d   : > { %v3634_v49 = vpop.eup %3633  ;;  %v2734_v35 = vmul.f32 %v3632_v50, %v2733_v8  ;;  %v2718_v56 = vadd.f32 1e-05, %v2714_v26 }
 0x82e   : > { %v2740_v55 = vmul.f32 %v3634_v49, %v2717_v24  ;;  %vm2746_vm5 = vweird.f32 %v3634_v49 }
 0x82f   : > { %v2738_v45 = vsel %vm2737_vm4, %v3632_v50, %v2734_v35  ;;  %3635 = vrsqrt.f32 %v2718_v56  ;;  %vm2747_vm6 = vmor %vm2745_vm7, %vm2746_vm5  ;;  %vm2755_vm9 = vweird.f32 %v2718_v56 }
 0x830   : > { %v2760_v48 = vmul.f32 %v2738_v45, %v2692_v51  ;;  %v2741_v47 = vmul.f32 %v3634_v49, %v2740_v55 }
 0x832   : > { %v2767_v3 = vmul.f32 %v3477_v58, %v2760_v48  ;;  %v2742_v43 = vmul.f32 0.5, %v2741_v47 }
 0x834   : > { %v5245_v10 = vadd.f32 %v3478_v15, %v2767_v3  ;;  %v2743_v40 = vsub.f32 1.5, %v2742_v43 }
 0x835   : > { %v3636_v20 = vpop.eup %3635 }
 0x836   : > { %v2744_v44 = vmul.f32 %v3634_v49, %v2743_v40  ;;  %v2750_v23 = vmul.f32 %v3636_v20, %v2718_v56  ;;  %v2777_v33 = vpack.c.bf16 %v5245_v10, %v5243_v61  ;;  %vm2756_vm8 = vweird.f32 %v3636_v20 }
 0x837   : > { %vm2757_vm10 = vmor %vm2755_vm9, %vm2756_vm8 }
 0x838   : > { %v2751_v38 = vmul.f32 %v3636_v20, %v2750_v23  ;;  %3339 = vmatmul.msk.bf16.vlgmr.msra.gmra.mxu2 %vm594_vm0, %v2777_v33  ;;  %v2748_v32 = vsel %vm2747_vm6, %v3634_v49, %v2744_v44 }
 0x839   : > { %v2761_v54 = vmul.f32 %v2748_v32, %v5216_v63  ;;  %v3479_v63 = vld [vmem:[%s5541_s19] ss:$0 sm:$0xff]  ;;  %s3737_s19 = sshra.s32 %s3184_s21, 4  ;;  %s3738_s19 = int_to_ptr.hbm [resolvable:$true] %s3737_s19 }
 0x83a   : > { %v2752_v39 = vmul.f32 0.5, %v2751_v38  ;;  %p3744_p0 = scmp.lt.s32.totalorder %s3738_s19, %s5549_s1 }
 0x83b   : > { %v2768_v42 = vmul.f32 %v3477_v58, %v2761_v54 }
 0x83c   : > { %v2753_v5 = vsub.f32 1.5, %v2752_v39 }
 0x83d   : > { %v5252_v14 = vadd.f32 %v3478_v15, %v2768_v42 }
 0x83e   : > { %v2754_v37 = vmul.f32 %v3636_v20, %v2753_v5 }
 0x840   : > { %v2758_v51 = vsel %vm2757_vm10, %v3636_v20, %v2754_v37 }
 0x841   : > { %v2762_v22 = vmul.f32 %v2758_v51, %v5222_v41 }
 0x843   : > { %v2769_v12 = vmul.f32 %v3477_v58, %v2762_v22 }
 0x845   : > { %v5254_v62 = vadd.f32 %v3478_v15, %v2769_v12 }
 0x847   : > { %v2778_v19 = vpack.c.bf16 %v5254_v62, %v5252_v14 }
 0x849   : > { %3340 = vmatmul.msk.bf16.gmra.mxu2 %vm594_vm0, %v2778_v19 }
 0x8bb   : > { %v2814_v60 = vpop.f32.mrf.mxu2 }
 0x8bc   : > { %v5262_v16 = vadd.f32 %v3479_v63, %v2814_v60 }
 0x8be   : > { %v5265_v41 = vmul.f32 0.70710677, %v5262_v16 }
 0x8c0   : > { %v2832_v53 = vand.u32 2147483647, %v5265_v41 }
 0x8c2   : > { %v2836_v25 = vmul.f32 0.3275911, %v2832_v53  ;;  %v2940_v56 = vsub.f32 0.0, %v2832_v53 }
 0x8c3   : > { %v2816_v21 = vpop.f32.mrf.mxu2 }
 0x8c4   : > { %v2840_v17 = vadd.f32 1.0, %v2836_v25  ;;  %v5268_v59 = vadd.f32 %v3479_v63, %v2816_v21  ;;  %v2944_v40 = vmul.f32 %v2940_v56, %v2832_v53 }
 0x8c6   : > { %3637 = vrcp.f32 %v2840_v17  ;;  %v5271_v7 = vmul.f32 0.70710677, %v5268_v59  ;;  %v2855_v31 = vand.u32 2147483648, %v2840_v17  ;;  %v2853_v2 = vand.u32 2147483647, %v2840_v17 }
 0x8c7   : > { %vm2849_vm12 = vweird.f32 %v2840_v17  ;;  %v2948_v37 = vmul.f32 1.442695, %v2944_v40 }
 0x8c8   : > { %v2833_v28 = vand.u32 2147483647, %v5271_v7  ;;  %v2856_v18 = vor.u32 1.1754944e-38, %v2855_v31  ;;  %vm2854_vm2 = vcmp.eq.f32.partialorder %v2853_v2, 8.507059e+37 }
 0x8ca   : > { %v2837_v29 = vmul.f32 0.3275911, %v2833_v28  ;;  %v2941_v33 = vsub.f32 0.0, %v2833_v28 }
 0x8cc   : > { %v3638_v9 = vpop.eup %3637  ;;  %v2819_v34 = vpop.f32.mrf.mxu2  ;;  %v2841_v13 = vadd.f32 1.0, %v2837_v29  ;;  %v2945_v42 = vmul.f32 %v2941_v33, %v2833_v28 }
 0x8cd   : > { %v2845_v0 = vmul.f32 %v3638_v9, %v2840_v17  ;;  %v5274_v46 = vadd.f32 %v3479_v63, %v2819_v34  ;;  %vm2850_vm11 = vweird.f32 %v3638_v9 }
 0x8ce   : > { %3639 = vrcp.f32 %v2841_v13  ;;  %vm2851_vm13 = vmor %vm2849_vm12, %vm2850_vm11  ;;  %v2870_v15 = vand.u32 2147483648, %v2841_v13  ;;  %v2868_v47 = vand.u32 2147483647, %v2841_v13  ;;  %vm2864_vm1 = vweird.f32 %v2841_v13 }
 0x8cf   : > { %v2846_v57 = vsub.f32 1.0, %v2845_v0  ;;  %v5277_v52 = vmul.f32 0.70710677, %v5274_v46  ;;  %vm2964_vm12 = vcmp.lt.f32.partialorder %v5265_v41, 0.0 }
 0x8d0   : > { %v2871_v23 = vor.u32 1.1754944e-38, %v2870_v15  ;;  %vm2869_vm15 = vcmp.eq.f32.partialorder %v2868_v47, 8.507059e+37 }
 0x8d1   : > { %v2847_v36 = vmul.f32 %v3638_v9, %v2846_v57  ;;  %v5280_v50 = vand.u32 2147483647, %v5277_v52 }
 0x8d3   : > { %v2848_v27 = vadd.f32 %v3638_v9, %v2847_v36  ;;  %v2838_v24 = vmul.f32 0.3275911, %v5280_v50  ;;  %v2942_v28 = vsub.f32 0.0, %v5280_v50 }
 0x8d4   : > { %v2821_v1 = vpop.f32.mrf.mxu2  ;;  %v3640_v11 = vpop.eup %3639 }
 0x8d5   : > { %v5283_v6 = vadd.f32 %v3479_v63, %v2821_v1  ;;  %v2852_v8 = vsel %vm2851_vm13, %v3638_v9, %v2848_v27  ;;  %v2860_v26 = vmul.f32 %v3640_v11, %v2841_v13  ;;  %v2842_v58 = vadd.f32 1.0, %v2838_v24 }
 0x8d6   : > { %v2857_v49 = vsel %vm2854_vm2, %v2856_v18, %v2852_v8  ;;  %vm2865_vm3 = vweird.f32 %v3640_v11  ;;  %v2950_v13 = vmul.f32 1.442695, %v2945_v42  ;;  %vm2986_vm13 = vcmask 523264  }
 0x8d7   : > { %v5286_v4 = vmul.f32 0.70710677, %v5283_v6  ;;  %v2861_v35 = vsub.f32 1.0, %v2860_v26  ;;  %3641 = vrcp.f32 %v2842_v58  ;;  %v2904_v30 = vmul.f32 1.0614054, %v2857_v49  ;;  %vm2866_vm14 = vmor %vm2864_vm1, %vm2865_vm3 }
 0x8d8   : > { %v2885_v12 = vand.u32 2147483648, %v2842_v58  ;;  %v2883_v53 = vand.u32 2147483647, %v2842_v58  ;;  %vm2879_vm5 = vweird.f32 %v2842_v58  ;;  %vm2965_vm2 = vcmp.lt.f32.partialorder %v5271_v7, 0.0 }
 0x8d9   : > { %v5289_v55 = vand.u32 2147483647, %v5286_v4  ;;  %v2862_v45 = vmul.f32 %v3640_v11, %v2861_v35  ;;  %v2908_v3 = vadd.f32 -1.4531521, %v2904_v30  ;;  %vm2966_vm3 = vcmp.lt.f32.partialorder %v5277_v52, 0.0 }
 0x8da   : > { %v2886_v0 = vor.u32 1.1754944e-38, %v2885_v12  ;;  %vm2884_vm6 = vcmp.eq.f32.partialorder %v2883_v53, 8.507059e+37  ;;  %vm2967_vm1 = vcmp.lt.f32.partialorder %v5286_v4, 0.0 }
 0x8db   : > { %v2839_v48 = vmul.f32 0.3275911, %v5289_v55  ;;  %v2863_v43 = vadd.f32 %v3640_v11, %v2862_v45  ;;  %v2912_v38 = vmul.f32 %v2908_v3, %v2857_v49  ;;  %v2946_v45 = vmul.f32 %v2942_v28, %v5280_v50 }
 0x8dd   : > { %v2843_v20 = vadd.f32 1.0, %v2839_v48  ;;  %v3642_v44 = vpop.eup %3641  ;;  %v2867_v32 = vsel %vm2866_vm14, %v3640_v11, %v2863_v43  ;;  %v2916_v5 = vadd.f32 1.4214138, %v2912_v38  ;;  %v2952_v38 = vmul.f32 1.442695, %v2946_v45 }
 0x8de   : > { %v2875_v39 = vmul.f32 %v3642_v44, %v2842_v58  ;;  %v2872_v54 = vsel %vm2869_vm15, %v2871_v23, %v2867_v32  ;;  %vm2880_vm4 = vweird.f32 %v3642_v44 }
 0x8df   : > { %3643 = vrcp.f32 %v2843_v20  ;;  %v2905_v22 = vmul.f32 1.0614054, %v2872_v54  ;;  %v2920_v19 = vmul.f32 %v2916_v5, %v2857_v49  ;;  %vm2881_vm7 = vmor %vm2879_vm5, %vm2880_vm4  ;;  %v2900_v24 = vand.u32 2147483648, %v2843_v20 }
 0x8e0   : > { %v2876_v51 = vsub.f32 1.0, %v2875_v39  ;;  %3645 = vpow2.f32 %v2948_v37  ;;  %v2898_v26 = vand.u32 2147483647, %v2843_v20  ;;  %vm2894_vm9 = vweird.f32 %v2843_v20 }
 0x8e1   : > { %v2909_v60 = vadd.f32 -1.4531521, %v2905_v22  ;;  %v2924_v25 = vadd.f32 -0.28449672, %v2920_v19  ;;  %3647 = vpow2.f32 %v2950_v13  ;;  %v2901_v48 = vor.u32 1.1754944e-38, %v2900_v24 }
 0x8e2   : > { %v2877_v63 = vmul.f32 %v3642_v44, %v2876_v51  ;;  %vm2899_vm11 = vcmp.eq.f32.partialorder %v2898_v26, 8.507059e+37  ;;  %v2824_v37 = vmul.f32 0.5, %v5262_v16  ;;  %3649 = vpow2.f32 %v2952_v38 }
 0x8e3   : > { %v2913_v17 = vmul.f32 %v2909_v60, %v2872_v54  ;;  %v2928_v34 = vmul.f32 %v2924_v25, %v2857_v49  ;;  %v2825_v13 = vmul.f32 0.5, %v5268_v59  ;;  %v2826_v26 = vmul.f32 0.5, %v5274_v46 }
 0x8e4   : > { %v2878_v29 = vadd.f32 %v3642_v44, %v2877_v63 }
 0x8e5   : > { %v3644_v21 = vpop.eup %3643  ;;  %v2917_v57 = vadd.f32 1.4214138, %v2913_v17  ;;  %v2932_v2 = vadd.f32 0.2548296, %v2928_v34 }
 0x8e6   : > { %v2890_v9 = vmul.f32 %v3644_v21, %v2843_v20  ;;  %v2882_v36 = vsel %vm2881_vm7, %v3642_v44, %v2878_v29  ;;  %vm2895_vm8 = vweird.f32 %v3644_v21  ;;  %v3646_v58 = vpop.eup %3645  ;;  %v2943_v44 = vsub.f32 0.0, %v5289_v55 }
 0x8e7   : > { %v2887_v27 = vsel %vm2884_vm6, %v2886_v0, %v2882_v36  ;;  %v2921_v1 = vmul.f32 %v2917_v57, %v2872_v54  ;;  %v2936_v8 = vmul.f32 %v2932_v2, %v2857_v49  ;;  %vm2896_vm10 = vmor %vm2894_vm9, %vm2895_vm8  ;;  %v3648_v5 = vpop.eup %3647 }
 0x8e8   : > { %v2891_v31 = vsub.f32 1.0, %v2890_v9  ;;  %v2906_v11 = vmul.f32 1.0614054, %v2887_v27  ;;  %v2947_v42 = vmul.f32 %v2943_v44, %v5289_v55  ;;  %v3650_v0 = vpop.eup %3649 }
 0x8e9   : > { %v2925_v35 = vadd.f32 -0.28449672, %v2921_v1  ;;  %v2956_v15 = vmul.f32 %v3646_v58, %v2936_v8 }
 0x8ea   : > { %v2892_v18 = vmul.f32 %v3644_v21, %v2891_v31  ;;  %v2910_v56 = vadd.f32 -1.4531521, %v2906_v11  ;;  %v2954_v29 = vmul.f32 1.442695, %v2947_v42 }
 0x8eb   : > { %v2929_v47 = vmul.f32 %v2925_v35, %v2872_v54  ;;  %v2960_v43 = vsub.f32 1.0, %v2956_v15 }
 0x8ec   : > { %v2893_v30 = vadd.f32 %v3644_v21, %v2892_v18  ;;  %v2914_v3 = vmul.f32 %v2910_v56, %v2887_v27  ;;  %3651 = vpow2.f32 %v2954_v29 }
 0x8ed   : > { %v2933_v49 = vadd.f32 0.2548296, %v2929_v47  ;;  %v2968_v32 = vsub.f32 0.0, %v2960_v43 }
 0x8ee   : > { %v2897_v40 = vsel %vm2896_vm10, %v3644_v21, %v2893_v30  ;;  %v2918_v23 = vadd.f32 1.4214138, %v2914_v3 }
 0x8ef   : > { %v2902_v33 = vsel %vm2899_vm11, %v2901_v48, %v2897_v40  ;;  %v2937_v50 = vmul.f32 %v2933_v49, %v2872_v54  ;;  %v2972_v51 = vsel %vm2964_vm12, %v2968_v32, %v2960_v43  ;;  %v2827_v48 = vmul.f32 0.5, %v5283_v6 }
 0x8f0   : > { %v2907_v39 = vmul.f32 1.0614054, %v2902_v33  ;;  %v2922_v20 = vmul.f32 %v2918_v23, %v2887_v27  ;;  %v2976_v12 = vadd.f32 1.0, %v2972_v51  ;;  %v3829_v43 = vmov 64.0  }
 0x8f1   : > { %v2957_v19 = vmul.f32 %v3648_v5, %v2937_v50  ;;  %3653 = vrcp.f32 %v3829_v43 }
 0x8f2   : > { %v2911_v22 = vadd.f32 -1.4531521, %v2907_v39  ;;  %v2926_v63 = vadd.f32 -0.28449672, %v2922_v20  ;;  %v2980_v53 = vmul.f32 %v2976_v12, %v2824_v37  ;;  %v3652_v8 = vpop.eup %3651 }
 0x8f3   : > { %v2961_v25 = vsub.f32 1.0, %v2957_v19 }
 0x8f4   : > { %v2915_v60 = vmul.f32 %v2911_v22, %v2902_v33  ;;  %v2930_v21 = vmul.f32 %v2926_v63, %v2887_v27  ;;  %v2987_v41 = vsel %vm2986_vm13, %v2980_v53, 0.0 }
 0x8f5   : > { %v2969_v54 = vsub.f32 0.0, %v2961_v25  ;;  %2988 = vadd.xlane.f32.xlu0 %v2987_v41 }
 0x8f6   : > { %v2919_v17 = vadd.f32 1.4214138, %v2915_v60  ;;  %v2934_v9 = vadd.f32 0.2548296, %v2930_v21 }
 0x8f7   : > { %v2973_v55 = vsel %vm2965_vm2, %v2969_v54, %v2961_v25  ;;  %v3654_v46 = vpop.eup %3653 }
 0x8f8   : > { %v2923_v16 = vmul.f32 %v2919_v17, %v2902_v33  ;;  %v2938_v34 = vmul.f32 %v2934_v9, %v2887_v27  ;;  %v2977_v57 = vadd.f32 1.0, %v2973_v55  ;;  %v3000_v40 = vmul.f32 64.0, %v3654_v46  ;;  %v3376_v9 = vld [vmem:[%s5542_s27 + $0x18] sm:$0xff] }
 0x8f9   : > { %vm3004_vm14 = vweird.f32 %v3654_v46  ;;  %3144 = vmatpush.bf16.msra.mxu3 %v3376_v9 }
 0x8fa   : > { %v2927_v36 = vadd.f32 -0.28449672, %v2923_v16  ;;  %v2958_v28 = vmul.f32 %v3650_v0, %v2938_v34  ;;  %v2981_v31 = vmul.f32 %v2977_v57, %v2825_v13  ;;  %v3001_v44 = vsub.f32 1.0, %v3000_v40  ;;  %v3375_v34 = vld [vmem:[%s5543_s30 + $0x10] sm:$0xff]  ;;  %v3481_v40 = vld [vmem:[%s5545_s13] ss:$0 sm:$0xff] }
 0x8fb   : > { %s3739_s13 = scalar_lea.hbm %s3738_s19, 32 }
 0x8fc   : > { %v2931_v2 = vmul.f32 %v2927_v36, %v2902_v33  ;;  %v2962_v24 = vsub.f32 1.0, %v2958_v28  ;;  %v2990_v1 = vsel %vm2986_vm13, %v2981_v31, 0.0  ;;  %v3002_v49 = vmul.f32 %v3654_v46, %v3001_v44  ;;  %v3374_v28 = vld [vmem:[%s5543_s30 + $0x8] sm:$0xff]  ;;  %p3740_p4 = scmp.ne.s32.totalorder %s3738_s19, %s3739_s13 }
 0x8fd   : > { %2991 = vadd.xlane.f32.xlu2 %v2990_v1  ;;  %3145 = vmatpush.bf16.msra.mxu3 %v3375_v34  ;;  %v3373_v1 = vld [vmem:[%s5543_s30] sm:$0xff] }
 0x8fe   : > { %v2935_v11 = vadd.f32 0.2548296, %v2931_v2  ;;  %v2970_v18 = vsub.f32 0.0, %v2962_v24  ;;  %v3003_v23 = vadd.f32 %v3654_v46, %v3002_v49  ;;  %p3741_p6 = pnand %p3740_p4, %p3973_p11 }
 0x900   : > { %v2939_v7 = vmul.f32 %v2935_v11, %v2902_v33  ;;  %v2974_v27 = vsel %vm2966_vm3, %v2970_v18, %v2962_v24  ;;  %v3005_v33 = vsel %vm3004_vm14, %v3654_v46, %v3003_v23  ;;  %p3742_p13 = pneg %p3741_p6 }
 0x901   : > { %v2978_v59 = vadd.f32 1.0, %v2974_v27  ;;  %3146 = vmatpush.bf16.msra.mxu3 %v3374_v28 }
 0x902   : > { %v2959_v58 = vmul.f32 %v3652_v8, %v2939_v7 }
 0x903   : > { %v2982_v35 = vmul.f32 %v2978_v59, %v2826_v26 }
 0x904   : > { %v2963_v56 = vsub.f32 1.0, %v2959_v58 }
 0x905   : > { %v2993_v45 = vsel %vm2986_vm13, %v2982_v35, 0.0  ;;  %3147 = vmatpush.bf16.msra.mxu3 %v3373_v1 }
 0x906   : > { %v2971_v15 = vsub.f32 0.0, %v2963_v56  ;;  %2994 = vadd.xlane.f32.xlu1 %v2993_v45 }
 0x908   : > { %v2975_v30 = vsel %vm2967_vm1, %v2971_v15, %v2963_v56 }
 0x909   : > { %v2979_v47 = vadd.f32 1.0, %v2975_v30 }
 0x90b   : > { %v2983_v52 = vmul.f32 %v2979_v47, %v2827_v48  ;;  %v3480_v48 = vld [vmem:[%s5544_s29] ss:$0 sm:$0xff]  ;;  %s3181_s29 = sshll.u32 %s584_s17, 4  ;;  %s3182_s29 = int_to_ptr.vmem [resolvable:$true] %s3181_s29 }
 0x90d   : > { %v2996_v3 = vsel %vm2986_vm13, %v2983_v52, 0.0 }
 0x90e   : > { %2997 = vadd.xlane.f32.xlu0 %v2996_v3 }
 0x968   : > { %v2989_v38 = vpop.xlane.xlu0 %2988 }
 0x969   : > { %v3006_v4 = vmul.f32 %v3005_v33, %v2989_v38 }
 0x96b   : > { %v5308_v32 = vsub.f32 %v2980_v53, %v3006_v4 }
 0x96d   : > { %v3014_v6 = vmul.f32 %v5308_v32, %v5308_v32 }
 0x96f   : > { %v3018_v5 = vsel %vm2986_vm13, %v3014_v6, 0.0 }
 0x970   : > { %v2992_v39 = vpop.xlane.xlu2 %2991  ;;  %3019 = vadd.xlane.f32.xlu2 %v3018_v5 }
 0x971   : > { %v3007_v50 = vmul.f32 %v3005_v33, %v2992_v39 }
 0x973   : > { %v5313_v20 = vsub.f32 %v2981_v31, %v3007_v50 }
 0x975   : > { %v3015_v37 = vmul.f32 %v5313_v20, %v5313_v20 }
 0x977   : > { %v3021_v51 = vsel %vm2986_vm13, %v3015_v37, 0.0 }
 0x978   : > { %3022 = vadd.xlane.f32.xlu1 %v3021_v51 }
 0x979   : > { %v2995_v22 = vpop.xlane.xlu1 %2994 }
 0x97a   : > { %v3008_v42 = vmul.f32 %v3005_v33, %v2995_v22 }
 0x97c   : > { %v5318_v12 = vsub.f32 %v2982_v35, %v3008_v42 }
 0x97e   : > { %v3016_v19 = vmul.f32 %v5318_v12, %v5318_v12 }
 0x980   : > { %v3024_v63 = vsel %vm2986_vm13, %v3016_v19, 0.0 }
 0x981   : > { %v2998_v60 = vpop.xlane.xlu0 %2997  ;;  %3025 = vadd.xlane.f32.xlu0 %v3024_v63 }
 0x982   : > { %v3009_v53 = vmul.f32 %v3005_v33, %v2998_v60 }
 0x984   : > { %v5323_v25 = vsub.f32 %v2983_v52, %v3009_v53 }
 0x986   : > { %v3017_v21 = vmul.f32 %v5323_v25, %v5323_v25 }
 0x988   : > { %v3027_v17 = vsel %vm2986_vm13, %v3017_v21, 0.0 }
 0x989   : > { %3028 = vadd.xlane.f32.xlu2 %v3027_v17 }
 0x9e3   : > { %v3020_v29 = vpop.xlane.xlu2 %3019 }
 0x9e4   : > { %v3030_v41 = vmul.f32 %v3020_v29, %v3005_v33 }
 0x9e6   : > { %v3034_v54 = vadd.f32 1e-05, %v3030_v41 }
 0x9e8   : > { %3655 = vrsqrt.f32 %v3034_v54  ;;  %vm3044_vm4 = vweird.f32 %v3034_v54 }
 0x9eb   : > { %v3023_v16 = vpop.xlane.xlu1 %3022 }
 0x9ec   : > { %v3031_v55 = vmul.f32 %v3023_v16, %v3005_v33 }
 0x9ee   : > { %v3035_v0 = vadd.f32 1e-05, %v3031_v55  ;;  %v3656_v13 = vpop.eup %3655 }
 0x9ef   : > { %v3039_v57 = vmul.f32 %v3656_v13, %v3034_v54  ;;  %vm3045_vm15 = vweird.f32 %v3656_v13  ;;  %v3482_v54 = vld [vmem:[%s5546_s15] ss:$0 sm:$0xff]  ;;  %s3743_s15 = scalar_lea.hbm %s5549_s1, 64 }
 0x9f0   : > { %3657 = vrsqrt.f32 %v3035_v0  ;;  %vm3046_vm5 = vmor %vm3044_vm4, %vm3045_vm15  ;;  %vm3054_vm6 = vweird.f32 %v3035_v0  ;;  %p3745_p7 = scmp.lt.s32.totalorder %s3743_s15, %s3739_s13 }
 0x9f1   : > { %v3040_v36 = vmul.f32 %v3656_v13, %v3039_v57 }
 0x9f2   : > { %p3746_p5 = por %p3745_p7, %p3744_p0 }
 0x9f3   : > { %v3041_v2 = vmul.f32 0.5, %v3040_v36 }
 0x9f4   : > { %v3026_v31 = vpop.xlane.xlu0 %3025  ;;  %p3747_p8 = pnand %p3746_p5, %p3742_p13 }
 0x9f5   : > { %v3032_v24 = vmul.f32 %v3026_v31, %v3005_v33  ;;  %v3042_v18 = vsub.f32 1.5, %v3041_v2 }
 0x9f6   : > { %v3658_v11 = vpop.eup %3657 }
 0x9f7   : > { %v3036_v7 = vadd.f32 1e-05, %v3032_v24  ;;  %v3049_v8 = vmul.f32 %v3658_v11, %v3035_v0  ;;  %v3043_v27 = vmul.f32 %v3656_v13, %v3042_v18  ;;  %vm3055_vm7 = vweird.f32 %v3658_v11 }
 0x9f8   : > { %vm3056_vm8 = vmor %vm3054_vm6, %vm3055_vm7 }
 0x9f9   : > { %3659 = vrsqrt.f32 %v3036_v7  ;;  %v3050_v26 = vmul.f32 %v3658_v11, %v3049_v8  ;;  %v3047_v58 = vsel %vm3046_vm5, %v3656_v13, %v3043_v27  ;;  %vm3064_vm10 = vweird.f32 %v3036_v7 }
 0x9fa   : > { %v3078_v47 = vmul.f32 %v3047_v58, %v5308_v32 }
 0x9fb   : > { %v3051_v35 = vmul.f32 0.5, %v3050_v26 }
 0x9fc   : > { %v3029_v59 = vpop.xlane.xlu2 %3028  ;;  %v3085_v44 = vmul.f32 %v3480_v48, %v3078_v47 }
 0x9fd   : > { %v3033_v56 = vmul.f32 %v3029_v59, %v3005_v33  ;;  %v3052_v45 = vsub.f32 1.5, %v3051_v35 }
 0x9fe   : > { %v3092_v6 = vadd.f32 %v3481_v40, %v3085_v44 }
 0x9ff   : > { %v3037_v15 = vadd.f32 1e-05, %v3033_v56  ;;  %v3660_v30 = vpop.eup %3659  ;;  %v3053_v52 = vmul.f32 %v3658_v11, %v3052_v45 }
 0xa00   : > { %v3059_v3 = vmul.f32 %v3660_v30, %v3036_v7  ;;  %vm3065_vm9 = vweird.f32 %v3660_v30 }
 0xa01   : > { %3661 = vrsqrt.f32 %v3037_v15  ;;  %v3057_v43 = vsel %vm3056_vm8, %v3658_v11, %v3053_v52  ;;  %vm3066_vm11 = vmor %vm3064_vm10, %vm3065_vm9  ;;  %vm3074_vm2 = vweird.f32 %v3037_v15 }
 0xa02   : > { %v3060_v46 = vmul.f32 %v3660_v30, %v3059_v3  ;;  %v3079_v49 = vmul.f32 %v3057_v43, %v5313_v20 }
 0xa04   : > { %v3061_v23 = vmul.f32 0.5, %v3060_v46  ;;  %v3086_v33 = vmul.f32 %v3480_v48, %v3079_v49 }
 0xa06   : > { %v3062_v38 = vsub.f32 1.5, %v3061_v23  ;;  %v3093_v32 = vadd.f32 %v3481_v40, %v3086_v33 }
 0xa07   : > { %v3662_v4 = vpop.eup %3661 }
 0xa08   : > { %v3063_v39 = vmul.f32 %v3660_v30, %v3062_v38  ;;  %v3069_v5 = vmul.f32 %v3662_v4, %v3037_v15  ;;  %v3096_v50 = vpack.c.bf16 %v3093_v32, %v3092_v6  ;;  %vm3075_vm12 = vweird.f32 %v3662_v4 }
 0xa09   : > { %vm3076_vm3 = vmor %vm3074_vm2, %vm3075_vm12 }
 0xa0a   : > { %v3070_v37 = vmul.f32 %v3662_v4, %v3069_v5  ;;  %3357 = vmatmul.msk.bf16.vlgmr.msra.gmra.mxu3 %vm2986_vm13, %v3096_v50  ;;  %v3067_v51 = vsel %vm3066_vm11, %v3660_v30, %v3063_v39 }
 0xa0b   : > { %v3080_v20 = vmul.f32 %v3067_v51, %v5318_v12 }
 0xa0c   : > { %v3071_v22 = vmul.f32 0.5, %v3070_v37 }
 0xa0d   : > { %v3087_v53 = vmul.f32 %v3480_v48, %v3080_v20 }
 0xa0e   : > { %v3072_v42 = vsub.f32 1.5, %v3071_v22 }
 0xa0f   : > { %v3094_v17 = vadd.f32 %v3481_v40, %v3087_v53 }
 0xa10   : > { %v3073_v19 = vmul.f32 %v3662_v4, %v3072_v42 }
 0xa12   : > { %v3077_v63 = vsel %vm3076_vm3, %v3662_v4, %v3073_v19 }
 0xa13   : > { %v3081_v60 = vmul.f32 %v3077_v63, %v5323_v25 }
 0xa15   : > { %v3088_v21 = vmul.f32 %v3480_v48, %v3081_v60 }
 0xa17   : > { %v3095_v29 = vadd.f32 %v3481_v40, %v3088_v21 }
 0xa19   : > { %v3097_v41 = vpack.c.bf16 %v3095_v29, %v3094_v17 }
 0xa1b   : > { %3358 = vmatmul.msk.bf16.gmra.mxu3 %vm2986_vm13, %v3097_v41 }
 0xa8d   : > { %v3149_v12 = vpop.f32.mrf.mxu3 }
 0xa8e   : > { %v3150_v9 = vadd.f32 %v3482_v54, %v3149_v12 }
 0xa90   : > { %v3159_v16 = vadd.f32 %v3150_v9, %v5243_v61 }
 0xa92   : > { %3163 = vst.msk [vmem:[%s584_s17] sm:$0xff] %vm594_vm0, %v3159_v16 }
 0xa95   : > { %v3151_v25 = vpop.f32.mrf.mxu3 }
 0xa96   : > { %v3152_v55 = vadd.f32 %v3482_v54, %v3151_v25 }
 0xa98   : > { %v3160_v34 = vadd.f32 %v3152_v55, %v5245_v10 }
 0xa9a   : > { %3164 = vst.msk [vmem:[%s584_s17 + $0x8] sm:$0xff] %vm594_vm0, %v3160_v34 }
 0xa9e   : > { %v3154_v0 = vpop.f32.mrf.mxu3 }
 0xa9f   : > { %v3155_v13 = vadd.f32 %v3482_v54, %v3154_v0 }
 0xaa1   : > { %v3161_v57 = vadd.f32 %v3155_v13, %v5252_v14 }
 0xaa3   : > { %3165 = vst.msk [vmem:[%s584_s17 + $0x10] sm:$0xff] %vm594_vm0, %v3161_v57 }
 0xaa6   : > { %v3156_v61 = vpop.f32.mrf.mxu3 }
 0xaa7   : > { %v3157_v36 = vadd.f32 %v3482_v54, %v3156_v61 }
 0xaa9   : > { %v3162_v10 = vadd.f32 %v3157_v36, %v5254_v62 }
 0xaab   : > { %3166 = vst.msk [vmem:[%s584_s17 + $0x18] sm:$0xff] %vm594_vm0, %v3162_v10 }
 0xaac   : > { %3750 = shalt.err (!%p3747_p8)
}
 0xaad   : > { %s3830_s22 = smov 128  }
 0xaae   : > { %3385 = dma.vmem_to_hbm [thread:$0]  (%p3973_p11), %s3182_s29, 512, %s3184_s21, %s3168_s28, %s3830_s22, %s3830_s22, %s3823_s12  }
 0xaaf PF: > { %s5550_s17 = sld [smem:[#allocation11_spill]] }
 0xab0   : > { %s5552_s26 = sld [smem:[#allocation13_spill]] }
 0xab5   : > { %s3198_s24 = sand.u32 1, %s5550_s17  }
 0xab6   : > { %p5553_p9 = scmp.ge.s32.totalorder %s5552_s26, 2  ;;  %s3199_s14 = scalar_lea.sflag [#allocation4], %s3198_s24 }
 0xab8   : > { %p3396_p10 = pnand %p5553_p9, %p3977_p12 }
 0xaba   : > { %p3397_p1 = pneg %p3396_p10 }
 0xabc   : > { %3776 = dma.done.wait (%p3397_p1), %s3199_s14, 512  }
 0xabd   : > { %3778 = vsyncadd (%p3397_p1), %s3199_s14, 4294966784  ;;  %s5554_s27 = sld [smem:[#allocation14_spill]]  ;;  %s5557_s24 = smov %s3785_s25 }
 0xabe   : > { %s5555_s19 = sld [smem:[#allocation12_spill]] }
 0xabf   : > { %s5556_s26 = sld [smem:[#allocation15_spill]] }
 0xac3   : > { %p31_p2 = scmp.ge.s32.totalorder %s5554_s27, 4  }
 0xac4   : > { %s5558_s25 = smov %s5555_s19 }
 0xac5   :  { %33 = sbr.rel (!%p31_p2) target bundleno = 15 (0xf), region = 137 }
 0xaca   :  { %3205 = vsyncpa [#allocation3], 1 }
 0xacb   :  { %3207 = vsyncpa [#allocation3 + $0x1], 1 }
 0xacc   :  { %3208 = vsyncpa [#allocation6], 1 }
 0xacd   :  { %3209 = vsyncpa [#allocation4], 1 }
 0xace   :  { %3211 = vsyncpa [#allocation4 + $0x1], 1 }

</bundles_post_ra>
